<compile_context>
chip_gen: v7x
topology: tpu7x:2x2x1
jax: 0.10.0
libtpu: 0.0.40
codegen_flags: <defaults>
</compile_context>

<pallas_src>
import functools
import math

import jax
import jax.numpy as jnp
from jax.experimental import pallas as pl
from jax.experimental.pallas import tpu as pltpu


_VMEM_LIMIT = 48 * 1024 * 1024   # > v5e's 16 MiB default scoped limit, < v7x physical


# ----------------------------------------------------------------------------
# shared helpers (traced inside kernels)
# ----------------------------------------------------------------------------

def _pick_bm(M, cap=512):
    """Row-tile size: big tiles for HBM BW, but >=2 tiles when possible so a
    parallel grid axis exists for v7x's two TensorCores."""
    bm = min(cap, M)
    if bm == M and M >= 16:
        bm = max(8, ((M // 2) + 7) // 8 * 8)
    return bm


def _seq_tile(S, cap=512):
    """Sequence/query tile: bounds VMEM at large S; 512 keeps (8,128) divisibility."""
    return S if S <= cap else cap


def _cparams(*sem):
    return pltpu.CompilerParams(dimension_semantics=sem,
                                vmem_limit_bytes=_VMEM_LIMIT)


def _layernorm(x, gamma, beta, eps):
    mu = jnp.mean(x, axis=-1, keepdims=True)
    var = jnp.mean(jnp.square(x - mu), axis=-1, keepdims=True)
    return (x - mu) * jax.lax.rsqrt(var + eps) * gamma + beta


def _softmax_lastdim(s):
    m = jnp.max(s, axis=-1, keepdims=True)
    p = jnp.exp(s - m)
    denom = jnp.sum(p, axis=-1, keepdims=True)
    return p * pl.reciprocal(denom, approx=True)       # EUP reciprocal (free slot)


def _mha_into(attn_scr, q, k, v, heads, hd):
    """q:(tq,H*hd) bf16, k/v:(skv,H*hd) bf16 (scale already folded into q).
    Writes per-head softmax(q k^T) v into attn_scr (tq, H*hd) f32 at lane offset h*hd
    so the head merge is free and the O-projection is a single lane-dense matmul."""
    for h in range(heads):
        sl = slice(h * hd, (h + 1) * hd)
        s = jax.lax.dot_general(q[:, sl], k[:, sl], (((1,), (1,)), ((), ())),
                                preferred_element_type=jnp.float32)     # (tq, skv)
        p = _softmax_lastdim(s).astype(jnp.bfloat16)
        attn_scr[:, sl] = jnp.dot(p, v[:, sl], preferred_element_type=jnp.float32)


# ----------------------------------------------------------------------------
# kernel: plain row-tiled matmul (used for per-block cross-attention K/V precompute)
# ----------------------------------------------------------------------------

def _matmul_kernel(x_ref, w_ref, o_ref):
    o_ref[...] = jnp.dot(x_ref[...].astype(jnp.bfloat16), w_ref[...],
                         preferred_element_type=jnp.float32).astype(o_ref.dtype)


def matmul_pallas(x, w_bf16, out_dtype=jnp.float32):
    M, K = x.shape
    _, N = w_bf16.shape
    bm = _pick_bm(M)
    return pl.pallas_call(
        _matmul_kernel,
        out_shape=jax.ShapeDtypeStruct((M, N), out_dtype),
        grid=(pl.cdiv(M, bm),),
        in_specs=[pl.BlockSpec((bm, K), lambda i: (i, 0)),
                  pl.BlockSpec((K, N), lambda i: (0, 0))],     # weight stays resident
        out_specs=pl.BlockSpec((bm, N), lambda i: (i, 0)),
        compiler_params=_cparams("parallel"),
    )(x, w_bf16)


# ----------------------------------------------------------------------------
# kernel: GroupNorm on the lane-dense (G, Cg*S) view, affine pre-expanded
# ----------------------------------------------------------------------------

def _groupnorm_kernel(x_ref, g_ref, b_ref, o_ref, *, eps):
    x = x_ref[0].astype(jnp.float32)                     # (G, Cg*S) -- lane-major reduce
    mu = jnp.mean(x, axis=-1, keepdims=True)
    d = x - mu
    var = jnp.mean(d * d, axis=-1, keepdims=True)
    o_ref[0] = (d * jax.lax.rsqrt(var + eps) * g_ref[...] + b_ref[...]).astype(o_ref.dtype)


def groupnorm_pallas(x, gamma, beta, *, num_groups=32, eps=1e-6):
    BT, C, S = x.shape
    G = num_groups
    Cg = C // G
    CgS = Cg * S
    x3 = x.reshape(BT, G, CgS)                                      # free reshape
    g_e = jnp.broadcast_to(gamma.reshape(G, Cg, 1), (G, Cg, S)).reshape(G, CgS)
    b_e = jnp.broadcast_to(beta.reshape(G, Cg, 1), (G, Cg, S)).reshape(G, CgS)
    out = pl.pallas_call(
        functools.partial(_groupnorm_kernel, eps=eps),
        out_shape=jax.ShapeDtypeStruct((BT, G, CgS), jnp.float32),
        grid=(BT,),
        in_specs=[pl.BlockSpec((1, G, CgS), lambda b: (b, 0, 0)),
                  pl.BlockSpec((G, CgS), lambda b: (0, 0)),
                  pl.BlockSpec((G, CgS), lambda b: (0, 0))],
        out_specs=pl.BlockSpec((1, G, CgS), lambda b: (b, 0, 0)),
        compiler_params=_cparams("parallel"),
    )(x3, g_e, b_e)
    return out.reshape(BT, C, S)


# ----------------------------------------------------------------------------
# kernels: proj_in / proj_out with fused channel<->token transpose (+ residual)
# ----------------------------------------------------------------------------

def _proj_in_kernel(x_ref, w_ref, b_ref, o_ref):
    xt = jnp.transpose(x_ref[0], (1, 0)).astype(jnp.bfloat16)      # (tS, C), in-VMEM xpose
    acc = jnp.dot(xt, w_ref[...], preferred_element_type=jnp.float32)
    o_ref[0] = (acc + b_ref[...]).astype(o_ref.dtype)


def proj_in_pallas(xn, w_bf16, b):
    BT, C, S = xn.shape
    inner = w_bf16.shape[1]
    tS = _seq_tile(S)
    return pl.pallas_call(
        _proj_in_kernel,
        out_shape=jax.ShapeDtypeStruct((BT, S, inner), jnp.float32),
        grid=(BT, pl.cdiv(S, tS)),
        in_specs=[pl.BlockSpec((1, C, tS), lambda bt, si: (bt, 0, si)),
                  pl.BlockSpec((C, inner), lambda bt, si: (0, 0)),
                  pl.BlockSpec((1, inner), lambda bt, si: (0, 0))],
        out_specs=pl.BlockSpec((1, tS, inner), lambda bt, si: (bt, si, 0)),
        compiler_params=_cparams("parallel", "parallel"),
    )(xn, w_bf16, b)


def _proj_out_kernel(h_ref, r_ref, w_ref, b_ref, o_ref):
    t = jnp.dot(h_ref[0].astype(jnp.bfloat16), w_ref[...],
                preferred_element_type=jnp.float32) + b_ref[...]    # (tS, C)
    o_ref[0] = (jnp.transpose(t, (1, 0)) + r_ref[0].astype(jnp.float32)).astype(o_ref.dtype)


def proj_out_pallas(h3, res, w_bf16, b):
    BT, S, inner = h3.shape
    C = w_bf16.shape[1]
    tS = _seq_tile(S)
    return pl.pallas_call(
        _proj_out_kernel,
        out_shape=jax.ShapeDtypeStruct((BT, C, S), jnp.float32),
        grid=(BT, pl.cdiv(S, tS)),
        in_specs=[pl.BlockSpec((1, tS, inner), lambda bt, si: (bt, si, 0)),
                  pl.BlockSpec((1, C, tS), lambda bt, si: (bt, 0, si)),
                  pl.BlockSpec((inner, C), lambda bt, si: (0, 0)),
                  pl.BlockSpec((1, C), lambda bt, si: (0, 0))],
        out_specs=pl.BlockSpec((1, C, tS), lambda bt, si: (bt, 0, si)),
        compiler_params=_cparams("parallel", "parallel"),
    )(h3, res, w_bf16, b)


# ----------------------------------------------------------------------------
# kernels: fused attention blocks (LN + fused QKV + attn + single O-proj + residual)
# ----------------------------------------------------------------------------

def _self_attn_kernel(hf_ref, hq_ref, g_ref, b_ref, wq_ref, wkv_ref, wo_ref,
                      bo_ref, o_ref, kv_scr, attn_scr, *, heads, hd, eps):
    inner = heads * hd

    @pl.when(pl.program_id(1) == 0)                       # K/V once per BT step
    def _():
        x = hf_ref[0].astype(jnp.float32)                                    # (S, inner)
        xb = _layernorm(x, g_ref[...], b_ref[...], eps).astype(jnp.bfloat16)
        kv_scr[...] = jnp.dot(xb, wkv_ref[...],                              # one lane-dense matmul
                              preferred_element_type=jnp.float32).astype(jnp.bfloat16)

    res = hq_ref[0].astype(jnp.float32)                                      # (tq, inner)
    xq = _layernorm(res, g_ref[...], b_ref[...], eps).astype(jnp.bfloat16)
    q = jnp.dot(xq, wq_ref[...],                                             # scale folded in Wq
                preferred_element_type=jnp.float32).astype(jnp.bfloat16)
    kv = kv_scr[...]
    _mha_into(attn_scr, q, kv[:, :inner], kv[:, inner:], heads, hd)
    out = jnp.dot(attn_scr[...].astype(jnp.bfloat16), wo_ref[...],
                  preferred_element_type=jnp.float32) + bo_ref[...]
    o_ref[0] = (res + out).astype(o_ref.dtype)


def self_attn_pallas(h3, gamma, beta, wq, wkv, wo, bo, *, heads, hd, eps=1e-5):
    BT, S, inner = h3.shape
    tq = _seq_tile(S)
    kernel = functools.partial(_self_attn_kernel, heads=heads, hd=hd, eps=eps)
    return pl.pallas_call(
        kernel,
        out_shape=jax.ShapeDtypeStruct((BT, S, inner), jnp.float32),
        grid=(BT, pl.cdiv(S, tq)),
        in_specs=[pl.BlockSpec((1, S, inner), lambda bt, qi: (bt, 0, 0)),      # full seq (K/V)
                  pl.BlockSpec((1, tq, inner), lambda bt, qi: (bt, qi, 0)),    # query tile
                  pl.BlockSpec((1, inner), lambda bt, qi: (0, 0)),
                  pl.BlockSpec((1, inner), lambda bt, qi: (0, 0)),
                  pl.BlockSpec((inner, inner), lambda bt, qi: (0, 0)),
                  pl.BlockSpec((inner, 2 * inner), lambda bt, qi: (0, 0)),
                  pl.BlockSpec((inner, inner), lambda bt, qi: (0, 0)),
                  pl.BlockSpec((1, inner), lambda bt, qi: (0, 0))],
        out_specs=pl.BlockSpec((1, tq, inner), lambda bt, qi: (bt, qi, 0)),
        scratch_shapes=[pltpu.VMEM((S, 2 * inner), jnp.bfloat16),
                        pltpu.VMEM((tq, inner), jnp.float32)],
        compiler_params=_cparams("parallel", "arbitrary"),
    )(h3, h3, gamma, beta, wq, wkv, wo, bo)


def _cross_attn_kernel(hq_ref, kv_ref, g_ref, b_ref, wq_ref, wo_ref, bo_ref,
                       o_ref, attn_scr, *, heads, hd, eps):
    inner = heads * hd
    res = hq_ref[0].astype(jnp.float32)                                      # (tq, inner)
    xq = _layernorm(res, g_ref[...], b_ref[...], eps).astype(jnp.bfloat16)
    q = jnp.dot(xq, wq_ref[...],
                preferred_element_type=jnp.float32).astype(jnp.bfloat16)
    kv = kv_ref[0]                                                           # (Skv, 2*inner) bf16
    _mha_into(attn_scr, q, kv[:, :inner], kv[:, inner:], heads, hd)
    out = jnp.dot(attn_scr[...].astype(jnp.bfloat16), wo_ref[...],
                  preferred_element_type=jnp.float32) + bo_ref[...]
    o_ref[0] = (res + out).astype(o_ref.dtype)


def cross_attn_pallas(h3, kv, gamma, beta, wq, wo, bo, *, heads, hd, eps=1e-5):
    BT, S, inner = h3.shape
    Skv = kv.shape[1]
    tq = _seq_tile(S)
    kernel = functools.partial(_cross_attn_kernel, heads=heads, hd=hd, eps=eps)
    return pl.pallas_call(
        kernel,
        out_shape=jax.ShapeDtypeStruct((BT, S, inner), jnp.float32),
        grid=(BT, pl.cdiv(S, tq)),
        in_specs=[pl.BlockSpec((1, tq, inner), lambda bt, qi: (bt, qi, 0)),
                  pl.BlockSpec((1, Skv, 2 * inner), lambda bt, qi: (bt, 0, 0)),
                  pl.BlockSpec((1, inner), lambda bt, qi: (0, 0)),
                  pl.BlockSpec((1, inner), lambda bt, qi: (0, 0)),
                  pl.BlockSpec((inner, inner), lambda bt, qi: (0, 0)),
                  pl.BlockSpec((inner, inner), lambda bt, qi: (0, 0)),
                  pl.BlockSpec((1, inner), lambda bt, qi: (0, 0))],
        out_specs=pl.BlockSpec((1, tq, inner), lambda bt, qi: (bt, qi, 0)),
        scratch_shapes=[pltpu.VMEM((tq, inner), jnp.float32)],
        compiler_params=_cparams("parallel", "parallel"),
    )(h3, kv, gamma, beta, wq, wo, bo)


# ----------------------------------------------------------------------------
# kernel: fused LN + GEGLU feed-forward + residual (row-tiled, fused W1 slab)
# ----------------------------------------------------------------------------

def _ff_geglu_kernel(h_ref, g_ref, b_ref, w1_ref, b1_ref, w2_ref, b2_ref, o_ref,
                     *, ffi, eps):
    res = h_ref[...].astype(jnp.float32)                     # (bm, inner)
    xb = _layernorm(res, g_ref[...], b_ref[...], eps).astype(jnp.bfloat16)
    vg = jnp.dot(xb, w1_ref[...], preferred_element_type=jnp.float32) + b1_ref[...]
    val, gate = vg[:, :ffi], vg[:, ffi:]
    # TODO(synk): exact-erf GELU approximated with tanh GELU.
    f = (val * jax.nn.gelu(gate, approximate=True)).astype(jnp.bfloat16)
    out = jnp.dot(f, w2_ref[...], preferred_element_type=jnp.float32) + b2_ref[...]
    o_ref[...] = (res + out).astype(o_ref.dtype)


def ff_block_pallas(h2, gamma, beta, w1, b1, w2, b2, eps=1e-5):
    M, inner = h2.shape
    ffi2 = w1.shape[1]
    ffi = ffi2 // 2
    bm = _pick_bm(M)
    row = lambda i: (i, 0)
    fixed = lambda i: (0, 0)
    return pl.pallas_call(
        functools.partial(_ff_geglu_kernel, ffi=ffi, eps=eps),
        out_shape=jax.ShapeDtypeStruct((M, inner), jnp.float32),
        grid=(pl.cdiv(M, bm),),
        in_specs=[pl.BlockSpec((bm, inner), row),
                  pl.BlockSpec((1, inner), fixed),
                  pl.BlockSpec((1, inner), fixed),
                  pl.BlockSpec((inner, ffi2), fixed),
                  pl.BlockSpec((1, ffi2), fixed),
                  pl.BlockSpec((ffi, inner), fixed),
                  pl.BlockSpec((1, inner), fixed)],
        out_specs=pl.BlockSpec((bm, inner), row),
        compiler_params=_cparams("parallel"),
    )(h2, gamma, beta, w1, b1, w2, b2)


# ----------------------------------------------------------------------------
# model glue (plain JAX reshapes only; all weight prep hoisted to prepare_params)
# ----------------------------------------------------------------------------

def transformer1d(prep, x, ctx, cfg):
    """x: (BT, C, S) channel-first tokens; ctx: (BT, S_img, 1536) image features."""
    BT, C, S = x.shape
    heads, hd = cfg["num_heads"], cfg["head_dim"]
    inner = heads * hd

    xn = groupnorm_pallas(x, prep["gn_gamma"], prep["gn_beta"], num_groups=32, eps=1e-6)
    h3 = proj_in_pallas(xn, prep["proj_in_w"], prep["proj_in_b"])      # (BT, S, inner)

    Skv, cross = ctx.shape[1], ctx.shape[2]
    ctx2 = ctx.astype(jnp.bfloat16).reshape(BT * Skv, cross)

    for blk in prep["blocks"]:
        # -- self attention: LN + fused QKV + attn + single O-proj + residual --------
        h3 = self_attn_pallas(h3, blk["norm1_g"], blk["norm1_b"], blk["attn1_wq"],
                              blk["attn1_wkv"], blk["attn1_wo"], blk["attn1_bo"],
                              heads=heads, hd=hd)
        # -- cross attention: K/V from ctx projected ONCE per block -----------------
        kv = matmul_pallas(ctx2, blk["attn2_wkv"],
                           out_dtype=jnp.bfloat16).reshape(BT, Skv, 2 * inner)
        h3 = cross_attn_pallas(h3, kv, blk["norm2_g"], blk["norm2_b"], blk["attn2_wq"],
                               blk["attn2_wo"], blk["attn2_bo"], heads=heads, hd=hd)
        # -- LN + GEGLU FF + residual -------------------------------------------------
        h3 = ff_block_pallas(h3.reshape(BT * S, inner), blk["norm3_g"], blk["norm3_b"],
                             blk["ff_w1"], blk["ff_b1"], blk["ff_w2"],
                             blk["ff_b2"]).reshape(BT, S, inner)

    # proj_out + token->channel transpose + residual add fused in one kernel
    return proj_out_pallas(h3, x, prep["proj_out_w"], prep["proj_out_b"])


def feature_fusion_forward(prep, geometry_triplane, image_features, smpl_tokens, cfg):
    B, T, NP, C, H, W = geometry_triplane.shape
    BT = B * T
    geo = geometry_triplane.reshape(BT, NP, C, H, W)
    img = image_features.reshape(BT, image_features.shape[2], image_features.shape[3])

    # TriplaneLearnablePositionalEmbedding (reconstructed): learned (3,C,H,W) + cond,
    # rearrange "B Np C H W -> B C (Np H W)".  The tiny add stays in XLA.
    summed = geo + prep["tri_emb"][None]
    tri_tokens = jnp.transpose(summed, (0, 2, 1, 3, 4)).reshape(BT, C, NP * H * W)

    combined = jnp.concatenate([tri_tokens, smpl_tokens], axis=2)      # (BT, C, S)
    out = transformer1d(prep, combined, img, cfg)

    s_tri = NP * H * W
    tokens, smpl_out = out[:, :, :s_tri], out[:, :, s_tri:]
    triplane_tokens = tokens.reshape(B, T, C, s_tri)
    smpl_tokens_out = smpl_out.reshape(B, T, C, smpl_tokens.shape[-1])
    return triplane_tokens, smpl_tokens_out


# ----------------------------------------------------------------------------
# parameter init (torch-style layout) + one-time kernel-ready preparation
# ----------------------------------------------------------------------------

def init_params(key, cfg):
    C = cfg["triplane_feature_dim"]
    R = cfg["triplane_resolution"]
    heads, hd = cfg["num_heads"], cfg["head_dim"]
    inner = heads * hd
    assert inner == C, "inner_dim must equal in_channels for residual path"
    cross_dim = 1536
    ff_inner = inner * 4
    keys = iter(jax.random.split(key, 64))

    def w(shape, scale=0.02):
        return jax.random.normal(next(keys), shape, jnp.float32) * scale

    params = dict(
        tri_emb=jax.random.normal(next(keys), (3, C, R, R), jnp.float32) / math.sqrt(C),
        gn_gamma=jnp.ones((C,), jnp.float32),
        gn_beta=jnp.zeros((C,), jnp.float32),
        proj_in_w=w((C, inner)), proj_in_b=jnp.zeros((inner,), jnp.float32),
        proj_out_w=w((inner, C)), proj_out_b=jnp.zeros((C,), jnp.float32),
        blocks=[],
    )
    for _ in range(cfg["layers"]):
        params["blocks"].append(dict(
            norm1_g=jnp.ones((inner,), jnp.float32), norm1_b=jnp.zeros((inner,), jnp.float32),
            attn1_q=w((inner, inner)), attn1_k=w((inner, inner)), attn1_v=w((inner, inner)),
            attn1_o_w=w((inner, inner)), attn1_o_b=jnp.zeros((inner,), jnp.float32),
            norm2_g=jnp.ones((inner,), jnp.float32), norm2_b=jnp.zeros((inner,), jnp.float32),
            attn2_q=w((inner, inner)), attn2_k=w((cross_dim, inner)), attn2_v=w((cross_dim, inner)),
            attn2_o_w=w((inner, inner)), attn2_o_b=jnp.zeros((inner,), jnp.float32),
            norm3_g=jnp.ones((inner,), jnp.float32), norm3_b=jnp.zeros((inner,), jnp.float32),
            ff_w1v=w((inner, ff_inner)), ff_w1g=w((inner, ff_inner)),
            ff_b1v=jnp.zeros((ff_inner,), jnp.float32), ff_b1g=jnp.zeros((ff_inner,), jnp.float32),
            ff_w2=w((ff_inner, inner)), ff_b2=jnp.zeros((inner,), jnp.float32),
        ))
    return params


def prepare_params(params, cfg):
    """One-time weight re-layout: bf16 casts, QKV/W1 concatenation, 1/sqrt(d) folding."""
    heads, hd = cfg["num_heads"], cfg["head_dim"]
    inner = heads * hd
    scale = 1.0 / math.sqrt(hd)
    bf = lambda a: a.astype(jnp.bfloat16)

    prep = dict(
        tri_emb=params["tri_emb"],
        gn_gamma=params["gn_gamma"], gn_beta=params["gn_beta"],
        proj_in_w=bf(params["proj_in_w"]), proj_in_b=params["proj_in_b"].reshape(1, -1),
        proj_out_w=bf(params["proj_out_w"]), proj_out_b=params["proj_out_b"].reshape(1, -1),
        blocks=[],
    )
    for blk in params["blocks"]:
        prep["blocks"].append(dict(
            norm1_g=blk["norm1_g"].reshape(1, inner), norm1_b=blk["norm1_b"].reshape(1, inner),
            attn1_wq=bf(blk["attn1_q"] * scale),
            attn1_wkv=bf(jnp.concatenate([blk["attn1_k"], blk["attn1_v"]], axis=1)),
            attn1_wo=bf(blk["attn1_o_w"]), attn1_bo=blk["attn1_o_b"].reshape(1, inner),
            norm2_g=blk["norm2_g"].reshape(1, inner), norm2_b=blk["norm2_b"].reshape(1, inner),
            attn2_wq=bf(blk["attn2_q"] * scale),
            attn2_wkv=bf(jnp.concatenate([blk["attn2_k"], blk["attn2_v"]], axis=1)),
            attn2_wo=bf(blk["attn2_o_w"]), attn2_bo=blk["attn2_o_b"].reshape(1, inner),
            norm3_g=blk["norm3_g"].reshape(1, inner), norm3_b=blk["norm3_b"].reshape(1, inner),
            ff_w1=bf(jnp.concatenate([blk["ff_w1v"], blk["ff_w1g"]], axis=1)),
            ff_b1=jnp.concatenate([blk["ff_b1v"], blk["ff_b1g"]]).reshape(1, -1),
            ff_w2=bf(blk["ff_w2"]), ff_b2=blk["ff_b2"].reshape(1, inner),
        ))
    return prep


# ----------------------------------------------------------------------------

if __name__ == "__main__":
    cfg = dict(
        triplane_resolution=4,      # small demo resolution
        triplane_feature_dim=64,
        layers=2,                   # cfg.cross_transformer_layers
        num_heads=4,                # cfg.cross_transformer_num_heads
        head_dim=16,                # cfg.cross_transformer_head_dim
    )
    key = jax.random.PRNGKey(0)
    kp, k1, k2, k3 = jax.random.split(key, 4)
    params = init_params(kp, cfg)
    prep = prepare_params(params, cfg)     # hoisted one-time weight prep (not per forward)

    B, T = 1, 2
    C, R = cfg["triplane_feature_dim"], cfg["triplane_resolution"]
    S_img, N_smpl = 8, 16

    geometry_triplane = jax.random.normal(k1, (B, T, 3, C, R, R), jnp.float32)
    image_features = jax.random.normal(k2, (B, T, S_img, 1536), jnp.float32)
    smpl_tokens = jax.random.normal(k3, (B * T, C, N_smpl), jnp.float32)

    @jax.jit
    def run(p, geo, img, smpl):
        return feature_fusion_forward(p, geo, img, smpl, cfg)

    tri, smpl = run(prep, geometry_triplane, image_features, smpl_tokens)
    tri, smpl = jax.block_until_ready((tri, smpl))

    assert tri.shape == (B, T, C, 3 * R * R), tri.shape
    assert smpl.shape == (B, T, C, N_smpl), smpl.shape
    assert jnp.all(jnp.isfinite(tri)) and jnp.all(jnp.isfinite(smpl))
    print("KERNEL_OK")
</pallas_src>

<mosaic_0001>
module attributes {stable_mosaic.version = 11 : i64} {
  func.func @_groupnorm_kernel(%arg0: i32, %arg1: memref<1x32x128xf32, #tpu.memory_space<vmem>>, %arg2: memref<32x128xf32, #tpu.memory_space<vmem>>, %arg3: memref<32x128xf32, #tpu.memory_space<vmem>>, %arg4: memref<1x32x128xf32, #tpu.memory_space<vmem>>) attributes {dimension_semantics = [#tpu.dimension_semantics<parallel>], iteration_bounds = array<i64: 2>, scalar_prefetch = 0 : i64, scratch_operands = 0 : i64, tpu.core_type = #tpu.core_type<tc>, window_params = [{transform_indices = @transform_0, window_bounds = array<i64: 1, 32, 128>}, {pipeline_mode = #tpu.pipeline_mode<synchronous>, transform_indices = @transform_1, window_bounds = array<i64: 32, 128>}, {pipeline_mode = #tpu.pipeline_mode<synchronous>, transform_indices = @transform_2, window_bounds = array<i64: 32, 128>}, {transform_indices = @transform_3, window_bounds = array<i64: 1, 32, 128>}]} {
    %c0 = arith.constant 0 : index
    %c0_0 = arith.constant 0 : index
    %c0_1 = arith.constant 0 : index
    %0 = vector.load %arg1[%c0, %c0_0, %c0_1] : memref<1x32x128xf32, #tpu.memory_space<vmem>>, vector<1x32x128xf32>
    %1 = vector.shape_cast %0 : vector<1x32x128xf32> to vector<32x128xf32>
    %cst = arith.constant dense<0.000000e+00> : vector<32xf32>
    %2 = vector.multi_reduction <add>, %1, %cst [1] : vector<32x128xf32> to vector<32xf32>
    %3 = vector.shape_cast %2 : vector<32xf32> to vector<32x1xf32>
    %cst_2 = arith.constant 1.280000e+02 : f32
    %4 = vector.broadcast %cst_2 : f32 to vector<32x1xf32>
    %5 = arith.divf %3, %4 : vector<32x1xf32>
    %6 = vector.broadcast %5 : vector<32x1xf32> to vector<32x128xf32>
    %7 = arith.subf %1, %6 : vector<32x128xf32>
    %8 = arith.mulf %7, %7 : vector<32x128xf32>
    %cst_3 = arith.constant dense<0.000000e+00> : vector<32xf32>
    %9 = vector.multi_reduction <add>, %8, %cst_3 [1] : vector<32x128xf32> to vector<32xf32>
    %10 = vector.shape_cast %9 : vector<32xf32> to vector<32x1xf32>
    %cst_4 = arith.constant 1.280000e+02 : f32
    %11 = vector.broadcast %cst_4 : f32 to vector<32x1xf32>
    %12 = arith.divf %10, %11 : vector<32x1xf32>
    %cst_5 = arith.constant 9.99999997E-7 : f32
    %13 = vector.broadcast %cst_5 : f32 to vector<32x1xf32>
    %14 = arith.addf %12, %13 : vector<32x1xf32>
    %15 = math.rsqrt %14 : vector<32x1xf32>
    %16 = vector.broadcast %15 : vector<32x1xf32> to vector<32x128xf32>
    %17 = arith.mulf %7, %16 : vector<32x128xf32>
    %c0_6 = arith.constant 0 : index
    %c0_7 = arith.constant 0 : index
    %18 = vector.load %arg2[%c0_6, %c0_7] : memref<32x128xf32, #tpu.memory_space<vmem>>, vector<32x128xf32>
    %19 = arith.mulf %17, %18 : vector<32x128xf32>
    %c0_8 = arith.constant 0 : index
    %c0_9 = arith.constant 0 : index
    %20 = vector.load %arg3[%c0_8, %c0_9] : memref<32x128xf32, #tpu.memory_space<vmem>>, vector<32x128xf32>
    %21 = arith.addf %19, %20 : vector<32x128xf32>
    %c0_10 = arith.constant 0 : index
    %c0_11 = arith.constant 0 : index
    %c0_12 = arith.constant 0 : index
    %22 = vector.load %arg4[%c0_10, %c0_11, %c0_12] : memref<1x32x128xf32, #tpu.memory_space<vmem>>, vector<1x32x128xf32>
    %23 = vector.shape_cast %22 : vector<1x32x128xf32> to vector<32x128xf32>
    %24 = vector.shape_cast %21 : vector<32x128xf32> to vector<1x32x128xf32>
    tpu.vector_store %arg4[%c0_10, %c0_11, %c0_12], %24 {strides = array<i32>} : memref<1x32x128xf32, #tpu.memory_space<vmem>>, vector<1x32x128xf32>,
    return
  }
  func.func @transform_0(%arg0: i32) -> (i32, i32, i32) {
    %c0_i32 = arith.constant 0 : i32
    %c0_i32_0 = arith.constant 0 : i32
    %c0_i32_1 = arith.constant 0 : i32
    return %arg0, %c0_i32, %c0_i32_0 : i32, i32, i32
  }
  func.func @transform_1(%arg0: i32) -> (i32, i32) {
    %c0_i32 = arith.constant 0 : i32
    %c0_i32_0 = arith.constant 0 : i32
    %c0_i32_1 = arith.constant 0 : i32
    return %c0_i32, %c0_i32_0 : i32, i32
  }
  func.func @transform_2(%arg0: i32) -> (i32, i32) {
    %c0_i32 = arith.constant 0 : i32
    %c0_i32_0 = arith.constant 0 : i32
    %c0_i32_1 = arith.constant 0 : i32
    return %c0_i32, %c0_i32_0 : i32, i32
  }
  func.func @transform_3(%arg0: i32) -> (i32, i32, i32) {
    %c0_i32 = arith.constant 0 : i32
    %c0_i32_0 = arith.constant 0 : i32
    %c0_i32_1 = arith.constant 0 : i32
    return %arg0, %c0_i32, %c0_i32_0 : i32, i32, i32
  }
}

module attributes {stable_mosaic.version = 11 : i64} {
  func.func @_proj_in_kernel(%arg0: i32, %arg1: i32, %arg2: memref<1x64x64xf32, #tpu.memory_space<vmem>>, %arg3: memref<64x64xbf16, #tpu.memory_space<vmem>>, %arg4: memref<1x64xf32, #tpu.memory_space<vmem>>, %arg5: memref<1x64x64xf32, #tpu.memory_space<vmem>>) attributes {dimension_semantics = [#tpu.dimension_semantics<parallel>, #tpu.dimension_semantics<parallel>], iteration_bounds = array<i64: 2, 1>, scalar_prefetch = 0 : i64, scratch_operands = 0 : i64, tpu.core_type = #tpu.core_type<tc>, window_params = [{transform_indices = @transform_0, window_bounds = array<i64: 1, 64, 64>}, {pipeline_mode = #tpu.pipeline_mode<synchronous>, transform_indices = @transform_1, window_bounds = array<i64: 64, 64>}, {pipeline_mode = #tpu.pipeline_mode<synchronous>, transform_indices = @transform_2, window_bounds = array<i64: 1, 64>}, {transform_indices = @transform_3, window_bounds = array<i64: 1, 64, 64>}]} {
    %c0 = arith.constant 0 : index
    %c0_0 = arith.constant 0 : index
    %c0_1 = arith.constant 0 : index
    %0 = vector.load %arg2[%c0, %c0_0, %c0_1] : memref<1x64x64xf32, #tpu.memory_space<vmem>>, vector<1x64x64xf32>
    %1 = vector.shape_cast %0 : vector<1x64x64xf32> to vector<64x64xf32>
    %2 = tpu.transpose %1, [1, 0] : vector<64x64xf32> -> vector<64x64xf32>
    %3 = arith.truncf %2 : vector<64x64xf32> to vector<64x64xbf16>
    %c0_2 = arith.constant 0 : index
    %c0_3 = arith.constant 0 : index
    %4 = vector.load %arg3[%c0_2, %c0_3] : memref<64x64xbf16, #tpu.memory_space<vmem>>, vector<64x64xbf16>
    %cst = arith.constant dense<0.000000e+00> : vector<64x64xf32>
    %5 = tpu.matmul %3, %4, %cst {dimension_numbers = #tpu.dot_dimension_numbers<[1], [0], [0], [1], [0, 0, 1, 1], [], []>} : vector<64x64xbf16>, vector<64x64xbf16>, vector<64x64xf32> -> vector<64x64xf32>
    %c0_4 = arith.constant 0 : index
    %c0_5 = arith.constant 0 : index
    %6 = vector.load %arg4[%c0_4, %c0_5] : memref<1x64xf32, #tpu.memory_space<vmem>>, vector<1x64xf32>
    %7 = vector.broadcast %6 : vector<1x64xf32> to vector<64x64xf32>
    %8 = arith.addf %5, %7 : vector<64x64xf32>
    %c0_6 = arith.constant 0 : index
    %c0_7 = arith.constant 0 : index
    %c0_8 = arith.constant 0 : index
    %9 = vector.load %arg5[%c0_6, %c0_7, %c0_8] : memref<1x64x64xf32, #tpu.memory_space<vmem>>, vector<1x64x64xf32>
    %10 = vector.shape_cast %9 : vector<1x64x64xf32> to vector<64x64xf32>
    %11 = vector.shape_cast %8 : vector<64x64xf32> to vector<1x64x64xf32>
    tpu.vector_store %arg5[%c0_6, %c0_7, %c0_8], %11 {strides = array<i32>} : memref<1x64x64xf32, #tpu.memory_space<vmem>>, vector<1x64x64xf32>,
    return
  }
  func.func @transform_0(%arg0: i32, %arg1: i32) -> (i32, i32, i32) {
    %c0_i32 = arith.constant 0 : i32
    %c0_i32_0 = arith.constant 0 : i32
    return %arg0, %c0_i32, %arg1 : i32, i32, i32
  }
  func.func @transform_1(%arg0: i32, %arg1: i32) -> (i32, i32) {
    %c0_i32 = arith.constant 0 : i32
    %c0_i32_0 = arith.constant 0 : i32
    %c0_i32_1 = arith.constant 0 : i32
    return %c0_i32, %c0_i32_0 : i32, i32
  }
  func.func @transform_2(%arg0: i32, %arg1: i32) -> (i32, i32) {
    %c0_i32 = arith.constant 0 : i32
    %c0_i32_0 = arith.constant 0 : i32
    %c0_i32_1 = arith.constant 0 : i32
    return %c0_i32, %c0_i32_0 : i32, i32
  }
  func.func @transform_3(%arg0: i32, %arg1: i32) -> (i32, i32, i32) {
    %c0_i32 = arith.constant 0 : i32
    %c0_i32_0 = arith.constant 0 : i32
    return %arg0, %arg1, %c0_i32 : i32, i32, i32
  }
}

module attributes {stable_mosaic.version = 11 : i64} {
  func.func @_self_attn_kernel(%arg0: i32, %arg1: i32, %arg2: memref<1x64x64xf32, #tpu.memory_space<vmem>>, %arg3: memref<1x64x64xf32, #tpu.memory_space<vmem>>, %arg4: memref<1x64xf32, #tpu.memory_space<vmem>>, %arg5: memref<1x64xf32, #tpu.memory_space<vmem>>, %arg6: memref<64x64xbf16, #tpu.memory_space<vmem>>, %arg7: memref<64x128xbf16, #tpu.memory_space<vmem>>, %arg8: memref<64x64xbf16, #tpu.memory_space<vmem>>, %arg9: memref<1x64xf32, #tpu.memory_space<vmem>>, %arg10: memref<1x64x64xf32, #tpu.memory_space<vmem>>, %arg11: memref<64x128xbf16, #tpu.memory_space<vmem>>, %arg12: memref<64x64xf32, #tpu.memory_space<vmem>>) attributes {dimension_semantics = [#tpu.dimension_semantics<parallel>, #tpu.dimension_semantics<arbitrary>], iteration_bounds = array<i64: 2, 1>, scalar_prefetch = 0 : i64, scratch_operands = 2 : i64, tpu.core_type = #tpu.core_type<tc>, window_params = [{transform_indices = @transform_0, window_bounds = array<i64: 1, 64, 64>}, {transform_indices = @transform_1, window_bounds = array<i64: 1, 64, 64>}, {pipeline_mode = #tpu.pipeline_mode<synchronous>, transform_indices = @transform_2, window_bounds = array<i64: 1, 64>}, {pipeline_mode = #tpu.pipeline_mode<synchronous>, transform_indices = @transform_3, window_bounds = array<i64: 1, 64>}, {pipeline_mode = #tpu.pipeline_mode<synchronous>, transform_indices = @transform_4, window_bounds = array<i64: 64, 64>}, {pipeline_mode = #tpu.pipeline_mode<synchronous>, transform_indices = @transform_5, window_bounds = array<i64: 64, 128>}, {pipeline_mode = #tpu.pipeline_mode<synchronous>, transform_indices = @transform_6, window_bounds = array<i64: 64, 64>}, {pipeline_mode = #tpu.pipeline_mode<synchronous>, transform_indices = @transform_7, window_bounds = array<i64: 1, 64>}, {transform_indices = @transform_8, window_bounds = array<i64: 1, 64, 64>}]} {
    %c0_i32 = arith.constant 0 : i32
    %0 = arith.cmpi eq, %arg1, %c0_i32 : i32
    %1 = arith.extui %0 : i1 to i32
    %c0_i32_0 = arith.constant 0 : i32
    %2 = arith.cmpi ne, %1, %c0_i32_0 : i32
    scf.if %2 {
      %c0_47 = arith.constant 0 : index
      %c0_48 = arith.constant 0 : index
      %c0_49 = arith.constant 0 : index
      %115 = vector.load %arg2[%c0_47, %c0_48, %c0_49] : memref<1x64x64xf32, #tpu.memory_space<vmem>>, vector<1x64x64xf32>
      %116 = vector.shape_cast %115 : vector<1x64x64xf32> to vector<64x64xf32>
      %c0_50 = arith.constant 0 : index
      %c0_51 = arith.constant 0 : index
      %117 = vector.load %arg4[%c0_50, %c0_51] : memref<1x64xf32, #tpu.memory_space<vmem>>, vector<1x64xf32>
      %c0_52 = arith.constant 0 : index
      %c0_53 = arith.constant 0 : index
      %118 = vector.load %arg5[%c0_52, %c0_53] : memref<1x64xf32, #tpu.memory_space<vmem>>, vector<1x64xf32>
      %cst_54 = arith.constant dense<0.000000e+00> : vector<64xf32>
      %119 = vector.multi_reduction <add>, %116, %cst_54 [1] : vector<64x64xf32> to vector<64xf32>
      %120 = vector.shape_cast %119 : vector<64xf32> to vector<64x1xf32>
      %cst_55 = arith.constant 6.400000e+01 : f32
      %121 = vector.broadcast %cst_55 : f32 to vector<64x1xf32>
      %122 = arith.divf %120, %121 : vector<64x1xf32>
      %123 = vector.broadcast %122 : vector<64x1xf32> to vector<64x64xf32>
      %124 = arith.subf %116, %123 : vector<64x64xf32>
      %125 = arith.mulf %124, %124 : vector<64x64xf32>
      %cst_56 = arith.constant dense<0.000000e+00> : vector<64xf32>
      %126 = vector.multi_reduction <add>, %125, %cst_56 [1] : vector<64x64xf32> to vector<64xf32>
      %127 = vector.shape_cast %126 : vector<64xf32> to vector<64x1xf32>
      %cst_57 = arith.constant 6.400000e+01 : f32
      %128 = vector.broadcast %cst_57 : f32 to vector<64x1xf32>
      %129 = arith.divf %127, %128 : vector<64x1xf32>
      %130 = vector.broadcast %122 : vector<64x1xf32> to vector<64x64xf32>
      %131 = arith.subf %116, %130 : vector<64x64xf32>
      %cst_58 = arith.constant 9.99999974E-6 : f32
      %132 = vector.broadcast %cst_58 : f32 to vector<64x1xf32>
      %133 = arith.addf %129, %132 : vector<64x1xf32>
      %134 = math.rsqrt %133 : vector<64x1xf32>
      %135 = vector.broadcast %134 : vector<64x1xf32> to vector<64x64xf32>
      %136 = arith.mulf %131, %135 : vector<64x64xf32>
      %137 = vector.broadcast %117 : vector<1x64xf32> to vector<64x64xf32>
      %138 = arith.mulf %136, %137 : vector<64x64xf32>
      %139 = vector.broadcast %118 : vector<1x64xf32> to vector<64x64xf32>
      %140 = arith.addf %138, %139 : vector<64x64xf32>
      %141 = arith.truncf %140 : vector<64x64xf32> to vector<64x64xbf16>
      %c0_59 = arith.constant 0 : index
      %c0_60 = arith.constant 0 : index
      %142 = vector.load %arg7[%c0_59, %c0_60] : memref<64x128xbf16, #tpu.memory_space<vmem>>, vector<64x128xbf16>
      %cst_61 = arith.constant dense<0.000000e+00> : vector<64x128xf32>
      %143 = tpu.matmul %141, %142, %cst_61 {dimension_numbers = #tpu.dot_dimension_numbers<[1], [0], [0], [1], [0, 0, 1, 1], [], []>} : vector<64x64xbf16>, vector<64x128xbf16>, vector<64x128xf32> -> vector<64x128xf32>
      %144 = arith.truncf %143 : vector<64x128xf32> to vector<64x128xbf16>
      %c0_62 = arith.constant 0 : index
      %c0_63 = arith.constant 0 : index
      %145 = vector.load %arg11[%c0_62, %c0_63] : memref<64x128xbf16, #tpu.memory_space<vmem>>, vector<64x128xbf16>
      tpu.vector_store %arg11[%c0_62, %c0_63], %144 {strides = array<i32>} : memref<64x128xbf16, #tpu.memory_space<vmem>>, vector<64x128xbf16>,
    } else {
    }
    %c0 = arith.constant 0 : index
    %c0_1 = arith.constant 0 : index
    %c0_2 = arith.constant 0 : index
    %3 = vector.load %arg3[%c0, %c0_1, %c0_2] : memref<1x64x64xf32, #tpu.memory_space<vmem>>, vector<1x64x64xf32>
    %4 = vector.shape_cast %3 : vector<1x64x64xf32> to vector<64x64xf32>
    %c0_3 = arith.constant 0 : index
    %c0_4 = arith.constant 0 : index
    %5 = vector.load %arg4[%c0_3, %c0_4] : memref<1x64xf32, #tpu.memory_space<vmem>>, vector<1x64xf32>
    %c0_5 = arith.constant 0 : index
    %c0_6 = arith.constant 0 : index
    %6 = vector.load %arg5[%c0_5, %c0_6] : memref<1x64xf32, #tpu.memory_space<vmem>>, vector<1x64xf32>
    %cst = arith.constant dense<0.000000e+00> : vector<64xf32>
    %7 = vector.multi_reduction <add>, %4, %cst [1] : vector<64x64xf32> to vector<64xf32>
    %8 = vector.shape_cast %7 : vector<64xf32> to vector<64x1xf32>
    %cst_7 = arith.constant 6.400000e+01 : f32
    %9 = vector.broadcast %cst_7 : f32 to vector<64x1xf32>
    %10 = arith.divf %8, %9 : vector<64x1xf32>
    %11 = vector.broadcast %10 : vector<64x1xf32> to vector<64x64xf32>
    %12 = arith.subf %4, %11 : vector<64x64xf32>
    %13 = arith.mulf %12, %12 : vector<64x64xf32>
    %cst_8 = arith.constant dense<0.000000e+00> : vector<64xf32>
    %14 = vector.multi_reduction <add>, %13, %cst_8 [1] : vector<64x64xf32> to vector<64xf32>
    %15 = vector.shape_cast %14 : vector<64xf32> to vector<64x1xf32>
    %cst_9 = arith.constant 6.400000e+01 : f32
    %16 = vector.broadcast %cst_9 : f32 to vector<64x1xf32>
    %17 = arith.divf %15, %16 : vector<64x1xf32>
    %18 = vector.broadcast %10 : vector<64x1xf32> to vector<64x64xf32>
    %19 = arith.subf %4, %18 : vector<64x64xf32>
    %cst_10 = arith.constant 9.99999974E-6 : f32
    %20 = vector.broadcast %cst_10 : f32 to vector<64x1xf32>
    %21 = arith.addf %17, %20 : vector<64x1xf32>
    %22 = math.rsqrt %21 : vector<64x1xf32>
    %23 = vector.broadcast %22 : vector<64x1xf32> to vector<64x64xf32>
    %24 = arith.mulf %19, %23 : vector<64x64xf32>
    %25 = vector.broadcast %5 : vector<1x64xf32> to vector<64x64xf32>
    %26 = arith.mulf %24, %25 : vector<64x64xf32>
    %27 = vector.broadcast %6 : vector<1x64xf32> to vector<64x64xf32>
    %28 = arith.addf %26, %27 : vector<64x64xf32>
    %29 = arith.truncf %28 : vector<64x64xf32> to vector<64x64xbf16>
    %c0_11 = arith.constant 0 : index
    %c0_12 = arith.constant 0 : index
    %30 = vector.load %arg6[%c0_11, %c0_12] : memref<64x64xbf16, #tpu.memory_space<vmem>>, vector<64x64xbf16>
    %cst_13 = arith.constant dense<0.000000e+00> : vector<64x64xf32>
    %31 = tpu.matmul %29, %30, %cst_13 {dimension_numbers = #tpu.dot_dimension_numbers<[1], [0], [0], [1], [0, 0, 1, 1], [], []>} : vector<64x64xbf16>, vector<64x64xbf16>, vector<64x64xf32> -> vector<64x64xf32>
    %32 = arith.truncf %31 : vector<64x64xf32> to vector<64x64xbf16>
    %c0_14 = arith.constant 0 : index
    %c0_15 = arith.constant 0 : index
    %33 = vector.load %arg11[%c0_14, %c0_15] : memref<64x128xbf16, #tpu.memory_space<vmem>>, vector<64x128xbf16>
    %34 = vector.extract_strided_slice %33 {offsets = [0, 0], sizes = [64, 64], strides = [1, 1]} : vector<64x128xbf16> to vector<64x64xbf16>
    %35 = vector.extract_strided_slice %33 {offsets = [0, 64], sizes = [64, 64], strides = [1, 1]} : vector<64x128xbf16> to vector<64x64xbf16>
    %36 = vector.extract_strided_slice %32 {offsets = [0, 0], sizes = [64, 16], strides = [1, 1]} : vector<64x64xbf16> to vector<64x16xbf16>
    %37 = vector.extract_strided_slice %34 {offsets = [0, 0], sizes = [64, 16], strides = [1, 1]} : vector<64x64xbf16> to vector<64x16xbf16>
    %cst_16 = arith.constant dense<0.000000e+00> : vector<64x64xf32>
    %38 = tpu.matmul %36, %37, %cst_16 {dimension_numbers = #tpu.dot_dimension_numbers<[1], [1], [0], [0], [0, 0, 1, 0], [], []>} : vector<64x16xbf16>, vector<64x16xbf16>, vector<64x64xf32> -> vector<64x64xf32>
    %cst_17 = arith.constant dense<0xFF800000> : vector<64xf32>
    %39 = vector.multi_reduction <maximumf>, %38, %cst_17 [1] : vector<64x64xf32> to vector<64xf32>
    %40 = vector.shape_cast %39 : vector<64xf32> to vector<64x1xf32>
    %41 = vector.broadcast %40 : vector<64x1xf32> to vector<64x64xf32>
    %42 = arith.subf %38, %41 : vector<64x64xf32>
    %43 = math.exp %42 : vector<64x64xf32>
    %cst_18 = arith.constant dense<0.000000e+00> : vector<64xf32>
    %44 = vector.multi_reduction <add>, %43, %cst_18 [1] : vector<64x64xf32> to vector<64xf32>
    %45 = vector.shape_cast %44 : vector<64xf32> to vector<64x1xf32>
    %46 = tpu.reciprocal %45 {approx = true} : vector<64x1xf32> -> vector<64x1xf32>
    %47 = vector.broadcast %46 : vector<64x1xf32> to vector<64x64xf32>
    %48 = arith.mulf %43, %47 : vector<64x64xf32>
    %49 = arith.truncf %48 : vector<64x64xf32> to vector<64x64xbf16>
    %50 = vector.extract_strided_slice %35 {offsets = [0, 0], sizes = [64, 16], strides = [1, 1]} : vector<64x64xbf16> to vector<64x16xbf16>
    %cst_19 = arith.constant dense<0.000000e+00> : vector<64x16xf32>
    %51 = tpu.matmul %49, %50, %cst_19 {dimension_numbers = #tpu.dot_dimension_numbers<[1], [0], [0], [1], [0, 0, 1, 1], [], []>} : vector<64x64xbf16>, vector<64x16xbf16>, vector<64x16xf32> -> vector<64x16xf32>
    %c0_20 = arith.constant 0 : index
    %c0_21 = arith.constant 0 : index
    %52 = vector.load %arg12[%c0_20, %c0_21] : memref<64x64xf32, #tpu.memory_space<vmem>>, vector<64x16xf32>
    tpu.vector_store %arg12[%c0_20, %c0_21], %51 {strides = array<i32>} : memref<64x64xf32, #tpu.memory_space<vmem>>, vector<64x16xf32>,
    %53 = vector.extract_strided_slice %32 {offsets = [0, 16], sizes = [64, 16], strides = [1, 1]} : vector<64x64xbf16> to vector<64x16xbf16>
    %54 = vector.extract_strided_slice %34 {offsets = [0, 16], sizes = [64, 16], strides = [1, 1]} : vector<64x64xbf16> to vector<64x16xbf16>
    %cst_22 = arith.constant dense<0.000000e+00> : vector<64x64xf32>
    %55 = tpu.matmul %53, %54, %cst_22 {dimension_numbers = #tpu.dot_dimension_numbers<[1], [1], [0], [0], [0, 0, 1, 0], [], []>} : vector<64x16xbf16>, vector<64x16xbf16>, vector<64x64xf32> -> vector<64x64xf32>
    %cst_23 = arith.constant dense<0xFF800000> : vector<64xf32>
    %56 = vector.multi_reduction <maximumf>, %55, %cst_23 [1] : vector<64x64xf32> to vector<64xf32>
    %57 = vector.shape_cast %56 : vector<64xf32> to vector<64x1xf32>
    %58 = vector.broadcast %57 : vector<64x1xf32> to vector<64x64xf32>
    %59 = arith.subf %55, %58 : vector<64x64xf32>
    %60 = math.exp %59 : vector<64x64xf32>
    %cst_24 = arith.constant dense<0.000000e+00> : vector<64xf32>
    %61 = vector.multi_reduction <add>, %60, %cst_24 [1] : vector<64x64xf32> to vector<64xf32>
    %62 = vector.shape_cast %61 : vector<64xf32> to vector<64x1xf32>
    %63 = tpu.reciprocal %62 {approx = true} : vector<64x1xf32> -> vector<64x1xf32>
    %64 = vector.broadcast %63 : vector<64x1xf32> to vector<64x64xf32>
    %65 = arith.mulf %60, %64 : vector<64x64xf32>
    %66 = arith.truncf %65 : vector<64x64xf32> to vector<64x64xbf16>
    %67 = vector.extract_strided_slice %35 {offsets = [0, 16], sizes = [64, 16], strides = [1, 1]} : vector<64x64xbf16> to vector<64x16xbf16>
    %cst_25 = arith.constant dense<0.000000e+00> : vector<64x16xf32>
    %68 = tpu.matmul %66, %67, %cst_25 {dimension_numbers = #tpu.dot_dimension_numbers<[1], [0], [0], [1], [0, 0, 1, 1], [], []>} : vector<64x64xbf16>, vector<64x16xbf16>, vector<64x16xf32> -> vector<64x16xf32>
    %c0_26 = arith.constant 0 : index
    %c16 = arith.constant 16 : index
    %69 = vector.load %arg12[%c0_26, %c16] : memref<64x64xf32, #tpu.memory_space<vmem>>, vector<64x16xf32>
    tpu.vector_store %arg12[%c0_26, %c16], %68 {strides = array<i32>} : memref<64x64xf32, #tpu.memory_space<vmem>>, vector<64x16xf32>,
    %70 = vector.extract_strided_slice %32 {offsets = [0, 32], sizes = [64, 16], strides = [1, 1]} : vector<64x64xbf16> to vector<64x16xbf16>
    %71 = vector.extract_strided_slice %34 {offsets = [0, 32], sizes = [64, 16], strides = [1, 1]} : vector<64x64xbf16> to vector<64x16xbf16>
    %cst_27 = arith.constant dense<0.000000e+00> : vector<64x64xf32>
    %72 = tpu.matmul %70, %71, %cst_27 {dimension_numbers = #tpu.dot_dimension_numbers<[1], [1], [0], [0], [0, 0, 1, 0], [], []>} : vector<64x16xbf16>, vector<64x16xbf16>, vector<64x64xf32> -> vector<64x64xf32>
    %cst_28 = arith.constant dense<0xFF800000> : vector<64xf32>
    %73 = vector.multi_reduction <maximumf>, %72, %cst_28 [1] : vector<64x64xf32> to vector<64xf32>
    %74 = vector.shape_cast %73 : vector<64xf32> to vector<64x1xf32>
    %75 = vector.broadcast %74 : vector<64x1xf32> to vector<64x64xf32>
    %76 = arith.subf %72, %75 : vector<64x64xf32>
    %77 = math.exp %76 : vector<64x64xf32>
    %cst_29 = arith.constant dense<0.000000e+00> : vector<64xf32>
    %78 = vector.multi_reduction <add>, %77, %cst_29 [1] : vector<64x64xf32> to vector<64xf32>
    %79 = vector.shape_cast %78 : vector<64xf32> to vector<64x1xf32>
    %80 = tpu.reciprocal %79 {approx = true} : vector<64x1xf32> -> vector<64x1xf32>
    %81 = vector.broadcast %80 : vector<64x1xf32> to vector<64x64xf32>
    %82 = arith.mulf %77, %81 : vector<64x64xf32>
    %83 = arith.truncf %82 : vector<64x64xf32> to vector<64x64xbf16>
    %84 = vector.extract_strided_slice %35 {offsets = [0, 32], sizes = [64, 16], strides = [1, 1]} : vector<64x64xbf16> to vector<64x16xbf16>
    %cst_30 = arith.constant dense<0.000000e+00> : vector<64x16xf32>
    %85 = tpu.matmul %83, %84, %cst_30 {dimension_numbers = #tpu.dot_dimension_numbers<[1], [0], [0], [1], [0, 0, 1, 1], [], []>} : vector<64x64xbf16>, vector<64x16xbf16>, vector<64x16xf32> -> vector<64x16xf32>
    %c0_31 = arith.constant 0 : index
    %c32 = arith.constant 32 : index
    %86 = vector.load %arg12[%c0_31, %c32] : memref<64x64xf32, #tpu.memory_space<vmem>>, vector<64x16xf32>
    tpu.vector_store %arg12[%c0_31, %c32], %85 {strides = array<i32>} : memref<64x64xf32, #tpu.memory_space<vmem>>, vector<64x16xf32>,
    %87 = vector.extract_strided_slice %32 {offsets = [0, 48], sizes = [64, 16], strides = [1, 1]} : vector<64x64xbf16> to vector<64x16xbf16>
    %88 = vector.extract_strided_slice %34 {offsets = [0, 48], sizes = [64, 16], strides = [1, 1]} : vector<64x64xbf16> to vector<64x16xbf16>
    %cst_32 = arith.constant dense<0.000000e+00> : vector<64x64xf32>
    %89 = tpu.matmul %87, %88, %cst_32 {dimension_numbers = #tpu.dot_dimension_numbers<[1], [1], [0], [0], [0, 0, 1, 0], [], []>} : vector<64x16xbf16>, vector<64x16xbf16>, vector<64x64xf32> -> vector<64x64xf32>
    %cst_33 = arith.constant dense<0xFF800000> : vector<64xf32>
    %90 = vector.multi_reduction <maximumf>, %89, %cst_33 [1] : vector<64x64xf32> to vector<64xf32>
    %91 = vector.shape_cast %90 : vector<64xf32> to vector<64x1xf32>
    %92 = vector.broadcast %91 : vector<64x1xf32> to vector<64x64xf32>
    %93 = arith.subf %89, %92 : vector<64x64xf32>
    %94 = math.exp %93 : vector<64x64xf32>
    %cst_34 = arith.constant dense<0.000000e+00> : vector<64xf32>
    %95 = vector.multi_reduction <add>, %94, %cst_34 [1] : vector<64x64xf32> to vector<64xf32>
    %96 = vector.shape_cast %95 : vector<64xf32> to vector<64x1xf32>
    %97 = tpu.reciprocal %96 {approx = true} : vector<64x1xf32> -> vector<64x1xf32>
    %98 = vector.broadcast %97 : vector<64x1xf32> to vector<64x64xf32>
    %99 = arith.mulf %94, %98 : vector<64x64xf32>
    %100 = arith.truncf %99 : vector<64x64xf32> to vector<64x64xbf16>
    %101 = vector.extract_strided_slice %35 {offsets = [0, 48], sizes = [64, 16], strides = [1, 1]} : vector<64x64xbf16> to vector<64x16xbf16>
    %cst_35 = arith.constant dense<0.000000e+00> : vector<64x16xf32>
    %102 = tpu.matmul %100, %101, %cst_35 {dimension_numbers = #tpu.dot_dimension_numbers<[1], [0], [0], [1], [0, 0, 1, 1], [], []>} : vector<64x64xbf16>, vector<64x16xbf16>, vector<64x16xf32> -> vector<64x16xf32>
    %c0_36 = arith.constant 0 : index
    %c48 = arith.constant 48 : index
    %103 = vector.load %arg12[%c0_36, %c48] : memref<64x64xf32, #tpu.memory_space<vmem>>, vector<64x16xf32>
    tpu.vector_store %arg12[%c0_36, %c48], %102 {strides = array<i32>} : memref<64x64xf32, #tpu.memory_space<vmem>>, vector<64x16xf32>,
    %c0_37 = arith.constant 0 : index
    %c0_38 = arith.constant 0 : index
    %104 = vector.load %arg12[%c0_37, %c0_38] : memref<64x64xf32, #tpu.memory_space<vmem>>, vector<64x64xf32>
    %105 = arith.truncf %104 : vector<64x64xf32> to vector<64x64xbf16>
    %c0_39 = arith.constant 0 : index
    %c0_40 = arith.constant 0 : index
    %106 = vector.load %arg8[%c0_39, %c0_40] : memref<64x64xbf16, #tpu.memory_space<vmem>>, vector<64x64xbf16>
    %cst_41 = arith.constant dense<0.000000e+00> : vector<64x64xf32>
    %107 = tpu.matmul %105, %106, %cst_41 {dimension_numbers = #tpu.dot_dimension_numbers<[1], [0], [0], [1], [0, 0, 1, 1], [], []>} : vector<64x64xbf16>, vector<64x64xbf16>, vector<64x64xf32> -> vector<64x64xf32>
    %c0_42 = arith.constant 0 : index
    %c0_43 = arith.constant 0 : index
    %108 = vector.load %arg9[%c0_42, %c0_43] : memref<1x64xf32, #tpu.memory_space<vmem>>, vector<1x64xf32>
    %109 = vector.broadcast %108 : vector<1x64xf32> to vector<64x64xf32>
    %110 = arith.addf %107, %109 : vector<64x64xf32>
    %111 = arith.addf %4, %110 : vector<64x64xf32>
    %c0_44 = arith.constant 0 : index
    %c0_45 = arith.constant 0 : index
    %c0_46 = arith.constant 0 : index
    %112 = vector.load %arg10[%c0_44, %c0_45, %c0_46] : memref<1x64x64xf32, #tpu.memory_space<vmem>>, vector<1x64x64xf32>
    %113 = vector.shape_cast %112 : vector<1x64x64xf32> to vector<64x64xf32>
    %114 = vector.shape_cast %111 : vector<64x64xf32> to vector<1x64x64xf32>
    tpu.vector_store %arg10[%c0_44, %c0_45, %c0_46], %114 {strides = array<i32>} : memref<1x64x64xf32, #tpu.memory_space<vmem>>, vector<1x64x64xf32>,
    return
  }
  func.func @transform_0(%arg0: i32, %arg1: i32) -> (i32, i32, i32) {
    %c0_i32 = arith.constant 0 : i32
    %c0_i32_0 = arith.constant 0 : i32
    %c0_i32_1 = arith.constant 0 : i32
    return %arg0, %c0_i32, %c0_i32_0 : i32, i32, i32
  }
  func.func @transform_1(%arg0: i32, %arg1: i32) -> (i32, i32, i32) {
    %c0_i32 = arith.constant 0 : i32
    %c0_i32_0 = arith.constant 0 : i32
    return %arg0, %arg1, %c0_i32 : i32, i32, i32
  }
  func.func @transform_2(%arg0: i32, %arg1: i32) -> (i32, i32) {
    %c0_i32 = arith.constant 0 : i32
    %c0_i32_0 = arith.constant 0 : i32
    %c0_i32_1 = arith.constant 0 : i32
    return %c0_i32, %c0_i32_0 : i32, i32
  }
  func.func @transform_3(%arg0: i32, %arg1: i32) -> (i32, i32) {
    %c0_i32 = arith.constant 0 : i32
    %c0_i32_0 = arith.constant 0 : i32
    %c0_i32_1 = arith.constant 0 : i32
    return %c0_i32, %c0_i32_0 : i32, i32
  }
  func.func @transform_4(%arg0: i32, %arg1: i32) -> (i32, i32) {
    %c0_i32 = arith.constant 0 : i32
    %c0_i32_0 = arith.constant 0 : i32
    %c0_i32_1 = arith.constant 0 : i32
    return %c0_i32, %c0_i32_0 : i32, i32
  }
  func.func @transform_5(%arg0: i32, %arg1: i32) -> (i32, i32) {
    %c0_i32 = arith.constant 0 : i32
    %c0_i32_0 = arith.constant 0 : i32
    %c0_i32_1 = arith.constant 0 : i32
    return %c0_i32, %c0_i32_0 : i32, i32
  }
  func.func @transform_6(%arg0: i32, %arg1: i32) -> (i32, i32) {
    %c0_i32 = arith.constant 0 : i32
    %c0_i32_0 = arith.constant 0 : i32
    %c0_i32_1 = arith.constant 0 : i32
    return %c0_i32, %c0_i32_0 : i32, i32
  }
  func.func @transform_7(%arg0: i32, %arg1: i32) -> (i32, i32) {
    %c0_i32 = arith.constant 0 : i32
    %c0_i32_0 = arith.constant 0 : i32
    %c0_i32_1 = arith.constant 0 : i32
    return %c0_i32, %c0_i32_0 : i32, i32
  }
  func.func @transform_8(%arg0: i32, %arg1: i32) -> (i32, i32, i32) {
    %c0_i32 = arith.constant 0 : i32
    %c0_i32_0 = arith.constant 0 : i32
    return %arg0, %arg1, %c0_i32 : i32, i32, i32
  }
}

module attributes {stable_mosaic.version = 11 : i64} {
  func.func @_matmul_kernel(%arg0: i32, %arg1: memref<8x1536xbf16, #tpu.memory_space<vmem>>, %arg2: memref<1536x128xbf16, #tpu.memory_space<vmem>>, %arg3: memref<8x128xbf16, #tpu.memory_space<vmem>>) attributes {dimension_semantics = [#tpu.dimension_semantics<parallel>], iteration_bounds = array<i64: 2>, scalar_prefetch = 0 : i64, scratch_operands = 0 : i64, tpu.core_type = #tpu.core_type<tc>, window_params = [{transform_indices = @transform_0, window_bounds = array<i64: 8, 1536>}, {pipeline_mode = #tpu.pipeline_mode<synchronous>, transform_indices = @transform_1, window_bounds = array<i64: 1536, 128>}, {transform_indices = @transform_2, window_bounds = array<i64: 8, 128>}]} {
    %c0 = arith.constant 0 : index
    %c0_0 = arith.constant 0 : index
    %0 = vector.load %arg1[%c0, %c0_0] : memref<8x1536xbf16, #tpu.memory_space<vmem>>, vector<8x1536xbf16>
    %c0_1 = arith.constant 0 : index
    %c0_2 = arith.constant 0 : index
    %1 = vector.load %arg2[%c0_1, %c0_2] : memref<1536x128xbf16, #tpu.memory_space<vmem>>, vector<1536x128xbf16>
    %cst = arith.constant dense<0.000000e+00> : vector<8x128xf32>
    %2 = tpu.matmul %0, %1, %cst {dimension_numbers = #tpu.dot_dimension_numbers<[1], [0], [0], [1], [0, 0, 1, 1], [], []>} : vector<8x1536xbf16>, vector<1536x128xbf16>, vector<8x128xf32> -> vector<8x128xf32>
    %3 = arith.truncf %2 : vector<8x128xf32> to vector<8x128xbf16>
    %c0_3 = arith.constant 0 : index
    %c0_4 = arith.constant 0 : index
    %4 = vector.load %arg3[%c0_3, %c0_4] : memref<8x128xbf16, #tpu.memory_space<vmem>>, vector<8x128xbf16>
    tpu.vector_store %arg3[%c0_3, %c0_4], %3 {strides = array<i32>} : memref<8x128xbf16, #tpu.memory_space<vmem>>, vector<8x128xbf16>,
    return
  }
  func.func @transform_0(%arg0: i32) -> (i32, i32) {
    %c0_i32 = arith.constant 0 : i32
    %c0_i32_0 = arith.constant 0 : i32
    return %arg0, %c0_i32 : i32, i32
  }
  func.func @transform_1(%arg0: i32) -> (i32, i32) {
    %c0_i32 = arith.constant 0 : i32
    %c0_i32_0 = arith.constant 0 : i32
    %c0_i32_1 = arith.constant 0 : i32
    return %c0_i32, %c0_i32_0 : i32, i32
  }
  func.func @transform_2(%arg0: i32) -> (i32, i32) {
    %c0_i32 = arith.constant 0 : i32
    %c0_i32_0 = arith.constant 0 : i32
    return %arg0, %c0_i32 : i32, i32
  }
}

module attributes {stable_mosaic.version = 11 : i64} {
  func.func @_cross_attn_kernel(%arg0: i32, %arg1: i32, %arg2: memref<1x64x64xf32, #tpu.memory_space<vmem>>, %arg3: memref<1x8x128xbf16, #tpu.memory_space<vmem>>, %arg4: memref<1x64xf32, #tpu.memory_space<vmem>>, %arg5: memref<1x64xf32, #tpu.memory_space<vmem>>, %arg6: memref<64x64xbf16, #tpu.memory_space<vmem>>, %arg7: memref<64x64xbf16, #tpu.memory_space<vmem>>, %arg8: memref<1x64xf32, #tpu.memory_space<vmem>>, %arg9: memref<1x64x64xf32, #tpu.memory_space<vmem>>, %arg10: memref<64x64xf32, #tpu.memory_space<vmem>>) attributes {dimension_semantics = [#tpu.dimension_semantics<parallel>, #tpu.dimension_semantics<parallel>], iteration_bounds = array<i64: 2, 1>, scalar_prefetch = 0 : i64, scratch_operands = 1 : i64, tpu.core_type = #tpu.core_type<tc>, window_params = [{transform_indices = @transform_0, window_bounds = array<i64: 1, 64, 64>}, {transform_indices = @transform_1, window_bounds = array<i64: 1, 8, 128>}, {pipeline_mode = #tpu.pipeline_mode<synchronous>, transform_indices = @transform_2, window_bounds = array<i64: 1, 64>}, {pipeline_mode = #tpu.pipeline_mode<synchronous>, transform_indices = @transform_3, window_bounds = array<i64: 1, 64>}, {pipeline_mode = #tpu.pipeline_mode<synchronous>, transform_indices = @transform_4, window_bounds = array<i64: 64, 64>}, {pipeline_mode = #tpu.pipeline_mode<synchronous>, transform_indices = @transform_5, window_bounds = array<i64: 64, 64>}, {pipeline_mode = #tpu.pipeline_mode<synchronous>, transform_indices = @transform_6, window_bounds = array<i64: 1, 64>}, {transform_indices = @transform_7, window_bounds = array<i64: 1, 64, 64>}]} {
    %c0 = arith.constant 0 : index
    %c0_0 = arith.constant 0 : index
    %c0_1 = arith.constant 0 : index
    %0 = vector.load %arg2[%c0, %c0_0, %c0_1] : memref<1x64x64xf32, #tpu.memory_space<vmem>>, vector<1x64x64xf32>
    %1 = vector.shape_cast %0 : vector<1x64x64xf32> to vector<64x64xf32>
    %c0_2 = arith.constant 0 : index
    %c0_3 = arith.constant 0 : index
    %2 = vector.load %arg4[%c0_2, %c0_3] : memref<1x64xf32, #tpu.memory_space<vmem>>, vector<1x64xf32>
    %c0_4 = arith.constant 0 : index
    %c0_5 = arith.constant 0 : index
    %3 = vector.load %arg5[%c0_4, %c0_5] : memref<1x64xf32, #tpu.memory_space<vmem>>, vector<1x64xf32>
    %cst = arith.constant dense<0.000000e+00> : vector<64xf32>
    %4 = vector.multi_reduction <add>, %1, %cst [1] : vector<64x64xf32> to vector<64xf32>
    %5 = vector.shape_cast %4 : vector<64xf32> to vector<64x1xf32>
    %cst_6 = arith.constant 6.400000e+01 : f32
    %6 = vector.broadcast %cst_6 : f32 to vector<64x1xf32>
    %7 = arith.divf %5, %6 : vector<64x1xf32>
    %8 = vector.broadcast %7 : vector<64x1xf32> to vector<64x64xf32>
    %9 = arith.subf %1, %8 : vector<64x64xf32>
    %10 = arith.mulf %9, %9 : vector<64x64xf32>
    %cst_7 = arith.constant dense<0.000000e+00> : vector<64xf32>
    %11 = vector.multi_reduction <add>, %10, %cst_7 [1] : vector<64x64xf32> to vector<64xf32>
    %12 = vector.shape_cast %11 : vector<64xf32> to vector<64x1xf32>
    %cst_8 = arith.constant 6.400000e+01 : f32
    %13 = vector.broadcast %cst_8 : f32 to vector<64x1xf32>
    %14 = arith.divf %12, %13 : vector<64x1xf32>
    %15 = vector.broadcast %7 : vector<64x1xf32> to vector<64x64xf32>
    %16 = arith.subf %1, %15 : vector<64x64xf32>
    %cst_9 = arith.constant 9.99999974E-6 : f32
    %17 = vector.broadcast %cst_9 : f32 to vector<64x1xf32>
    %18 = arith.addf %14, %17 : vector<64x1xf32>
    %19 = math.rsqrt %18 : vector<64x1xf32>
    %20 = vector.broadcast %19 : vector<64x1xf32> to vector<64x64xf32>
    %21 = arith.mulf %16, %20 : vector<64x64xf32>
    %22 = vector.broadcast %2 : vector<1x64xf32> to vector<64x64xf32>
    %23 = arith.mulf %21, %22 : vector<64x64xf32>
    %24 = vector.broadcast %3 : vector<1x64xf32> to vector<64x64xf32>
    %25 = arith.addf %23, %24 : vector<64x64xf32>
    %26 = arith.truncf %25 : vector<64x64xf32> to vector<64x64xbf16>
    %c0_10 = arith.constant 0 : index
    %c0_11 = arith.constant 0 : index
    %27 = vector.load %arg6[%c0_10, %c0_11] : memref<64x64xbf16, #tpu.memory_space<vmem>>, vector<64x64xbf16>
    %cst_12 = arith.constant dense<0.000000e+00> : vector<64x64xf32>
    %28 = tpu.matmul %26, %27, %cst_12 {dimension_numbers = #tpu.dot_dimension_numbers<[1], [0], [0], [1], [0, 0, 1, 1], [], []>} : vector<64x64xbf16>, vector<64x64xbf16>, vector<64x64xf32> -> vector<64x64xf32>
    %29 = arith.truncf %28 : vector<64x64xf32> to vector<64x64xbf16>
    %c0_13 = arith.constant 0 : index
    %c0_14 = arith.constant 0 : index
    %c0_15 = arith.constant 0 : index
    %30 = vector.load %arg3[%c0_13, %c0_14, %c0_15] : memref<1x8x128xbf16, #tpu.memory_space<vmem>>, vector<1x8x128xbf16>
    %31 = vector.shape_cast %30 : vector<1x8x128xbf16> to vector<8x128xbf16>
    %32 = vector.extract_strided_slice %31 {offsets = [0, 0], sizes = [8, 64], strides = [1, 1]} : vector<8x128xbf16> to vector<8x64xbf16>
    %33 = vector.extract_strided_slice %31 {offsets = [0, 64], sizes = [8, 64], strides = [1, 1]} : vector<8x128xbf16> to vector<8x64xbf16>
    %34 = vector.extract_strided_slice %29 {offsets = [0, 0], sizes = [64, 16], strides = [1, 1]} : vector<64x64xbf16> to vector<64x16xbf16>
    %35 = vector.extract_strided_slice %32 {offsets = [0, 0], sizes = [8, 16], strides = [1, 1]} : vector<8x64xbf16> to vector<8x16xbf16>
    %cst_16 = arith.constant dense<0.000000e+00> : vector<64x8xf32>
    %36 = tpu.matmul %34, %35, %cst_16 {dimension_numbers = #tpu.dot_dimension_numbers<[1], [1], [0], [0], [0, 0, 1, 0], [], []>} : vector<64x16xbf16>, vector<8x16xbf16>, vector<64x8xf32> -> vector<64x8xf32>
    %cst_17 = arith.constant dense<0xFF800000> : vector<64xf32>
    %37 = vector.multi_reduction <maximumf>, %36, %cst_17 [1] : vector<64x8xf32> to vector<64xf32>
    %38 = vector.shape_cast %37 : vector<64xf32> to vector<64x1xf32>
    %39 = vector.broadcast %38 : vector<64x1xf32> to vector<64x8xf32>
    %40 = arith.subf %36, %39 : vector<64x8xf32>
    %41 = math.exp %40 : vector<64x8xf32>
    %cst_18 = arith.constant dense<0.000000e+00> : vector<64xf32>
    %42 = vector.multi_reduction <add>, %41, %cst_18 [1] : vector<64x8xf32> to vector<64xf32>
    %43 = vector.shape_cast %42 : vector<64xf32> to vector<64x1xf32>
    %44 = tpu.reciprocal %43 {approx = true} : vector<64x1xf32> -> vector<64x1xf32>
    %45 = vector.broadcast %44 : vector<64x1xf32> to vector<64x8xf32>
    %46 = arith.mulf %41, %45 : vector<64x8xf32>
    %47 = arith.truncf %46 : vector<64x8xf32> to vector<64x8xbf16>
    %48 = vector.extract_strided_slice %33 {offsets = [0, 0], sizes = [8, 16], strides = [1, 1]} : vector<8x64xbf16> to vector<8x16xbf16>
    %cst_19 = arith.constant dense<0.000000e+00> : vector<64x16xf32>
    %49 = tpu.matmul %47, %48, %cst_19 {dimension_numbers = #tpu.dot_dimension_numbers<[1], [0], [0], [1], [0, 0, 1, 1], [], []>} : vector<64x8xbf16>, vector<8x16xbf16>, vector<64x16xf32> -> vector<64x16xf32>
    %c0_20 = arith.constant 0 : index
    %c0_21 = arith.constant 0 : index
    %50 = vector.load %arg10[%c0_20, %c0_21] : memref<64x64xf32, #tpu.memory_space<vmem>>, vector<64x16xf32>
    tpu.vector_store %arg10[%c0_20, %c0_21], %49 {strides = array<i32>} : memref<64x64xf32, #tpu.memory_space<vmem>>, vector<64x16xf32>,
    %51 = vector.extract_strided_slice %29 {offsets = [0, 16], sizes = [64, 16], strides = [1, 1]} : vector<64x64xbf16> to vector<64x16xbf16>
    %52 = vector.extract_strided_slice %32 {offsets = [0, 16], sizes = [8, 16], strides = [1, 1]} : vector<8x64xbf16> to vector<8x16xbf16>
    %cst_22 = arith.constant dense<0.000000e+00> : vector<64x8xf32>
    %53 = tpu.matmul %51, %52, %cst_22 {dimension_numbers = #tpu.dot_dimension_numbers<[1], [1], [0], [0], [0, 0, 1, 0], [], []>} : vector<64x16xbf16>, vector<8x16xbf16>, vector<64x8xf32> -> vector<64x8xf32>
    %cst_23 = arith.constant dense<0xFF800000> : vector<64xf32>
    %54 = vector.multi_reduction <maximumf>, %53, %cst_23 [1] : vector<64x8xf32> to vector<64xf32>
    %55 = vector.shape_cast %54 : vector<64xf32> to vector<64x1xf32>
    %56 = vector.broadcast %55 : vector<64x1xf32> to vector<64x8xf32>
    %57 = arith.subf %53, %56 : vector<64x8xf32>
    %58 = math.exp %57 : vector<64x8xf32>
    %cst_24 = arith.constant dense<0.000000e+00> : vector<64xf32>
    %59 = vector.multi_reduction <add>, %58, %cst_24 [1] : vector<64x8xf32> to vector<64xf32>
    %60 = vector.shape_cast %59 : vector<64xf32> to vector<64x1xf32>
    %61 = tpu.reciprocal %60 {approx = true} : vector<64x1xf32> -> vector<64x1xf32>
    %62 = vector.broadcast %61 : vector<64x1xf32> to vector<64x8xf32>
    %63 = arith.mulf %58, %62 : vector<64x8xf32>
    %64 = arith.truncf %63 : vector<64x8xf32> to vector<64x8xbf16>
    %65 = vector.extract_strided_slice %33 {offsets = [0, 16], sizes = [8, 16], strides = [1, 1]} : vector<8x64xbf16> to vector<8x16xbf16>
    %cst_25 = arith.constant dense<0.000000e+00> : vector<64x16xf32>
    %66 = tpu.matmul %64, %65, %cst_25 {dimension_numbers = #tpu.dot_dimension_numbers<[1], [0], [0], [1], [0, 0, 1, 1], [], []>} : vector<64x8xbf16>, vector<8x16xbf16>, vector<64x16xf32> -> vector<64x16xf32>
    %c0_26 = arith.constant 0 : index
    %c16 = arith.constant 16 : index
    %67 = vector.load %arg10[%c0_26, %c16] : memref<64x64xf32, #tpu.memory_space<vmem>>, vector<64x16xf32>
    tpu.vector_store %arg10[%c0_26, %c16], %66 {strides = array<i32>} : memref<64x64xf32, #tpu.memory_space<vmem>>, vector<64x16xf32>,
    %68 = vector.extract_strided_slice %29 {offsets = [0, 32], sizes = [64, 16], strides = [1, 1]} : vector<64x64xbf16> to vector<64x16xbf16>
    %69 = vector.extract_strided_slice %32 {offsets = [0, 32], sizes = [8, 16], strides = [1, 1]} : vector<8x64xbf16> to vector<8x16xbf16>
    %cst_27 = arith.constant dense<0.000000e+00> : vector<64x8xf32>
    %70 = tpu.matmul %68, %69, %cst_27 {dimension_numbers = #tpu.dot_dimension_numbers<[1], [1], [0], [0], [0, 0, 1, 0], [], []>} : vector<64x16xbf16>, vector<8x16xbf16>, vector<64x8xf32> -> vector<64x8xf32>
    %cst_28 = arith.constant dense<0xFF800000> : vector<64xf32>
    %71 = vector.multi_reduction <maximumf>, %70, %cst_28 [1] : vector<64x8xf32> to vector<64xf32>
    %72 = vector.shape_cast %71 : vector<64xf32> to vector<64x1xf32>
    %73 = vector.broadcast %72 : vector<64x1xf32> to vector<64x8xf32>
    %74 = arith.subf %70, %73 : vector<64x8xf32>
    %75 = math.exp %74 : vector<64x8xf32>
    %cst_29 = arith.constant dense<0.000000e+00> : vector<64xf32>
    %76 = vector.multi_reduction <add>, %75, %cst_29 [1] : vector<64x8xf32> to vector<64xf32>
    %77 = vector.shape_cast %76 : vector<64xf32> to vector<64x1xf32>
    %78 = tpu.reciprocal %77 {approx = true} : vector<64x1xf32> -> vector<64x1xf32>
    %79 = vector.broadcast %78 : vector<64x1xf32> to vector<64x8xf32>
    %80 = arith.mulf %75, %79 : vector<64x8xf32>
    %81 = arith.truncf %80 : vector<64x8xf32> to vector<64x8xbf16>
    %82 = vector.extract_strided_slice %33 {offsets = [0, 32], sizes = [8, 16], strides = [1, 1]} : vector<8x64xbf16> to vector<8x16xbf16>
    %cst_30 = arith.constant dense<0.000000e+00> : vector<64x16xf32>
    %83 = tpu.matmul %81, %82, %cst_30 {dimension_numbers = #tpu.dot_dimension_numbers<[1], [0], [0], [1], [0, 0, 1, 1], [], []>} : vector<64x8xbf16>, vector<8x16xbf16>, vector<64x16xf32> -> vector<64x16xf32>
    %c0_31 = arith.constant 0 : index
    %c32 = arith.constant 32 : index
    %84 = vector.load %arg10[%c0_31, %c32] : memref<64x64xf32, #tpu.memory_space<vmem>>, vector<64x16xf32>
    tpu.vector_store %arg10[%c0_31, %c32], %83 {strides = array<i32>} : memref<64x64xf32, #tpu.memory_space<vmem>>, vector<64x16xf32>,
    %85 = vector.extract_strided_slice %29 {offsets = [0, 48], sizes = [64, 16], strides = [1, 1]} : vector<64x64xbf16> to vector<64x16xbf16>
    %86 = vector.extract_strided_slice %32 {offsets = [0, 48], sizes = [8, 16], strides = [1, 1]} : vector<8x64xbf16> to vector<8x16xbf16>
    %cst_32 = arith.constant dense<0.000000e+00> : vector<64x8xf32>
    %87 = tpu.matmul %85, %86, %cst_32 {dimension_numbers = #tpu.dot_dimension_numbers<[1], [1], [0], [0], [0, 0, 1, 0], [], []>} : vector<64x16xbf16>, vector<8x16xbf16>, vector<64x8xf32> -> vector<64x8xf32>
    %cst_33 = arith.constant dense<0xFF800000> : vector<64xf32>
    %88 = vector.multi_reduction <maximumf>, %87, %cst_33 [1] : vector<64x8xf32> to vector<64xf32>
    %89 = vector.shape_cast %88 : vector<64xf32> to vector<64x1xf32>
    %90 = vector.broadcast %89 : vector<64x1xf32> to vector<64x8xf32>
    %91 = arith.subf %87, %90 : vector<64x8xf32>
    %92 = math.exp %91 : vector<64x8xf32>
    %cst_34 = arith.constant dense<0.000000e+00> : vector<64xf32>
    %93 = vector.multi_reduction <add>, %92, %cst_34 [1] : vector<64x8xf32> to vector<64xf32>
    %94 = vector.shape_cast %93 : vector<64xf32> to vector<64x1xf32>
    %95 = tpu.reciprocal %94 {approx = true} : vector<64x1xf32> -> vector<64x1xf32>
    %96 = vector.broadcast %95 : vector<64x1xf32> to vector<64x8xf32>
    %97 = arith.mulf %92, %96 : vector<64x8xf32>
    %98 = arith.truncf %97 : vector<64x8xf32> to vector<64x8xbf16>
    %99 = vector.extract_strided_slice %33 {offsets = [0, 48], sizes = [8, 16], strides = [1, 1]} : vector<8x64xbf16> to vector<8x16xbf16>
    %cst_35 = arith.constant dense<0.000000e+00> : vector<64x16xf32>
    %100 = tpu.matmul %98, %99, %cst_35 {dimension_numbers = #tpu.dot_dimension_numbers<[1], [0], [0], [1], [0, 0, 1, 1], [], []>} : vector<64x8xbf16>, vector<8x16xbf16>, vector<64x16xf32> -> vector<64x16xf32>
    %c0_36 = arith.constant 0 : index
    %c48 = arith.constant 48 : index
    %101 = vector.load %arg10[%c0_36, %c48] : memref<64x64xf32, #tpu.memory_space<vmem>>, vector<64x16xf32>
    tpu.vector_store %arg10[%c0_36, %c48], %100 {strides = array<i32>} : memref<64x64xf32, #tpu.memory_space<vmem>>, vector<64x16xf32>,
    %c0_37 = arith.constant 0 : index
    %c0_38 = arith.constant 0 : index
    %102 = vector.load %arg10[%c0_37, %c0_38] : memref<64x64xf32, #tpu.memory_space<vmem>>, vector<64x64xf32>
    %103 = arith.truncf %102 : vector<64x64xf32> to vector<64x64xbf16>
    %c0_39 = arith.constant 0 : index
    %c0_40 = arith.constant 0 : index
    %104 = vector.load %arg7[%c0_39, %c0_40] : memref<64x64xbf16, #tpu.memory_space<vmem>>, vector<64x64xbf16>
    %cst_41 = arith.constant dense<0.000000e+00> : vector<64x64xf32>
    %105 = tpu.matmul %103, %104, %cst_41 {dimension_numbers = #tpu.dot_dimension_numbers<[1], [0], [0], [1], [0, 0, 1, 1], [], []>} : vector<64x64xbf16>, vector<64x64xbf16>, vector<64x64xf32> -> vector<64x64xf32>
    %c0_42 = arith.constant 0 : index
    %c0_43 = arith.constant 0 : index
    %106 = vector.load %arg8[%c0_42, %c0_43] : memref<1x64xf32, #tpu.memory_space<vmem>>, vector<1x64xf32>
    %107 = vector.broadcast %106 : vector<1x64xf32> to vector<64x64xf32>
    %108 = arith.addf %105, %107 : vector<64x64xf32>
    %109 = arith.addf %1, %108 : vector<64x64xf32>
    %c0_44 = arith.constant 0 : index
    %c0_45 = arith.constant 0 : index
    %c0_46 = arith.constant 0 : index
    %110 = vector.load %arg9[%c0_44, %c0_45, %c0_46] : memref<1x64x64xf32, #tpu.memory_space<vmem>>, vector<1x64x64xf32>
    %111 = vector.shape_cast %110 : vector<1x64x64xf32> to vector<64x64xf32>
    %112 = vector.shape_cast %109 : vector<64x64xf32> to vector<1x64x64xf32>
    tpu.vector_store %arg9[%c0_44, %c0_45, %c0_46], %112 {strides = array<i32>} : memref<1x64x64xf32, #tpu.memory_space<vmem>>, vector<1x64x64xf32>,
    return
  }
  func.func @transform_0(%arg0: i32, %arg1: i32) -> (i32, i32, i32) {
    %c0_i32 = arith.constant 0 : i32
    %c0_i32_0 = arith.constant 0 : i32
    return %arg0, %arg1, %c0_i32 : i32, i32, i32
  }
  func.func @transform_1(%arg0: i32, %arg1: i32) -> (i32, i32, i32) {
    %c0_i32 = arith.constant 0 : i32
    %c0_i32_0 = arith.constant 0 : i32
    %c0_i32_1 = arith.constant 0 : i32
    return %arg0, %c0_i32, %c0_i32_0 : i32, i32, i32
  }
  func.func @transform_2(%arg0: i32, %arg1: i32) -> (i32, i32) {
    %c0_i32 = arith.constant 0 : i32
    %c0_i32_0 = arith.constant 0 : i32
    %c0_i32_1 = arith.constant 0 : i32
    return %c0_i32, %c0_i32_0 : i32, i32
  }
  func.func @transform_3(%arg0: i32, %arg1: i32) -> (i32, i32) {
    %c0_i32 = arith.constant 0 : i32
    %c0_i32_0 = arith.constant 0 : i32
    %c0_i32_1 = arith.constant 0 : i32
    return %c0_i32, %c0_i32_0 : i32, i32
  }
  func.func @transform_4(%arg0: i32, %arg1: i32) -> (i32, i32) {
    %c0_i32 = arith.constant 0 : i32
    %c0_i32_0 = arith.constant 0 : i32
    %c0_i32_1 = arith.constant 0 : i32
    return %c0_i32, %c0_i32_0 : i32, i32
  }
  func.func @transform_5(%arg0: i32, %arg1: i32) -> (i32, i32) {
    %c0_i32 = arith.constant 0 : i32
    %c0_i32_0 = arith.constant 0 : i32
    %c0_i32_1 = arith.constant 0 : i32
    return %c0_i32, %c0_i32_0 : i32, i32
  }
  func.func @transform_6(%arg0: i32, %arg1: i32) -> (i32, i32) {
    %c0_i32 = arith.constant 0 : i32
    %c0_i32_0 = arith.constant 0 : i32
    %c0_i32_1 = arith.constant 0 : i32
    return %c0_i32, %c0_i32_0 : i32, i32
  }
  func.func @transform_7(%arg0: i32, %arg1: i32) -> (i32, i32, i32) {
    %c0_i32 = arith.constant 0 : i32
    %c0_i32_0 = arith.constant 0 : i32
    return %arg0, %arg1, %c0_i32 : i32, i32, i32
  }
}

module attributes {stable_mosaic.version = 11 : i64} {
  func.func @_ff_geglu_kernel(%arg0: i32, %arg1: memref<64x64xf32, #tpu.memory_space<vmem>>, %arg2: memref<1x64xf32, #tpu.memory_space<vmem>>, %arg3: memref<1x64xf32, #tpu.memory_space<vmem>>, %arg4: memref<64x512xbf16, #tpu.memory_space<vmem>>, %arg5: memref<1x512xf32, #tpu.memory_space<vmem>>, %arg6: memref<256x64xbf16, #tpu.memory_space<vmem>>, %arg7: memref<1x64xf32, #tpu.memory_space<vmem>>, %arg8: memref<64x64xf32, #tpu.memory_space<vmem>>) attributes {dimension_semantics = [#tpu.dimension_semantics<parallel>], iteration_bounds = array<i64: 2>, scalar_prefetch = 0 : i64, scratch_operands = 0 : i64, tpu.core_type = #tpu.core_type<tc>, window_params = [{transform_indices = @transform_0, window_bounds = array<i64: 64, 64>}, {pipeline_mode = #tpu.pipeline_mode<synchronous>, transform_indices = @transform_1, window_bounds = array<i64: 1, 64>}, {pipeline_mode = #tpu.pipeline_mode<synchronous>, transform_indices = @transform_2, window_bounds = array<i64: 1, 64>}, {pipeline_mode = #tpu.pipeline_mode<synchronous>, transform_indices = @transform_3, window_bounds = array<i64: 64, 512>}, {pipeline_mode = #tpu.pipeline_mode<synchronous>, transform_indices = @transform_4, window_bounds = array<i64: 1, 512>}, {pipeline_mode = #tpu.pipeline_mode<synchronous>, transform_indices = @transform_5, window_bounds = array<i64: 256, 64>}, {pipeline_mode = #tpu.pipeline_mode<synchronous>, transform_indices = @transform_6, window_bounds = array<i64: 1, 64>}, {transform_indices = @transform_7, window_bounds = array<i64: 64, 64>}]} {
    %c0 = arith.constant 0 : index
    %c0_0 = arith.constant 0 : index
    %0 = vector.load %arg1[%c0, %c0_0] : memref<64x64xf32, #tpu.memory_space<vmem>>, vector<64x64xf32>
    %c0_1 = arith.constant 0 : index
    %c0_2 = arith.constant 0 : index
    %1 = vector.load %arg2[%c0_1, %c0_2] : memref<1x64xf32, #tpu.memory_space<vmem>>, vector<1x64xf32>
    %c0_3 = arith.constant 0 : index
    %c0_4 = arith.constant 0 : index
    %2 = vector.load %arg3[%c0_3, %c0_4] : memref<1x64xf32, #tpu.memory_space<vmem>>, vector<1x64xf32>
    %cst = arith.constant dense<0.000000e+00> : vector<64xf32>
    %3 = vector.multi_reduction <add>, %0, %cst [1] : vector<64x64xf32> to vector<64xf32>
    %4 = vector.shape_cast %3 : vector<64xf32> to vector<64x1xf32>
    %cst_5 = arith.constant 6.400000e+01 : f32
    %5 = vector.broadcast %cst_5 : f32 to vector<64x1xf32>
    %6 = arith.divf %4, %5 : vector<64x1xf32>
    %7 = vector.broadcast %6 : vector<64x1xf32> to vector<64x64xf32>
    %8 = arith.subf %0, %7 : vector<64x64xf32>
    %9 = arith.mulf %8, %8 : vector<64x64xf32>
    %cst_6 = arith.constant dense<0.000000e+00> : vector<64xf32>
    %10 = vector.multi_reduction <add>, %9, %cst_6 [1] : vector<64x64xf32> to vector<64xf32>
    %11 = vector.shape_cast %10 : vector<64xf32> to vector<64x1xf32>
    %cst_7 = arith.constant 6.400000e+01 : f32
    %12 = vector.broadcast %cst_7 : f32 to vector<64x1xf32>
    %13 = arith.divf %11, %12 : vector<64x1xf32>
    %14 = vector.broadcast %6 : vector<64x1xf32> to vector<64x64xf32>
    %15 = arith.subf %0, %14 : vector<64x64xf32>
    %cst_8 = arith.constant 9.99999974E-6 : f32
    %16 = vector.broadcast %cst_8 : f32 to vector<64x1xf32>
    %17 = arith.addf %13, %16 : vector<64x1xf32>
    %18 = math.rsqrt %17 : vector<64x1xf32>
    %19 = vector.broadcast %18 : vector<64x1xf32> to vector<64x64xf32>
    %20 = arith.mulf %15, %19 : vector<64x64xf32>
    %21 = vector.broadcast %1 : vector<1x64xf32> to vector<64x64xf32>
    %22 = arith.mulf %20, %21 : vector<64x64xf32>
    %23 = vector.broadcast %2 : vector<1x64xf32> to vector<64x64xf32>
    %24 = arith.addf %22, %23 : vector<64x64xf32>
    %25 = arith.truncf %24 : vector<64x64xf32> to vector<64x64xbf16>
    %c0_9 = arith.constant 0 : index
    %c0_10 = arith.constant 0 : index
    %26 = vector.load %arg4[%c0_9, %c0_10] : memref<64x512xbf16, #tpu.memory_space<vmem>>, vector<64x512xbf16>
    %cst_11 = arith.constant dense<0.000000e+00> : vector<64x512xf32>
    %27 = tpu.matmul %25, %26, %cst_11 {dimension_numbers = #tpu.dot_dimension_numbers<[1], [0], [0], [1], [0, 0, 1, 1], [], []>} : vector<64x64xbf16>, vector<64x512xbf16>, vector<64x512xf32> -> vector<64x512xf32>
    %c0_12 = arith.constant 0 : index
    %c0_13 = arith.constant 0 : index
    %28 = vector.load %arg5[%c0_12, %c0_13] : memref<1x512xf32, #tpu.memory_space<vmem>>, vector<1x512xf32>
    %29 = vector.broadcast %28 : vector<1x512xf32> to vector<64x512xf32>
    %30 = arith.addf %27, %29 : vector<64x512xf32>
    %31 = vector.extract_strided_slice %30 {offsets = [0, 0], sizes = [64, 256], strides = [1, 1]} : vector<64x512xf32> to vector<64x256xf32>
    %32 = vector.extract_strided_slice %30 {offsets = [0, 256], sizes = [64, 256], strides = [1, 1]} : vector<64x512xf32> to vector<64x256xf32>
    %33 = arith.mulf %32, %32 : vector<64x256xf32>
    %34 = arith.mulf %32, %33 : vector<64x256xf32>
    %cst_14 = arith.constant 4.471500e-02 : f32
    %35 = vector.broadcast %cst_14 : f32 to vector<64x256xf32>
    %36 = arith.mulf %35, %34 : vector<64x256xf32>
    %37 = arith.addf %32, %36 : vector<64x256xf32>
    %cst_15 = arith.constant 0.797884583 : f32
    %38 = vector.broadcast %cst_15 : f32 to vector<64x256xf32>
    %39 = arith.mulf %38, %37 : vector<64x256xf32>
    %40 = math.tanh %39 : vector<64x256xf32>
    %cst_16 = arith.constant 1.000000e+00 : f32
    %41 = vector.broadcast %cst_16 : f32 to vector<64x256xf32>
    %42 = arith.addf %41, %40 : vector<64x256xf32>
    %cst_17 = arith.constant 5.000000e-01 : f32
    %43 = vector.broadcast %cst_17 : f32 to vector<64x256xf32>
    %44 = arith.mulf %43, %42 : vector<64x256xf32>
    %45 = arith.mulf %32, %44 : vector<64x256xf32>
    %46 = arith.mulf %31, %45 : vector<64x256xf32>
    %47 = arith.truncf %46 : vector<64x256xf32> to vector<64x256xbf16>
    %c0_18 = arith.constant 0 : index
    %c0_19 = arith.constant 0 : index
    %48 = vector.load %arg6[%c0_18, %c0_19] : memref<256x64xbf16, #tpu.memory_space<vmem>>, vector<256x64xbf16>
    %cst_20 = arith.constant dense<0.000000e+00> : vector<64x64xf32>
    %49 = tpu.matmul %47, %48, %cst_20 {dimension_numbers = #tpu.dot_dimension_numbers<[1], [0], [0], [1], [0, 0, 1, 1], [], []>} : vector<64x256xbf16>, vector<256x64xbf16>, vector<64x64xf32> -> vector<64x64xf32>
    %c0_21 = arith.constant 0 : index
    %c0_22 = arith.constant 0 : index
    %50 = vector.load %arg7[%c0_21, %c0_22] : memref<1x64xf32, #tpu.memory_space<vmem>>, vector<1x64xf32>
    %51 = vector.broadcast %50 : vector<1x64xf32> to vector<64x64xf32>
    %52 = arith.addf %49, %51 : vector<64x64xf32>
    %53 = arith.addf %0, %52 : vector<64x64xf32>
    %c0_23 = arith.constant 0 : index
    %c0_24 = arith.constant 0 : index
    %54 = vector.load %arg8[%c0_23, %c0_24] : memref<64x64xf32, #tpu.memory_space<vmem>>, vector<64x64xf32>
    tpu.vector_store %arg8[%c0_23, %c0_24], %53 {strides = array<i32>} : memref<64x64xf32, #tpu.memory_space<vmem>>, vector<64x64xf32>,
    return
  }
  func.func @transform_0(%arg0: i32) -> (i32, i32) {
    %c0_i32 = arith.constant 0 : i32
    %c0_i32_0 = arith.constant 0 : i32
    return %arg0, %c0_i32 : i32, i32
  }
  func.func @transform_1(%arg0: i32) -> (i32, i32) {
    %c0_i32 = arith.constant 0 : i32
    %c0_i32_0 = arith.constant 0 : i32
    %c0_i32_1 = arith.constant 0 : i32
    return %c0_i32, %c0_i32_0 : i32, i32
  }
  func.func @transform_2(%arg0: i32) -> (i32, i32) {
    %c0_i32 = arith.constant 0 : i32
    %c0_i32_0 = arith.constant 0 : i32
    %c0_i32_1 = arith.constant 0 : i32
    return %c0_i32, %c0_i32_0 : i32, i32
  }
  func.func @transform_3(%arg0: i32) -> (i32, i32) {
    %c0_i32 = arith.constant 0 : i32
    %c0_i32_0 = arith.constant 0 : i32
    %c0_i32_1 = arith.constant 0 : i32
    return %c0_i32, %c0_i32_0 : i32, i32
  }
  func.func @transform_4(%arg0: i32) -> (i32, i32) {
    %c0_i32 = arith.constant 0 : i32
    %c0_i32_0 = arith.constant 0 : i32
    %c0_i32_1 = arith.constant 0 : i32
    return %c0_i32, %c0_i32_0 : i32, i32
  }
  func.func @transform_5(%arg0: i32) -> (i32, i32) {
    %c0_i32 = arith.constant 0 : i32
    %c0_i32_0 = arith.constant 0 : i32
    %c0_i32_1 = arith.constant 0 : i32
    return %c0_i32, %c0_i32_0 : i32, i32
  }
  func.func @transform_6(%arg0: i32) -> (i32, i32) {
    %c0_i32 = arith.constant 0 : i32
    %c0_i32_0 = arith.constant 0 : i32
    %c0_i32_1 = arith.constant 0 : i32
    return %c0_i32, %c0_i32_0 : i32, i32
  }
  func.func @transform_7(%arg0: i32) -> (i32, i32) {
    %c0_i32 = arith.constant 0 : i32
    %c0_i32_0 = arith.constant 0 : i32
    return %arg0, %c0_i32 : i32, i32
  }
}

module attributes {stable_mosaic.version = 11 : i64} {
  func.func @_proj_out_kernel(%arg0: i32, %arg1: i32, %arg2: memref<1x64x64xf32, #tpu.memory_space<vmem>>, %arg3: memref<1x64x64xf32, #tpu.memory_space<vmem>>, %arg4: memref<64x64xbf16, #tpu.memory_space<vmem>>, %arg5: memref<1x64xf32, #tpu.memory_space<vmem>>, %arg6: memref<1x64x64xf32, #tpu.memory_space<vmem>>) attributes {dimension_semantics = [#tpu.dimension_semantics<parallel>, #tpu.dimension_semantics<parallel>], iteration_bounds = array<i64: 2, 1>, scalar_prefetch = 0 : i64, scratch_operands = 0 : i64, tpu.core_type = #tpu.core_type<tc>, window_params = [{transform_indices = @transform_0, window_bounds = array<i64: 1, 64, 64>}, {transform_indices = @transform_1, window_bounds = array<i64: 1, 64, 64>}, {pipeline_mode = #tpu.pipeline_mode<synchronous>, transform_indices = @transform_2, window_bounds = array<i64: 64, 64>}, {pipeline_mode = #tpu.pipeline_mode<synchronous>, transform_indices = @transform_3, window_bounds = array<i64: 1, 64>}, {transform_indices = @transform_4, window_bounds = array<i64: 1, 64, 64>}]} {
    %c0 = arith.constant 0 : index
    %c0_0 = arith.constant 0 : index
    %c0_1 = arith.constant 0 : index
    %0 = vector.load %arg2[%c0, %c0_0, %c0_1] : memref<1x64x64xf32, #tpu.memory_space<vmem>>, vector<1x64x64xf32>
    %1 = vector.shape_cast %0 : vector<1x64x64xf32> to vector<64x64xf32>
    %2 = arith.truncf %1 : vector<64x64xf32> to vector<64x64xbf16>
    %c0_2 = arith.constant 0 : index
    %c0_3 = arith.constant 0 : index
    %3 = vector.load %arg4[%c0_2, %c0_3] : memref<64x64xbf16, #tpu.memory_space<vmem>>, vector<64x64xbf16>
    %cst = arith.constant dense<0.000000e+00> : vector<64x64xf32>
    %4 = tpu.matmul %2, %3, %cst {dimension_numbers = #tpu.dot_dimension_numbers<[1], [0], [0], [1], [0, 0, 1, 1], [], []>} : vector<64x64xbf16>, vector<64x64xbf16>, vector<64x64xf32> -> vector<64x64xf32>
    %c0_4 = arith.constant 0 : index
    %c0_5 = arith.constant 0 : index
    %5 = vector.load %arg5[%c0_4, %c0_5] : memref<1x64xf32, #tpu.memory_space<vmem>>, vector<1x64xf32>
    %6 = vector.broadcast %5 : vector<1x64xf32> to vector<64x64xf32>
    %7 = arith.addf %4, %6 : vector<64x64xf32>
    %8 = tpu.transpose %7, [1, 0] : vector<64x64xf32> -> vector<64x64xf32>
    %c0_6 = arith.constant 0 : index
    %c0_7 = arith.constant 0 : index
    %c0_8 = arith.constant 0 : index
    %9 = vector.load %arg3[%c0_6, %c0_7, %c0_8] : memref<1x64x64xf32, #tpu.memory_space<vmem>>, vector<1x64x64xf32>
    %10 = vector.shape_cast %9 : vector<1x64x64xf32> to vector<64x64xf32>
    %11 = arith.addf %8, %10 : vector<64x64xf32>
    %c0_9 = arith.constant 0 : index
    %c0_10 = arith.constant 0 : index
    %c0_11 = arith.constant 0 : index
    %12 = vector.load %arg6[%c0_9, %c0_10, %c0_11] : memref<1x64x64xf32, #tpu.memory_space<vmem>>, vector<1x64x64xf32>
    %13 = vector.shape_cast %12 : vector<1x64x64xf32> to vector<64x64xf32>
    %14 = vector.shape_cast %11 : vector<64x64xf32> to vector<1x64x64xf32>
    tpu.vector_store %arg6[%c0_9, %c0_10, %c0_11], %14 {strides = array<i32>} : memref<1x64x64xf32, #tpu.memory_space<vmem>>, vector<1x64x64xf32>,
    return
  }
  func.func @transform_0(%arg0: i32, %arg1: i32) -> (i32, i32, i32) {
    %c0_i32 = arith.constant 0 : i32
    %c0_i32_0 = arith.constant 0 : i32
    return %arg0, %arg1, %c0_i32 : i32, i32, i32
  }
  func.func @transform_1(%arg0: i32, %arg1: i32) -> (i32, i32, i32) {
    %c0_i32 = arith.constant 0 : i32
    %c0_i32_0 = arith.constant 0 : i32
    return %arg0, %c0_i32, %arg1 : i32, i32, i32
  }
  func.func @transform_2(%arg0: i32, %arg1: i32) -> (i32, i32) {
    %c0_i32 = arith.constant 0 : i32
    %c0_i32_0 = arith.constant 0 : i32
    %c0_i32_1 = arith.constant 0 : i32
    return %c0_i32, %c0_i32_0 : i32, i32
  }
  func.func @transform_3(%arg0: i32, %arg1: i32) -> (i32, i32) {
    %c0_i32 = arith.constant 0 : i32
    %c0_i32_0 = arith.constant 0 : i32
    %c0_i32_1 = arith.constant 0 : i32
    return %c0_i32, %c0_i32_0 : i32, i32
  }
  func.func @transform_4(%arg0: i32, %arg1: i32) -> (i32, i32, i32) {
    %c0_i32 = arith.constant 0 : i32
    %c0_i32_0 = arith.constant 0 : i32
    return %arg0, %c0_i32, %arg1 : i32, i32, i32
  }
}

</mosaic_0001>

<bundles_post_ra>
// kernel: run.12
= control target key start
LH: loop header
LB: loop body
LE: loop exit
PB: predicated region body
PF: predicated region fallthrough
CT: control target
= control target key end

     0   :  { %s589_s12 = smov 0   ;;  %s591_s13 = smov 0   ;;  %s656_s0 = inlined_call_operand.vmem [shape: f32[2,64,64], index: 0, kind: input, shape index: {}]   ;;  %s657_s1 = inlined_call_operand.vmem [shape: bf16[64,64], index: 1, kind: input, shape index: {}]   ;;  %s658_s2 = inlined_call_operand.vmem [shape: f32[1,64], index: 2, kind: input, shape index: {}]   ;;  %s659_s3 = inlined_call_operand.vmem [shape: f32[2,64,64], index: 3, kind: output, shape index: {}]  }
   0x1   :  { %s593_s14 = smov 0  }
   0x2 LB: > { %s25_s15 = sadd.s32 1, %s563_s13  ;;  %p466_p0 = scmp.ge.s32.totalorder %s567_s14, 1  ;;  %s567_s14 = sphi %s593_s14, %s13_s14   ;;  %s563_s13 = sphi %s591_s13, %s661_s13   ;;  %s559_s12 = sphi %s589_s12, %s660_s12  }
   0x3   : > { %p27_p1 = scmp.ge.s32.totalorder %s25_s15, 2  ;;  %p156_p2 = scmp.lt.s32.totalorder %s567_s14, 3 }
   0x5   : > { %s663_s15 = smov (%p27_p1, %s25_s15), 0  ;;  %p157_p3 = pnand %p466_p0, %p156_p2 }
   0x6   : > { %p187_p4 = scmp.lt.s32.totalorder (!%p157_p3), %s559_s12, 1  ;;  %v541_v0 = vld [vmem:[%s657_s1] sm:$0xff] (!%p157_p3)   ;;  %v542_v3 = vld [vmem:[%s657_s1 + $0x8] sm:$0xff] (!%p157_p3)   ;;  %v543_v5 = vld [vmem:[%s657_s1 + $0x10] sm:$0xff] (!%p157_p3)   ;;  %vm289_vm0 = vcmask (!%p157_p3), 523264  }
   0x7   : > { %160 = sbr.rel (%p157_p3) target bundleno = 395 (0x18b), region = 32  ;;  %492 = vmatprep.subr.bf16.mxu0 (!%p157_p3), %v541_v0  ;;  %508 = vmatprep.subr.bf16.mxu1 (!%p157_p3), %v541_v0  ;;  %v544_v6 = vld [vmem:[%s657_s1 + $0x18] sm:$0xff] (!%p157_p3)   ;;  %v471_v24 = vld [vmem:[%s658_s2] ss:$0 sm:$0xff] (!%p157_p3) }
   0x8   : > { %493 = vmatpush3.bf16.msra.mxu0 (!%p157_p3), %v541_v0  ;;  %512 = vmatpush3.bf16.msra.mxu1 (!%p157_p3), %v541_v0 }
   0x9   : > { %494 = vmatprep.subr.bf16.mxu0 (!%p157_p3), %v542_v3  ;;  %509 = vmatprep.subr.bf16.mxu1 (!%p157_p3), %v542_v3 }
   0xc   : > { %495 = vmatpush3.bf16.msra.mxu0 (!%p157_p3), %v542_v3  ;;  %513 = vmatpush3.bf16.msra.mxu1 (!%p157_p3), %v542_v3 }
   0xd   : > { %496 = vmatprep.subr.bf16.mxu0 (!%p157_p3), %v543_v5  ;;  %510 = vmatprep.subr.bf16.mxu1 (!%p157_p3), %v543_v5 }
   0xe   : > { %s665_s12 = smov (!%p187_p4, %s559_s12), 1 }
   0xf   : > { %s482_s18 = sshll.u32 %s665_s12, 6 }
  0x10   : > { %s194_s21 = scalar_lea.vmem %s656_s0, %s482_s18  ;;  %497 = vmatpush3.bf16.msra.mxu0 %v543_v5  ;;  %514 = vmatpush3.bf16.msra.mxu1 %v543_v5  ;;  %s203_s5 = scalar_lea.vmem %s659_s3, %s482_s18 }
  0x11   : > { %v206_v1 = vld [vmem:[%s194_s21] sm:$0xff]  ;;  %v207_v2 = vld [vmem:[%s194_s21 + $0x8] sm:$0xff]  ;;  %v208_v4 = vld [vmem:[%s194_s21 + $0x10] sm:$0xff]  ;;  %498 = vmatprep.subr.bf16.mxu0 %v544_v6  ;;  %511 = vmatprep.subr.bf16.mxu1 %v544_v6 }
  0x12   : > { %214 = vxpose.xlu0.b32.start [1/8] (short) (narrow) %v206_v1, 64  ;;  %v209_v7 = vld [vmem:[%s194_s21 + $0x18] sm:$0xff]  ;;  %v210_v8 = vld [vmem:[%s194_s21 + $0x20] sm:$0xff]  ;;  %v211_v9 = vld [vmem:[%s194_s21 + $0x28] sm:$0xff] }
  0x13   : > { %v212_v10 = vld [vmem:[%s194_s21 + $0x30] sm:$0xff]  ;;  %v213_v11 = vld [vmem:[%s194_s21 + $0x38] sm:$0xff] }
  0x14   : > { %499 = vmatpush3.bf16.msra.mxu0 %v544_v6  ;;  %515 = vmatpush3.bf16.msra.mxu1 %v544_v6 }
  0x16   : > { %215 = vxpose.xlu0.b32.cont [2/8] (short) (narrow) %v207_v2, 64 }
  0x1a   : > { %216 = vxpose.xlu0.b32.cont [3/8] (short) (narrow) %v208_v4, 64 }
  0x1e   : > { %217 = vxpose.xlu0.b32.cont [4/8] (short) (narrow) %v209_v7, 64 }
  0x22   : > { %218 = vxpose.xlu0.b32.cont [5/8] (short) (narrow) %v210_v8, 64 }
  0x26   : > { %219 = vxpose.xlu0.b32.cont [6/8] (short) (narrow) %v211_v9, 64 }
  0x2a   : > { %220 = vxpose.xlu0.b32.cont [7/8] (short) (narrow) %v212_v10, 64 }
  0x2e   : > { %221 = vxpose.xlu0.b32.end [8/8] (short) (narrow) %v213_v11, 64 }
  0x92   : > { %v230_v12 = vpop.trf.xlu0 }
  0x96   : > { %v231_v13 = vpop.trf.xlu0 }
  0x97   : > { %v246_v14 = vpack.c.bf16 %v231_v13, %v230_v12 }
  0x99   : > { %500 = vmatprep.mubr.msk.bf16.mxu0 %vm289_vm0, %v246_v14 }
  0x9a   : > { %v232_v15 = vpop.trf.xlu0 }
  0x9e   : > { %v233_v16 = vpop.trf.xlu0 }
  0x9f   : > { %v247_v17 = vpack.c.bf16 %v233_v16, %v232_v15 }
  0xa1   : > { %501 = vmatmul.mubr.msk.bf16.vlgmr.msra.gmra.mrb[0].mxu0 %vm289_vm0, %v247_v17 }
  0xa2   : > { %v234_v18 = vpop.trf.xlu0 }
  0xa6   : > { %v235_v19 = vpop.trf.xlu0 }
  0xa7   : > { %v248_v20 = vpack.c.bf16 %v235_v19, %v234_v18 }
  0xa9   : > { %504 = vmatprep.mubr.msk.bf16.mxu1 %vm289_vm0, %v248_v20 }
  0xaa   : > { %v236_v21 = vpop.trf.xlu0 }
  0xae   : > { %v237_v22 = vpop.trf.xlu0 }
  0xaf   : > { %v249_v23 = vpack.c.bf16 %v237_v22, %v236_v21 }
  0xb1   : > { %505 = vmatmul.mubr.msk.bf16.vlgmr.msra.gmra.mrb[0].mxu1 %vm289_vm0, %v249_v23 }
 0x174   : > { %v502_v25 = vpop.f32.mrb[0].mxu0 }
 0x175   : > { %v345_v26 = vadd.f32 %v502_v25, %v471_v24  ;;  %v336_v27 = vpop.f32.mrb[1].mxu0 }
 0x176   : > { %v337_v28 = vadd.f32 %v471_v24, %v336_v27  ;;  %v503_v29 = vpop.f32.mrb[2].mxu0 }
 0x177   : > { %369 = vst.msk [vmem:[%s203_s5 + $0x10] sm:$0xff] %vm289_vm0, %v345_v26  ;;  %v348_v30 = vadd.f32 %v503_v29, %v471_v24  ;;  %v339_v31 = vpop.f32.mrb[3].mxu0 }
 0x178   : > { %367 = vst.msk [vmem:[%s203_s5] sm:$0xff] %vm289_vm0, %v337_v28  ;;  %v340_v32 = vadd.f32 %v471_v24, %v339_v31 }
 0x179   : > { %370 = vst.msk [vmem:[%s203_s5 + $0x18] sm:$0xff] %vm289_vm0, %v348_v30 }
 0x17a   : > { %368 = vst.msk [vmem:[%s203_s5 + $0x8] sm:$0xff] %vm289_vm0, %v340_v32 }
 0x184   : > { %v506_v33 = vpop.f32.mrb[0].mxu1 }
 0x185   : > { %v361_v34 = vadd.f32 %v506_v33, %v471_v24  ;;  %v352_v35 = vpop.f32.mrb[1].mxu1 }
 0x186   : > { %v353_v36 = vadd.f32 %v471_v24, %v352_v35  ;;  %v507_v37 = vpop.f32.mrb[2].mxu1 }
 0x187   : > { %373 = vst.msk [vmem:[%s203_s5 + $0x30] sm:$0xff] %vm289_vm0, %v361_v34  ;;  %v364_v38 = vadd.f32 %v507_v37, %v471_v24  ;;  %v355_v39 = vpop.f32.mrb[3].mxu1 }
 0x188   : > { %371 = vst.msk [vmem:[%s203_s5 + $0x20] sm:$0xff] %vm289_vm0, %v353_v36  ;;  %v356_v40 = vadd.f32 %v471_v24, %v355_v39 }
 0x189   : > { %374 = vst.msk [vmem:[%s203_s5 + $0x38] sm:$0xff] %vm289_vm0, %v364_v38 }
 0x18a   : > { %372 = vst.msk [vmem:[%s203_s5 + $0x28] sm:$0xff] %vm289_vm0, %v356_v40 }
 0x18b PF: > { %s13_s14 = sadd.s32 1, %s567_s14   ;;  %s660_s12 = smov %s563_s13 }
 0x18c   : > { %p10_p5 = scmp.ge.s32.totalorder %s13_s14, 4   ;;  %s661_s13 = smov %s663_s15 }
 0x18e   :  { %12 = sbr.rel (!%p10_p5) target bundleno = 2 (0x2), region = 62 }

// kernel: run.11
= control target key start
LH: loop header
LB: loop body
LE: loop exit
PB: predicated region body
PF: predicated region fallthrough
CT: control target
= control target key end

     0   :  { %s352_s12 = smov 0   ;;  %s400_s0 = inlined_call_operand.vmem [shape: f32[2,32,128], index: 0, kind: input, shape index: {}]   ;;  %s401_s1 = inlined_call_operand.vmem [shape: f32[32,128], index: 1, kind: input, shape index: {}]   ;;  %s402_s2 = inlined_call_operand.vmem [shape: f32[32,128], index: 2, kind: input, shape index: {}]   ;;  %s403_s3 = inlined_call_operand.vmem [shape: f32[2,32,128], index: 3, kind: output, shape index: {}]  }
   0x1 LB: > { %s295_s13 = sadd.s32 4294967295, %s330_s12   ;;  %p299_p0 = scmp.ge.s32.totalorder %s330_s12, 1  ;;  %s330_s12 = sphi %s352_s12, %s13_s12  }
   0x2   : > { %p137_p1 = scmp.lt.s32.totalorder %s330_s12, 3 }
   0x4   : > { %p138_p2 = pnand %p299_p0, %p137_p1 }
   0x5   : > { %p161_p3 = scmp.lt.s32.totalorder (!%p138_p2), %s295_s13, 1  ;;  %v220_v33 = vld [vmem:[%s401_s1] sm:$0xff] (!%p138_p2)  ;;  %v221_v38 = vld [vmem:[%s401_s1 + $0x8] sm:$0xff] (!%p138_p2)  ;;  %v222_v42 = vld [vmem:[%s401_s1 + $0x10] sm:$0xff] (!%p138_p2) }
   0x6   : > { %141 = sbr.rel (%p138_p2) target bundleno = 337 (0x151), region = 32  ;;  %v228_v35 = vld [vmem:[%s402_s2] sm:$0xff] (!%p138_p2)  ;;  %v229_v43 = vld [vmem:[%s402_s2 + $0x8] sm:$0xff] (!%p138_p2)  ;;  %v230_v46 = vld [vmem:[%s402_s2 + $0x10] sm:$0xff] (!%p138_p2) }
   0x7   : > { %v223_v49 = vld [vmem:[%s401_s1 + $0x18] sm:$0xff] (!%p138_p2) }
   0x8   : > { %v231_v53 = vld [vmem:[%s402_s2 + $0x18] sm:$0xff] (!%p138_p2) }
   0xd   : > { %s405_s13 = smov (!%p161_p3, %s295_s13), 1 }
   0xe   : > { %s306_s14 = sshll.u32 %s405_s13, 5 }
   0xf   : > { %s165_s17 = scalar_lea.vmem %s400_s0, %s306_s14  ;;  %s170_s24 = scalar_lea.vmem %s403_s3, %s306_s14 }
  0x10   : > { %v171_v0 = vld [vmem:[%s165_s17] sm:$0xff]  ;;  %v173_v1 = vld [vmem:[%s165_s17 + $0x10] sm:$0xff]  ;;  %v172_v2 = vld [vmem:[%s165_s17 + $0x8] sm:$0xff] }
  0x11   : > { %175 = vadd.xlane.f32.xlu0 %v171_v0  ;;  %179 = vadd.xlane.f32.xlu1 %v173_v1  ;;  %v174_v3 = vld [vmem:[%s165_s17 + $0x18] sm:$0xff] }
  0x15   : > { %177 = vadd.xlane.f32.xlu0 %v172_v2  ;;  %181 = vadd.xlane.f32.xlu1 %v174_v3 }
  0x9e   : > { %v176_v4 = vpop.xlane.xlu0 %175  ;;  %v180_v5 = vpop.xlane.xlu1 %179 }
  0x9f   : > { %v184_v6 = vmul.f32 0.0078125, %v176_v4  ;;  %v186_v7 = vmul.f32 0.0078125, %v180_v5 }
  0xa1   : > { %v188_v8 = vsub.f32 %v171_v0, %v184_v6  ;;  %v190_v9 = vsub.f32 %v173_v1, %v186_v7 }
  0xa2   : > { %v178_v10 = vpop.xlane.xlu0 %177  ;;  %v182_v11 = vpop.xlane.xlu1 %181 }
  0xa3   : > { %v185_v12 = vmul.f32 0.0078125, %v178_v10  ;;  %v192_v13 = vmul.f32 %v188_v8, %v188_v8  ;;  %v187_v14 = vmul.f32 0.0078125, %v182_v11  ;;  %v194_v17 = vmul.f32 %v190_v9, %v190_v9 }
  0xa5   : > { %v189_v15 = vsub.f32 %v172_v2, %v185_v12  ;;  %196 = vadd.xlane.f32.xlu0 %v192_v13  ;;  %v191_v16 = vsub.f32 %v174_v3, %v187_v14 }
  0xa7   : > { %v193_v18 = vmul.f32 %v189_v15, %v189_v15  ;;  %v195_v19 = vmul.f32 %v191_v16, %v191_v16 }
  0xa9   : > { %200 = vadd.xlane.f32.xlu0 %v194_v17  ;;  %198 = vadd.xlane.f32.xlu1 %v193_v18 }
  0xad   : > { %202 = vadd.xlane.f32.xlu1 %v195_v19 }
 0x132   : > { %v197_v20 = vpop.xlane.xlu0 %196 }
 0x133   : > { %v204_v21 = vmul.f32 0.0078125, %v197_v20 }
 0x135   : > { %v208_v22 = vadd.f32 1e-06, %v204_v21 }
 0x136   : > { %v199_v23 = vpop.xlane.xlu1 %198  ;;  %v201_v24 = vpop.xlane.xlu0 %200 }
 0x137   : > { %316 = vrsqrt.f32 %v208_v22  ;;  %v205_v25 = vmul.f32 0.0078125, %v199_v23  ;;  %v206_v26 = vmul.f32 0.0078125, %v201_v24 }
 0x139   : > { %v209_v27 = vadd.f32 1e-06, %v205_v25  ;;  %v210_v28 = vadd.f32 1e-06, %v206_v26 }
 0x13a   : > { %v203_v29 = vpop.xlane.xlu1 %202 }
 0x13b   : > { %318 = vrsqrt.f32 %v209_v27  ;;  %v207_v30 = vmul.f32 0.0078125, %v203_v29 }
 0x13c   : > { %320 = vrsqrt.f32 %v210_v28 }
 0x13d   : > { %v211_v31 = vadd.f32 1e-06, %v207_v30 }
 0x13f   : > { %322 = vrsqrt.f32 %v211_v31 }
 0x141   : > { %v317_v32 = vpop.eup %316 }
 0x142   : > { %v216_v34 = vmul.f32 %v317_v32, %v188_v8 }
 0x144   : > { %v224_v36 = vmul.f32 %v220_v33, %v216_v34 }
 0x145   : > { %v319_v37 = vpop.eup %318 }
 0x146   : > { %v321_v39 = vpop.eup %320  ;;  %v232_v40 = vadd.f32 %v228_v35, %v224_v36  ;;  %v217_v41 = vmul.f32 %v319_v37, %v189_v15 }
 0x147   : > { %v218_v44 = vmul.f32 %v321_v39, %v190_v9 }
 0x148   : > { %236 = vst [vmem:[%s170_s24] sm:$0xff] %v232_v40  ;;  %v225_v45 = vmul.f32 %v221_v38, %v217_v41 }
 0x149   : > { %v323_v47 = vpop.eup %322  ;;  %v226_v48 = vmul.f32 %v222_v42, %v218_v44 }
 0x14a   : > { %v233_v50 = vadd.f32 %v229_v43, %v225_v45  ;;  %v219_v51 = vmul.f32 %v323_v47, %v191_v16 }
 0x14b   : > { %v234_v52 = vadd.f32 %v230_v46, %v226_v48 }
 0x14c   : > { %237 = vst [vmem:[%s170_s24 + $0x8] sm:$0xff] %v233_v50  ;;  %v227_v54 = vmul.f32 %v223_v49, %v219_v51 }
 0x14d   : > { %238 = vst [vmem:[%s170_s24 + $0x10] sm:$0xff] %v234_v52 }
 0x14e   : > { %v235_v55 = vadd.f32 %v231_v53, %v227_v54 }
 0x150   : > { %239 = vst [vmem:[%s170_s24 + $0x18] sm:$0xff] %v235_v55 }
 0x151 PF: > { %s13_s12 = sadd.s32 1, %s330_s12  }
 0x152   : > { %p10_p4 = scmp.ge.s32.totalorder %s13_s12, 4  }
 0x154   :  { %12 = sbr.rel (!%p10_p4) target bundleno = 1 (0x1), region = 62 }

// kernel: run.14
= control target key start
LH: loop header
LB: loop body
LE: loop exit
PB: predicated region body
PF: predicated region fallthrough
CT: control target
= control target key end

     0   :  { %s1643_s9 = smov 0   ;;  %s1964_s0 = inlined_call_operand.vmem [shape: bf16[16,1536], index: 0, kind: input, shape index: {}]   ;;  %s1965_s1 = inlined_call_operand.vmem [shape: bf16[1536,128], index: 1, kind: input, shape index: {}]   ;;  %s1966_s2 = inlined_call_operand.vmem [shape: bf16[16,128], index: 2, kind: output, shape index: {}]  }
   0x1 LB: > { %s1254_s10 = sadd.s32 4294967295, %s1626_s9   ;;  %p1258_p0 = scmp.ge.s32.totalorder %s1626_s9, 1  ;;  %s1626_s9 = sphi %s1643_s9, %s12_s9  }
   0x2   : > { %p112_p1 = scmp.lt.s32.totalorder %s1626_s9, 3 }
   0x4   : > { %p113_p2 = pnand %p1258_p0, %p112_p1 }
   0x5   : > { %v1512_v0 = vld [vmem:[%s1965_s1 + $0x40] sm:$0xff] (!%p113_p2)   ;;  %v1516_v4 = vld [vmem:[%s1965_s1 + $0x48] sm:$0xff] (!%p113_p2)   ;;  %v1520_v8 = vld [vmem:[%s1965_s1 + $0x50] sm:$0xff] (!%p113_p2)   ;;  %p133_p3 = scmp.lt.s32.totalorder (!%p113_p2), %s1254_s10, 1 }
   0x6   : > { %116 = sbr.rel (%p113_p2) target bundleno = 325 (0x145), region = 28  ;;  %v1513_v1 = vld [vmem:[%s1965_s1 + $0xc0] sm:$0xff] (!%p113_p2)   ;;  %1371 = vmatprep.subr.bf16.mxu0 (!%p113_p2), %v1512_v0  ;;  %v1517_v5 = vld [vmem:[%s1965_s1 + $0xc8] sm:$0xff] (!%p113_p2)   ;;  %v1521_v9 = vld [vmem:[%s1965_s1 + $0xd0] sm:$0xff] (!%p113_p2)  }
   0x7   : > { %v1514_v2 = vld [vmem:[%s1965_s1] sm:$0xff] (!%p113_p2)   ;;  %1393 = vmatprep.subr.bf16.mxu1 (!%p113_p2), %v1513_v1  ;;  %v1518_v6 = vld [vmem:[%s1965_s1 + $0x8] sm:$0xff] (!%p113_p2)   ;;  %v1522_v10 = vld [vmem:[%s1965_s1 + $0x10] sm:$0xff] (!%p113_p2)  }
   0x8   : > { %v1515_v3 = vld [vmem:[%s1965_s1 + $0x80] sm:$0xff] (!%p113_p2)   ;;  %1372 = vmatpush3.bf16.msra.mxu0 (!%p113_p2), %v1514_v2  ;;  %v1519_v7 = vld [vmem:[%s1965_s1 + $0x88] sm:$0xff] (!%p113_p2)   ;;  %v1523_v11 = vld [vmem:[%s1965_s1 + $0x90] sm:$0xff] (!%p113_p2)  }
   0x9   : > { %1394 = vmatpush3.bf16.msra.mxu1 (!%p113_p2), %v1515_v3  ;;  %1373 = vmatprep.subr.bf16.mxu0 (!%p113_p2), %v1516_v4  ;;  %v1524_v12 = vld [vmem:[%s1965_s1 + $0x58] sm:$0xff] (!%p113_p2)   ;;  %v1528_v16 = vld [vmem:[%s1965_s1 + $0x60] sm:$0xff] (!%p113_p2)   ;;  %v1532_v20 = vld [vmem:[%s1965_s1 + $0x68] sm:$0xff] (!%p113_p2)  }
   0xa   : > { %1395 = vmatprep.subr.bf16.mxu1 (!%p113_p2), %v1517_v5  ;;  %v1525_v13 = vld [vmem:[%s1965_s1 + $0xd8] sm:$0xff] (!%p113_p2)   ;;  %v1529_v17 = vld [vmem:[%s1965_s1 + $0xe0] sm:$0xff] (!%p113_p2)   ;;  %v1533_v21 = vld [vmem:[%s1965_s1 + $0xe8] sm:$0xff] (!%p113_p2)  }
   0xb   : > { %v1526_v14 = vld [vmem:[%s1965_s1 + $0x18] sm:$0xff] (!%p113_p2)   ;;  %v1530_v18 = vld [vmem:[%s1965_s1 + $0x20] sm:$0xff] (!%p113_p2)   ;;  %v1534_v22 = vld [vmem:[%s1965_s1 + $0x28] sm:$0xff] (!%p113_p2)  }
   0xc   : > { %1374 = vmatpush3.bf16.msra.mxu0 (!%p113_p2), %v1518_v6  ;;  %v1527_v15 = vld [vmem:[%s1965_s1 + $0x98] sm:$0xff] (!%p113_p2)   ;;  %v1531_v19 = vld [vmem:[%s1965_s1 + $0xa0] sm:$0xff] (!%p113_p2)   ;;  %v1535_v23 = vld [vmem:[%s1965_s1 + $0xa8] sm:$0xff] (!%p113_p2)  }
   0xd   : > { %1396 = vmatpush3.bf16.msra.mxu1 %v1519_v7  ;;  %1375 = vmatprep.subr.bf16.mxu0 %v1520_v8  ;;  %s1968_s10 = smov (!%p133_p3, %s1254_s10), 1  ;;  %v1536_v24 = vld [vmem:[%s1965_s1 + $0x70] sm:$0xff]   ;;  %v1540_v28 = vld [vmem:[%s1965_s1 + $0x78] sm:$0xff]   ;;  %v1548_v38 = vld [vmem:[%s1965_s1 + $0x140] sm:$0xff]  }
   0xe   : > { %1397 = vmatprep.subr.bf16.mxu1 %v1521_v9  ;;  %v1537_v25 = vld [vmem:[%s1965_s1 + $0xf0] sm:$0xff]   ;;  %s1503_s11 = smul.u32 48, %s1968_s10  ;;  %v1541_v29 = vld [vmem:[%s1965_s1 + $0xf8] sm:$0xff]   ;;  %v1549_v39 = vld [vmem:[%s1965_s1 + $0x1c0] sm:$0xff]  }
   0xf   : > { %v1538_v26 = vld [vmem:[%s1965_s1 + $0x30] sm:$0xff]   ;;  %v1542_v30 = vld [vmem:[%s1965_s1 + $0x38] sm:$0xff]   ;;  %v1550_v40 = vld [vmem:[%s1965_s1 + $0x100] sm:$0xff]  }
  0x10   : > { %1376 = vmatpush3.bf16.msra.mxu0 %v1522_v10  ;;  %v1539_v27 = vld [vmem:[%s1965_s1 + $0xb0] sm:$0xff]   ;;  %s1751_s22 = scalar_lea.vmem %s1964_s0, %s1503_s11  ;;  %v1543_v31 = vld [vmem:[%s1965_s1 + $0xb8] sm:$0xff]   ;;  %v1551_v41 = vld [vmem:[%s1965_s1 + $0x180] sm:$0xff]  }
  0x11   : > { %1398 = vmatpush3.bf16.msra.mxu1 %v1523_v11  ;;  %1377 = vmatprep.subr.bf16.mxu0 %v1524_v12  ;;  %v143_v32 = vld [vmem:[%s1751_s22] sm:$0xff]  ;;  %v144_v33 = vld [vmem:[%s1751_s22 + $0x8] sm:$0xff]  ;;  %v1556_v46 = vld [vmem:[%s1965_s1 + $0x150] sm:$0xff]  }
  0x12   : > { %1399 = vmatprep.subr.bf16.mxu1 %v1525_v13  ;;  %v1261_v34 = vcombine.low %v143_v32, %v143_v32  ;;  %v1262_v35 = vcombine.high %v143_v32, %v143_v32  ;;  %v1263_v36 = vcombine.low %v144_v33, %v144_v33  ;;  %v1264_v37 = vcombine.high %v144_v33, %v144_v33  ;;  %v1552_v42 = vld [vmem:[%s1965_s1 + $0x148] sm:$0xff]   ;;  %v1557_v47 = vld [vmem:[%s1965_s1 + $0x1d0] sm:$0xff]   ;;  %v1560_v50 = vld [vmem:[%s1965_s1 + $0x158] sm:$0xff]  }
  0x13   : > { %v1553_v43 = vld [vmem:[%s1965_s1 + $0x1c8] sm:$0xff]   ;;  %v1558_v48 = vld [vmem:[%s1965_s1 + $0x110] sm:$0xff]   ;;  %v1561_v51 = vld [vmem:[%s1965_s1 + $0x1d8] sm:$0xff]  }
  0x14   : > { %1378 = vmatpush3.bf16.msra.mxu0 %v1526_v14  ;;  %991 = vmatprep.mubr.bf16.mxu0 %v1262_v35  ;;  %v1554_v44 = vld [vmem:[%s1965_s1 + $0x108] sm:$0xff]   ;;  %v1559_v49 = vld [vmem:[%s1965_s1 + $0x190] sm:$0xff]   ;;  %v1562_v52 = vld [vmem:[%s1965_s1 + $0x118] sm:$0xff]  }
  0x15   : > { %1400 = vmatpush3.bf16.msra.mxu1 %v1527_v15  ;;  %1379 = vmatprep.subr.bf16.mxu0 %v1528_v16  ;;  %v1555_v45 = vld [vmem:[%s1965_s1 + $0x188] sm:$0xff]   ;;  %v1563_v53 = vld [vmem:[%s1965_s1 + $0x198] sm:$0xff]   ;;  %v1564_v54 = vld [vmem:[%s1965_s1 + $0x160] sm:$0xff]  }
  0x16   : > { %1401 = vmatprep.subr.bf16.mxu1 %v1529_v17  ;;  %1031 = vmatprep.mubr.bf16.mxu1 %v1264_v37  ;;  %v1565_v55 = vld [vmem:[%s1965_s1 + $0x1e0] sm:$0xff]   ;;  %v1568_v58 = vld [vmem:[%s1965_s1 + $0x168] sm:$0xff]   ;;  %v1572_v62 = vld [vmem:[%s1965_s1 + $0x170] sm:$0xff]  }
  0x17   : > { %v1566_v56 = vld [vmem:[%s1965_s1 + $0x120] sm:$0xff]   ;;  %v1569_v59 = vld [vmem:[%s1965_s1 + $0x1e8] sm:$0xff]   ;;  %v1573_v63 = vld [vmem:[%s1965_s1 + $0x1f0] sm:$0xff]  }
  0x18   : > { %1380 = vmatpush3.bf16.msra.mxu0 %v1530_v18  ;;  %v1567_v57 = vld [vmem:[%s1965_s1 + $0x1a0] sm:$0xff]   ;;  %v1570_v60 = vld [vmem:[%s1965_s1 + $0x128] sm:$0xff]   ;;  %v1574_v0 = vld [vmem:[%s1965_s1 + $0x130] sm:$0xff]  }
  0x19   : > { %1402 = vmatpush3.bf16.msra.mxu1 %v1531_v19  ;;  %1381 = vmatprep.subr.bf16.mxu0 %v1532_v20  ;;  %v1571_v61 = vld [vmem:[%s1965_s1 + $0x1a8] sm:$0xff]   ;;  %v1575_v1 = vld [vmem:[%s1965_s1 + $0x1b0] sm:$0xff]   ;;  %v1576_v2 = vld [vmem:[%s1965_s1 + $0x178] sm:$0xff]  }
  0x1a   : > { %1403 = vmatprep.subr.bf16.mxu1 %v1533_v21  ;;  %v1577_v3 = vld [vmem:[%s1965_s1 + $0x1f8] sm:$0xff]   ;;  %v145_v6 = vld [vmem:[%s1751_s22 + $0x10] sm:$0xff]  ;;  %v1584_v12 = vld [vmem:[%s1965_s1 + $0x240] sm:$0xff]  }
  0x1b   : > { %v1578_v4 = vld [vmem:[%s1965_s1 + $0x138] sm:$0xff]   ;;  %v1265_v7 = vcombine.low %v145_v6, %v145_v6  ;;  %v1266_v8 = vcombine.high %v145_v6, %v145_v6  ;;  %v1585_v13 = vld [vmem:[%s1965_s1 + $0x2c0] sm:$0xff]   ;;  %v1588_v16 = vld [vmem:[%s1965_s1 + $0x248] sm:$0xff]  }
  0x1c   : > { %1382 = vmatpush3.bf16.msra.mxu0 %v1534_v22  ;;  %v1579_v5 = vld [vmem:[%s1965_s1 + $0x1b8] sm:$0xff]   ;;  %v1586_v14 = vld [vmem:[%s1965_s1 + $0x200] sm:$0xff]   ;;  %v1589_v17 = vld [vmem:[%s1965_s1 + $0x2c8] sm:$0xff]  }
  0x1d   : > { %1404 = vmatpush3.bf16.msra.mxu1 %v1535_v23  ;;  %1383 = vmatprep.subr.bf16.mxu0 %v1536_v24  ;;  %v146_v9 = vld [vmem:[%s1751_s22 + $0x18] sm:$0xff]  ;;  %v1587_v15 = vld [vmem:[%s1965_s1 + $0x280] sm:$0xff]   ;;  %v1590_v18 = vld [vmem:[%s1965_s1 + $0x208] sm:$0xff]  }
  0x1e   : > { %1405 = vmatprep.subr.bf16.mxu1 %v1537_v25  ;;  %v1267_v10 = vcombine.low %v146_v9, %v146_v9  ;;  %v1268_v11 = vcombine.high %v146_v9, %v146_v9  ;;  %v1591_v19 = vld [vmem:[%s1965_s1 + $0x288] sm:$0xff]   ;;  %v1592_v20 = vld [vmem:[%s1965_s1 + $0x250] sm:$0xff]   ;;  %v1596_v24 = vld [vmem:[%s1965_s1 + $0x258] sm:$0xff]  }
  0x1f   : > { %v1593_v21 = vld [vmem:[%s1965_s1 + $0x2d0] sm:$0xff]   ;;  %v1597_v25 = vld [vmem:[%s1965_s1 + $0x2d8] sm:$0xff]   ;;  %v1604_v32 = vld [vmem:[%s1965_s1 + $0x268] sm:$0xff]  }
  0x20   : > { %1384 = vmatpush3.bf16.msra.mxu0 %v1538_v26  ;;  %v1594_v22 = vld [vmem:[%s1965_s1 + $0x210] sm:$0xff]   ;;  %v1598_v26 = vld [vmem:[%s1965_s1 + $0x218] sm:$0xff]   ;;  %v1605_v33 = vld [vmem:[%s1965_s1 + $0x2e8] sm:$0xff]  }
  0x21   : > { %1406 = vmatpush3.bf16.msra.mxu1 %v1539_v27  ;;  %1385 = vmatprep.subr.bf16.mxu0 %v1540_v28  ;;  %v1595_v23 = vld [vmem:[%s1965_s1 + $0x290] sm:$0xff]   ;;  %v1599_v27 = vld [vmem:[%s1965_s1 + $0x298] sm:$0xff]   ;;  %v1600_v28 = vld [vmem:[%s1965_s1 + $0x260] sm:$0xff]  }
  0x22   : > { %1407 = vmatprep.subr.bf16.mxu1 %v1541_v29  ;;  %v1601_v29 = vld [vmem:[%s1965_s1 + $0x2e0] sm:$0xff]   ;;  %v1607_v35 = vld [vmem:[%s1965_s1 + $0x2a8] sm:$0xff]   ;;  %v1609_v37 = vld [vmem:[%s1965_s1 + $0x2f0] sm:$0xff]  }
  0x24   : > { %1386 = vmatpush3.bf16.msra.mxu0 %v1542_v30  ;;  %v1602_v30 = vld [vmem:[%s1965_s1 + $0x220] sm:$0xff]  }
  0x25   : > { %1408 = vmatpush3.bf16.msra.mxu1 %v1543_v31  ;;  %1415 = vmatprep.subr.bf16.mxu0 %v1548_v38  ;;  %v1603_v31 = vld [vmem:[%s1965_s1 + $0x2a0] sm:$0xff]   ;;  %v1610_v38 = vld [vmem:[%s1965_s1 + $0x230] sm:$0xff]  }
  0x26   : > { %1437 = vmatprep.subr.bf16.mxu1 %v1549_v39  ;;  %v1611_v39 = vld [vmem:[%s1965_s1 + $0x2b0] sm:$0xff]  }
  0x27   : > { %992 = vmatmul.mubr.bf16.vlgmr.msra.gmra.mrb[0].mxu0 %v1261_v34  ;;  %v1606_v34 = vld [vmem:[%s1965_s1 + $0x228] sm:$0xff]  }
  0x28   : > { %1032 = vmatmul.mubr.bf16.vlgmr.msra.gmra.mrb[0].mxu1 %v1263_v36  ;;  %1416 = vmatpush3.bf16.msra.mxu0 %v1550_v40  ;;  %v1608_v36 = vld [vmem:[%s1965_s1 + $0x270] sm:$0xff]   ;;  %v1612_v40 = vld [vmem:[%s1965_s1 + $0x278] sm:$0xff]  }
  0x29   : > { %1438 = vmatpush3.bf16.msra.mxu1 %v1551_v41  ;;  %1417 = vmatprep.subr.bf16.mxu0 %v1552_v42  ;;  %v1613_v41 = vld [vmem:[%s1965_s1 + $0x2f8] sm:$0xff]  }
  0x2a   : > { %1439 = vmatprep.subr.bf16.mxu1 %v1553_v43  ;;  %1071 = vmatprep.mubr.bf16.mxu0 %v1266_v8  ;;  %v1614_v42 = vld [vmem:[%s1965_s1 + $0x238] sm:$0xff]  }
  0x2b   : > { %1111 = vmatprep.mubr.bf16.mxu1 %v1268_v11  ;;  %v1615_v43 = vld [vmem:[%s1965_s1 + $0x2b8] sm:$0xff]  }
  0x2c   : > { %1418 = vmatpush3.bf16.msra.mxu0 %v1554_v44  ;;  %v147_v44 = vld [vmem:[%s1751_s22 + $0x20] sm:$0xff] }
  0x2d   : > { %1440 = vmatpush3.bf16.msra.mxu1 %v1555_v45  ;;  %1419 = vmatprep.subr.bf16.mxu0 %v1556_v46  ;;  %v148_v45 = vld [vmem:[%s1751_s22 + $0x28] sm:$0xff]  ;;  %v1269_v46 = vcombine.low %v147_v44, %v147_v44  ;;  %s1260_s22 = sshll.u32 %s1968_s10, 2 }
  0x2e   : > { %1441 = vmatprep.subr.bf16.mxu1 %v1557_v47  ;;  %v1270_v47 = vcombine.high %v147_v44, %v147_v44  ;;  %s141_s4 = scalar_lea.vmem %s1966_s2, %s1260_s22 }
  0x30   : > { %1420 = vmatpush3.bf16.msra.mxu0 %v1558_v48  ;;  %v1271_v48 = vcombine.low %v148_v45, %v148_v45 }
  0x31   : > { %1442 = vmatpush3.bf16.msra.mxu1 %v1559_v49  ;;  %1421 = vmatprep.subr.bf16.mxu0 %v1560_v50  ;;  %v1272_v49 = vcombine.high %v148_v45, %v148_v45 }
  0x32   : > { %1443 = vmatprep.subr.bf16.mxu1 %v1561_v51 }
  0x34   : > { %1422 = vmatpush3.bf16.msra.mxu0 %v1562_v52 }
  0x35   : > { %1444 = vmatpush3.bf16.msra.mxu1 %v1563_v53  ;;  %1423 = vmatprep.subr.bf16.mxu0 %v1564_v54 }
  0x36   : > { %1445 = vmatprep.subr.bf16.mxu1 %v1565_v55 }
  0x38   : > { %1424 = vmatpush3.bf16.msra.mxu0 %v1566_v56 }
  0x39   : > { %1446 = vmatpush3.bf16.msra.mxu1 %v1567_v57  ;;  %1425 = vmatprep.subr.bf16.mxu0 %v1568_v58 }
  0x3a   : > { %1447 = vmatprep.subr.bf16.mxu1 %v1569_v59 }
  0x3c   : > { %1426 = vmatpush3.bf16.msra.mxu0 %v1570_v60 }
  0x3d   : > { %1448 = vmatpush3.bf16.msra.mxu1 %v1571_v61  ;;  %1427 = vmatprep.subr.bf16.mxu0 %v1572_v62 }
  0x3e   : > { %1449 = vmatprep.subr.bf16.mxu1 %v1573_v63 }
  0x40   : > { %1428 = vmatpush3.bf16.msra.mxu0 %v1574_v0 }
  0x41   : > { %1450 = vmatpush3.bf16.msra.mxu1 %v1575_v1  ;;  %1429 = vmatprep.subr.bf16.mxu0 %v1576_v2 }
  0x42   : > { %1451 = vmatprep.subr.bf16.mxu1 %v1577_v3 }
  0x44   : > { %1430 = vmatpush3.bf16.msra.mxu0 %v1578_v4 }
  0x45   : > { %1452 = vmatpush3.bf16.msra.mxu1 %v1579_v5  ;;  %1459 = vmatprep.subr.bf16.mxu0 %v1584_v12 }
  0x46   : > { %1481 = vmatprep.subr.bf16.mxu1 %v1585_v13 }
  0x47   : > { %1072 = vmatmul.mubr.bf16.vlgmr.msra.gmra.mrb[4].mxu0 %v1265_v7 }
  0x48   : > { %1112 = vmatmul.mubr.bf16.vlgmr.msra.gmra.mrb[4].mxu1 %v1267_v10  ;;  %1460 = vmatpush3.bf16.msra.mxu0 %v1586_v14 }
  0x49   : > { %1482 = vmatpush3.bf16.msra.mxu1 %v1587_v15  ;;  %1461 = vmatprep.subr.bf16.mxu0 %v1588_v16 }
  0x4a   : > { %1483 = vmatprep.subr.bf16.mxu1 %v1589_v17  ;;  %1151 = vmatprep.mubr.bf16.mxu0 %v1270_v47 }
  0x4b   : > { %1191 = vmatprep.mubr.bf16.mxu1 %v1272_v49 }
  0x4c   : > { %1462 = vmatpush3.bf16.msra.mxu0 %v1590_v18 }
  0x4d   : > { %1484 = vmatpush3.bf16.msra.mxu1 %v1591_v19  ;;  %1463 = vmatprep.subr.bf16.mxu0 %v1592_v20 }
  0x4e   : > { %1485 = vmatprep.subr.bf16.mxu1 %v1593_v21 }
  0x50   : > { %1464 = vmatpush3.bf16.msra.mxu0 %v1594_v22 }
  0x51   : > { %1486 = vmatpush3.bf16.msra.mxu1 %v1595_v23  ;;  %1465 = vmatprep.subr.bf16.mxu0 %v1596_v24 }
  0x52   : > { %1487 = vmatprep.subr.bf16.mxu1 %v1597_v25 }
  0x54   : > { %1466 = vmatpush3.bf16.msra.mxu0 %v1598_v26 }
  0x55   : > { %1488 = vmatpush3.bf16.msra.mxu1 %v1599_v27  ;;  %1467 = vmatprep.subr.bf16.mxu0 %v1600_v28 }
  0x56   : > { %1489 = vmatprep.subr.bf16.mxu1 %v1601_v29 }
  0x58   : > { %1468 = vmatpush3.bf16.msra.mxu0 %v1602_v30 }
  0x59   : > { %1490 = vmatpush3.bf16.msra.mxu1 %v1603_v31  ;;  %1469 = vmatprep.subr.bf16.mxu0 %v1604_v32 }
  0x5a   : > { %1491 = vmatprep.subr.bf16.mxu1 %v1605_v33 }
  0x5c   : > { %1470 = vmatpush3.bf16.msra.mxu0 %v1606_v34 }
  0x5d   : > { %1492 = vmatpush3.bf16.msra.mxu1 %v1607_v35  ;;  %1471 = vmatprep.subr.bf16.mxu0 %v1608_v36 }
  0x5e   : > { %1493 = vmatprep.subr.bf16.mxu1 %v1609_v37 }
  0x60   : > { %1472 = vmatpush3.bf16.msra.mxu0 %v1610_v38 }
  0x61   : > { %1494 = vmatpush3.bf16.msra.mxu1 %v1611_v39  ;;  %1473 = vmatprep.subr.bf16.mxu0 %v1612_v40 }
  0x62   : > { %1495 = vmatprep.subr.bf16.mxu1 %v1613_v41 }
  0x64   : > { %1474 = vmatpush3.bf16.msra.mxu0 %v1614_v42 }
  0x65   : > { %1496 = vmatpush3.bf16.msra.mxu1 %v1615_v43 }
  0x67   : > { %1152 = vmatmul.mubr.bf16.vlgmr.msra.gmra.mrb[8].mxu0 %v1269_v46 }
  0x68   : > { %1192 = vmatmul.mubr.bf16.vlgmr.msra.gmra.mrb[8].mxu1 %v1271_v48 }
  0xfa   : > { %v1387_v50 = vpop.f32.mrb[0].mxu0 }
  0xfb   : > { %v1409_v51 = vpop.f32.mrb[0].mxu1  ;;  %v1388_v52 = vpop.f32.mrb[1].mxu0 }
  0xfc   : > { %v1410_v53 = vpop.f32.mrb[1].mxu1  ;;  %v1389_v54 = vadd.f32 %v1388_v52, %v1387_v50  ;;  %v1390_v56 = vpop.f32.mrb[2].mxu0 }
  0xfd   : > { %v1411_v55 = vadd.f32 %v1410_v53, %v1409_v51  ;;  %v1412_v57 = vpop.f32.mrb[2].mxu1  ;;  %v1391_v58 = vpop.f32.mrb[3].mxu0 }
  0xfe   : > { %v1413_v59 = vpop.f32.mrb[3].mxu1 }
  0xff   : > { %v1034_v60 = vadd.f32 %v1411_v55, %v1389_v54 }
 0x11a   : > { %v1431_v61 = vpop.f32.mrb[4].mxu0 }
 0x11b   : > { %v1453_v62 = vpop.f32.mrb[4].mxu1  ;;  %v1432_v63 = vpop.f32.mrb[5].mxu0 }
 0x11c   : > { %v1454_v0 = vpop.f32.mrb[5].mxu1  ;;  %v1433_v1 = vadd.f32 %v1432_v63, %v1431_v61  ;;  %v1434_v3 = vpop.f32.mrb[6].mxu0 }
 0x11d   : > { %v1455_v2 = vadd.f32 %v1454_v0, %v1453_v62  ;;  %v1456_v4 = vpop.f32.mrb[6].mxu1  ;;  %v1435_v5 = vpop.f32.mrb[7].mxu0 }
 0x11e   : > { %v1457_v6 = vpop.f32.mrb[7].mxu1  ;;  %v1074_v7 = vadd.f32 %v1433_v1, %v1034_v60 }
 0x120   : > { %v1114_v8 = vadd.f32 %v1455_v2, %v1074_v7 }
 0x13a   : > { %v1475_v9 = vpop.f32.mrb[8].mxu0 }
 0x13b   : > { %v1497_v10 = vpop.f32.mrb[8].mxu1  ;;  %v1476_v11 = vpop.f32.mrb[9].mxu0 }
 0x13c   : > { %v1477_v12 = vadd.f32 %v1476_v11, %v1475_v9  ;;  %v1498_v13 = vpop.f32.mrb[9].mxu1  ;;  %v1478_v14 = vpop.f32.mrb[10].mxu0 }
 0x13d   : > { %v1499_v15 = vadd.f32 %v1498_v13, %v1497_v10  ;;  %v1500_v16 = vpop.f32.mrb[10].mxu1  ;;  %v1479_v17 = vpop.f32.mrb[11].mxu0 }
 0x13e   : > { %v1154_v18 = vadd.f32 %v1477_v12, %v1114_v8  ;;  %v1501_v19 = vpop.f32.mrb[11].mxu1 }
 0x140   : > { %v1194_v20 = vadd.f32 %v1499_v15, %v1154_v18 }
 0x142   : > { %v1199_v21 = vpack.c.bf16 %v1194_v20, %v1194_v20 }
 0x144   : > { %1200 = vst [vmem:[%s141_s4] sm:$0xf] %v1199_v21 }
 0x145 PF: > { %s12_s9 = sadd.s32 1, %s1626_s9  }
 0x146   : > { %p9_p4 = scmp.ge.s32.totalorder %s12_s9, 4  }
 0x148   :  { %11 = sbr.rel (!%p9_p4) target bundleno = 1 (0x1), region = 58 }

// kernel: run.13
= control target key start
LH: loop header
LB: loop body
LE: loop exit
PB: predicated region body
PF: predicated region fallthrough
CT: control target
= control target key end

     0   :  { %s3063_s27 = smov 0   ;;  %s3065_s28 = smov 0   ;;  %s3793_s0 = inlined_call_operand.vmem [shape: f32[2,64,64], index: 0, kind: input, shape index: {}, may-alias: {0,1}]   ;;  %s3794_s1 = inlined_call_operand.vmem [shape: f32[2,64,64], index: 1, kind: input, shape index: {}, may-alias: {0,1}]   ;;  %s3795_s2 = inlined_call_operand.vmem [shape: f32[1,64], index: 2, kind: input, shape index: {}]   ;;  %s3796_s3 = inlined_call_operand.vmem [shape: f32[1,64], index: 3, kind: input, shape index: {}]   ;;  %s3797_s4 = inlined_call_operand.vmem [shape: bf16[64,64], index: 4, kind: input, shape index: {}]   ;;  %s3798_s5 = inlined_call_operand.vmem [shape: bf16[64,128], index: 5, kind: input, shape index: {}]   ;;  %s3799_s6 = inlined_call_operand.vmem [shape: bf16[64,64], index: 6, kind: input, shape index: {}]   ;;  %s3800_s7 = inlined_call_operand.vmem [shape: f32[1,64], index: 7, kind: input, shape index: {}]   ;;  %s3801_s8 = inlined_call_operand.vmem [shape: f32[2,64,64], index: 8, kind: output, shape index: {}]  }
   0x1   :  { %s3067_s29 = smov 0  }
   0x2 LB: > { %s30_s30 = sadd.s32 1, %s3005_s28  ;;  %p2415_p0 = scmp.ge.s32.totalorder %s3009_s29, 1  ;;  %s3009_s29 = sphi %s3067_s29, %s18_s29   ;;  %s3005_s28 = sphi %s3065_s28, %s3803_s28   ;;  %s3001_s27 = sphi %s3063_s27, %s3802_s27  }
   0x3   : > { %p32_p1 = scmp.ge.s32.totalorder %s30_s30, 2  ;;  %p293_p2 = scmp.lt.s32.totalorder %s3009_s29, 3 }
   0x5   : > { %s3805_s30 = smov (%p32_p1, %s30_s30), 0  ;;  %p294_p3 = pnand %p2415_p0, %p293_p2 }
   0x6   : > { %p340_p4 = scmp.lt.s32.totalorder (!%p294_p3), %s3001_s27, 1  ;;  %vm380_vm0 = vcmask (!%p294_p3), 523264   ;;  %vm900_vm1 = vcmask (!%p294_p3), 130048   ;;  %s3011_s19 = smov (!%p294_p3), 64   ;;  %vm1505_vm2 = vcmask (!%p294_p3), 261248   ;;  %vm1832_vm3 = vcmask (!%p294_p3), 392448  }
   0x7   : > { %297 = sbr.rel (%p294_p3) target bundleno = 3587 (0xe03), region = 52  ;;  %s3012_s20 = smov (!%p294_p3), 112   ;;  %vm2159_vm4 = vcmask (!%p294_p3), 523648  }
   0x8   : > { %s3013_s21 = smov (!%p294_p3), 48   ;;  %s3014_s22 = smov (!%p294_p3), 96  }
   0x9   : > { %s3015_s23 = smov (!%p294_p3), 32   ;;  %s3016_s24 = smov (!%p294_p3), 80  }
   0xa   : > { %s3017_s25 = smov (!%p294_p3), 16  }
   0xe   : > { %s3807_s27 = smov (!%p340_p4, %s3001_s27), 1 }
   0xf   : > { %s3081_s9 = sshll.u32 %s3807_s27, 6 }
  0x10   : > { %s344_s12 = scalar_lea.vmem %s3793_s0, %s3081_s9  ;;  %s3104_s15 = scalar_lea.vmem %s3794_s1, %s3081_s9 }
  0x11   : > { %v370_v0 = vld [vmem:[%s344_s12] sm:$0xff]  ;;  %v372_v1 = vld [vmem:[%s344_s12 + $0x10] sm:$0xff]  ;;  %v371_v2 = vld [vmem:[%s344_s12 + $0x8] sm:$0xff] }
  0x12   : > { %v381_v3 = vsel %vm380_vm0, %v370_v0, 0.0  ;;  %v387_v4 = vsel %vm380_vm0, %v372_v1, 0.0  ;;  %v373_v5 = vld [vmem:[%s344_s12 + $0x18] sm:$0xff]  ;;  %v3089_v6 = vld [vmem:[%s344_s12 + $0x20] sm:$0xff]  ;;  %v384_v7 = vsel %vm380_vm0, %v371_v2, 0.0  ;;  %v375_v9 = vld [vmem:[%s344_s12 + $0x28] sm:$0xff] }
  0x13   : > { %382 = vadd.xlane.f32.xlu0 %v381_v3  ;;  %388 = vadd.xlane.f32.xlu1 %v387_v4  ;;  %v390_v8 = vsel %vm380_vm0, %v373_v5, 0.0  ;;  %v393_v10 = vsel %vm380_vm0, %v3089_v6, 0.0  ;;  %v396_v11 = vsel %vm380_vm0, %v375_v9, 0.0  ;;  %v3096_v12 = vld [vmem:[%s344_s12 + $0x30] sm:$0xff]  ;;  %v3098_v13 = vld [vmem:[%s344_s12 + $0x38] sm:$0xff]  ;;  %v3111_v16 = vld [vmem:[%s3104_s15] sm:$0xff] }
  0x14   : > { %v399_v14 = vsel %vm380_vm0, %v3096_v12, 0.0  ;;  %v402_v15 = vsel %vm380_vm0, %v3098_v13, 0.0  ;;  %v3114_v17 = vld [vmem:[%s3104_s15 + $0x8] sm:$0xff]  ;;  %v646_v18 = vsel %vm380_vm0, %v3111_v16, 0.0  ;;  %v3121_v20 = vld [vmem:[%s3104_s15 + $0x10] sm:$0xff]  ;;  %v3124_v21 = vld [vmem:[%s3104_s15 + $0x18] sm:$0xff] }
  0x15   : > { %v649_v19 = vsel %vm380_vm0, %v3114_v17, 0.0  ;;  %v652_v22 = vsel %vm380_vm0, %v3121_v20, 0.0  ;;  %v655_v23 = vsel %vm380_vm0, %v3124_v21, 0.0  ;;  %v3131_v24 = vld [vmem:[%s3104_s15 + $0x20] sm:$0xff]  ;;  %v3134_v25 = vld [vmem:[%s3104_s15 + $0x28] sm:$0xff]  ;;  %v3141_v28 = vld [vmem:[%s3104_s15 + $0x30] sm:$0xff] }
  0x16   : > { %v658_v26 = vsel %vm380_vm0, %v3131_v24, 0.0  ;;  %v661_v27 = vsel %vm380_vm0, %v3134_v25, 0.0  ;;  %v3144_v29 = vld [vmem:[%s3104_s15 + $0x38] sm:$0xff]  ;;  %v664_v30 = vsel %vm380_vm0, %v3141_v28, 0.0 }
  0x17   : > { %385 = vadd.xlane.f32.xlu0 %v384_v7  ;;  %391 = vadd.xlane.f32.xlu1 %v390_v8  ;;  %v667_v31 = vsel %vm380_vm0, %v3144_v29, 0.0 }
  0x1b   : > { %394 = vadd.xlane.f32.xlu0 %v393_v10  ;;  %397 = vadd.xlane.f32.xlu1 %v396_v11 }
  0x1f   : > { %400 = vadd.xlane.f32.xlu0 %v399_v14  ;;  %403 = vadd.xlane.f32.xlu1 %v402_v15 }
  0x23   : > { %647 = vadd.xlane.f32.xlu0 %v646_v18  ;;  %650 = vadd.xlane.f32.xlu1 %v649_v19 }
  0x27   : > { %653 = vadd.xlane.f32.xlu0 %v652_v22  ;;  %656 = vadd.xlane.f32.xlu1 %v655_v23 }
  0x2b   : > { %659 = vadd.xlane.f32.xlu0 %v658_v26  ;;  %662 = vadd.xlane.f32.xlu1 %v661_v27 }
  0x2f   : > { %665 = vadd.xlane.f32.xlu0 %v664_v30  ;;  %668 = vadd.xlane.f32.xlu1 %v667_v31 }
  0xa0   : > { %v383_v32 = vpop.xlane.xlu0 %382  ;;  %v389_v33 = vpop.xlane.xlu1 %388 }
  0xa1   : > { %v406_v34 = vmul.f32 0.015625, %v383_v32  ;;  %v408_v35 = vmul.f32 0.015625, %v389_v33 }
  0xa3   : > { %v3150_v36 = vsub.f32 %v370_v0, %v406_v34  ;;  %v3152_v37 = vsub.f32 %v372_v1, %v408_v35 }
  0xa4   : > { %v386_v38 = vpop.xlane.xlu0 %385  ;;  %v392_v39 = vpop.xlane.xlu1 %391 }
  0xa5   : > { %v407_v40 = vmul.f32 0.015625, %v386_v38  ;;  %v409_v41 = vmul.f32 0.015625, %v392_v39  ;;  %v422_v42 = vmul.f32 %v3150_v36, %v3150_v36  ;;  %v424_v43 = vmul.f32 %v3152_v37, %v3152_v37 }
  0xa7   : > { %v3158_v44 = vsub.f32 %v371_v2, %v407_v40  ;;  %v3160_v45 = vsub.f32 %v373_v5, %v409_v41  ;;  %v430_v46 = vsel %vm380_vm0, %v422_v42, 0.0  ;;  %v436_v49 = vsel %vm380_vm0, %v424_v43, 0.0 }
  0xa8   : > { %431 = vadd.xlane.f32.xlu0 %v430_v46  ;;  %v395_v47 = vpop.xlane.xlu0 %394  ;;  %v398_v48 = vpop.xlane.xlu1 %397 }
  0xa9   : > { %v410_v50 = vmul.f32 0.015625, %v395_v47  ;;  %v411_v51 = vmul.f32 0.015625, %v398_v48  ;;  %v423_v52 = vmul.f32 %v3158_v44, %v3158_v44  ;;  %v425_v53 = vmul.f32 %v3160_v45, %v3160_v45 }
  0xab   : > { %v3169_v54 = vsub.f32 %v3089_v6, %v410_v50  ;;  %v3171_v55 = vsub.f32 %v375_v9, %v411_v51  ;;  %v433_v56 = vsel %vm380_vm0, %v423_v52, 0.0  ;;  %v439_v59 = vsel %vm380_vm0, %v425_v53, 0.0  ;;  %v2808_v53 = vld [vmem:[%s3798_s5 + $0x8] sm:$0xff]  }
  0xac   : > { %437 = vadd.xlane.f32.xlu0 %v436_v49  ;;  %434 = vadd.xlane.f32.xlu1 %v433_v56  ;;  %v401_v57 = vpop.xlane.xlu0 %400  ;;  %v404_v58 = vpop.xlane.xlu1 %403  ;;  %v2809_v56 = vld [vmem:[%s3798_s5 + $0x10] sm:$0xff]  }
  0xad   : > { %v412_v60 = vmul.f32 0.015625, %v401_v57  ;;  %v413_v61 = vmul.f32 0.015625, %v404_v58  ;;  %v426_v62 = vmul.f32 %v3169_v54, %v3169_v54  ;;  %v427_v63 = vmul.f32 %v3171_v55, %v3171_v55  ;;  %v2810_v57 = vld [vmem:[%s3798_s5 + $0x18] sm:$0xff]   ;;  %v2811_v58 = vld [vmem:[%s3797_s4] sm:$0xff]  }
  0xae   : > { %2592 = vmatprep.subr.bf16.mxu1 %v2811_v58 }
  0xaf   : > { %v3180_v0 = vsub.f32 %v3096_v12, %v412_v60  ;;  %v3183_v1 = vsub.f32 %v3098_v13, %v413_v61  ;;  %v442_v2 = vsel %vm380_vm0, %v426_v62, 0.0  ;;  %v445_v5 = vsel %vm380_vm0, %v427_v63, 0.0  ;;  %2593 = vmatpush3.bf16.msra.mxu1 %v2811_v58  ;;  %v2813_v60 = vld [vmem:[%s3797_s4 + $0x10] sm:$0xff]   ;;  %v2814_v61 = vld [vmem:[%s3797_s4 + $0x18] sm:$0xff]  }
  0xb0   : > { %440 = vadd.xlane.f32.xlu1 %v439_v59  ;;  %443 = vadd.xlane.f32.xlu0 %v442_v2  ;;  %v648_v3 = vpop.xlane.xlu0 %647  ;;  %v651_v4 = vpop.xlane.xlu1 %650  ;;  %v2812_v59 = vld [vmem:[%s3797_s4 + $0x8] sm:$0xff]  }
  0xb1   : > { %v671_v6 = vmul.f32 0.015625, %v648_v3  ;;  %v672_v7 = vmul.f32 0.015625, %v651_v4  ;;  %v428_v8 = vmul.f32 %v3180_v0, %v3180_v0  ;;  %v429_v9 = vmul.f32 %v3183_v1, %v3183_v1  ;;  %2594 = vmatprep.subr.bf16.mxu1 %v2812_v59 }
  0xb3   : > { %v3192_v10 = vsub.f32 %v3111_v16, %v671_v6  ;;  %v3195_v11 = vsub.f32 %v3114_v17, %v672_v7  ;;  %v448_v12 = vsel %vm380_vm0, %v428_v8, 0.0  ;;  %v451_v15 = vsel %vm380_vm0, %v429_v9, 0.0  ;;  %2595 = vmatpush3.bf16.msra.mxu1 %v2812_v59 }
  0xb4   : > { %446 = vadd.xlane.f32.xlu1 %v445_v5  ;;  %449 = vadd.xlane.f32.xlu0 %v448_v12  ;;  %v654_v13 = vpop.xlane.xlu0 %653  ;;  %v657_v14 = vpop.xlane.xlu1 %656 }
  0xb5   : > { %v673_v18 = vmul.f32 0.015625, %v654_v13  ;;  %v674_v19 = vmul.f32 0.015625, %v657_v14  ;;  %v687_v22 = vmul.f32 %v3192_v10, %v3192_v10  ;;  %v688_v16 = vmul.f32 %v3195_v11, %v3195_v11  ;;  %2596 = vmatprep.subr.bf16.mxu1 %v2813_v60 }
  0xb7   : > { %v3204_v23 = vsub.f32 %v3121_v20, %v673_v18  ;;  %v3207_v17 = vsub.f32 %v3124_v21, %v674_v19  ;;  %v695_v26 = vsel %vm380_vm0, %v687_v22, 0.0  ;;  %v698_v31 = vsel %vm380_vm0, %v688_v16, 0.0  ;;  %2597 = vmatpush3.bf16.msra.mxu1 %v2813_v60 }
  0xb8   : > { %452 = vadd.xlane.f32.xlu1 %v451_v15  ;;  %696 = vadd.xlane.f32.xlu0 %v695_v26  ;;  %v660_v27 = vpop.xlane.xlu0 %659  ;;  %v663_v30 = vpop.xlane.xlu1 %662 }
  0xb9   : > { %v675_v32 = vmul.f32 0.015625, %v660_v27  ;;  %v676_v33 = vmul.f32 0.015625, %v663_v30  ;;  %v689_v34 = vmul.f32 %v3204_v23, %v3204_v23  ;;  %v690_v20 = vmul.f32 %v3207_v17, %v3207_v17  ;;  %2598 = vmatprep.subr.bf16.mxu1 %v2814_v61 }
  0xbb   : > { %v3216_v35 = vsub.f32 %v3131_v24, %v675_v32  ;;  %v3219_v21 = vsub.f32 %v3134_v25, %v676_v33  ;;  %v701_v38 = vsel %vm380_vm0, %v689_v34, 0.0  ;;  %v704_v41 = vsel %vm380_vm0, %v690_v20, 0.0  ;;  %2599 = vmatpush3.bf16.msra.mxu1 %v2814_v61 }
  0xbc   : > { %699 = vadd.xlane.f32.xlu1 %v698_v31  ;;  %702 = vadd.xlane.f32.xlu0 %v701_v38  ;;  %v666_v39 = vpop.xlane.xlu0 %665  ;;  %v669_v40 = vpop.xlane.xlu1 %668 }
  0xbd   : > { %v677_v42 = vmul.f32 0.015625, %v666_v39  ;;  %v678_v43 = vmul.f32 0.015625, %v669_v40  ;;  %v691_v46 = vmul.f32 %v3216_v35, %v3216_v35  ;;  %v692_v24 = vmul.f32 %v3219_v21, %v3219_v21  ;;  %v3269_v39 = vld [vmem:[%s3795_s2] ss:$0 sm:$0xff] }
  0xbf   : > { %v3228_v47 = vsub.f32 %v3141_v28, %v677_v42  ;;  %v3231_v25 = vsub.f32 %v3144_v29, %v678_v43  ;;  %v707_v48 = vsel %vm380_vm0, %v691_v46, 0.0  ;;  %v710_v49 = vsel %vm380_vm0, %v692_v24, 0.0  ;;  %v2807_v28 = vld [vmem:[%s3798_s5] sm:$0xff]  }
  0xc0   : > { %705 = vadd.xlane.f32.xlu1 %v704_v41  ;;  %708 = vadd.xlane.f32.xlu0 %v707_v48 }
  0xc1   : > { %v693_v50 = vmul.f32 %v3228_v47, %v3228_v47  ;;  %v694_v51 = vmul.f32 %v3231_v25, %v3231_v25  ;;  %2576 = vmatprep.subr.bf16.mxu0 %v2807_v28 }
  0xc2   : > { %2577 = vmatpush3.bf16.msra.mxu0 %v2807_v28 }
  0xc3   : > { %v713_v52 = vsel %vm380_vm0, %v693_v50, 0.0  ;;  %v716_v29 = vsel %vm380_vm0, %v694_v51, 0.0  ;;  %2578 = vmatprep.subr.bf16.mxu0 %v2808_v53  ;;  %v3276_v51 = vld [vmem:[%s3796_s3] ss:$0 sm:$0xff] }
  0xc4   : > { %711 = vadd.xlane.f32.xlu1 %v710_v49  ;;  %714 = vadd.xlane.f32.xlu0 %v713_v52 }
  0xc6   : > { %2579 = vmatpush3.bf16.msra.mxu0 %v2808_v53 }
  0xc7   : > { %2580 = vmatprep.subr.bf16.mxu0 %v2809_v56 }
  0xc8   : > { %717 = vadd.xlane.f32.xlu1 %v716_v29 }
  0xca   : > { %2581 = vmatpush3.bf16.msra.mxu0 %v2809_v56 }
  0xcb   : > { %2582 = vmatprep.subr.bf16.mxu0 %v2810_v57 }
  0xce   : > { %2583 = vmatpush3.bf16.msra.mxu0 %v2810_v57 }
 0x135   : > { %v432_v62 = vpop.xlane.xlu0 %431 }
 0x136   : > { %v454_v63 = vmul.f32 0.015625, %v432_v62 }
 0x138   : > { %v462_v2 = vadd.f32 1e-05, %v454_v63 }
 0x139   : > { %v435_v3 = vpop.xlane.xlu1 %434  ;;  %v438_v4 = vpop.xlane.xlu0 %437 }
 0x13a   : > { %2819 = vrsqrt.f32 %v462_v2  ;;  %v455_v5 = vmul.f32 0.015625, %v435_v3  ;;  %v456_v6 = vmul.f32 0.015625, %v438_v4 }
 0x13c   : > { %v463_v7 = vadd.f32 1e-05, %v455_v5  ;;  %v464_v8 = vadd.f32 1e-05, %v456_v6 }
 0x13d   : > { %v441_v9 = vpop.xlane.xlu1 %440  ;;  %v444_v12 = vpop.xlane.xlu0 %443 }
 0x13e   : > { %2821 = vrsqrt.f32 %v463_v7  ;;  %v457_v13 = vmul.f32 0.015625, %v441_v9  ;;  %v458_v14 = vmul.f32 0.015625, %v444_v12 }
 0x13f   : > { %2823 = vrsqrt.f32 %v464_v8 }
 0x140   : > { %v465_v15 = vadd.f32 1e-05, %v457_v13  ;;  %v466_v18 = vadd.f32 1e-05, %v458_v14 }
 0x141   : > { %v447_v19 = vpop.xlane.xlu1 %446  ;;  %v450_v22 = vpop.xlane.xlu0 %449 }
 0x142   : > { %2825 = vrsqrt.f32 %v465_v15  ;;  %v459_v16 = vmul.f32 0.015625, %v447_v19  ;;  %v460_v26 = vmul.f32 0.015625, %v450_v22 }
 0x143   : > { %2827 = vrsqrt.f32 %v466_v18 }
 0x144   : > { %v2820_v27 = vpop.eup %2819  ;;  %v467_v30 = vadd.f32 1e-05, %v459_v16  ;;  %v468_v31 = vadd.f32 1e-05, %v460_v26 }
 0x145   : > { %v453_v32 = vpop.xlane.xlu1 %452  ;;  %v697_v33 = vpop.xlane.xlu0 %696  ;;  %v478_v34 = vmul.f32 %v2820_v27, %v3150_v36 }
 0x146   : > { %2829 = vrsqrt.f32 %v467_v30  ;;  %v461_v20 = vmul.f32 0.015625, %v453_v32  ;;  %v719_v38 = vmul.f32 0.015625, %v697_v33 }
 0x147   : > { %2831 = vrsqrt.f32 %v468_v31  ;;  %v492_v49 = vmul.f32 %v3269_v39, %v478_v34 }
 0x148   : > { %v2822_v40 = vpop.eup %2821  ;;  %v469_v41 = vadd.f32 1e-05, %v461_v20  ;;  %v727_v42 = vadd.f32 1e-05, %v719_v38 }
 0x149   : > { %v2824_v43 = vpop.eup %2823  ;;  %v700_v46 = vpop.xlane.xlu1 %699  ;;  %v479_v48 = vmul.f32 %v2822_v40, %v3158_v44  ;;  %v506_v59 = vadd.f32 %v3276_v51, %v492_v49 }
 0x14a   : > { %v703_v24 = vpop.xlane.xlu0 %702  ;;  %2833 = vrsqrt.f32 %v469_v41  ;;  %v720_v36 = vmul.f32 0.015625, %v700_v46  ;;  %v480_v52 = vmul.f32 %v2824_v43, %v3152_v37 }
 0x14b   : > { %v721_v50 = vmul.f32 0.015625, %v703_v24  ;;  %2835 = vrsqrt.f32 %v727_v42  ;;  %v493_v28 = vmul.f32 %v3269_v39, %v479_v48 }
 0x14c   : > { %v2826_v29 = vpop.eup %2825  ;;  %v728_v53 = vadd.f32 1e-05, %v720_v36  ;;  %v494_v62 = vmul.f32 %v3269_v39, %v480_v52 }
 0x14d   : > { %v729_v56 = vadd.f32 1e-05, %v721_v50  ;;  %v2828_v57 = vpop.eup %2827  ;;  %v706_v44 = vpop.xlane.xlu1 %705  ;;  %v507_v60 = vadd.f32 %v3276_v51, %v493_v28  ;;  %v481_v61 = vmul.f32 %v2826_v29, %v3160_v45 }
 0x14e   : > { %v709_v58 = vpop.xlane.xlu0 %708  ;;  %2837 = vrsqrt.f32 %v728_v53  ;;  %v722_v63 = vmul.f32 0.015625, %v706_v44  ;;  %v482_v4 = vmul.f32 %v2828_v57, %v3169_v54  ;;  %v508_v45 = vadd.f32 %v3276_v51, %v494_v62 }
 0x14f   : > { %v723_v37 = vmul.f32 0.015625, %v709_v58  ;;  %2839 = vrsqrt.f32 %v729_v56  ;;  %v514_v2 = vpack.c.bf16 %v507_v60, %v506_v59  ;;  %v495_v3 = vmul.f32 %v3269_v39, %v481_v61 }
 0x150   : > { %v2830_v5 = vpop.eup %2829  ;;  %v730_v6 = vadd.f32 1e-05, %v722_v63  ;;  %v496_v15 = vmul.f32 %v3269_v39, %v482_v4 }
 0x151   : > { %v731_v7 = vadd.f32 1e-05, %v723_v37  ;;  %v2832_v8 = vpop.eup %2831  ;;  %v712_v9 = vpop.xlane.xlu1 %711  ;;  %2584 = vmatprep.mubr.msk.bf16.mxu0 %vm380_vm0, %v514_v2  ;;  %v509_v13 = vadd.f32 %v3276_v51, %v495_v3  ;;  %v483_v14 = vmul.f32 %v2830_v5, %v3171_v55 }
 0x152   : > { %v715_v12 = vpop.xlane.xlu0 %714  ;;  %2841 = vrsqrt.f32 %v730_v6  ;;  %v724_v18 = vmul.f32 0.015625, %v712_v9  ;;  %v484_v54 = vmul.f32 %v2832_v8, %v3180_v0  ;;  %v510_v55 = vadd.f32 %v3276_v51, %v496_v15 }
 0x153   : > { %v725_v19 = vmul.f32 0.015625, %v715_v12  ;;  %2843 = vrsqrt.f32 %v731_v7  ;;  %v515_v22 = vpack.c.bf16 %v509_v13, %v508_v45  ;;  %v497_v16 = vmul.f32 %v3269_v39, %v483_v14 }
 0x154   : > { %v2834_v26 = vpop.eup %2833  ;;  %v732_v27 = vadd.f32 1e-05, %v724_v18  ;;  %v498_v20 = vmul.f32 %v3269_v39, %v484_v54 }
 0x155   : > { %v733_v30 = vadd.f32 1e-05, %v725_v19  ;;  %v2836_v31 = vpop.eup %2835  ;;  %v718_v32 = vpop.xlane.xlu1 %717  ;;  %2585 = vmatmul.mubr.msk.bf16.vlgmr.msra.gmra.mrb[0].mxu0 %vm380_vm0, %v515_v22  ;;  %v511_v33 = vadd.f32 %v3276_v51, %v497_v16  ;;  %v485_v34 = vmul.f32 %v2834_v26, %v3183_v1 }
 0x156   : > { %2845 = vrsqrt.f32 %v732_v27  ;;  %v726_v0 = vmul.f32 0.015625, %v718_v32  ;;  %v743_v38 = vmul.f32 %v2836_v31, %v3192_v10  ;;  %v512_v24 = vadd.f32 %v3276_v51, %v498_v20 }
 0x157   : > { %2847 = vrsqrt.f32 %v733_v30  ;;  %v516_v40 = vpack.c.bf16 %v511_v33, %v510_v55  ;;  %v499_v41 = vmul.f32 %v3269_v39, %v485_v34 }
 0x158   : > { %v2838_v42 = vpop.eup %2837  ;;  %v734_v43 = vadd.f32 1e-05, %v726_v0  ;;  %v757_v49 = vmul.f32 %v3269_v39, %v743_v38 }
 0x159   : > { %v2840_v46 = vpop.eup %2839  ;;  %2588 = vmatprep.mubr.msk.bf16.mxu0 %vm380_vm0, %v516_v40  ;;  %v513_v48 = vadd.f32 %v3276_v51, %v499_v41  ;;  %v744_v1 = vmul.f32 %v2838_v42, %v3195_v11 }
 0x15a   : > { %2849 = vrsqrt.f32 %v734_v43  ;;  %v745_v10 = vmul.f32 %v2840_v46, %v3204_v23  ;;  %v771_v29 = vadd.f32 %v3276_v51, %v757_v49 }
 0x15b   : > { %v517_v36 = vpack.c.bf16 %v513_v48, %v512_v24  ;;  %v758_v50 = vmul.f32 %v3269_v39, %v744_v1 }
 0x15c   : > { %v2842_v52 = vpop.eup %2841  ;;  %v759_v11 = vmul.f32 %v3269_v39, %v745_v10 }
 0x15d   : > { %v2844_v28 = vpop.eup %2843  ;;  %2589 = vmatmul.mubr.msk.bf16.gmra.mrb[4].mxu0 %vm380_vm0, %v517_v36  ;;  %v772_v53 = vadd.f32 %v3276_v51, %v758_v50  ;;  %v746_v56 = vmul.f32 %v2842_v52, %v3207_v17 }
 0x15e   : > { %v747_v57 = vmul.f32 %v2844_v28, %v3216_v35  ;;  %v773_v60 = vadd.f32 %v3276_v51, %v759_v11 }
 0x15f   : > { %v779_v44 = vpack.c.bf16 %v772_v53, %v771_v29  ;;  %v760_v23 = vmul.f32 %v3269_v39, %v746_v56 }
 0x160   : > { %v2846_v58 = vpop.eup %2845  ;;  %v761_v63 = vmul.f32 %v3269_v39, %v747_v57 }
 0x161   : > { %v2848_v59 = vpop.eup %2847  ;;  %2600 = vmatprep.mubr.msk.bf16.mxu1 %vm380_vm0, %v779_v44  ;;  %v774_v61 = vadd.f32 %v3276_v51, %v760_v23  ;;  %v748_v62 = vmul.f32 %v2846_v58, %v3219_v21 }
 0x162   : > { %v749_v17 = vmul.f32 %v2848_v59, %v3228_v47  ;;  %v775_v3 = vadd.f32 %v3276_v51, %v761_v63 }
 0x163   : > { %v780_v37 = vpack.c.bf16 %v774_v61, %v773_v60  ;;  %v762_v35 = vmul.f32 %v3269_v39, %v748_v62 }
 0x164   : > { %v2850_v2 = vpop.eup %2849  ;;  %v763_v6 = vmul.f32 %v3269_v39, %v749_v17 }
 0x165   : > { %2601 = vmatmul.mubr.msk.bf16.vlgmr.msra.gmra.mrb[0].mxu1 %vm380_vm0, %v780_v37  ;;  %v776_v4 = vadd.f32 %v3276_v51, %v762_v35  ;;  %v750_v5 = vmul.f32 %v2850_v2, %v3231_v25 }
 0x166   : > { %v777_v47 = vadd.f32 %v3276_v51, %v763_v6 }
 0x167   : > { %v781_v7 = vpack.c.bf16 %v776_v4, %v775_v3  ;;  %v764_v21 = vmul.f32 %v3269_v39, %v750_v5 }
 0x169   : > { %2604 = vmatprep.mubr.msk.bf16.mxu1 %vm380_vm0, %v781_v7  ;;  %v778_v8 = vadd.f32 %v3276_v51, %v764_v21 }
 0x16b   : > { %v782_v9 = vpack.c.bf16 %v778_v8, %v777_v47 }
 0x16d   : > { %2605 = vmatmul.mubr.msk.bf16.gmra.mrb[4].mxu1 %vm380_vm0, %v782_v9 }
 0x228   : > { %v2586_v12 = vpop.f32.mrb[0].mxu0 }
 0x229   : > { %v596_v45 = vpop.f32.mrb[1].mxu0 }
 0x22a   : > { %v2587_v13 = vpop.f32.mrb[2].mxu0 }
 0x22b   : > { %v3331_v14 = vpack.c.bf16 %v2587_v13, %v2586_v12  ;;  %v599_v25 = vpop.f32.mrb[3].mxu0 }
 0x22c   : > { %v3333_v15 = vpack.c.bf16 %v599_v25, %v596_v45 }
 0x22d   : > { %v917_v26 = vsel %vm900_vm1, %v3331_v14, 0 }
 0x22e   : > { %2760 = vmatprep.subr.msk.bf16.mxu0 %vm900_vm1, %v3333_v15  ;;  %v914_v39 = vsel %vm900_vm1, %v3333_v15, 0 }
 0x22f   : > { %2609 = vmatpush3.bf16.xpose.msra.mxu0 %v914_v39 }
 0x230   : > { %v2590_v51 = vpop.f32.mrb[4].mxu0  ;;  %2761 = vmatprep.subr.msk.bf16.mxu0 %vm900_vm1, %v3331_v14 }
 0x231   : > { %v612_v18 = vpop.f32.mrb[5].mxu0 }
 0x232   : > { %v2591_v19 = vpop.f32.mrb[6].mxu0 }
 0x233   : > { %v3341_v54 = vpack.c.bf16 %v2591_v19, %v2590_v51  ;;  %v615_v22 = vpop.f32.mrb[7].mxu0 }
 0x234   : > { %v3343_v16 = vpack.c.bf16 %v615_v22, %v612_v18 }
 0x235   : > { %v923_v43 = vsel %vm900_vm1, %v3341_v54, 0 }
 0x236   : > { %v920_v34 = vsel %vm900_vm1, %v3343_v16, 0 }
 0x237   : > { %2611 = vmatpush3.bf16.xpose.msra.mxu0 %v917_v26 }
 0x238   : > { %v2602_v27 = vpop.f32.mrb[0].mxu1  ;;  %2762 = vmatprep.subr.msk.bf16.mxu0 %vm900_vm1, %v3343_v16 }
 0x239   : > { %v861_v30 = vpop.f32.mrb[1].mxu1 }
 0x23a   : > { %v2603_v31 = vpop.f32.mrb[2].mxu1 }
 0x23b   : > { %v3349_v32 = vpack.c.bf16 %v2603_v31, %v2602_v27  ;;  %v864_v55 = vpop.f32.mrb[3].mxu1 }
 0x23c   : > { %v3351_v33 = vpack.c.bf16 %v864_v55, %v861_v30 }
 0x23e   : > { %2616 = vmatprep.mubr.msk.bf16.mxu0 %vm900_vm1, %v3351_v33 }
 0x23f   : > { %2613 = vmatpush3.bf16.xpose.msra.mxu0 %v920_v34 }
 0x240   : > { %v2606_v20 = vpop.f32.mrb[4].mxu1  ;;  %2763 = vmatprep.subr.msk.bf16.mxu0 %vm900_vm1, %v3341_v54 }
 0x241   : > { %v877_v0 = vpop.f32.mrb[5].mxu1 }
 0x242   : > { %v2607_v38 = vpop.f32.mrb[6].mxu1 }
 0x243   : > { %v3359_v40 = vpack.c.bf16 %v2607_v38, %v2606_v20  ;;  %v880_v41 = vpop.f32.mrb[7].mxu1 }
 0x244   : > { %v3361_v42 = vpack.c.bf16 %v880_v41, %v877_v0 }
 0x247   : > { %2615 = vmatpush3.bf16.xpose.msra.mxu0 %v923_v43 }
 0x24e   : > { %2617 = vmatmul.mubr.msk.bf16.vlgmr.msra.gmra.mrb[8].mxu0 %vm900_vm1, %v3349_v32 }
 0x24f   : > { %2620 = vmatprep.mubr.msk.bf16.mxu0 %vm900_vm1, %v3361_v42 }
 0x256   : > { %2621 = vmatmul.mubr.msk.bf16.gmra.mrb[12].mxu0 %vm900_vm1, %v3359_v40 }
 0x321   : > { %v2618_v46 = vpop.f32.mrb[8].mxu0 }
 0x322   : > { %v959_v24 = vpop.f32.mrb[9].mxu0  ;;  %v996_v36 = vsel %vm380_vm0, %v2618_v46, -inf }
 0x323   : > { %v2619_v48 = vpop.f32.mrb[10].mxu0  ;;  %v990_v1 = vsel %vm380_vm0, %v959_v24, -inf }
 0x324   : > { %991 = vmax.xlane.f32.xlu0 %v990_v1  ;;  %v962_v49 = vpop.f32.mrb[11].mxu0  ;;  %v999_v10 = vsel %vm380_vm0, %v2619_v48, -inf }
 0x325   : > { %1000 = vmax.xlane.f32.xlu1 %v999_v10  ;;  %v993_v50 = vsel %vm380_vm0, %v962_v49, -inf }
 0x328   : > { %997 = vmax.xlane.f32.xlu0 %v996_v36 }
 0x329   : > { %994 = vmax.xlane.f32.xlu1 %v993_v50  ;;  %v2622_v52 = vpop.f32.mrb[12].mxu0 }
 0x32a   : > { %v975_v28 = vpop.f32.mrb[13].mxu0  ;;  %v1008_v29 = vsel %vm380_vm0, %v2622_v52, -inf }
 0x32b   : > { %v3376_v53 = vpop.f32.mrb[14].mxu0  ;;  %v1002_v11 = vsel %vm380_vm0, %v975_v28, -inf }
 0x32c   : > { %1009 = vmax.xlane.f32.xlu0 %v1008_v29  ;;  %v3378_v56 = vpop.f32.mrb[15].mxu0  ;;  %v1011_v57 = vsel %vm380_vm0, %v3376_v53, -inf }
 0x32d   : > { %v1005_v44 = vsel %vm380_vm0, %v3378_v56, -inf }
 0x330   : > { %1003 = vmax.xlane.f32.xlu0 %v1002_v11 }
 0x33a   : > { %1088 = vrot.lane.b32.xlu1 %v3331_v14, %s3011_s19 }
 0x33e   : > { %1090 = vrot.lane.b32.xlu1 %v3343_v16, %s3011_s19 }
 0x346   : > { %1086 = vrot.lane.b32.xlu0 %v3333_v15, %s3011_s19 }
 0x362   : > { %1012 = vmax.xlane.f32.xlu1 %v1011_v57 }
 0x366   : > { %1006 = vmax.xlane.f32.xlu1 %v1005_v44 }
 0x377   : > { %1092 = vrot.lane.b32.xlu1 %v3341_v54, %s3011_s19 }
 0x3b1   : > { %v992_v23 = vpop.xlane.xlu0 %991 }
 0x3b2   : > { %v1001_v58 = vpop.xlane.xlu1 %1000  ;;  %v1014_v60 = vsub.f32 %v959_v24, %v992_v23 }
 0x3b3   : > { %v1017_v59 = vsub.f32 %v2619_v48, %v1001_v58 }
 0x3b4   : > { %v1022_v35 = vmul.f32 1.442695, %v1014_v60 }
 0x3b5   : > { %v1028_v61 = vmul.f32 1.442695, %v1017_v59  ;;  %v998_v62 = vpop.xlane.xlu0 %997 }
 0x3b6   : > { %v1016_v63 = vsub.f32 %v2618_v46, %v998_v62  ;;  %v995_v17 = vpop.xlane.xlu1 %994 }
 0x3b7   : > { %2851 = vpow2.f32 %v1028_v61  ;;  %v1015_v37 = vsub.f32 %v962_v49, %v995_v17 }
 0x3b8   : > { %v1026_v2 = vmul.f32 1.442695, %v1016_v63 }
 0x3b9   : > { %v1024_v3 = vmul.f32 1.442695, %v1015_v37  ;;  %v1010_v4 = vpop.xlane.xlu0 %1009 }
 0x3ba   : > { %2853 = vpow2.f32 %v1026_v2  ;;  %v1020_v5 = vsub.f32 %v2622_v52, %v1010_v4  ;;  %v1089_v9 = vpop.permute.xlu1 %1088 }
 0x3bb   : > { %2855 = vpow2.f32 %v1024_v3 }
 0x3bc   : > { %2857 = vpow2.f32 %v1022_v35  ;;  %v1034_v6 = vmul.f32 1.442695, %v1020_v5 }
 0x3bd   : > { %v1004_v7 = vpop.xlane.xlu0 %1003 }
 0x3be   : > { %v1018_v21 = vsub.f32 %v975_v28, %v1004_v7  ;;  %2859 = vpow2.f32 %v1034_v6  ;;  %v1091_v19 = vpop.permute.xlu1 %1090 }
 0x3c0   : > { %v1030_v47 = vmul.f32 1.442695, %v1018_v21 }
 0x3c1   : > { %v3389_v8 = vpop.eup %2851  ;;  %v1087_v12 = vpop.permute.xlu0 %1086 }
 0x3c2   : > { %2624 = vmatprep.subr.bf16.mxu1 %v1087_v12  ;;  %v1047_v45 = vsel %vm380_vm0, %v3389_v8, 0.0  ;;  %2861 = vpow2.f32 %v1030_v47 }
 0x3c3   : > { %1048 = vadd.xlane.f32.xlu1 %v1047_v45  ;;  %2625 = vmatpush3.bf16.msra.mxu1 %v1087_v12 }
 0x3c4   : > { %v2854_v13 = vpop.eup %2853  ;;  %2626 = vmatprep.subr.bf16.mxu1 %v1089_v9 }
 0x3c5   : > { %v2856_v25 = vpop.eup %2855  ;;  %v1044_v39 = vsel %vm380_vm0, %v2854_v13, 0.0 }
 0x3c6   : > { %v2858_v51 = vpop.eup %2857  ;;  %1045 = vadd.xlane.f32.xlu0 %v1044_v39  ;;  %v1041_v18 = vsel %vm380_vm0, %v2856_v25, 0.0 }
 0x3c7   : > { %1042 = vadd.xlane.f32.xlu1 %v1041_v18  ;;  %2627 = vmatpush3.bf16.msra.mxu1 %v1089_v9  ;;  %v1038_v22 = vsel %vm380_vm0, %v2858_v51, 0.0 }
 0x3c8   : > { %2628 = vmatprep.subr.bf16.mxu1 %v1091_v19  ;;  %v3396_v26 = vpop.eup %2859 }
 0x3c9   : > { %v1056_v27 = vsel %vm380_vm0, %v3396_v26, 0.0 }
 0x3ca   : > { %1039 = vadd.xlane.f32.xlu0 %v1038_v22 }
 0x3cb   : > { %2629 = vmatpush3.bf16.msra.mxu1 %v1091_v19 }
 0x3cc   : > { %v3400_v30 = vpop.eup %2861 }
 0x3cd   : > { %v1050_v31 = vsel %vm380_vm0, %v3400_v30, 0.0 }
 0x3ce   : > { %1057 = vadd.xlane.f32.xlu0 %v1056_v27 }
 0x3d2   : > { %1051 = vadd.xlane.f32.xlu0 %v1050_v31 }
 0x3d8   : > { %1197 = vrot.lane.b32.xlu1 %v3331_v14, %s3012_s20 }
 0x3dc   : > { %1199 = vrot.lane.b32.xlu1 %v3343_v16, %s3012_s20 }
 0x3ef   : > { %v1013_v55 = vpop.xlane.xlu1 %1012 }
 0x3f0   : > { %v1021_v34 = vsub.f32 %v3376_v53, %v1013_v55 }
 0x3f2   : > { %v1036_v20 = vmul.f32 1.442695, %v1021_v34 }
 0x3f3   : > { %v1007_v0 = vpop.xlane.xlu1 %1006 }
 0x3f4   : > { %2863 = vpow2.f32 %v1036_v20  ;;  %v1019_v38 = vsub.f32 %v3378_v56, %v1007_v0 }
 0x3f6   : > { %v1032_v41 = vmul.f32 1.442695, %v1019_v38 }
 0x3f7   : > { %v1093_v43 = vpop.permute.xlu1 %1092 }
 0x3f8   : > { %2865 = vpow2.f32 %v1032_v41  ;;  %2630 = vmatprep.subr.bf16.mxu1 %v1093_v43 }
 0x3f9   : > { %2631 = vmatpush3.bf16.msra.mxu1 %v1093_v43 }
 0x3fe   : > { %v2864_v46 = vpop.eup %2863 }
 0x3ff   : > { %v1059_v24 = vsel %vm380_vm0, %v2864_v46, 0.0 }
 0x400   : > { %1060 = vadd.xlane.f32.xlu0 %v1059_v24 }
 0x402   : > { %v2866_v48 = vpop.eup %2865 }
 0x403   : > { %v1053_v1 = vsel %vm380_vm0, %v2866_v48, 0.0 }
 0x404   : > { %1054 = vadd.xlane.f32.xlu1 %v1053_v1 }
 0x415   : > { %1201 = vrot.lane.b32.xlu1 %v3341_v54, %s3012_s20 }
 0x416   : > { %1195 = vrot.lane.b32.xlu0 %v3333_v15, %s3012_s20 }
 0x419   : > { %1189 = vrot.lane.b32.xlu1 %v3349_v32, %s3012_s20 }
 0x41a   : > { %1187 = vrot.lane.b32.xlu0 %v3351_v33, %s3012_s20 }
 0x41d   : > { %1193 = vrot.lane.b32.xlu1 %v3359_v40, %s3012_s20 }
 0x41e   : > { %1191 = vrot.lane.b32.xlu0 %v3361_v42, %s3012_s20 }
 0x450   : > { %v1049_v49 = vpop.xlane.xlu1 %1048 }
 0x453   : > { %v1046_v10 = vpop.xlane.xlu0 %1045 }
 0x454   : > { %v1043_v36 = vpop.xlane.xlu1 %1042  ;;  %2867 = vrcp.f32 %v1046_v10 }
 0x455   : > { %2869 = vrcp.f32 %v1043_v36 }
 0x456   : > { %2871 = vrcp.f32 %v1049_v49 }
 0x457   : > { %v1040_v50 = vpop.xlane.xlu0 %1039 }
 0x458   : > { %2873 = vrcp.f32 %v1040_v50  ;;  %v1198_v60 = vpop.permute.xlu1 %1197 }
 0x459   : > { %v1219_v4 = vsel %vm900_vm1, %v1198_v60, 0 }
 0x45b   : > { %v1058_v59 = vpop.xlane.xlu0 %1057 }
 0x45c   : > { %v1200_v62 = vpop.permute.xlu1 %1199 }
 0x45e   : > { %v2868_v52 = vpop.eup %2867 }
 0x45f   : > { %v2870_v28 = vpop.eup %2869  ;;  %v1072_v56 = vmul.f32 %v2868_v52, %v2854_v13  ;;  %v1052_v61 = vpop.xlane.xlu0 %1051  ;;  %v1222_v13 = vsel %vm900_vm1, %v1200_v62, 0 }
 0x460   : > { %v2872_v29 = vpop.eup %2871  ;;  %v1071_v57 = vmul.f32 %v2870_v28, %v2856_v25 }
 0x461   : > { %v1073_v44 = vmul.f32 %v2872_v29, %v3389_v8 }
 0x462   : > { %v2874_v53 = vpop.eup %2873 }
 0x463   : > { %v1070_v11 = vmul.f32 %v2874_v53, %v2858_v51  ;;  %v1079_v58 = vpack.c.bf16 %v1073_v44, %v1072_v56 }
 0x465   : > { %v1078_v23 = vpack.c.bf16 %v1071_v57, %v1070_v11 }
 0x467   : > { %2632 = vmatprep.mubr.msk.bf16.mxu1 %vm380_vm0, %v1078_v23 }
 0x468   : > { %2633 = vmatmul.mubr.msk.bf16.vlgmr.msra.gmra.mrb[8].mxu1 %vm380_vm0, %v1079_v58 }
 0x48d   : > { %v1061_v63 = vpop.xlane.xlu0 %1060 }
 0x48e   : > { %2875 = vrcp.f32 %v1061_v63 }
 0x48f   : > { %2877 = vrcp.f32 %v1052_v61 }
 0x490   : > { %2879 = vrcp.f32 %v1058_v59 }
 0x491   : > { %v1055_v17 = vpop.xlane.xlu1 %1054  ;;  %v1196_v37 = vpop.permute.xlu0 %1195 }
 0x492   : > { %2881 = vrcp.f32 %v1055_v17  ;;  %2764 = vmatprep.subr.msk.bf16.mxu1 %vm900_vm1, %v1196_v37  ;;  %v1216_v35 = vsel %vm900_vm1, %v1196_v37, 0 }
 0x493   : > { %2641 = vmatpush3.bf16.xpose.msra.mxu1 %v1216_v35 }
 0x494   : > { %2765 = vmatprep.subr.msk.bf16.mxu1 %vm900_vm1, %v1198_v60 }
 0x495   : > { %v1188_v45 = vpop.permute.xlu0 %1187  ;;  %v1202_v25 = vpop.permute.xlu1 %1201 }
 0x496   : > { %v1225_v39 = vsel %vm900_vm1, %v1202_v25, 0 }
 0x498   : > { %v2876_v2 = vpop.eup %2875 }
 0x499   : > { %v2878_v3 = vpop.eup %2877  ;;  %v1077_v7 = vmul.f32 %v2876_v2, %v2864_v46  ;;  %v1190_v51 = vpop.permute.xlu1 %1189 }
 0x49a   : > { %v2880_v5 = vpop.eup %2879  ;;  %v1074_v21 = vmul.f32 %v2878_v3, %v3400_v30  ;;  %v1192_v18 = vpop.permute.xlu0 %1191 }
 0x49b   : > { %2643 = vmatpush3.bf16.xpose.msra.mxu1 %v1219_v4  ;;  %v1076_v8 = vmul.f32 %v2880_v5, %v3396_v26 }
 0x49c   : > { %v2882_v6 = vpop.eup %2881  ;;  %2766 = vmatprep.subr.msk.bf16.mxu1 %vm900_vm1, %v1200_v62 }
 0x49d   : > { %v1075_v47 = vmul.f32 %v2882_v6, %v2866_v48  ;;  %v1081_v12 = vpack.c.bf16 %v1077_v7, %v1076_v8  ;;  %v1194_v19 = vpop.permute.xlu1 %1193 }
 0x49f   : > { %v1080_v9 = vpack.c.bf16 %v1075_v47, %v1074_v21 }
 0x4a1   : > { %2636 = vmatprep.mubr.msk.bf16.mxu1 %vm380_vm0, %v1080_v9 }
 0x4a2   : > { %2637 = vmatmul.mubr.msk.bf16.gmra.mrb[12].mxu1 %vm380_vm0, %v1081_v12 }
 0x4a3   : > { %2645 = vmatpush3.bf16.xpose.msra.mxu1 %v1222_v13  ;;  %2648 = vmatprep.mubr.msk.bf16.mxu1 %vm900_vm1, %v1188_v45 }
 0x4a4   : > { %2767 = vmatprep.subr.msk.bf16.mxu1 %vm900_vm1, %v1202_v25 }
 0x4ab   : > { %2647 = vmatpush3.bf16.xpose.msra.mxu1 %v1225_v39 }
 0x4b2   : > { %2649 = vmatmul.mubr.msk.bf16.vlgmr.msra.gmra.mrb[16].mxu1 %vm900_vm1, %v1190_v51 }
 0x4b3   : > { %2652 = vmatprep.mubr.msk.bf16.mxu1 %vm900_vm1, %v1192_v18 }
 0x4ba   : > { %2653 = vmatmul.mubr.msk.bf16.gmra.mrb[20].mxu1 %vm900_vm1, %v1194_v19 }
 0x53b   : > { %v2634_v22 = vpop.f32.mrb[8].mxu1 }
 0x53c   : > { %1177 = vst.msk [vmem:[#allocation3 + $0x10] sm:$0xff] %vm900_vm1, %v2634_v22  ;;  %v1144_v26 = vpop.f32.mrb[9].mxu1 }
 0x53d   : > { %1175 = vst.msk [vmem:[#allocation3] sm:$0xff] %vm900_vm1, %v1144_v26  ;;  %v2635_v27 = vpop.f32.mrb[10].mxu1 }
 0x53e   : > { %1178 = vst.msk [vmem:[#allocation3 + $0x18] sm:$0xff] %vm900_vm1, %v2635_v27  ;;  %v1147_v30 = vpop.f32.mrb[11].mxu1 }
 0x53f   : > { %1176 = vst.msk [vmem:[#allocation3 + $0x8] sm:$0xff] %vm900_vm1, %v1147_v30 }
 0x575   : > { %v2638_v31 = vpop.f32.mrb[12].mxu1 }
 0x576   : > { %1181 = vst.msk [vmem:[#allocation3 + $0x30] sm:$0xff] %vm900_vm1, %v2638_v31  ;;  %v1160_v55 = vpop.f32.mrb[13].mxu1 }
 0x577   : > { %1179 = vst.msk [vmem:[#allocation3 + $0x20] sm:$0xff] %vm900_vm1, %v1160_v55  ;;  %v2639_v34 = vpop.f32.mrb[14].mxu1 }
 0x578   : > { %1182 = vst.msk [vmem:[#allocation3 + $0x38] sm:$0xff] %vm900_vm1, %v2639_v34  ;;  %v1163_v20 = vpop.f32.mrb[15].mxu1 }
 0x579   : > { %1180 = vst.msk [vmem:[#allocation3 + $0x28] sm:$0xff] %vm900_vm1, %v1163_v20 }
 0x585   : > { %v2650_v0 = vpop.f32.mrb[16].mxu1 }
 0x586   : > { %v1261_v38 = vpop.f32.mrb[17].mxu1  ;;  %v1298_v41 = vsel %vm380_vm0, %v2650_v0, -inf }
 0x587   : > { %1299 = vmax.xlane.f32.xlu0 %v1298_v41  ;;  %v2651_v43 = vpop.f32.mrb[18].mxu1  ;;  %v1292_v48 = vsel %vm380_vm0, %v1261_v38, -inf }
 0x588   : > { %v1264_v46 = vpop.f32.mrb[19].mxu1  ;;  %v1301_v10 = vsel %vm380_vm0, %v2651_v43, -inf }
 0x589   : > { %v1295_v24 = vsel %vm380_vm0, %v1264_v46, -inf }
 0x58a   : > { %1296 = vmax.xlane.f32.xlu1 %v1295_v24 }
 0x58b   : > { %1293 = vmax.xlane.f32.xlu0 %v1292_v48 }
 0x58d   : > { %v2654_v1 = vpop.f32.mrb[20].mxu1 }
 0x58e   : > { %v1277_v49 = vpop.f32.mrb[21].mxu1  ;;  %v1310_v52 = vsel %vm380_vm0, %v2654_v1, -inf }
 0x58f   : > { %1302 = vmax.xlane.f32.xlu0 %v1301_v10  ;;  %v3447_v36 = vpop.f32.mrb[22].mxu1  ;;  %v1304_v28 = vsel %vm380_vm0, %v1277_v49, -inf }
 0x590   : > { %v3449_v50 = vpop.f32.mrb[23].mxu1  ;;  %v1313_v29 = vsel %vm380_vm0, %v3447_v36, -inf }
 0x591   : > { %v1307_v53 = vsel %vm380_vm0, %v3449_v50, -inf }
 0x593   : > { %1311 = vmax.xlane.f32.xlu0 %v1310_v52 }
 0x597   : > { %1305 = vmax.xlane.f32.xlu0 %v1304_v28 }
 0x59b   : > { %1386 = vrot.lane.b32.xlu1 %v3331_v14, %s3013_s21 }
 0x59f   : > { %1388 = vrot.lane.b32.xlu1 %v3343_v16, %s3013_s21 }
 0x5ad   : > { %1384 = vrot.lane.b32.xlu0 %v3333_v15, %s3013_s21 }
 0x5c3   : > { %1314 = vmax.xlane.f32.xlu1 %v1313_v29 }
 0x5c7   : > { %1308 = vmax.xlane.f32.xlu1 %v1307_v53 }
 0x5d8   : > { %1390 = vrot.lane.b32.xlu1 %v3341_v54, %s3013_s21 }
 0x614   : > { %v1300_v56 = vpop.xlane.xlu0 %1299 }
 0x615   : > { %v1318_v11 = vsub.f32 %v2650_v0, %v1300_v56 }
 0x617   : > { %v1328_v57 = vmul.f32 1.442695, %v1318_v11  ;;  %v1297_v44 = vpop.xlane.xlu1 %1296 }
 0x618   : > { %v1294_v23 = vpop.xlane.xlu0 %1293  ;;  %v1317_v59 = vsub.f32 %v1264_v46, %v1297_v44 }
 0x619   : > { %2883 = vpow2.f32 %v1328_v57  ;;  %v1316_v58 = vsub.f32 %v1261_v38, %v1294_v23 }
 0x61a   : > { %v1326_v63 = vmul.f32 1.442695, %v1317_v59 }
 0x61b   : > { %v1324_v60 = vmul.f32 1.442695, %v1316_v58  ;;  %v1387_v47 = vpop.permute.xlu1 %1386 }
 0x61c   : > { %v1303_v61 = vpop.xlane.xlu0 %1302 }
 0x61d   : > { %2885 = vpow2.f32 %v1324_v60  ;;  %v1319_v62 = vsub.f32 %v2651_v43, %v1303_v61 }
 0x61f   : > { %v1330_v17 = vmul.f32 1.442695, %v1319_v62  ;;  %v1389_v25 = vpop.permute.xlu1 %1388 }
 0x620   : > { %v1312_v37 = vpop.xlane.xlu0 %1311 }
 0x621   : > { %2887 = vpow2.f32 %v1330_v17  ;;  %v1322_v35 = vsub.f32 %v2654_v1, %v1312_v37 }
 0x622   : > { %2889 = vpow2.f32 %v1326_v63 }
 0x623   : > { %v3465_v2 = vpop.eup %2883  ;;  %v1336_v3 = vmul.f32 1.442695, %v1322_v35 }
 0x624   : > { %v1306_v4 = vpop.xlane.xlu0 %1305  ;;  %v1346_v5 = vsel %vm380_vm0, %v3465_v2, 0.0 }
 0x625   : > { %2891 = vpow2.f32 %v1336_v3  ;;  %v1320_v6 = vsub.f32 %v1277_v49, %v1306_v4  ;;  %1347 = vadd.xlane.f32.xlu0 %v1346_v5 }
 0x627   : > { %v3469_v7 = vpop.eup %2885  ;;  %v1332_v21 = vmul.f32 1.442695, %v1320_v6 }
 0x628   : > { %v1385_v8 = vpop.permute.xlu0 %1384  ;;  %v1340_v9 = vsel %vm380_vm0, %v3469_v7, 0.0 }
 0x629   : > { %2893 = vpow2.f32 %v1332_v21  ;;  %1341 = vadd.xlane.f32.xlu0 %v1340_v9  ;;  %2656 = vmatprep.subr.bf16.mxu0 %v1385_v8 }
 0x62a   : > { %2657 = vmatpush3.bf16.msra.mxu0 %v1385_v8 }
 0x62b   : > { %v2888_v12 = vpop.eup %2887  ;;  %2658 = vmatprep.subr.bf16.mxu0 %v1387_v47 }
 0x62c   : > { %v1349_v45 = vsel %vm380_vm0, %v2888_v12, 0.0  ;;  %v2890_v13 = vpop.eup %2889 }
 0x62d   : > { %1350 = vadd.xlane.f32.xlu1 %v1349_v45  ;;  %v1343_v51 = vsel %vm380_vm0, %v2890_v13, 0.0 }
 0x62e   : > { %2659 = vmatpush3.bf16.msra.mxu0 %v1387_v47 }
 0x62f   : > { %v3474_v39 = vpop.eup %2891  ;;  %2660 = vmatprep.subr.bf16.mxu0 %v1389_v25 }
 0x630   : > { %v1358_v18 = vsel %vm380_vm0, %v3474_v39, 0.0 }
 0x631   : > { %1344 = vadd.xlane.f32.xlu1 %v1343_v51  ;;  %1359 = vadd.xlane.f32.xlu0 %v1358_v18 }
 0x632   : > { %2661 = vmatpush3.bf16.msra.mxu0 %v1389_v25 }
 0x633   : > { %v3479_v19 = vpop.eup %2893 }
 0x634   : > { %v1352_v22 = vsel %vm380_vm0, %v3479_v19, 0.0 }
 0x635   : > { %1353 = vadd.xlane.f32.xlu0 %v1352_v22 }
 0x642   : > { %1524 = vrot.lane.b32.xlu1 %v3331_v14, %s3014_s22 }
 0x646   : > { %1526 = vrot.lane.b32.xlu1 %v3343_v16, %s3014_s22 }
 0x650   : > { %v1315_v26 = vpop.xlane.xlu1 %1314 }
 0x651   : > { %v1323_v27 = vsub.f32 %v3447_v36, %v1315_v26 }
 0x653   : > { %v1338_v30 = vmul.f32 1.442695, %v1323_v27 }
 0x654   : > { %v1309_v31 = vpop.xlane.xlu1 %1308 }
 0x655   : > { %2895 = vpow2.f32 %v1338_v30  ;;  %v1321_v55 = vsub.f32 %v3449_v50, %v1309_v31 }
 0x657   : > { %v1334_v34 = vmul.f32 1.442695, %v1321_v55 }
 0x658   : > { %v1391_v20 = vpop.permute.xlu1 %1390 }
 0x659   : > { %2662 = vmatprep.subr.bf16.mxu0 %v1391_v20  ;;  %2897 = vpow2.f32 %v1334_v34 }
 0x65a   : > { %2663 = vmatpush3.bf16.msra.mxu0 %v1391_v20 }
 0x65f   : > { %v2896_v0 = vpop.eup %2895 }
 0x660   : > { %v1361_v38 = vsel %vm380_vm0, %v2896_v0, 0.0 }
 0x661   : > { %1362 = vadd.xlane.f32.xlu0 %v1361_v38 }
 0x663   : > { %v2898_v41 = vpop.eup %2897 }
 0x664   : > { %v1355_v43 = vsel %vm380_vm0, %v2898_v41, 0.0 }
 0x66a   : > { %1356 = vadd.xlane.f32.xlu1 %v1355_v43 }
 0x677   : > { %1522 = vrot.lane.b32.xlu0 %v3333_v15, %s3014_s22 }
 0x67b   : > { %1528 = vrot.lane.b32.xlu1 %v3341_v54, %s3014_s22  ;;  %1514 = vrot.lane.b32.xlu0 %v3351_v33, %s3014_s22 }
 0x67f   : > { %1516 = vrot.lane.b32.xlu1 %v3349_v32, %s3014_s22  ;;  %1518 = vrot.lane.b32.xlu0 %v3361_v42, %s3014_s22 }
 0x683   : > { %1520 = vrot.lane.b32.xlu1 %v3359_v40, %s3014_s22 }
 0x6b2   : > { %v1348_v46 = vpop.xlane.xlu0 %1347 }
 0x6b6   : > { %v1342_v24 = vpop.xlane.xlu0 %1341 }
 0x6ba   : > { %v1351_v48 = vpop.xlane.xlu1 %1350 }
 0x6bb   : > { %2899 = vrcp.f32 %v1351_v48 }
 0x6bc   : > { %2901 = vrcp.f32 %v1342_v24 }
 0x6bd   : > { %2903 = vrcp.f32 %v1348_v46 }
 0x6be   : > { %v1345_v1 = vpop.xlane.xlu1 %1344  ;;  %v1360_v57 = vpop.xlane.xlu0 %1359 }
 0x6bf   : > { %2905 = vrcp.f32 %v1345_v1 }
 0x6c2   : > { %v1354_v44 = vpop.xlane.xlu0 %1353  ;;  %v1525_v23 = vpop.permute.xlu1 %1524 }
 0x6c3   : > { %v1546_v63 = vsel %vm900_vm1, %v1525_v23, 0 }
 0x6c5   : > { %v2900_v49 = vpop.eup %2899 }
 0x6c6   : > { %v2902_v10 = vpop.eup %2901  ;;  %v1375_v52 = vmul.f32 %v2900_v49, %v2888_v12  ;;  %v1527_v60 = vpop.permute.xlu1 %1526 }
 0x6c7   : > { %v2904_v36 = vpop.eup %2903  ;;  %v1372_v28 = vmul.f32 %v2902_v10, %v3469_v7  ;;  %v1549_v4 = vsel %vm900_vm1, %v1527_v60, 0 }
 0x6c8   : > { %v1374_v53 = vmul.f32 %v2904_v36, %v3465_v2 }
 0x6c9   : > { %v2906_v50 = vpop.eup %2905 }
 0x6ca   : > { %v1373_v29 = vmul.f32 %v2906_v50, %v2890_v13  ;;  %v1381_v11 = vpack.c.bf16 %v1375_v52, %v1374_v53 }
 0x6cc   : > { %v1380_v56 = vpack.c.bf16 %v1373_v29, %v1372_v28 }
 0x6ce   : > { %2664 = vmatprep.mubr.msk.bf16.mxu0 %vm380_vm0, %v1380_v56 }
 0x6cf   : > { %2665 = vmatmul.mubr.msk.bf16.vlgmr.msra.gmra.mrb[16].mxu0 %vm380_vm0, %v1381_v11 }
 0x6ee   : > { %v1363_v58 = vpop.xlane.xlu0 %1362 }
 0x6ef   : > { %2907 = vrcp.f32 %v1363_v58 }
 0x6f0   : > { %2909 = vrcp.f32 %v1354_v44 }
 0x6f1   : > { %2911 = vrcp.f32 %v1360_v57 }
 0x6f2   : > { %v1523_v59 = vpop.permute.xlu0 %1522 }
 0x6f3   : > { %v1543_v61 = vsel %vm900_vm1, %v1523_v59, 0  ;;  %2768 = vmatprep.subr.msk.bf16.mxu0 %vm900_vm1, %v1523_v59 }
 0x6f4   : > { %2673 = vmatpush3.bf16.xpose.msra.mxu0 %v1543_v61 }
 0x6f5   : > { %2769 = vmatprep.subr.msk.bf16.mxu0 %vm900_vm1, %v1525_v23 }
 0x6f6   : > { %v1515_v9 = vpop.permute.xlu0 %1514 }
 0x6f7   : > { %v1357_v62 = vpop.xlane.xlu1 %1356 }
 0x6f8   : > { %2913 = vrcp.f32 %v1357_v62 }
 0x6f9   : > { %v2908_v17 = vpop.eup %2907 }
 0x6fa   : > { %v2910_v37 = vpop.eup %2909  ;;  %v1379_v3 = vmul.f32 %v2908_v17, %v2896_v0  ;;  %v1519_v13 = vpop.permute.xlu0 %1518 }
 0x6fb   : > { %v2912_v35 = vpop.eup %2911  ;;  %v1376_v5 = vmul.f32 %v2910_v37, %v3479_v19  ;;  %v1529_v7 = vpop.permute.xlu1 %1528 }
 0x6fc   : > { %2675 = vmatpush3.bf16.xpose.msra.mxu0 %v1546_v63  ;;  %v1378_v21 = vmul.f32 %v2912_v35, %v3474_v39  ;;  %v1552_v12 = vsel %vm900_vm1, %v1529_v7, 0 }
 0x6fd   : > { %2770 = vmatprep.subr.msk.bf16.mxu0 %vm900_vm1, %v1527_v60 }
 0x6fe   : > { %v1383_v8 = vpack.c.bf16 %v1379_v3, %v1378_v21 }
 0x6ff   : > { %v1517_v45 = vpop.permute.xlu1 %1516 }
 0x702   : > { %v2914_v2 = vpop.eup %2913 }
 0x703   : > { %v1377_v6 = vmul.f32 %v2914_v2, %v2898_v41  ;;  %v1521_v25 = vpop.permute.xlu1 %1520 }
 0x704   : > { %2677 = vmatpush3.bf16.xpose.msra.mxu0 %v1549_v4 }
 0x705   : > { %2771 = vmatprep.subr.msk.bf16.mxu0 %vm900_vm1, %v1529_v7  ;;  %v1382_v47 = vpack.c.bf16 %v1377_v6, %v1376_v5 }
 0x707   : > { %2668 = vmatprep.mubr.msk.bf16.mxu0 %vm380_vm0, %v1382_v47 }
 0x708   : > { %2669 = vmatmul.mubr.msk.bf16.gmra.mrb[20].mxu0 %vm380_vm0, %v1383_v8 }
 0x709   : > { %2680 = vmatprep.mubr.msk.bf16.mxu0 %vm900_vm1, %v1515_v9 }
 0x70c   : > { %2679 = vmatpush3.bf16.xpose.msra.mxu0 %v1552_v12 }
 0x713   : > { %2681 = vmatmul.mubr.msk.bf16.vlgmr.msra.gmra.mrb[24].mxu0 %vm900_vm1, %v1517_v45 }
 0x714   : > { %2684 = vmatprep.mubr.msk.bf16.mxu0 %vm900_vm1, %v1519_v13 }
 0x71b   : > { %2685 = vmatmul.mubr.msk.bf16.gmra.mrb[28].mxu0 %vm900_vm1, %v1521_v25 }
 0x7a2   : > { %v3515_v39 = vpop.f32.mrb[16].mxu0 }
 0x7a3   : > { %v3517_v51 = vpop.f32.mrb[17].mxu0 }
 0x7a4   : > { %v3519_v18 = vpop.f32.mrb[18].mxu0 }
 0x7a5   : > { %v3521_v19 = vpop.f32.mrb[19].mxu0 }
 0x7db   : > { %v3523_v22 = vpop.f32.mrb[20].mxu0 }
 0x7dc   : > { %v3525_v26 = vpop.f32.mrb[21].mxu0 }
 0x7dd   : > { %v3527_v27 = vpop.f32.mrb[22].mxu0 }
 0x7de   : > { %v3529_v30 = vpop.f32.mrb[23].mxu0 }
 0x7e6   : > { %v2682_v31 = vpop.f32.mrb[24].mxu0 }
 0x7e7   : > { %v1588_v55 = vpop.f32.mrb[25].mxu0  ;;  %v1625_v34 = vsel %vm380_vm0, %v2682_v31, -inf }
 0x7e8   : > { %1626 = vmax.xlane.f32.xlu0 %v1625_v34  ;;  %v2683_v20 = vpop.f32.mrb[26].mxu0  ;;  %v1619_v41 = vsel %vm380_vm0, %v1588_v55, -inf }
 0x7e9   : > { %v1591_v0 = vpop.f32.mrb[27].mxu0  ;;  %v1628_v24 = vsel %vm380_vm0, %v2683_v20, -inf }
 0x7ea   : > { %v1622_v38 = vsel %vm380_vm0, %v1591_v0, -inf }
 0x7eb   : > { %1623 = vmax.xlane.f32.xlu1 %v1622_v38 }
 0x7ec   : > { %1620 = vmax.xlane.f32.xlu0 %v1619_v41 }
 0x7ee   : > { %v2686_v43 = vpop.f32.mrb[28].mxu0 }
 0x7ef   : > { %v1604_v46 = vpop.f32.mrb[29].mxu0  ;;  %v1637_v49 = vsel %vm380_vm0, %v2686_v43, -inf }
 0x7f0   : > { %1629 = vmax.xlane.f32.xlu0 %v1628_v24  ;;  %v3535_v48 = vpop.f32.mrb[30].mxu0  ;;  %v1631_v10 = vsel %vm380_vm0, %v1604_v46, -inf }
 0x7f1   : > { %v3537_v1 = vpop.f32.mrb[31].mxu0  ;;  %v1640_v36 = vsel %vm380_vm0, %v3535_v48, -inf }
 0x7f2   : > { %v1634_v50 = vsel %vm380_vm0, %v3537_v1, -inf }
 0x7f4   : > { %1638 = vmax.xlane.f32.xlu0 %v1637_v49 }
 0x7f8   : > { %1632 = vmax.xlane.f32.xlu0 %v1631_v10 }
 0x7fc   : > { %1713 = vrot.lane.b32.xlu1 %v3331_v14, %s3015_s23 }
 0x800   : > { %1715 = vrot.lane.b32.xlu1 %v3343_v16, %s3015_s23 }
 0x80e   : > { %1711 = vrot.lane.b32.xlu0 %v3333_v15, %s3015_s23 }
 0x824   : > { %1641 = vmax.xlane.f32.xlu1 %v1640_v36 }
 0x828   : > { %1635 = vmax.xlane.f32.xlu1 %v1634_v50 }
 0x839   : > { %1717 = vrot.lane.b32.xlu1 %v3341_v54, %s3015_s23 }
 0x875   : > { %v1627_v52 = vpop.xlane.xlu0 %1626 }
 0x876   : > { %v1645_v28 = vsub.f32 %v2682_v31, %v1627_v52 }
 0x878   : > { %v1655_v29 = vmul.f32 1.442695, %v1645_v28  ;;  %v1624_v53 = vpop.xlane.xlu1 %1623 }
 0x879   : > { %v1621_v56 = vpop.xlane.xlu0 %1620  ;;  %v1644_v57 = vsub.f32 %v1591_v0, %v1624_v53 }
 0x87a   : > { %2915 = vpow2.f32 %v1655_v29  ;;  %v1643_v11 = vsub.f32 %v1588_v55, %v1621_v56 }
 0x87b   : > { %v1653_v59 = vmul.f32 1.442695, %v1644_v57 }
 0x87c   : > { %v1651_v44 = vmul.f32 1.442695, %v1643_v11  ;;  %v1714_v5 = vpop.permute.xlu1 %1713 }
 0x87d   : > { %v1630_v23 = vpop.xlane.xlu0 %1629 }
 0x87e   : > { %2917 = vpow2.f32 %v1651_v44  ;;  %v1646_v58 = vsub.f32 %v2683_v20, %v1630_v23 }
 0x880   : > { %v1657_v60 = vmul.f32 1.442695, %v1646_v58  ;;  %v1716_v9 = vpop.permute.xlu1 %1715 }
 0x881   : > { %v1639_v61 = vpop.xlane.xlu0 %1638 }
 0x882   : > { %2919 = vpow2.f32 %v1657_v60  ;;  %v1649_v62 = vsub.f32 %v2686_v43, %v1639_v61 }
 0x883   : > { %2921 = vpow2.f32 %v1653_v59 }
 0x884   : > { %v3553_v63 = vpop.eup %2915  ;;  %v1663_v17 = vmul.f32 1.442695, %v1649_v62 }
 0x885   : > { %v1633_v37 = vpop.xlane.xlu0 %1632  ;;  %v1673_v35 = vsel %vm380_vm0, %v3553_v63, 0.0 }
 0x886   : > { %2923 = vpow2.f32 %v1663_v17  ;;  %v1647_v2 = vsub.f32 %v1604_v46, %v1633_v37  ;;  %1674 = vadd.xlane.f32.xlu0 %v1673_v35 }
 0x888   : > { %v3557_v3 = vpop.eup %2917  ;;  %v1659_v4 = vmul.f32 1.442695, %v1647_v2 }
 0x889   : > { %v1712_v6 = vpop.permute.xlu0 %1711  ;;  %v1667_v7 = vsel %vm380_vm0, %v3557_v3, 0.0 }
 0x88a   : > { %2925 = vpow2.f32 %v1659_v4  ;;  %1668 = vadd.xlane.f32.xlu0 %v1667_v7  ;;  %2688 = vmatprep.subr.bf16.mxu1 %v1712_v6 }
 0x88b   : > { %2689 = vmatpush3.bf16.msra.mxu1 %v1712_v6 }
 0x88c   : > { %v2920_v21 = vpop.eup %2919  ;;  %2690 = vmatprep.subr.bf16.mxu1 %v1714_v5 }
 0x88d   : > { %v1676_v47 = vsel %vm380_vm0, %v2920_v21, 0.0  ;;  %v2922_v8 = vpop.eup %2921 }
 0x88e   : > { %1677 = vadd.xlane.f32.xlu1 %v1676_v47  ;;  %v1670_v45 = vsel %vm380_vm0, %v2922_v8, 0.0 }
 0x88f   : > { %2691 = vmatpush3.bf16.msra.mxu1 %v1714_v5 }
 0x890   : > { %v3562_v12 = vpop.eup %2923  ;;  %2692 = vmatprep.subr.bf16.mxu1 %v1716_v9 }
 0x891   : > { %v1685_v13 = vsel %vm380_vm0, %v3562_v12, 0.0 }
 0x892   : > { %1671 = vadd.xlane.f32.xlu1 %v1670_v45  ;;  %1686 = vadd.xlane.f32.xlu0 %v1685_v13 }
 0x893   : > { %2693 = vmatpush3.bf16.msra.mxu1 %v1716_v9 }
 0x894   : > { %v3567_v25 = vpop.eup %2925 }
 0x895   : > { %v1679_v31 = vsel %vm380_vm0, %v3567_v25, 0.0 }
 0x896   : > { %1680 = vadd.xlane.f32.xlu0 %v1679_v31 }
 0x8a3   : > { %1851 = vrot.lane.b32.xlu1 %v3331_v14, %s3016_s24 }
 0x8a7   : > { %1853 = vrot.lane.b32.xlu1 %v3343_v16, %s3016_s24 }
 0x8b1   : > { %v1642_v55 = vpop.xlane.xlu1 %1641 }
 0x8b2   : > { %v1650_v34 = vsub.f32 %v3535_v48, %v1642_v55 }
 0x8b4   : > { %v1665_v20 = vmul.f32 1.442695, %v1650_v34 }
 0x8b5   : > { %v1636_v0 = vpop.xlane.xlu1 %1635 }
 0x8b6   : > { %2927 = vpow2.f32 %v1665_v20  ;;  %v1648_v38 = vsub.f32 %v3537_v1, %v1636_v0 }
 0x8b8   : > { %v1661_v41 = vmul.f32 1.442695, %v1648_v38 }
 0x8b9   : > { %v1718_v43 = vpop.permute.xlu1 %1717 }
 0x8ba   : > { %2694 = vmatprep.subr.bf16.mxu1 %v1718_v43  ;;  %2929 = vpow2.f32 %v1661_v41 }
 0x8bb   : > { %2695 = vmatpush3.bf16.msra.mxu1 %v1718_v43 }
 0x8c0   : > { %v2928_v46 = vpop.eup %2927 }
 0x8c1   : > { %v1688_v24 = vsel %vm380_vm0, %v2928_v46, 0.0 }
 0x8c2   : > { %1689 = vadd.xlane.f32.xlu0 %v1688_v24 }
 0x8c4   : > { %v2930_v49 = vpop.eup %2929 }
 0x8c5   : > { %v1682_v10 = vsel %vm380_vm0, %v2930_v49, 0.0 }
 0x8cb   : > { %1683 = vadd.xlane.f32.xlu1 %v1682_v10 }
 0x8d8   : > { %1849 = vrot.lane.b32.xlu0 %v3333_v15, %s3016_s24 }
 0x8dc   : > { %1855 = vrot.lane.b32.xlu1 %v3341_v54, %s3016_s24  ;;  %1841 = vrot.lane.b32.xlu0 %v3351_v33, %s3016_s24 }
 0x8e0   : > { %1843 = vrot.lane.b32.xlu1 %v3349_v32, %s3016_s24  ;;  %1845 = vrot.lane.b32.xlu0 %v3361_v42, %s3016_s24 }
 0x8e4   : > { %1847 = vrot.lane.b32.xlu1 %v3359_v40, %s3016_s24 }
 0x913   : > { %v1675_v48 = vpop.xlane.xlu0 %1674 }
 0x917   : > { %v1669_v1 = vpop.xlane.xlu0 %1668 }
 0x91b   : > { %v1678_v36 = vpop.xlane.xlu1 %1677 }
 0x91c   : > { %2931 = vrcp.f32 %v1678_v36 }
 0x91d   : > { %2933 = vrcp.f32 %v1669_v1 }
 0x91e   : > { %2935 = vrcp.f32 %v1675_v48 }
 0x91f   : > { %v1672_v50 = vpop.xlane.xlu1 %1671  ;;  %v1687_v57 = vpop.xlane.xlu0 %1686 }
 0x920   : > { %2937 = vrcp.f32 %v1672_v50 }
 0x923   : > { %v1681_v44 = vpop.xlane.xlu0 %1680  ;;  %v1852_v23 = vpop.permute.xlu1 %1851 }
 0x926   : > { %v2932_v52 = vpop.eup %2931 }
 0x927   : > { %v2934_v28 = vpop.eup %2933  ;;  %v1702_v56 = vmul.f32 %v2932_v52, %v2920_v21  ;;  %v1854_v60 = vpop.permute.xlu1 %1853 }
 0x928   : > { %v2936_v29 = vpop.eup %2935  ;;  %v1699_v33 = vmul.f32 %v2934_v28, %v3557_v3  ;;  %v1876_v4 = vsel %vm900_vm1, %v1854_v60, 0 }
 0x929   : > { %v1701_v42 = vmul.f32 %v2936_v29, %v3553_v63  ;;  %v1873_v63 = vsel %vm900_vm1, %v1852_v23, 0 }
 0x92a   : > { %v2938_v53 = vpop.eup %2937 }
 0x92b   : > { %v1700_v32 = vmul.f32 %v2938_v53, %v2922_v8  ;;  %v1708_v40 = vpack.c.bf16 %v1702_v56, %v1701_v42 }
 0x92d   : > { %v1707_v11 = vpack.c.bf16 %v1700_v32, %v1699_v33 }
 0x92f   : > { %2696 = vmatprep.mubr.msk.bf16.mxu1 %vm380_vm0, %v1707_v11 }
 0x930   : > { %2697 = vmatmul.mubr.msk.bf16.vlgmr.msra.gmra.mrb[24].mxu1 %vm380_vm0, %v1708_v40 }
 0x94f   : > { %v1690_v58 = vpop.xlane.xlu0 %1689 }
 0x950   : > { %2939 = vrcp.f32 %v1690_v58 }
 0x951   : > { %2941 = vrcp.f32 %v1681_v44 }
 0x952   : > { %2943 = vrcp.f32 %v1687_v57 }
 0x953   : > { %v1850_v59 = vpop.permute.xlu0 %1849 }
 0x954   : > { %v1870_v61 = vsel %vm900_vm1, %v1850_v59, 0  ;;  %2772 = vmatprep.subr.msk.bf16.mxu1 %vm900_vm1, %v1850_v59 }
 0x955   : > { %2705 = vmatpush3.bf16.xpose.msra.mxu1 %v1870_v61 }
 0x956   : > { %2773 = vmatprep.subr.msk.bf16.mxu1 %vm900_vm1, %v1852_v23 }
 0x957   : > { %v1842_v9 = vpop.permute.xlu0 %1841 }
 0x958   : > { %v1684_v62 = vpop.xlane.xlu1 %1683 }
 0x959   : > { %2945 = vrcp.f32 %v1684_v62 }
 0x95a   : > { %v2940_v17 = vpop.eup %2939 }
 0x95b   : > { %v2942_v37 = vpop.eup %2941  ;;  %v1706_v3 = vmul.f32 %v2940_v17, %v2928_v46 }
 0x95c   : > { %v2944_v35 = vpop.eup %2943  ;;  %v1703_v5 = vmul.f32 %v2942_v37, %v3567_v25  ;;  %v1856_v7 = vpop.permute.xlu1 %1855 }
 0x95d   : > { %2707 = vmatpush3.bf16.xpose.msra.mxu1 %v1873_v63  ;;  %v1705_v21 = vmul.f32 %v2944_v35, %v3562_v12  ;;  %v1879_v45 = vsel %vm900_vm1, %v1856_v7, 0  ;;  %v1846_v25 = vpop.permute.xlu0 %1845 }
 0x95e   : > { %2774 = vmatprep.subr.msk.bf16.mxu1 %vm900_vm1, %v1854_v60 }
 0x95f   : > { %v1710_v8 = vpack.c.bf16 %v1706_v3, %v1705_v21 }
 0x960   : > { %v1844_v13 = vpop.permute.xlu1 %1843 }
 0x963   : > { %v2946_v2 = vpop.eup %2945 }
 0x964   : > { %v1704_v6 = vmul.f32 %v2946_v2, %v2930_v49  ;;  %v1848_v12 = vpop.permute.xlu1 %1847 }
 0x965   : > { %2709 = vmatpush3.bf16.xpose.msra.mxu1 %v1876_v4 }
 0x966   : > { %2775 = vmatprep.subr.msk.bf16.mxu1 %vm900_vm1, %v1856_v7  ;;  %v1709_v47 = vpack.c.bf16 %v1704_v6, %v1703_v5 }
 0x968   : > { %2700 = vmatprep.mubr.msk.bf16.mxu1 %vm380_vm0, %v1709_v47 }
 0x969   : > { %2701 = vmatmul.mubr.msk.bf16.gmra.mrb[28].mxu1 %vm380_vm0, %v1710_v8 }
 0x96a   : > { %2712 = vmatprep.mubr.msk.bf16.mxu1 %vm900_vm1, %v1842_v9 }
 0x96d   : > { %2711 = vmatpush3.bf16.xpose.msra.mxu1 %v1879_v45 }
 0x974   : > { %2713 = vmatmul.mubr.msk.bf16.vlgmr.msra.gmra.mrb[32].mxu1 %vm900_vm1, %v1844_v13 }
 0x975   : > { %2716 = vmatprep.mubr.msk.bf16.mxu1 %vm900_vm1, %v1846_v25 }
 0x97c   : > { %2717 = vmatmul.mubr.msk.bf16.gmra.mrb[36].mxu1 %vm900_vm1, %v1848_v12 }
 0xa03   : > { %v3603_v31 = vpop.f32.mrb[24].mxu1 }
 0xa04   : > { %v3605_v55 = vpop.f32.mrb[25].mxu1 }
 0xa05   : > { %v3607_v34 = vpop.f32.mrb[26].mxu1 }
 0xa06   : > { %v3609_v20 = vpop.f32.mrb[27].mxu1 }
 0xa3c   : > { %v3611_v0 = vpop.f32.mrb[28].mxu1 }
 0xa3d   : > { %v3613_v38 = vpop.f32.mrb[29].mxu1 }
 0xa3e   : > { %v3615_v41 = vpop.f32.mrb[30].mxu1 }
 0xa3f   : > { %v3617_v43 = vpop.f32.mrb[31].mxu1 }
 0xa47   : > { %v2714_v46 = vpop.f32.mrb[32].mxu1 }
 0xa48   : > { %v1915_v24 = vpop.f32.mrb[33].mxu1  ;;  %v1952_v36 = vsel %vm380_vm0, %v2714_v46, -inf }
 0xa49   : > { %v2715_v49 = vpop.f32.mrb[34].mxu1  ;;  %v1946_v10 = vsel %vm380_vm0, %v1915_v24, -inf }
 0xa4a   : > { %1947 = vmax.xlane.f32.xlu0 %v1946_v10  ;;  %v1918_v48 = vpop.f32.mrb[35].mxu1  ;;  %v1955_v29 = vsel %vm380_vm0, %v2715_v49, -inf }
 0xa4b   : > { %v1949_v1 = vsel %vm380_vm0, %v1918_v48, -inf }
 0xa4c   : > { %1950 = vmax.xlane.f32.xlu1 %v1949_v1 }
 0xa4e   : > { %1953 = vmax.xlane.f32.xlu0 %v1952_v36 }
 0xa4f   : > { %v2718_v50 = vpop.f32.mrb[36].mxu1 }
 0xa50   : > { %v1931_v52 = vpop.f32.mrb[37].mxu1  ;;  %v1964_v42 = vsel %vm380_vm0, %v2718_v50, -inf }
 0xa51   : > { %v3622_v28 = vpop.f32.mrb[38].mxu1  ;;  %v1958_v33 = vsel %vm380_vm0, %v1931_v52, -inf }
 0xa52   : > { %1956 = vmax.xlane.f32.xlu0 %v1955_v29  ;;  %v3625_v53 = vpop.f32.mrb[39].mxu1  ;;  %v1967_v32 = vsel %vm380_vm0, %v3622_v28, -inf }
 0xa53   : > { %v1961_v56 = vsel %vm380_vm0, %v3625_v53, -inf }
 0xa54   : > { %1962 = vmax.xlane.f32.xlu1 %v1961_v56 }
 0xa56   : > { %1959 = vmax.xlane.f32.xlu0 %v1958_v33 }
 0xa58   : > { %1968 = vmax.xlane.f32.xlu1 %v1967_v32 }
 0xa5a   : > { %1965 = vmax.xlane.f32.xlu0 %v1964_v42 }
 0xad7   : > { %v1948_v11 = vpop.xlane.xlu0 %1947 }
 0xad8   : > { %v1970_v40 = vsub.f32 %v1915_v24, %v1948_v11 }
 0xad9   : > { %v1951_v57 = vpop.xlane.xlu1 %1950 }
 0xada   : > { %v1978_v58 = vmul.f32 1.442695, %v1970_v40  ;;  %v1971_v59 = vsub.f32 %v1918_v48, %v1951_v57 }
 0xadb   : > { %v1954_v44 = vpop.xlane.xlu0 %1953 }
 0xadc   : > { %v1972_v23 = vsub.f32 %v2714_v46, %v1954_v44  ;;  %v1980_v63 = vmul.f32 1.442695, %v1971_v59 }
 0xade   : > { %v1982_v60 = vmul.f32 1.442695, %v1972_v23 }
 0xadf   : > { %v1957_v61 = vpop.xlane.xlu0 %1956 }
 0xae0   : > { %2947 = vpow2.f32 %v1982_v60  ;;  %v1973_v62 = vsub.f32 %v2715_v49, %v1957_v61 }
 0xae1   : > { %2949 = vpow2.f32 %v1978_v58  ;;  %v1963_v49 = vpop.xlane.xlu1 %1962 }
 0xae2   : > { %v1984_v17 = vmul.f32 1.442695, %v1973_v62  ;;  %v1975_v1 = vsub.f32 %v3625_v53, %v1963_v49 }
 0xae3   : > { %v1960_v37 = vpop.xlane.xlu0 %1959 }
 0xae4   : > { %2951 = vpow2.f32 %v1984_v17  ;;  %v1974_v35 = vsub.f32 %v1931_v52, %v1960_v37 }
 0xae5   : > { %2953 = vpow2.f32 %v1980_v63  ;;  %v1969_v10 = vpop.xlane.xlu1 %1968 }
 0xae6   : > { %v1986_v5 = vmul.f32 1.442695, %v1974_v35  ;;  %v1977_v48 = vsub.f32 %v3622_v28, %v1969_v10 }
 0xae7   : > { %v1966_v2 = vpop.xlane.xlu0 %1965 }
 0xae8   : > { %v1976_v3 = vsub.f32 %v2718_v50, %v1966_v2  ;;  %v1992_v36 = vmul.f32 1.442695, %v1977_v48  ;;  %v1988_v50 = vmul.f32 1.442695, %v1975_v1 }
 0xaea   : > { %v3633_v4 = vpop.eup %2947  ;;  %v1990_v6 = vmul.f32 1.442695, %v1976_v3 }
 0xaeb   : > { %v2000_v7 = vsel %vm380_vm0, %v3633_v4, 0.0  ;;  %v3637_v21 = vpop.eup %2949 }
 0xaec   : > { %2955 = vpow2.f32 %v1990_v6  ;;  %2001 = vadd.xlane.f32.xlu0 %v2000_v7  ;;  %v1994_v8 = vsel %vm380_vm0, %v3637_v21, 0.0 }
 0xaed   : > { %2957 = vpow2.f32 %v1986_v5 }
 0xaee   : > { %v3639_v47 = vpop.eup %2951  ;;  %2959 = vpow2.f32 %v1992_v36 }
 0xaef   : > { %v2003_v9 = vsel %vm380_vm0, %v3639_v47, 0.0  ;;  %v2954_v45 = vpop.eup %2953  ;;  %2961 = vpow2.f32 %v1988_v50 }
 0xaf0   : > { %1995 = vadd.xlane.f32.xlu0 %v1994_v8  ;;  %2004 = vadd.xlane.f32.xlu1 %v2003_v9  ;;  %v1997_v13 = vsel %vm380_vm0, %v2954_v45, 0.0 }
 0xaf4   : > { %1998 = vadd.xlane.f32.xlu1 %v1997_v13  ;;  %v2816_v13 = vld [vmem:[%s3799_s6 + $0x8] sm:$0xff]  }
 0xaf6   : > { %v3646_v25 = vpop.eup %2955 }
 0xaf7   : > { %v2012_v12 = vsel %vm380_vm0, %v3646_v25, 0.0  ;;  %v3650_v46 = vpop.eup %2957 }
 0xaf8   : > { %2013 = vadd.xlane.f32.xlu0 %v2012_v12  ;;  %v2006_v24 = vsel %vm380_vm0, %v3650_v46, 0.0 }
 0xafc   : > { %2007 = vadd.xlane.f32.xlu0 %v2006_v24  ;;  %v2818_v24 = vld [vmem:[%s3799_s6 + $0x18] sm:$0xff]  }
 0xb05   : > { %2040 = vrot.lane.b32.xlu1 %v3331_v14, %s3017_s25  ;;  %v3665_v14 = vpop.eup %2959 }
 0xb09   : > { %2042 = vrot.lane.b32.xlu1 %v3343_v16, %s3017_s25  ;;  %v3671_v16 = vpop.eup %2961 }
 0xb12   : > { %2038 = vrot.lane.b32.xlu0 %v3333_v15, %s3017_s25  ;;  %v2015_v15 = vsel %vm380_vm0, %v3665_v14, 0.0 }
 0xb16   : > { %1481 = vrot.lane.b32.xlu0 %v3517_v51, %s3017_s25 }
 0xb1a   : > { %1489 = vrot.lane.b32.xlu0 %v3525_v26, %s3017_s25 }
 0xb1e   : > { %1485 = vrot.lane.b32.xlu0 %v3515_v39, %s3017_s25  ;;  %v2009_v39 = vsel %vm380_vm0, %v3671_v16, 0.0 }
 0xb22   : > { %1493 = vrot.lane.b32.xlu0 %v3523_v22, %s3017_s25 }
 0xb26   : > { %1808 = vrot.lane.b32.xlu0 %v3605_v55, %s3015_s23 }
 0xb2a   : > { %1816 = vrot.lane.b32.xlu0 %v3613_v38, %s3015_s23 }
 0xb2d   : > { %2016 = vadd.xlane.f32.xlu1 %v2015_v15 }
 0xb2e   : > { %1812 = vrot.lane.b32.xlu0 %v3603_v31, %s3015_s23 }
 0xb31   : > { %2010 = vadd.xlane.f32.xlu1 %v2009_v39 }
 0xb32   : > { %1820 = vrot.lane.b32.xlu0 %v3611_v0, %s3015_s23 }
 0xb42   : > { %2044 = vrot.lane.b32.xlu1 %v3341_v54, %s3017_s25 }
 0xb46   : > { %1483 = vrot.lane.b32.xlu1 %v3521_v19, %s3017_s25 }
 0xb4a   : > { %1491 = vrot.lane.b32.xlu1 %v3529_v30, %s3017_s25 }
 0xb4e   : > { %1487 = vrot.lane.b32.xlu1 %v3519_v18, %s3017_s25 }
 0xb52   : > { %1495 = vrot.lane.b32.xlu1 %v3527_v27, %s3017_s25 }
 0xb56   : > { %1810 = vrot.lane.b32.xlu1 %v3609_v20, %s3015_s23 }
 0xb5a   : > { %1818 = vrot.lane.b32.xlu1 %v3617_v43, %s3015_s23 }
 0xb5e   : > { %1814 = vrot.lane.b32.xlu1 %v3607_v34, %s3015_s23 }
 0xb62   : > { %1822 = vrot.lane.b32.xlu1 %v3615_v41, %s3015_s23 }
 0xb79   : > { %v2002_v54 = vpop.xlane.xlu0 %2001 }
 0xb7d   : > { %v2005_v51 = vpop.xlane.xlu1 %2004  ;;  %v1996_v19 = vpop.xlane.xlu0 %1995 }
 0xb7e   : > { %2963 = vrcp.f32 %v1996_v19 }
 0xb81   : > { %v1999_v22 = vpop.xlane.xlu1 %1998 }
 0xb82   : > { %2965 = vrcp.f32 %v1999_v22 }
 0xb83   : > { %2967 = vrcp.f32 %v2005_v51 }
 0xb84   : > { %2969 = vrcp.f32 %v2002_v54 }
 0xb85   : > { %v2014_v18 = vpop.xlane.xlu0 %2013  ;;  %v2041_v31 = vpop.permute.xlu1 %2040 }
 0xb88   : > { %v2964_v27 = vpop.eup %2963 }
 0xb89   : > { %v2008_v26 = vpop.xlane.xlu0 %2007  ;;  %v2026_v20 = vmul.f32 %v2964_v27, %v3637_v21  ;;  %v2043_v41 = vpop.permute.xlu1 %2042 }
 0xb8c   : > { %v2966_v30 = vpop.eup %2965 }
 0xb8d   : > { %v2039_v55 = vpop.permute.xlu0 %2038  ;;  %v2027_v0 = vmul.f32 %v2966_v30, %v2954_v45  ;;  %v2968_v42 = vpop.eup %2967  ;;  %v2815_v45 = vld [vmem:[%s3799_s6] sm:$0xff]  }
 0xb8e   : > { %2720 = vmatprep.subr.bf16.mxu0 %v2039_v55  ;;  %v2970_v40 = vpop.eup %2969  ;;  %v2029_v57 = vmul.f32 %v2968_v42, %v3639_v47  ;;  %2752 = vmatprep.subr.bf16.mxu1 %v2815_v45 }
 0xb8f   : > { %2721 = vmatpush3.bf16.msra.mxu0 %v2039_v55  ;;  %v2034_v34 = vpack.c.bf16 %v2027_v0, %v2026_v20  ;;  %v2028_v23 = vmul.f32 %v2970_v40, %v3633_v4  ;;  %2756 = vmatpush3.bf16.msra.mxu1 %v2815_v45 }
 0xb90   : > { %2722 = vmatprep.subr.bf16.mxu0 %v2041_v31  ;;  %2753 = vmatprep.subr.bf16.mxu1 %v2816_v13 }
 0xb91   : > { %2728 = vmatprep.mubr.msk.bf16.mxu0 %vm380_vm0, %v2034_v34  ;;  %v1482_v38 = vpop.permute.xlu0 %1481  ;;  %v2035_v58 = vpack.c.bf16 %v2029_v57, %v2028_v23  ;;  %v2980_v57 = vld [vmem:[%s3104_s15] sm:$0xff] }
 0xb92   : > { %1506 = vst.msk [vmem:[#allocation3] sm:$0xff] %vm1505_vm2, %v1482_v38 }
 0xb93   : > { %2723 = vmatpush3.bf16.msra.mxu0 %v2041_v31  ;;  %2757 = vmatpush3.bf16.msra.mxu1 %v2816_v13 }
 0xb94   : > { %2724 = vmatprep.subr.bf16.mxu0 %v2043_v41 }
 0xb95   : > { %v1490_v43 = vpop.permute.xlu0 %1489 }
 0xb96   : > { %1510 = vst.msk [vmem:[#allocation3 + $0x20] sm:$0xff] %vm1505_vm2, %v1490_v43 }
 0xb97   : > { %2725 = vmatpush3.bf16.msra.mxu0 %v2043_v41 }
 0xb99   : > { %v1486_v52 = vpop.permute.xlu0 %1485 }
 0xb9a   : > { %1508 = vst.msk [vmem:[#allocation3 + $0x10] sm:$0xff] %vm1505_vm2, %v1486_v52  ;;  %v2474_v52 = vld [vmem:[%s3800_s7] ss:$0 sm:$0xff] }
 0xb9d   : > { %v1494_v28 = vpop.permute.xlu0 %1493 }
 0xb9e   : > { %1512 = vst.msk [vmem:[#allocation3 + $0x30] sm:$0xff] %vm1505_vm2, %v1494_v28 }
 0xba1   : > { %v1809_v29 = vpop.permute.xlu0 %1808 }
 0xba2   : > { %1833 = vst.msk [vmem:[#allocation3] sm:$0xff] %vm1832_vm3, %v1809_v29 }
 0xba5   : > { %v1817_v53 = vpop.permute.xlu0 %1816 }
 0xba6   : > { %1837 = vst.msk [vmem:[#allocation3 + $0x20] sm:$0xff] %vm1832_vm3, %v1817_v53 }
 0xba9   : > { %v1813_v56 = vpop.permute.xlu0 %1812 }
 0xbaa   : > { %1835 = vst.msk [vmem:[#allocation3 + $0x10] sm:$0xff] %vm1832_vm3, %v1813_v56 }
 0xbad   : > { %v1821_v33 = vpop.permute.xlu0 %1820 }
 0xbae   : > { %1839 = vst.msk [vmem:[#allocation3 + $0x30] sm:$0xff] %vm1832_vm3, %v1821_v33 }
 0xbba   : > { %v2017_v32 = vpop.xlane.xlu1 %2016 }
 0xbbb   : > { %2971 = vrcp.f32 %v2017_v32  ;;  %v2979_v32 = vld [vmem:[%s3104_s15 + $0x10] sm:$0xff] }
 0xbbc   : > { %2973 = vrcp.f32 %v2008_v26 }
 0xbbd   : > { %2975 = vrcp.f32 %v2014_v18 }
 0xbbe   : > { %v2011_v11 = vpop.xlane.xlu1 %2010 }
 0xbbf   : > { %2977 = vrcp.f32 %v2011_v11 }
 0xbc2   : > { %v2045_v44 = vpop.permute.xlu1 %2044 }
 0xbc3   : > { %2726 = vmatprep.subr.bf16.mxu0 %v2045_v44 }
 0xbc4   : > { %2727 = vmatpush3.bf16.msra.mxu0 %v2045_v44 }
 0xbc5   : > { %v2972_v59 = vpop.eup %2971  ;;  %2736 = vmatprep.subr.bf16.mxu0 %v2815_v45 }
 0xbc6   : > { %v1484_v60 = vpop.permute.xlu1 %1483  ;;  %v2974_v61 = vpop.eup %2973  ;;  %v2033_v17 = vmul.f32 %v2972_v59, %v3665_v14 }
 0xbc7   : > { %1507 = vst.msk [vmem:[#allocation3 + $0x8] sm:$0xff] %vm1505_vm2, %v1484_v60  ;;  %2729 = vmatmul.mubr.msk.bf16.vlgmr.msra.gmra.mrb[32].mxu0 %vm380_vm0, %v2035_v58  ;;  %v2976_v62 = vpop.eup %2975  ;;  %v2030_v35 = vmul.f32 %v2974_v61, %v3650_v46  ;;  %v2981_v58 = vld [vmem:[%s3104_s15 + $0x18] sm:$0xff]  ;;  %v2982_v60 = vld [vmem:[%s3104_s15 + $0x8] sm:$0xff] }
 0xbc8   : > { %v2032_v3 = vmul.f32 %v2976_v62, %v3646_v25  ;;  %2737 = vmatpush3.bf16.msra.mxu0 %v2815_v45  ;;  %v2817_v25 = vld [vmem:[%s3799_s6 + $0x10] sm:$0xff]  }
 0xbc9   : > { %v2978_v63 = vpop.eup %2977  ;;  %2738 = vmatprep.subr.bf16.mxu0 %v2816_v13  ;;  %2754 = vmatprep.subr.bf16.mxu1 %v2817_v25 }
 0xbca   : > { %v1492_v37 = vpop.permute.xlu1 %1491  ;;  %v2031_v2 = vmul.f32 %v2978_v63, %v3671_v16  ;;  %v2037_v5 = vpack.c.bf16 %v2033_v17, %v2032_v3  ;;  %2758 = vmatpush3.bf16.msra.mxu1 %v2817_v25 }
 0xbcb   : > { %1511 = vst.msk [vmem:[#allocation3 + $0x28] sm:$0xff] %vm1505_vm2, %v1492_v37  ;;  %2755 = vmatprep.subr.bf16.mxu1 %v2818_v24 }
 0xbcc   : > { %v2036_v4 = vpack.c.bf16 %v2031_v2, %v2030_v35  ;;  %2739 = vmatpush3.bf16.msra.mxu0 %v2816_v13  ;;  %v2983_v2 = vld [vmem:[%s3104_s15 + $0x30] sm:$0xff] }
 0xbcd   : > { %2740 = vmatprep.subr.bf16.mxu0 %v2817_v25 }
 0xbce   : > { %v1488_v6 = vpop.permute.xlu1 %1487  ;;  %2732 = vmatprep.mubr.msk.bf16.mxu0 %vm380_vm0, %v2036_v4  ;;  %2759 = vmatpush3.bf16.msra.mxu1 %v2818_v24 }
 0xbcf   : > { %1509 = vst.msk [vmem:[#allocation3 + $0x18] sm:$0xff] %vm1505_vm2, %v1488_v6  ;;  %2733 = vmatmul.mubr.msk.bf16.gmra.mrb[36].mxu0 %vm380_vm0, %v2037_v5  ;;  %v2984_v6 = vld [vmem:[%s3104_s15 + $0x20] sm:$0xff] }
 0xbd0   : > { %2741 = vmatpush3.bf16.msra.mxu0 %v2817_v25 }
 0xbd1   : > { %2742 = vmatprep.subr.bf16.mxu0 %v2818_v24 }
 0xbd2   : > { %v1496_v7 = vpop.permute.xlu1 %1495 }
 0xbd3   : > { %1513 = vst.msk [vmem:[#allocation3 + $0x38] sm:$0xff] %vm1505_vm2, %v1496_v7 }
 0xbd4   : > { %2743 = vmatpush3.bf16.msra.mxu0 %v2818_v24 }
 0xbd6   : > { %v1811_v21 = vpop.permute.xlu1 %1810 }
 0xbd7   : > { %1834 = vst.msk [vmem:[#allocation3 + $0x8] sm:$0xff] %vm1832_vm3, %v1811_v21 }
 0xbda   : > { %v1819_v47 = vpop.permute.xlu1 %1818 }
 0xbdb   : > { %1838 = vst.msk [vmem:[#allocation3 + $0x28] sm:$0xff] %vm1832_vm3, %v1819_v47  ;;  %v2985_v47 = vld [vmem:[%s3104_s15 + $0x38] sm:$0xff] }
 0xbde   : > { %v1815_v8 = vpop.permute.xlu1 %1814 }
 0xbdf   : > { %1836 = vst.msk [vmem:[#allocation3 + $0x18] sm:$0xff] %vm1832_vm3, %v1815_v8 }
 0xbe2   : > { %v1823_v9 = vpop.permute.xlu1 %1822 }
 0xbe3   : > { %1840 = vst.msk [vmem:[#allocation3 + $0x38] sm:$0xff] %vm1832_vm3, %v1823_v9  ;;  %v2986_v9 = vld [vmem:[%s3104_s15 + $0x28] sm:$0xff] }
 0xc9a   : > { %v2730_v12 = vpop.f32.mrb[32].mxu0 }
 0xc9b   : > { %2139 = vrot.lane.b32.xlu0 %v2730_v12, %s3013_s21  ;;  %v2096_v46 = vpop.f32.mrb[33].mxu0 }
 0xc9c   : > { %v2731_v49 = vpop.f32.mrb[34].mxu0 }
 0xc9d   : > { %2141 = vrot.lane.b32.xlu1 %v2731_v49, %s3013_s21  ;;  %v2099_v10 = vpop.f32.mrb[35].mxu0 }
 0xc9f   : > { %2135 = vrot.lane.b32.xlu0 %v2096_v46, %s3013_s21 }
 0xca1   : > { %2137 = vrot.lane.b32.xlu1 %v2099_v10, %s3013_s21 }
 0xca2   : > { %v2734_v48 = vpop.f32.mrb[36].mxu0 }
 0xca3   : > { %v2112_v1 = vpop.f32.mrb[37].mxu0 }
 0xca4   : > { %2143 = vrot.lane.b32.xlu0 %v2112_v1, %s3013_s21  ;;  %v2735_v36 = vpop.f32.mrb[38].mxu0 }
 0xca5   : > { %v2115_v50 = vpop.f32.mrb[39].mxu0 }
 0xca6   : > { %2145 = vrot.lane.b32.xlu1 %v2115_v50, %s3013_s21 }
 0xca8   : > { %2147 = vrot.lane.b32.xlu0 %v2734_v48, %s3013_s21 }
 0xcaa   : > { %2149 = vrot.lane.b32.xlu1 %v2735_v36, %s3013_s21  ;;  %s3758_s21 = scalar_lea.vmem %s3801_s8, %s3081_s9 }
 0xd0d   : > { %v2140_v14 = vpop.permute.xlu0 %2139 }
 0xd0e   : > { %2162 = vst.msk [vmem:[#allocation3 + $0x10] sm:$0xff] %vm2159_vm4, %v2140_v14 }
 0xd0f   : > { %v2142_v15 = vpop.permute.xlu1 %2141 }
 0xd10   : > { %2163 = vst.msk [vmem:[#allocation3 + $0x18] sm:$0xff] %vm2159_vm4, %v2142_v15 }
 0xd11   : > { %v2136_v16 = vpop.permute.xlu0 %2135 }
 0xd12   : > { %2160 = vst.msk [vmem:[#allocation3] sm:$0xff] %vm2159_vm4, %v2136_v16 }
 0xd13   : > { %v2138_v39 = vpop.permute.xlu1 %2137 }
 0xd14   : > { %2161 = vst.msk [vmem:[#allocation3 + $0x8] sm:$0xff] %vm2159_vm4, %v2138_v39 }
 0xd15   : > { %v2170_v31 = vld [vmem:[#allocation3 + $0x10] sm:$0xff] }
 0xd16   : > { %v2144_v54 = vpop.permute.xlu0 %2143 }
 0xd17   : > { %2164 = vst.msk [vmem:[#allocation3 + $0x20] sm:$0xff] %vm2159_vm4, %v2144_v54  ;;  %v2171_v22 = vld [vmem:[#allocation3 + $0x18] sm:$0xff] }
 0xd18   : > { %v2146_v51 = vpop.permute.xlu1 %2145  ;;  %v2177_v55 = vpack.c.bf16 %v2171_v22, %v2170_v31 }
 0xd19   : > { %2165 = vst.msk [vmem:[#allocation3 + $0x28] sm:$0xff] %vm2159_vm4, %v2146_v51  ;;  %v2168_v18 = vld [vmem:[#allocation3] sm:$0xff] }
 0xd1a   : > { %v2148_v19 = vpop.permute.xlu0 %2147 }
 0xd1b   : > { %2166 = vst.msk [vmem:[#allocation3 + $0x30] sm:$0xff] %vm2159_vm4, %v2148_v19  ;;  %v2169_v26 = vld [vmem:[#allocation3 + $0x8] sm:$0xff] }
 0xd1c   : > { %v2150_v27 = vpop.permute.xlu1 %2149  ;;  %v2176_v30 = vpack.c.bf16 %v2169_v26, %v2168_v18 }
 0xd1d   : > { %2167 = vst.msk [vmem:[#allocation3 + $0x38] sm:$0xff] %vm2159_vm4, %v2150_v27 }
 0xd1e   : > { %2744 = vmatprep.mubr.msk.bf16.mxu0 %vm380_vm0, %v2176_v30  ;;  %v2172_v20 = vld [vmem:[#allocation3 + $0x20] sm:$0xff] }
 0xd1f   : > { %2745 = vmatmul.mubr.msk.bf16.vlgmr.msra.gmra.mrb[40].mxu0 %vm380_vm0, %v2177_v55 }
 0xd20   : > { %v2173_v0 = vld [vmem:[#allocation3 + $0x28] sm:$0xff] }
 0xd21   : > { %v2178_v34 = vpack.c.bf16 %v2173_v0, %v2172_v20 }
 0xd22   : > { %v2174_v38 = vld [vmem:[#allocation3 + $0x30] sm:$0xff] }
 0xd23   : > { %2748 = vmatprep.mubr.msk.bf16.mxu1 %vm380_vm0, %v2178_v34 }
 0xd24   : > { %v2175_v41 = vld [vmem:[#allocation3 + $0x38] sm:$0xff] }
 0xd25   : > { %v2179_v43 = vpack.c.bf16 %v2175_v41, %v2174_v38 }
 0xd27   : > { %2749 = vmatmul.mubr.msk.bf16.vlgmr.msra.gmra.mrb[40].mxu1 %vm380_vm0, %v2179_v43 }
 0xdf2   : > { %v2746_v28 = vpop.f32.mrb[40].mxu0 }
 0xdf3   : > { %v2274_v29 = vadd.f32 %v2746_v28, %v2474_v52  ;;  %v2265_v53 = vpop.f32.mrb[41].mxu0 }
 0xdf4   : > { %v2266_v56 = vadd.f32 %v2474_v52, %v2265_v53  ;;  %v2747_v33 = vpop.f32.mrb[42].mxu0 }
 0xdf5   : > { %v2298_v42 = vadd.f32 %v2979_v32, %v2274_v29  ;;  %v2277_v11 = vadd.f32 %v2747_v33, %v2474_v52  ;;  %v2268_v40 = vpop.f32.mrb[43].mxu0 }
 0xdf6   : > { %v2296_v44 = vadd.f32 %v2980_v57, %v2266_v56  ;;  %v2269_v23 = vadd.f32 %v2474_v52, %v2268_v40 }
 0xdf7   : > { %2306 = vst.msk [vmem:[%s3758_s21 + $0x10] sm:$0xff] %vm380_vm0, %v2298_v42  ;;  %v2299_v59 = vadd.f32 %v2981_v58, %v2277_v11 }
 0xdf8   : > { %2304 = vst.msk [vmem:[%s3758_s21] sm:$0xff] %vm380_vm0, %v2296_v44  ;;  %v2297_v61 = vadd.f32 %v2982_v60, %v2269_v23 }
 0xdf9   : > { %2307 = vst.msk [vmem:[%s3758_s21 + $0x18] sm:$0xff] %vm380_vm0, %v2299_v59 }
 0xdfa   : > { %2305 = vst.msk [vmem:[%s3758_s21 + $0x8] sm:$0xff] %vm380_vm0, %v2297_v61  ;;  %v2750_v62 = vpop.f32.mrb[40].mxu1 }
 0xdfb   : > { %v2290_v63 = vadd.f32 %v2750_v62, %v2474_v52  ;;  %v2281_v17 = vpop.f32.mrb[41].mxu1 }
 0xdfc   : > { %v2282_v37 = vadd.f32 %v2474_v52, %v2281_v17  ;;  %v2751_v35 = vpop.f32.mrb[42].mxu1 }
 0xdfd   : > { %v2302_v3 = vadd.f32 %v2983_v2, %v2290_v63  ;;  %v2293_v4 = vadd.f32 %v2751_v35, %v2474_v52  ;;  %v2284_v5 = vpop.f32.mrb[43].mxu1 }
 0xdfe   : > { %v2300_v7 = vadd.f32 %v2984_v6, %v2282_v37  ;;  %v2285_v21 = vadd.f32 %v2474_v52, %v2284_v5 }
 0xdff   : > { %2310 = vst.msk [vmem:[%s3758_s21 + $0x30] sm:$0xff] %vm380_vm0, %v2302_v3  ;;  %v2303_v8 = vadd.f32 %v2985_v47, %v2293_v4 }
 0xe00   : > { %2308 = vst.msk [vmem:[%s3758_s21 + $0x20] sm:$0xff] %vm380_vm0, %v2300_v7  ;;  %v2301_v45 = vadd.f32 %v2986_v9, %v2285_v21 }
 0xe01   : > { %2311 = vst.msk [vmem:[%s3758_s21 + $0x38] sm:$0xff] %vm380_vm0, %v2303_v8 }
 0xe02   : > { %2309 = vst.msk [vmem:[%s3758_s21 + $0x28] sm:$0xff] %vm380_vm0, %v2301_v45 }
 0xe03 PF: > { %s18_s29 = sadd.s32 1, %s3009_s29   ;;  %s3802_s27 = smov %s3005_s28 }
 0xe04   : > { %p15_p5 = scmp.ge.s32.totalorder %s18_s29, 4   ;;  %s3803_s28 = smov %s3805_s30 }
 0xe06   :  { %17 = sbr.rel (!%p15_p5) target bundleno = 2 (0x2), region = 89 }

// kernel: run.16
= control target key start
LH: loop header
LB: loop body
LE: loop exit
PB: predicated region body
PF: predicated region fallthrough
CT: control target
= control target key end

     0   :  { %s1411_s24 = smov 0   ;;  %s1866_s0 = inlined_call_operand.vmem [shape: f32[128,64], index: 0, kind: input, shape index: {}]   ;;  %s1867_s1 = inlined_call_operand.vmem [shape: f32[1,64], index: 1, kind: input, shape index: {}]   ;;  %s1868_s2 = inlined_call_operand.vmem [shape: f32[1,64], index: 2, kind: input, shape index: {}]   ;;  %s1869_s3 = inlined_call_operand.vmem [shape: bf16[64,512], index: 3, kind: input, shape index: {}]   ;;  %s1870_s4 = inlined_call_operand.vmem [shape: f32[1,512], index: 4, kind: input, shape index: {}]   ;;  %s1871_s5 = inlined_call_operand.vmem [shape: bf16[256,64], index: 5, kind: input, shape index: {}]   ;;  %s1872_s6 = inlined_call_operand.vmem [shape: f32[1,64], index: 6, kind: input, shape index: {}]   ;;  %s1873_s7 = inlined_call_operand.vmem [shape: f32[128,64], index: 7, kind: output, shape index: {}]  }
   0x1 LB: > { %s1147_s25 = sadd.s32 4294967295, %s1368_s24   ;;  %p1151_p0 = scmp.ge.s32.totalorder %s1368_s24, 1  ;;  %s1368_s24 = sphi %s1411_s24, %s17_s24  }
   0x2   : > { %p238_p1 = scmp.lt.s32.totalorder %s1368_s24, 3 }
   0x4   : > { %p239_p2 = pnand %p1151_p0, %p238_p1 }
   0x5   : > { %s1152_s26 = sshll.u32 (!%p239_p2), %s1147_s25, 3  ;;  %vm293_vm0 = vcmask (!%p239_p2), 523264   ;;  %v1266_v56 = vld [vmem:[%s1869_s3 + $0x4] ss:$16 sps:$4 sm:$0xff] (!%p239_p2)   ;;  %v1268_v57 = vld [vmem:[%s1869_s3 + $0xc] ss:$16 sps:$4 sm:$0xff] (!%p239_p2)  }
   0x6   : > { %242 = sbr.rel (%p239_p2) target bundleno = 835 (0x343), region = 48  ;;  %p271_p3 = scmp.lt.s32.totalorder (!%p239_p2), %s1152_s26, 15  ;;  %v1270_v58 = vld [vmem:[%s1869_s3] ss:$16 sps:$4 sm:$0xff] (!%p239_p2)   ;;  %v1271_v59 = vld [vmem:[%s1869_s3 + $0x8] ss:$16 sps:$4 sm:$0xff] (!%p239_p2)   ;;  %561 = vmatprep.subr.bf16.mxu0 (!%p239_p2), %v1266_v56  ;;  %634 = vmatprep.subr.bf16.mxu1 (!%p239_p2), %v1268_v57 }
   0x7   : > { %562 = vmatpush1.bf16.msra.mxu0 (!%p239_p2), %v1270_v58  ;;  %635 = vmatpush1.bf16.msra.mxu1 (!%p239_p2), %v1271_v59  ;;  %v1272_v60 = vld [vmem:[%s1869_s3 + $0x24] ss:$16 sps:$4 sm:$0xff] (!%p239_p2)   ;;  %v1274_v61 = vld [vmem:[%s1869_s3 + $0x2c] ss:$16 sps:$4 sm:$0xff] (!%p239_p2)   ;;  %v1276_v62 = vld [vmem:[%s1869_s3 + $0x20] ss:$16 sps:$4 sm:$0xff] (!%p239_p2)  }
   0x8   : > { %v1277_v63 = vld [vmem:[%s1869_s3 + $0x28] ss:$16 sps:$4 sm:$0xff] (!%p239_p2)   ;;  %563 = vmatprep.subr.bf16.mxu0 (!%p239_p2), %v1272_v60  ;;  %636 = vmatprep.subr.bf16.mxu1 (!%p239_p2), %v1274_v61 }
   0xb   : > { %564 = vmatpush1.bf16.msra.mxu0 (!%p239_p2), %v1276_v62  ;;  %637 = vmatpush1.bf16.msra.mxu1 (!%p239_p2), %v1277_v63 }
   0xd   : > { %s1875_s26 = smov (!%p271_p3, %s1152_s26), 15 }
   0xe   : > { %s1153_s27 = sshll.u32 %s1875_s26, 3 }
   0xf   : > { %s1427_s30 = scalar_lea.vmem %s1866_s0, %s1153_s27  ;;  %s1837_s28 = scalar_lea.vmem %s1873_s7, %s1153_s27 }
  0x10   : > { %v283_v0 = vld [vmem:[%s1427_s30] sm:$0xff]  ;;  %v285_v1 = vld [vmem:[%s1427_s30 + $0x10] sm:$0xff]  ;;  %v284_v2 = vld [vmem:[%s1427_s30 + $0x8] sm:$0xff] }
  0x11   : > { %v294_v3 = vsel %vm293_vm0, %v283_v0, 0.0  ;;  %v300_v4 = vsel %vm293_vm0, %v285_v1, 0.0  ;;  %v286_v5 = vld [vmem:[%s1427_s30 + $0x18] sm:$0xff]  ;;  %v287_v6 = vld [vmem:[%s1427_s30 + $0x20] sm:$0xff]  ;;  %v288_v7 = vld [vmem:[%s1427_s30 + $0x28] sm:$0xff]  ;;  %v297_v8 = vsel %vm293_vm0, %v284_v2, 0.0 }
  0x12   : > { %295 = vadd.xlane.f32.xlu0 %v294_v3  ;;  %301 = vadd.xlane.f32.xlu1 %v300_v4  ;;  %v303_v9 = vsel %vm293_vm0, %v286_v5, 0.0  ;;  %v306_v10 = vsel %vm293_vm0, %v287_v6, 0.0  ;;  %v309_v11 = vsel %vm293_vm0, %v288_v7, 0.0  ;;  %v289_v12 = vld [vmem:[%s1427_s30 + $0x30] sm:$0xff]  ;;  %v290_v13 = vld [vmem:[%s1427_s30 + $0x38] sm:$0xff] }
  0x13   : > { %v312_v14 = vsel %vm293_vm0, %v289_v12, 0.0  ;;  %v315_v15 = vsel %vm293_vm0, %v290_v13, 0.0  ;;  %v1283_v3 = vld [vmem:[%s1869_s3 + $0x48] ss:$16 sps:$4 sm:$0xff]   ;;  %v1284_v4 = vld [vmem:[%s1869_s3 + $0x64] ss:$16 sps:$4 sm:$0xff]  }
  0x16   : > { %298 = vadd.xlane.f32.xlu0 %v297_v8  ;;  %304 = vadd.xlane.f32.xlu1 %v303_v9  ;;  %v1370_v8 = vmov 0  }
  0x17   : > { %593 = vmatprep.mubr.bf16.mxu0 %v1370_v8  ;;  %666 = vmatprep.mubr.bf16.mxu1 %v1370_v8 }
  0x1a   : > { %307 = vadd.xlane.f32.xlu0 %v306_v10  ;;  %310 = vadd.xlane.f32.xlu1 %v309_v11 }
  0x1e   : > { %313 = vadd.xlane.f32.xlu0 %v312_v14  ;;  %316 = vadd.xlane.f32.xlu1 %v315_v15 }
  0x9f   : > { %v296_v16 = vpop.xlane.xlu0 %295  ;;  %v302_v17 = vpop.xlane.xlu1 %301 }
  0xa0   : > { %v319_v18 = vmul.f32 0.015625, %v296_v16  ;;  %v321_v19 = vmul.f32 0.015625, %v302_v17 }
  0xa2   : > { %v1445_v20 = vsub.f32 %v283_v0, %v319_v18  ;;  %v1447_v21 = vsub.f32 %v285_v1, %v321_v19  ;;  %v1278_v0 = vld [vmem:[%s1869_s3 + $0x44] ss:$16 sps:$4 sm:$0xff]   ;;  %v1280_v1 = vld [vmem:[%s1869_s3 + $0x4c] ss:$16 sps:$4 sm:$0xff]  }
  0xa3   : > { %v299_v22 = vpop.xlane.xlu0 %298  ;;  %v305_v23 = vpop.xlane.xlu1 %304  ;;  %565 = vmatprep.subr.bf16.mxu0 %v1278_v0  ;;  %638 = vmatprep.subr.bf16.mxu1 %v1280_v1 }
  0xa4   : > { %v320_v24 = vmul.f32 0.015625, %v299_v22  ;;  %v322_v25 = vmul.f32 0.015625, %v305_v23  ;;  %v335_v26 = vmul.f32 %v1445_v20, %v1445_v20  ;;  %v337_v27 = vmul.f32 %v1447_v21, %v1447_v21  ;;  %639 = vmatpush1.bf16.msra.mxu1 %v1283_v3 }
  0xa6   : > { %v1453_v28 = vsub.f32 %v284_v2, %v320_v24  ;;  %v1455_v29 = vsub.f32 %v286_v5, %v322_v25  ;;  %v343_v30 = vsel %vm293_vm0, %v335_v26, 0.0  ;;  %v349_v33 = vsel %vm293_vm0, %v337_v27, 0.0  ;;  %v1282_v2 = vld [vmem:[%s1869_s3 + $0x40] ss:$16 sps:$4 sm:$0xff]   ;;  %v1286_v5 = vld [vmem:[%s1869_s3 + $0x6c] ss:$16 sps:$4 sm:$0xff]  }
  0xa7   : > { %344 = vadd.xlane.f32.xlu0 %v343_v30  ;;  %v308_v31 = vpop.xlane.xlu0 %307  ;;  %v311_v32 = vpop.xlane.xlu1 %310  ;;  %566 = vmatpush1.bf16.msra.mxu0 %v1282_v2 }
  0xa8   : > { %v323_v34 = vmul.f32 0.015625, %v308_v31  ;;  %v324_v35 = vmul.f32 0.015625, %v311_v32  ;;  %v336_v36 = vmul.f32 %v1453_v28, %v1453_v28  ;;  %v338_v37 = vmul.f32 %v1455_v29, %v1455_v29  ;;  %567 = vmatprep.subr.bf16.mxu0 %v1284_v4  ;;  %640 = vmatprep.subr.bf16.mxu1 %v1286_v5 }
  0xaa   : > { %v1463_v38 = vsub.f32 %v287_v6, %v323_v34  ;;  %v1465_v39 = vsub.f32 %v288_v7, %v324_v35  ;;  %v346_v40 = vsel %vm293_vm0, %v336_v36, 0.0  ;;  %v352_v43 = vsel %vm293_vm0, %v338_v37, 0.0  ;;  %v1288_v6 = vld [vmem:[%s1869_s3 + $0x60] ss:$16 sps:$4 sm:$0xff]   ;;  %v1289_v7 = vld [vmem:[%s1869_s3 + $0x68] ss:$16 sps:$4 sm:$0xff]  }
  0xab   : > { %350 = vadd.xlane.f32.xlu0 %v349_v33  ;;  %347 = vadd.xlane.f32.xlu1 %v346_v40  ;;  %v314_v41 = vpop.xlane.xlu0 %313  ;;  %v317_v42 = vpop.xlane.xlu1 %316  ;;  %v1156_v36 = vld [vmem:[%s1867_s1] ss:$0 sm:$0xff] }
  0xac   : > { %v325_v44 = vmul.f32 0.015625, %v314_v41  ;;  %v326_v45 = vmul.f32 0.015625, %v317_v42  ;;  %v339_v46 = vmul.f32 %v1463_v38, %v1463_v38  ;;  %v340_v47 = vmul.f32 %v1465_v39, %v1465_v39  ;;  %568 = vmatpush1.bf16.msra.mxu0 %v1288_v6  ;;  %641 = vmatpush1.bf16.msra.mxu1 %v1289_v7 }
  0xae   : > { %v1473_v48 = vsub.f32 %v289_v12, %v325_v44  ;;  %v1475_v49 = vsub.f32 %v290_v13, %v326_v45  ;;  %v355_v50 = vsel %vm293_vm0, %v339_v46, 0.0  ;;  %v358_v51 = vsel %vm293_vm0, %v340_v47, 0.0 }
  0xaf   : > { %353 = vadd.xlane.f32.xlu1 %v352_v43  ;;  %356 = vadd.xlane.f32.xlu0 %v355_v50 }
  0xb0   : > { %v341_v52 = vmul.f32 %v1473_v48, %v1473_v48  ;;  %v342_v53 = vmul.f32 %v1475_v49, %v1475_v49 }
  0xb2   : > { %v361_v54 = vsel %vm293_vm0, %v341_v52, 0.0  ;;  %v364_v55 = vsel %vm293_vm0, %v342_v53, 0.0 }
  0xb3   : > { %359 = vadd.xlane.f32.xlu1 %v358_v51  ;;  %362 = vadd.xlane.f32.xlu0 %v361_v54 }
  0xb7   : > { %365 = vadd.xlane.f32.xlu1 %v364_v55 }
 0x134   : > { %v345_v9 = vpop.xlane.xlu0 %344 }
 0x135   : > { %v367_v10 = vmul.f32 0.015625, %v345_v9 }
 0x137   : > { %v375_v11 = vadd.f32 1e-05, %v367_v10  ;;  %v1293_v10 = vld [vmem:[%s1871_s5 + $0x8] sm:$0xff]  }
 0x138   : > { %v348_v12 = vpop.xlane.xlu1 %347  ;;  %v351_v13 = vpop.xlane.xlu0 %350 }
 0x139   : > { %1306 = vrsqrt.f32 %v375_v11  ;;  %v368_v14 = vmul.f32 0.015625, %v348_v12  ;;  %v369_v15 = vmul.f32 0.015625, %v351_v13  ;;  %v1294_v11 = vld [vmem:[%s1871_s5 + $0x50] sm:$0xff]   ;;  %v1296_v13 = vld [vmem:[%s1871_s5 + $0x58] sm:$0xff]  }
 0x13a   : > { %v1295_v12 = vld [vmem:[%s1871_s5 + $0x10] sm:$0xff]  }
 0x13b   : > { %v376_v16 = vadd.f32 1e-05, %v368_v14  ;;  %v377_v17 = vadd.f32 1e-05, %v369_v15  ;;  %v1297_v14 = vld [vmem:[%s1871_s5 + $0x18] sm:$0xff]   ;;  %v1298_v15 = vld [vmem:[%s1871_s5 + $0x60] sm:$0xff]  }
 0x13c   : > { %v354_v18 = vpop.xlane.xlu1 %353  ;;  %v357_v19 = vpop.xlane.xlu0 %356 }
 0x13d   : > { %1308 = vrsqrt.f32 %v376_v16  ;;  %v370_v22 = vmul.f32 0.015625, %v354_v18  ;;  %v371_v24 = vmul.f32 0.015625, %v357_v19  ;;  %v1299_v16 = vld [vmem:[%s1871_s5 + $0x20] sm:$0xff]   ;;  %v1301_v18 = vld [vmem:[%s1871_s5 + $0x28] sm:$0xff]   ;;  %v1302_v19 = vld [vmem:[%s1871_s5 + $0x70] sm:$0xff]  }
 0x13e   : > { %1310 = vrsqrt.f32 %v377_v17  ;;  %v1300_v17 = vld [vmem:[%s1871_s5 + $0x68] sm:$0xff]  }
 0x13f   : > { %v378_v23 = vadd.f32 1e-05, %v370_v22  ;;  %v379_v30 = vadd.f32 1e-05, %v371_v24  ;;  %v1303_v22 = vld [vmem:[%s1871_s5 + $0x30] sm:$0xff]   ;;  %v1305_v24 = vld [vmem:[%s1871_s5 + $0x38] sm:$0xff]  }
 0x140   : > { %v360_v25 = vpop.xlane.xlu1 %359  ;;  %v363_v33 = vpop.xlane.xlu0 %362 }
 0x141   : > { %1312 = vrsqrt.f32 %v378_v23  ;;  %v372_v26 = vmul.f32 0.015625, %v360_v25  ;;  %v373_v40 = vmul.f32 0.015625, %v363_v33  ;;  %v1304_v23 = vld [vmem:[%s1871_s5 + $0x78] sm:$0xff]   ;;  %v449_v25 = vlaneseq }
 0x143   : > { %v1307_v27 = vpop.eup %1306  ;;  %v380_v31 = vadd.f32 1e-05, %v372_v26  ;;  %v381_v47 = vadd.f32 1e-05, %v373_v40  ;;  %v450_v26 = vshrl.u32 %v449_v25, 7 }
 0x144   : > { %v391_v32 = vmul.f32 %v1307_v27, %v1445_v20  ;;  %v366_v34 = vpop.xlane.xlu1 %365  ;;  %v1157_v20 = vld [vmem:[%s1868_s2] ss:$0 sm:$0xff] }
 0x145   : > { %1314 = vrsqrt.f32 %v380_v31  ;;  %v374_v35 = vmul.f32 0.015625, %v366_v34  ;;  %v459_v27 = vsub.s32 2, %v450_v26  ;;  %v463_v31 = vsub.s32 3, %v450_v26 }
 0x146   : > { %1316 = vrsqrt.f32 %v379_v30  ;;  %v405_v42 = vmul.f32 %v1156_v36, %v391_v32  ;;  %v447_v30 = vld [vmem:[%s1870_s4] sm:$0xf] }
 0x147   : > { %v1309_v37 = vpop.eup %1308  ;;  %v382_v44 = vadd.f32 1e-05, %v374_v35  ;;  %v1614_v32 = vrot.slane %v447_v30, %v459_v27  ;;  %v1616_v33 = vrot.slane %v447_v30, %v463_v31 }
 0x148   : > { %v392_v41 = vmul.f32 %v1309_v37, %v1453_v28  ;;  %v1311_v43 = vpop.eup %1310  ;;  %v419_v52 = vadd.f32 %v1157_v20, %v405_v42 }
 0x149   : > { %v393_v50 = vmul.f32 %v1311_v43, %v1447_v21  ;;  %1318 = vrsqrt.f32 %v382_v44 }
 0x14a   : > { %v406_v45 = vmul.f32 %v1156_v36, %v392_v41  ;;  %1320 = vrsqrt.f32 %v381_v47 }
 0x14b   : > { %v1313_v46 = vpop.eup %1312  ;;  %v407_v56 = vmul.f32 %v1156_v36, %v393_v50 }
 0x14c   : > { %v394_v51 = vmul.f32 %v1313_v46, %v1455_v29  ;;  %v420_v53 = vadd.f32 %v1157_v20, %v406_v45 }
 0x14d   : > { %v421_v59 = vadd.f32 %v1157_v20, %v407_v56 }
 0x14e   : > { %v427_v54 = vpack.c.bf16 %v420_v53, %v419_v52  ;;  %v408_v55 = vmul.f32 %v1156_v36, %v394_v51  ;;  %v451_v53 = vsub.s32 0, %v450_v26 }
 0x14f   : > { %v1315_v28 = vpop.eup %1314 }
 0x150   : > { %1174 = vmatmul.mubr.msk.bf16.vlgmr.msra.gmra.mrb[0].mxu0 %vm293_vm0, %v427_v54  ;;  %1178 = vmatmul.mubr.msk.bf16.vlgmr.msra.gmra.mrb[0].mxu1 %vm293_vm0, %v427_v54  ;;  %v1317_v57 = vpop.eup %1316  ;;  %v396_v21 = vmul.f32 %v1315_v28, %v1465_v39  ;;  %v422_v29 = vadd.f32 %v1157_v20, %v408_v55 }
 0x151   : > { %603 = vmatprep.mubr.bf16.mxu0 %v1370_v8  ;;  %676 = vmatprep.mubr.bf16.mxu1 %v1370_v8  ;;  %v395_v58 = vmul.f32 %v1317_v57, %v1463_v38  ;;  %v455_v57 = vsub.s32 1, %v450_v26 }
 0x152   : > { %v428_v60 = vpack.c.bf16 %v422_v29, %v421_v59  ;;  %v410_v61 = vmul.f32 %v1156_v36, %v396_v21 }
 0x153   : > { %v1319_v62 = vpop.eup %1318  ;;  %v409_v63 = vmul.f32 %v1156_v36, %v395_v58 }
 0x154   : > { %v1321_v0 = vpop.eup %1320  ;;  %v398_v1 = vmul.f32 %v1319_v62, %v1475_v49  ;;  %v424_v39 = vadd.f32 %v1157_v20, %v410_v61  ;;  %v1291_v49 = vld [vmem:[%s1871_s5] sm:$0xff]  }
 0x155   : > { %v397_v2 = vmul.f32 %v1321_v0, %v1473_v48  ;;  %v423_v38 = vadd.f32 %v1157_v20, %v409_v63  ;;  %v1290_v48 = vld [vmem:[%s1871_s5 + $0x40] sm:$0xff]  }
 0x156   : > { %v412_v4 = vmul.f32 %v1156_v36, %v398_v1  ;;  %1201 = vmatprep.subr.bf16.mxu0 %v1290_v48  ;;  %1241 = vmatprep.subr.bf16.mxu1 %v1290_v48  ;;  %v1646_v1 = vrot.slane %v447_v30, %v451_v53 }
 0x157   : > { %v429_v3 = vpack.c.bf16 %v424_v39, %v423_v38  ;;  %v411_v5 = vmul.f32 %v1156_v36, %v397_v2  ;;  %1202 = vmatpush3.bf16.msra.mxu0 %v1291_v49  ;;  %1249 = vmatpush3.bf16.msra.mxu1 %v1291_v49  ;;  %v1659_v49 = vrot.slane %v447_v30, %v455_v57 }
 0x158   : > { %1175 = vmatmul.mubr.msk.bf16.gmra.mrb[4].mxu0 %vm293_vm0, %v428_v60  ;;  %1179 = vmatmul.mubr.msk.bf16.gmra.mrb[4].mxu1 %vm293_vm0, %v428_v60  ;;  %v426_v6 = vadd.f32 %v1157_v20, %v412_v4 }
 0x159   : > { %613 = vmatprep.mubr.bf16.mxu0 %v1370_v8  ;;  %686 = vmatprep.mubr.bf16.mxu1 %v1370_v8  ;;  %v425_v7 = vadd.f32 %v1157_v20, %v411_v5 }
 0x15b   : > { %v430_v9 = vpack.c.bf16 %v426_v6, %v425_v7 }
 0x160   : > { %1176 = vmatmul.mubr.msk.bf16.gmra.mrb[8].mxu0 %vm293_vm0, %v429_v3  ;;  %1180 = vmatmul.mubr.msk.bf16.gmra.mrb[8].mxu1 %vm293_vm0, %v429_v3 }
 0x161   : > { %623 = vmatprep.mubr.bf16.mxu0 %v1370_v8  ;;  %696 = vmatprep.mubr.bf16.mxu1 %v1370_v8  ;;  %v1292_v8 = vld [vmem:[%s1871_s5 + $0x48] sm:$0xff]  }
 0x162   : > { %1203 = vmatprep.subr.bf16.mxu0 %v1292_v8  ;;  %1242 = vmatprep.subr.bf16.mxu1 %v1292_v8 }
 0x163   : > { %1204 = vmatpush3.bf16.msra.mxu0 %v1293_v10  ;;  %1250 = vmatpush3.bf16.msra.mxu1 %v1293_v10 }
 0x164   : > { %1205 = vmatprep.subr.bf16.mxu0 %v1294_v11  ;;  %1243 = vmatprep.subr.bf16.mxu1 %v1294_v11 }
 0x167   : > { %1206 = vmatpush3.bf16.msra.mxu0 %v1295_v12  ;;  %1251 = vmatpush3.bf16.msra.mxu1 %v1295_v12 }
 0x168   : > { %1177 = vmatmul.mubr.msk.bf16.gmra.mrb[12].mxu0 %vm293_vm0, %v430_v9  ;;  %1181 = vmatmul.mubr.msk.bf16.gmra.mrb[12].mxu1 %vm293_vm0, %v430_v9 }
 0x169   : > { %1207 = vmatprep.subr.bf16.mxu0 %v1296_v13  ;;  %1244 = vmatprep.subr.bf16.mxu1 %v1296_v13 }
 0x16b   : > { %1208 = vmatpush3.bf16.msra.mxu0 %v1297_v14  ;;  %1252 = vmatpush3.bf16.msra.mxu1 %v1297_v14 }
 0x16c   : > { %1209 = vmatprep.subr.bf16.mxu0 %v1298_v15  ;;  %1245 = vmatprep.subr.bf16.mxu1 %v1298_v15 }
 0x16f   : > { %1210 = vmatpush3.bf16.msra.mxu0 %v1299_v16  ;;  %1253 = vmatpush3.bf16.msra.mxu1 %v1299_v16 }
 0x170   : > { %1211 = vmatprep.subr.bf16.mxu0 %v1300_v17  ;;  %1246 = vmatprep.subr.bf16.mxu1 %v1300_v17 }
 0x173   : > { %1212 = vmatpush3.bf16.msra.mxu0 %v1301_v18  ;;  %1254 = vmatpush3.bf16.msra.mxu1 %v1301_v18 }
 0x174   : > { %1213 = vmatprep.subr.bf16.mxu0 %v1302_v19  ;;  %1247 = vmatprep.subr.bf16.mxu1 %v1302_v19 }
 0x177   : > { %1214 = vmatpush3.bf16.msra.mxu0 %v1303_v22  ;;  %1255 = vmatpush3.bf16.msra.mxu1 %v1303_v22 }
 0x178   : > { %1215 = vmatprep.subr.bf16.mxu0 %v1304_v23  ;;  %1248 = vmatprep.subr.bf16.mxu1 %v1304_v23 }
 0x17b   : > { %1216 = vmatpush3.bf16.msra.mxu0 %v1305_v24  ;;  %1256 = vmatpush3.bf16.msra.mxu1 %v1305_v24 }
 0x223   : > { %v595_v34 = vpop.f32.mrb[0].mxu0  ;;  %v668_v35 = vpop.f32.mrb[0].mxu1 }
 0x224   : > { %v1619_v36 = vadd.f32 %v668_v35, %v1614_v32  ;;  %v597_v37 = vpop.f32.mrb[1].mxu0  ;;  %v670_v40 = vpop.f32.mrb[1].mxu1  ;;  %v1669_v14 = vadd.f32 %v595_v34, %v1646_v1 }
 0x225   : > { %v1622_v41 = vadd.f32 %v670_v40, %v1616_v33  ;;  %v599_v42 = vpop.f32.mrb[2].mxu0  ;;  %v672_v43 = vpop.f32.mrb[2].mxu1  ;;  %v1678_v22 = vadd.f32 %v597_v37, %v1659_v49 }
 0x226   : > { %v707_v44 = vmul.f32 %v1619_v36, %v1619_v36  ;;  %v1627_v20 = vadd.f32 %v672_v43, %v1614_v32  ;;  %v601_v45 = vpop.f32.mrb[3].mxu0  ;;  %v674_v46 = vpop.f32.mrb[3].mxu1  ;;  %v1681_v23 = vadd.f32 %v599_v42, %v1646_v1 }
 0x227   : > { %v708_v47 = vmul.f32 %v1622_v41, %v1622_v41  ;;  %v1632_v50 = vadd.f32 %v674_v46, %v1616_v33  ;;  %v1695_v42 = vadd.f32 %v601_v45, %v1659_v49 }
 0x228   : > { %v723_v51 = vmul.f32 %v707_v44, %v1619_v36  ;;  %v709_v52 = vmul.f32 %v1627_v20, %v1627_v20 }
 0x229   : > { %v724_v54 = vmul.f32 %v708_v47, %v1622_v41  ;;  %v710_v55 = vmul.f32 %v1632_v50, %v1632_v50 }
 0x22a   : > { %v739_v28 = vmul.f32 0.044715, %v723_v51  ;;  %v725_v56 = vmul.f32 %v709_v52, %v1627_v20 }
 0x22b   : > { %v740_v21 = vmul.f32 0.044715, %v724_v54  ;;  %v726_v29 = vmul.f32 %v710_v55, %v1632_v50  ;;  %v605_v58 = vpop.f32.mrb[4].mxu0  ;;  %v678_v59 = vpop.f32.mrb[4].mxu1 }
 0x22c   : > { %v755_v60 = vadd.f32 %v739_v28, %v1619_v36  ;;  %v741_v61 = vmul.f32 0.044715, %v725_v56  ;;  %v1644_v62 = vadd.f32 %v678_v59, %v1614_v32  ;;  %v607_v63 = vpop.f32.mrb[5].mxu0  ;;  %v680_v0 = vpop.f32.mrb[5].mxu1 }
 0x22d   : > { %v742_v39 = vmul.f32 0.044715, %v726_v29  ;;  %v1649_v2 = vadd.f32 %v680_v0, %v1616_v33  ;;  %v1651_v38 = vpop.f32.mrb[6].mxu0  ;;  %v682_v3 = vpop.f32.mrb[6].mxu1  ;;  %v756_v5 = vadd.f32 %v740_v21, %v1622_v41  ;;  %v1715_v29 = vadd.f32 %v605_v58, %v1646_v1 }
 0x22e   : > { %v771_v4 = vmul.f32 0.7978846, %v755_v60  ;;  %v757_v6 = vadd.f32 %v741_v61, %v1627_v20  ;;  %v711_v7 = vmul.f32 %v1644_v62, %v1644_v62  ;;  %v1657_v9 = vpop.f32.mrb[7].mxu0  ;;  %v684_v48 = vpop.f32.mrb[7].mxu1  ;;  %v1664_v10 = vadd.f32 %v682_v3, %v1614_v32 }
 0x22f   : > { %v712_v8 = vmul.f32 %v1649_v2, %v1649_v2  ;;  %v758_v12 = vadd.f32 %v742_v39, %v1632_v50  ;;  %v772_v17 = vmul.f32 0.7978846, %v756_v5  ;;  %v1675_v19 = vadd.f32 %v684_v48, %v1616_v33 }
 0x230   : > { %1322 = vtanh.f32 %v771_v4  ;;  %v773_v11 = vmul.f32 0.7978846, %v757_v6  ;;  %v727_v13 = vmul.f32 %v711_v7, %v1644_v62  ;;  %v713_v16 = vmul.f32 %v1664_v10, %v1664_v10 }
 0x231   : > { %v728_v15 = vmul.f32 %v712_v8, %v1649_v2  ;;  %v774_v30 = vmul.f32 0.7978846, %v758_v12  ;;  %v714_v34 = vmul.f32 %v1675_v19, %v1675_v19  ;;  %v1719_v61 = vadd.f32 %v607_v63, %v1659_v49 }
 0x232   : > { %1324 = vtanh.f32 %v773_v11  ;;  %v743_v18 = vmul.f32 0.044715, %v727_v13  ;;  %v729_v25 = vmul.f32 %v713_v16, %v1664_v10 }
 0x233   : > { %v744_v24 = vmul.f32 0.044715, %v728_v15  ;;  %v1684_v26 = vpop.f32.mrb[8].mxu0  ;;  %v688_v27 = vpop.f32.mrb[8].mxu1  ;;  %1326 = vtanh.f32 %v772_v17  ;;  %v730_v53 = vmul.f32 %v714_v34, %v1675_v19 }
 0x234   : > { %v759_v31 = vadd.f32 %v743_v18, %v1644_v62  ;;  %v1690_v35 = vadd.f32 %v688_v27, %v1614_v32  ;;  %v1692_v37 = vpop.f32.mrb[9].mxu0  ;;  %v690_v40 = vpop.f32.mrb[9].mxu1  ;;  %v745_v44 = vmul.f32 0.044715, %v729_v25  ;;  %1328 = vtanh.f32 %v774_v30 }
 0x235   : > { %v760_v43 = vadd.f32 %v744_v24, %v1649_v2  ;;  %v1699_v46 = vadd.f32 %v690_v40, %v1616_v33  ;;  %v1701_v47 = vpop.f32.mrb[10].mxu0  ;;  %v692_v51 = vpop.f32.mrb[10].mxu1  ;;  %v746_v59 = vmul.f32 0.044715, %v730_v53 }
 0x236   : > { %v775_v52 = vmul.f32 0.7978846, %v759_v31  ;;  %v715_v54 = vmul.f32 %v1690_v35, %v1690_v35  ;;  %v1706_v55 = vpop.f32.mrb[11].mxu0  ;;  %v694_v45 = vpop.f32.mrb[11].mxu1  ;;  %v761_v56 = vadd.f32 %v745_v44, %v1664_v10  ;;  %v1712_v21 = vadd.f32 %v692_v51, %v1614_v32 }
 0x237   : > { %v776_v28 = vmul.f32 0.7978846, %v760_v43  ;;  %v716_v57 = vmul.f32 %v1699_v46, %v1699_v46  ;;  %v762_v5 = vadd.f32 %v746_v59, %v1675_v19  ;;  %v1726_v58 = vadd.f32 %v694_v45, %v1616_v33 }
 0x238   : > { %v731_v60 = vmul.f32 %v715_v54, %v1690_v35  ;;  %v777_v0 = vmul.f32 0.7978846, %v761_v56  ;;  %v717_v3 = vmul.f32 %v1712_v21, %v1712_v21 }
 0x239   : > { %v732_v39 = vmul.f32 %v716_v57, %v1699_v46  ;;  %1330 = vtanh.f32 %v776_v28  ;;  %v778_v13 = vmul.f32 0.7978846, %v762_v5  ;;  %v718_v16 = vmul.f32 %v1726_v58, %v1726_v58 }
 0x23a   : > { %v1323_v4 = vpop.eup %1322  ;;  %v747_v6 = vmul.f32 0.044715, %v731_v60  ;;  %1332 = vtanh.f32 %v775_v52  ;;  %v733_v63 = vmul.f32 %v717_v3, %v1712_v21  ;;  %v1749_v57 = vadd.f32 %v1651_v38, %v1646_v1 }
 0x23b   : > { %v803_v7 = vadd.f32 1.0, %v1323_v4  ;;  %v748_v48 = vmul.f32 0.044715, %v732_v39  ;;  %v1729_v8 = vpop.f32.mrb[12].mxu0  ;;  %v698_v11 = vpop.f32.mrb[12].mxu1  ;;  %1334 = vtanh.f32 %v777_v0  ;;  %v734_v43 = vmul.f32 %v718_v16, %v1726_v58 }
 0x23c   : > { %v1325_v12 = vpop.eup %1324  ;;  %v763_v15 = vadd.f32 %v747_v6, %v1690_v35  ;;  %v1734_v17 = vpop.f32.mrb[13].mxu0  ;;  %v749_v30 = vmul.f32 0.044715, %v733_v63  ;;  %1336 = vtanh.f32 %v778_v13  ;;  %v1741_v44 = vadd.f32 %v698_v11, %v1614_v32 }
 0x23d   : > { %v700_v18 = vpop.f32.mrb[13].mxu1  ;;  %v819_v24 = vmul.f32 0.5, %v803_v7  ;;  %v805_v25 = vadd.f32 1.0, %v1325_v12  ;;  %v764_v27 = vadd.f32 %v748_v48, %v1699_v46  ;;  %v1737_v31 = vpop.f32.mrb[14].mxu0  ;;  %v750_v59 = vmul.f32 0.044715, %v734_v43 }
 0x23e   : > { %v702_v34 = vpop.f32.mrb[14].mxu1  ;;  %v779_v40 = vmul.f32 0.7978846, %v763_v15  ;;  %v1743_v51 = vpop.f32.mrb[15].mxu0  ;;  %v765_v28 = vadd.f32 %v749_v30, %v1712_v21  ;;  %v719_v60 = vmul.f32 %v1741_v44, %v1741_v44  ;;  %v1764_v6 = vadd.f32 %v700_v18, %v1616_v33 }
 0x23f   : > { %v704_v52 = vpop.f32.mrb[15].mxu1  ;;  %v835_v53 = vmul.f32 %v819_v24, %v1619_v36  ;;  %v821_v54 = vmul.f32 0.5, %v805_v25  ;;  %v780_v45 = vmul.f32 0.7978846, %v764_v27  ;;  %v1327_v56 = vpop.eup %1326  ;;  %v1759_v36 = vadd.f32 %v1657_v9, %v1659_v49 }
 0x240   : > { %1338 = vtanh.f32 %v779_v40  ;;  %v781_v3 = vmul.f32 0.7978846, %v765_v28  ;;  %v1329_v4 = vpop.eup %1328  ;;  %v766_v38 = vadd.f32 %v750_v59, %v1726_v58  ;;  %v735_v5 = vmul.f32 %v719_v60, %v1741_v44 }
 0x241   : > { %v1754_v0 = vmul.f32 %v835_v53, %v1669_v14  ;;  %v837_v39 = vmul.f32 %v821_v54, %v1627_v20  ;;  %1340 = vtanh.f32 %v780_v45  ;;  %v1771_v20 = vadd.f32 %v1684_v26, %v1646_v1 }
 0x242   : > { %1342 = vtanh.f32 %v781_v3  ;;  %v1774_v9 = vadd.f32 %v702_v34, %v1614_v32  ;;  %v782_v48 = vmul.f32 0.7978846, %v766_v38  ;;  %v751_v63 = vmul.f32 0.044715, %v735_v5 }
 0x243   : > { %v1767_v7 = vmul.f32 %v837_v39, %v1681_v23  ;;  %v1331_v14 = vpop.eup %1330  ;;  %v720_v11 = vmul.f32 %v1764_v6, %v1764_v6  ;;  %v1779_v12 = vadd.f32 %v704_v52, %v1616_v33  ;;  %v804_v15 = vadd.f32 1.0, %v1327_v56 }
 0x244   : > { %v1333_v13 = vpop.eup %1332  ;;  %v721_v23 = vmul.f32 %v1774_v9, %v1774_v9  ;;  %v806_v26 = vadd.f32 1.0, %v1329_v4  ;;  %1344 = vtanh.f32 %v782_v48  ;;  %v767_v18 = vadd.f32 %v751_v63, %v1741_v44 }
 0x245   : > { %v867_v16 = vpack.c.bf16 %v1767_v7, %v1754_v0  ;;  %v1335_v32 = vpop.eup %1334  ;;  %v736_v24 = vmul.f32 %v720_v11, %v1764_v6  ;;  %v722_v25 = vmul.f32 %v1779_v12, %v1779_v12  ;;  %v820_v27 = vmul.f32 0.5, %v804_v15 }
 0x246   : > { %v737_v33 = vmul.f32 %v721_v23, %v1774_v9  ;;  %v822_v30 = vmul.f32 0.5, %v806_v26  ;;  %v808_v34 = vadd.f32 1.0, %v1331_v14  ;;  %v1337_v40 = vpop.eup %1336  ;;  %v783_v43 = vmul.f32 0.7978846, %v767_v18 }
 0x247   : > { %v752_v52 = vmul.f32 0.044715, %v736_v24  ;;  %v738_v53 = vmul.f32 %v722_v25, %v1779_v12  ;;  %v807_v54 = vadd.f32 1.0, %v1333_v13  ;;  %v836_v28 = vmul.f32 %v820_v27, %v1622_v41 }
 0x248   : > { %v753_v45 = vmul.f32 0.044715, %v737_v33  ;;  %v838_v56 = vmul.f32 %v822_v30, %v1632_v50  ;;  %v810_v59 = vadd.f32 1.0, %v1337_v40  ;;  %1346 = vtanh.f32 %v783_v43 }
 0x249   : > { %v768_v0 = vadd.f32 %v752_v52, %v1764_v6  ;;  %v754_v39 = vmul.f32 0.044715, %v738_v53  ;;  %v824_v3 = vmul.f32 0.5, %v808_v34  ;;  %v852_v5 = vmul.f32 %v836_v28, %v1678_v22 }
 0x24a   : > { %v1339_v60 = vpop.eup %1338  ;;  %v769_v38 = vadd.f32 %v753_v45, %v1774_v9  ;;  %v854_v7 = vmul.f32 %v838_v56, %v1695_v42  ;;  %v826_v63 = vmul.f32 0.5, %v810_v59  ;;  %v809_v26 = vadd.f32 1.0, %v1335_v32 }
 0x24b   : > { %v811_v4 = vadd.f32 1.0, %v1339_v60  ;;  %v1341_v14 = vpop.eup %1340  ;;  %v784_v48 = vmul.f32 0.7978846, %v768_v0  ;;  %v770_v41 = vadd.f32 %v754_v39, %v1779_v12  ;;  %v840_v50 = vmul.f32 %v824_v3, %v1649_v2 }
 0x24c   : > { %v1343_v11 = vpop.eup %1342  ;;  %v785_v23 = vmul.f32 0.7978846, %v769_v38  ;;  %v868_v15 = vpack.c.bf16 %v854_v7, %v852_v5  ;;  %v842_v25 = vmul.f32 %v826_v63, %v1675_v19  ;;  %v823_v33 = vmul.f32 0.5, %v807_v54 }
 0x24d   : > { %v827_v13 = vmul.f32 0.5, %v811_v4  ;;  %v813_v18 = vadd.f32 1.0, %v1343_v11  ;;  %1348 = vtanh.f32 %v784_v48  ;;  %v786_v24 = vmul.f32 0.7978846, %v770_v41 }
 0x24e   : > { %1350 = vtanh.f32 %v785_v23  ;;  %1042 = vmatprep.mubr.bf16.mxu0 %v868_v15  ;;  %v856_v42 = vmul.f32 %v840_v50, %v1719_v61  ;;  %v1345_v27 = vpop.eup %1344  ;;  %v858_v2 = vmul.f32 %v842_v25, %v1759_v36  ;;  %v825_v34 = vmul.f32 0.5, %v809_v26  ;;  %v1354_v25 = vld [vmem:[%s1427_s30] sm:$0xff] }
 0x24f   : > { %v843_v22 = vmul.f32 %v827_v13, %v1690_v35  ;;  %v829_v30 = vmul.f32 0.5, %v813_v18  ;;  %1352 = vtanh.f32 %v786_v24  ;;  %1043 = vmatmul.mubr.bf16.vlgmr.msra.gmra.mrb[16].mxu0 %v867_v16  ;;  %v839_v40 = vmul.f32 %v823_v33, %v1644_v62  ;;  %v1355_v33 = vld [vmem:[%s1427_s30 + $0x8] sm:$0xff] }
 0x250   : > { %v812_v43 = vadd.f32 1.0, %v1341_v14  ;;  %v814_v19 = vadd.f32 1.0, %v1345_v27  ;;  %v620_v35 = vadd.f32 %v1701_v47, %v1646_v1  ;;  %v870_v61 = vpack.c.bf16 %v858_v2, %v856_v42 }
 0x251   : > { %v859_v32 = vmul.f32 %v843_v22, %v1771_v20  ;;  %v845_v52 = vmul.f32 %v829_v30, %v1712_v21  ;;  %v841_v53 = vmul.f32 %v825_v34, %v1664_v10  ;;  %v855_v54 = vmul.f32 %v839_v40, %v1715_v29 }
 0x252   : > { %v828_v16 = vmul.f32 0.5, %v812_v43  ;;  %v830_v45 = vmul.f32 0.5, %v814_v19  ;;  %v1347_v36 = vpop.eup %1346  ;;  %v618_v20 = vadd.f32 %v1692_v37, %v1659_v49  ;;  %1050 = vmatprep.mubr.bf16.mxu0 %v870_v61  ;;  %v622_v47 = vadd.f32 %v1706_v55, %v1659_v49  ;;  %v1356_v61 = vld [vmem:[%s1427_s30 + $0x10] sm:$0xff] }
 0x253   : > { %v861_v28 = vmul.f32 %v845_v52, %v620_v35  ;;  %v857_v62 = vmul.f32 %v841_v53, %v1749_v57  ;;  %v815_v10 = vadd.f32 1.0, %v1347_v36  ;;  %v626_v4 = vadd.f32 %v1729_v8, %v1646_v1 }
 0x254   : > { %v844_v21 = vmul.f32 %v828_v16, %v1699_v46  ;;  %v846_v56 = vmul.f32 %v830_v45, %v1726_v58  ;;  %v628_v41 = vadd.f32 %v1734_v17, %v1659_v49  ;;  %v630_v8 = vadd.f32 %v1737_v31, %v1646_v1  ;;  %v1182_v1 = vld [vmem:[%s1872_s6] ss:$0 sm:$0xff] }
 0x255   : > { %v869_v59 = vpack.c.bf16 %v857_v62, %v855_v54  ;;  %v871_v29 = vpack.c.bf16 %v861_v28, %v859_v32  ;;  %v831_v39 = vmul.f32 0.5, %v815_v10 }
 0x256   : > { %v860_v60 = vmul.f32 %v844_v21, %v618_v20  ;;  %v862_v0 = vmul.f32 %v846_v56, %v622_v47  ;;  %v1357_v20 = vld [vmem:[%s1427_s30 + $0x18] sm:$0xff]  ;;  %v1358_v21 = vld [vmem:[%s1427_s30 + $0x20] sm:$0xff] }
 0x257   : > { %v1349_v3 = vpop.eup %1348  ;;  %1051 = vmatmul.mubr.bf16.gmra.mrb[20].mxu0 %v869_v59  ;;  %v847_v55 = vmul.f32 %v831_v39, %v1741_v44  ;;  %v632_v44 = vadd.f32 %v1743_v51, %v1659_v49  ;;  %v1359_v59 = vld [vmem:[%s1427_s30 + $0x28] sm:$0xff] }
 0x258   : > { %v1351_v37 = vpop.eup %1350  ;;  %v872_v57 = vpack.c.bf16 %v862_v0, %v860_v60  ;;  %v816_v38 = vadd.f32 1.0, %v1349_v3 }
 0x259   : > { %v1353_v5 = vpop.eup %1352  ;;  %v817_v46 = vadd.f32 1.0, %v1351_v37  ;;  %v863_v14 = vmul.f32 %v847_v55, %v626_v4 }
 0x25a   : > { %1058 = vmatprep.mubr.bf16.mxu1 %v872_v57  ;;  %v818_v58 = vadd.f32 1.0, %v1353_v5  ;;  %v832_v7 = vmul.f32 0.5, %v816_v38  ;;  %v1360_v38 = vld [vmem:[%s1427_s30 + $0x30] sm:$0xff] }
 0x25b   : > { %1059 = vmatmul.mubr.bf16.vlgmr.msra.gmra.mrb[16].mxu1 %v871_v29  ;;  %v833_v48 = vmul.f32 0.5, %v817_v46  ;;  %v1361_v46 = vld [vmem:[%s1427_s30 + $0x38] sm:$0xff] }
 0x25c   : > { %v834_v63 = vmul.f32 0.5, %v818_v58  ;;  %v848_v50 = vmul.f32 %v832_v7, %v1764_v6 }
 0x25d   : > { %v849_v11 = vmul.f32 %v833_v48, %v1774_v9 }
 0x25e   : > { %v850_v13 = vmul.f32 %v834_v63, %v1779_v12  ;;  %v864_v23 = vmul.f32 %v848_v50, %v628_v41 }
 0x25f   : > { %v865_v15 = vmul.f32 %v849_v11, %v630_v8 }
 0x260   : > { %v866_v26 = vmul.f32 %v850_v13, %v632_v44 }
 0x261   : > { %v873_v18 = vpack.c.bf16 %v865_v15, %v863_v14 }
 0x262   : > { %v874_v17 = vpack.c.bf16 %v866_v26, %v864_v23 }
 0x264   : > { %1066 = vmatprep.mubr.bf16.mxu1 %v874_v17 }
 0x265   : > { %1067 = vmatmul.mubr.bf16.gmra.mrb[20].mxu1 %v873_v18 }
 0x322   : > { %v1217_v6 = vpop.f32.mrb[16].mxu0 }
 0x323   : > { %v1218_v31 = vpop.f32.mrb[17].mxu0 }
 0x324   : > { %v1219_v9 = vadd.f32 %v1218_v31, %v1217_v6  ;;  %v1220_v49 = vpop.f32.mrb[18].mxu0 }
 0x325   : > { %v1221_v51 = vpop.f32.mrb[19].mxu0 }
 0x326   : > { %v1045_v12 = vadd.f32 %v1219_v9, %v1182_v1  ;;  %v1222_v24 = vadd.f32 %v1221_v51, %v1220_v49 }
 0x328   : > { %v1075_v22 = vadd.f32 %v1354_v25, %v1045_v12  ;;  %v1048_v42 = vadd.f32 %v1222_v24, %v1182_v1 }
 0x32a   : > { %1083 = vst.msk [vmem:[%s1837_s28] sm:$0xff] %vm293_vm0, %v1075_v22  ;;  %v1076_v27 = vadd.f32 %v1355_v33, %v1048_v42  ;;  %v1223_v30 = vpop.f32.mrb[20].mxu0 }
 0x32b   : > { %v1224_v2 = vpop.f32.mrb[21].mxu0 }
 0x32c   : > { %1084 = vst.msk [vmem:[%s1837_s28 + $0x8] sm:$0xff] %vm293_vm0, %v1076_v27  ;;  %v1225_v34 = vadd.f32 %v1224_v2, %v1223_v30  ;;  %v1226_v32 = vpop.f32.mrb[22].mxu0 }
 0x32d   : > { %v1227_v40 = vpop.f32.mrb[23].mxu0 }
 0x32e   : > { %v1053_v43 = vadd.f32 %v1225_v34, %v1182_v1  ;;  %v1228_v19 = vadd.f32 %v1227_v40, %v1226_v32  ;;  %v1229_v35 = vpop.f32.mrb[16].mxu1 }
 0x32f   : > { %v1230_v52 = vpop.f32.mrb[17].mxu1 }
 0x330   : > { %v1077_v53 = vadd.f32 %v1356_v61, %v1053_v43  ;;  %v1056_v54 = vadd.f32 %v1228_v19, %v1182_v1  ;;  %v1231_v16 = vadd.f32 %v1230_v52, %v1229_v35  ;;  %v1232_v45 = vpop.f32.mrb[18].mxu1 }
 0x331   : > { %v1233_v36 = vpop.f32.mrb[19].mxu1 }
 0x332   : > { %1085 = vst.msk [vmem:[%s1837_s28 + $0x10] sm:$0xff] %vm293_vm0, %v1077_v53  ;;  %v1078_v28 = vadd.f32 %v1357_v20, %v1056_v54  ;;  %v1061_v62 = vadd.f32 %v1231_v16, %v1182_v1  ;;  %v1234_v47 = vadd.f32 %v1233_v36, %v1232_v45 }
 0x334   : > { %1086 = vst.msk [vmem:[%s1837_s28 + $0x18] sm:$0xff] %vm293_vm0, %v1078_v28  ;;  %v1079_v56 = vadd.f32 %v1358_v21, %v1061_v62  ;;  %v1064_v10 = vadd.f32 %v1234_v47, %v1182_v1 }
 0x336   : > { %1087 = vst.msk [vmem:[%s1837_s28 + $0x20] sm:$0xff] %vm293_vm0, %v1079_v56  ;;  %v1080_v29 = vadd.f32 %v1359_v59, %v1064_v10 }
 0x338   : > { %1088 = vst.msk [vmem:[%s1837_s28 + $0x28] sm:$0xff] %vm293_vm0, %v1080_v29  ;;  %v1235_v60 = vpop.f32.mrb[20].mxu1 }
 0x339   : > { %v1236_v0 = vpop.f32.mrb[21].mxu1 }
 0x33a   : > { %v1237_v39 = vadd.f32 %v1236_v0, %v1235_v60  ;;  %v1238_v3 = vpop.f32.mrb[22].mxu1 }
 0x33b   : > { %v1239_v37 = vpop.f32.mrb[23].mxu1 }
 0x33c   : > { %v1069_v4 = vadd.f32 %v1237_v39, %v1182_v1  ;;  %v1240_v57 = vadd.f32 %v1239_v37, %v1238_v3 }
 0x33e   : > { %v1081_v55 = vadd.f32 %v1360_v38, %v1069_v4  ;;  %v1072_v5 = vadd.f32 %v1240_v57, %v1182_v1 }
 0x340   : > { %1089 = vst.msk [vmem:[%s1837_s28 + $0x30] sm:$0xff] %vm293_vm0, %v1081_v55  ;;  %v1082_v58 = vadd.f32 %v1361_v46, %v1072_v5 }
 0x342   : > { %1090 = vst.msk [vmem:[%s1837_s28 + $0x38] sm:$0xff] %vm293_vm0, %v1082_v58 }
 0x343 PF: > { %s17_s24 = sadd.s32 1, %s1368_s24  }
 0x344   : > { %p14_p4 = scmp.ge.s32.totalorder %s17_s24, 4  }
 0x346   :  { %16 = sbr.rel (!%p14_p4) target bundleno = 1 (0x1), region = 78 }

// kernel: run.21
= control target key start
LH: loop header
LB: loop body
LE: loop exit
PB: predicated region body
PF: predicated region fallthrough
CT: control target
= control target key end

     0   :  { %s687_s15 = smov 0   ;;  %s689_s16 = smov 0   ;;  %s765_s0 = inlined_call_operand.vmem [shape: f32[2,64,64], index: 0, kind: input, shape index: {}]   ;;  %s766_s1 = inlined_call_operand.vmem [shape: f32[2,64,64], index: 1, kind: input, shape index: {}]   ;;  %s767_s2 = inlined_call_operand.vmem [shape: bf16[64,64], index: 2, kind: input, shape index: {}]   ;;  %s768_s3 = inlined_call_operand.vmem [shape: f32[1,64], index: 3, kind: input, shape index: {}]   ;;  %s769_s4 = inlined_call_operand.vmem [shape: f32[2,64,64], index: 4, kind: output, shape index: {}]  }
   0x1   :  { %s691_s17 = smov 0  }
   0x2 LB: > { %s26_s18 = sadd.s32 1, %s656_s16  ;;  %p556_p0 = scmp.ge.s32.totalorder %s660_s17, 1  ;;  %s660_s17 = sphi %s691_s17, %s14_s17   ;;  %s656_s16 = sphi %s689_s16, %s771_s16   ;;  %s652_s15 = sphi %s687_s15, %s770_s15  }
   0x3   : > { %p28_p1 = scmp.ge.s32.totalorder %s26_s18, 2  ;;  %p198_p2 = scmp.lt.s32.totalorder %s660_s17, 3 }
   0x5   : > { %s773_s18 = smov (%p28_p1, %s26_s18), 0  ;;  %p199_p3 = pnand %p556_p0, %p198_p2 }
   0x6   : > { %v634_v0 = vld [vmem:[%s767_s2] sm:$0xff] (!%p199_p3)   ;;  %p240_p4 = scmp.lt.s32.totalorder (!%p199_p3), %s652_s15, 1  ;;  %v635_v1 = vld [vmem:[%s767_s2 + $0x8] sm:$0xff] (!%p199_p3)   ;;  %v636_v2 = vld [vmem:[%s767_s2 + $0x10] sm:$0xff] (!%p199_p3)   ;;  %vm317_vm0 = vcmask (!%p199_p3), 523264  }
   0x7   : > { %202 = sbr.rel (%p199_p3) target bundleno = 398 (0x18e), region = 36  ;;  %585 = vmatprep.subr.bf16.mxu0 (!%p199_p3), %v634_v0  ;;  %601 = vmatprep.subr.bf16.mxu1 (!%p199_p3), %v634_v0  ;;  %v637_v8 = vld [vmem:[%s767_s2 + $0x18] sm:$0xff] (!%p199_p3)   ;;  %v563_v16 = vld [vmem:[%s768_s3] ss:$0 sm:$0xff] (!%p199_p3) }
   0x8   : > { %586 = vmatpush3.bf16.msra.mxu0 (!%p199_p3), %v634_v0  ;;  %605 = vmatpush3.bf16.msra.mxu1 (!%p199_p3), %v634_v0 }
   0x9   : > { %587 = vmatprep.subr.bf16.mxu0 (!%p199_p3), %v635_v1  ;;  %602 = vmatprep.subr.bf16.mxu1 (!%p199_p3), %v635_v1 }
   0xc   : > { %588 = vmatpush3.bf16.msra.mxu0 (!%p199_p3), %v635_v1  ;;  %606 = vmatpush3.bf16.msra.mxu1 (!%p199_p3), %v635_v1 }
   0xd   : > { %589 = vmatprep.subr.bf16.mxu0 (!%p199_p3), %v636_v2  ;;  %603 = vmatprep.subr.bf16.mxu1 (!%p199_p3), %v636_v2 }
   0xe   : > { %s775_s15 = smov (!%p240_p4, %s652_s15), 1 }
   0xf   : > { %s714_s25 = sshll.u32 %s775_s15, 6 }
  0x10   : > { %s247_s28 = scalar_lea.vmem %s765_s0, %s714_s25  ;;  %590 = vmatpush3.bf16.msra.mxu0 %v636_v2  ;;  %607 = vmatpush3.bf16.msra.mxu1 %v636_v2  ;;  %s256_s9 = scalar_lea.vmem %s766_s1, %s714_s25 }
  0x11   : > { %v266_v3 = vld [vmem:[%s247_s28] sm:$0xff]  ;;  %v267_v4 = vld [vmem:[%s247_s28 + $0x8] sm:$0xff]  ;;  %v268_v10 = vld [vmem:[%s247_s28 + $0x10] sm:$0xff]  ;;  %591 = vmatprep.subr.bf16.mxu0 %v637_v8  ;;  %604 = vmatprep.subr.bf16.mxu1 %v637_v8  ;;  %s738_s12 = scalar_lea.vmem %s769_s4, %s714_s25 }
  0x12   : > { %v274_v5 = vpack.c.bf16 %v267_v4, %v266_v3  ;;  %v270_v6 = vld [vmem:[%s247_s28 + $0x20] sm:$0xff]  ;;  %v271_v7 = vld [vmem:[%s247_s28 + $0x28] sm:$0xff]  ;;  %v269_v11 = vld [vmem:[%s247_s28 + $0x18] sm:$0xff] }
  0x13   : > { %v276_v9 = vpack.c.bf16 %v271_v7, %v270_v6  ;;  %v272_v12 = vld [vmem:[%s247_s28 + $0x30] sm:$0xff]  ;;  %v273_v13 = vld [vmem:[%s247_s28 + $0x38] sm:$0xff]  ;;  %v275_v14 = vpack.c.bf16 %v269_v11, %v268_v10  ;;  %v427_v33 = vld [vmem:[%s256_s9] sm:$0xff] }
  0x14   : > { %593 = vmatprep.mubr.msk.bf16.mxu0 %vm317_vm0, %v274_v5  ;;  %v277_v15 = vpack.c.bf16 %v273_v13, %v272_v12  ;;  %592 = vmatpush3.bf16.msra.mxu0 %v637_v8  ;;  %v428_v36 = vld [vmem:[%s256_s9 + $0x8] sm:$0xff]  ;;  %v429_v39 = vld [vmem:[%s256_s9 + $0x10] sm:$0xff]  ;;  %v430_v42 = vld [vmem:[%s256_s9 + $0x18] sm:$0xff] }
  0x15   : > { %597 = vmatprep.mubr.msk.bf16.mxu1 %vm317_vm0, %v276_v9  ;;  %608 = vmatpush3.bf16.msra.mxu1 %v637_v8  ;;  %v431_v45 = vld [vmem:[%s256_s9 + $0x20] sm:$0xff]  ;;  %v432_v48 = vld [vmem:[%s256_s9 + $0x28] sm:$0xff]  ;;  %v433_v51 = vld [vmem:[%s256_s9 + $0x30] sm:$0xff] }
  0x16   : > { %v434_v54 = vld [vmem:[%s256_s9 + $0x38] sm:$0xff] }
  0x17   : > { %594 = vmatmul.mubr.msk.bf16.vlgmr.msra.gmra.mrb[0].mxu0 %vm317_vm0, %v275_v14 }
  0x18   : > { %598 = vmatmul.mubr.msk.bf16.vlgmr.msra.gmra.mrb[0].mxu1 %vm317_vm0, %v277_v15 }
  0xea   : > { %v595_v17 = vpop.f32.mrb[0].mxu0 }
  0xeb   : > { %v599_v18 = vpop.f32.mrb[0].mxu1  ;;  %v364_v19 = vpop.f32.mrb[1].mxu0  ;;  %v373_v27 = vadd.f32 %v595_v17, %v563_v16 }
  0xec   : > { %v380_v20 = vpop.f32.mrb[1].mxu1  ;;  %v596_v21 = vpop.f32.mrb[2].mxu0  ;;  %v365_v22 = vadd.f32 %v563_v16, %v364_v19  ;;  %v389_v31 = vadd.f32 %v599_v18, %v563_v16 }
  0xed   : > { %v600_v23 = vpop.f32.mrb[2].mxu1  ;;  %v367_v24 = vpop.f32.mrb[3].mxu0  ;;  %v376_v28 = vadd.f32 %v596_v21, %v563_v16  ;;  %v381_v29 = vadd.f32 %v563_v16, %v380_v20 }
  0xee   : > { %v383_v25 = vpop.f32.mrb[3].mxu1  ;;  %395 = vxpose.xlu0.b32.start [1/8] (short) (narrow) %v365_v22, 64  ;;  %v368_v26 = vadd.f32 %v563_v16, %v367_v24  ;;  %v392_v32 = vadd.f32 %v600_v23, %v563_v16 }
  0xef   : > { %v384_v30 = vadd.f32 %v563_v16, %v383_v25 }
  0xf2   : > { %396 = vxpose.xlu0.b32.cont [2/8] (short) (narrow) %v368_v26, 64 }
  0xf6   : > { %397 = vxpose.xlu0.b32.cont [3/8] (short) (narrow) %v373_v27, 64 }
  0xfa   : > { %398 = vxpose.xlu0.b32.cont [4/8] (short) (narrow) %v376_v28, 64 }
  0xfe   : > { %399 = vxpose.xlu0.b32.cont [5/8] (short) (narrow) %v381_v29, 64 }
 0x102   : > { %400 = vxpose.xlu0.b32.cont [6/8] (short) (narrow) %v384_v30, 64 }
 0x106   : > { %401 = vxpose.xlu0.b32.cont [7/8] (short) (narrow) %v389_v31, 64 }
 0x10a   : > { %402 = vxpose.xlu0.b32.end [8/8] (short) (narrow) %v392_v32, 64 }
 0x16e   : > { %v411_v34 = vpop.trf.xlu0 }
 0x16f   : > { %v435_v35 = vadd.f32 %v427_v33, %v411_v34 }
 0x171   : > { %443 = vst.msk [vmem:[%s738_s12] sm:$0xff] %vm317_vm0, %v435_v35 }
 0x172   : > { %v412_v37 = vpop.trf.xlu0 }
 0x173   : > { %v436_v38 = vadd.f32 %v428_v36, %v412_v37 }
 0x175   : > { %444 = vst.msk [vmem:[%s738_s12 + $0x8] sm:$0xff] %vm317_vm0, %v436_v38 }
 0x176   : > { %v413_v40 = vpop.trf.xlu0 }
 0x177   : > { %v437_v41 = vadd.f32 %v429_v39, %v413_v40 }
 0x179   : > { %445 = vst.msk [vmem:[%s738_s12 + $0x10] sm:$0xff] %vm317_vm0, %v437_v41 }
 0x17a   : > { %v414_v43 = vpop.trf.xlu0 }
 0x17b   : > { %v438_v44 = vadd.f32 %v430_v42, %v414_v43 }
 0x17d   : > { %446 = vst.msk [vmem:[%s738_s12 + $0x18] sm:$0xff] %vm317_vm0, %v438_v44 }
 0x17e   : > { %v415_v46 = vpop.trf.xlu0 }
 0x17f   : > { %v439_v47 = vadd.f32 %v431_v45, %v415_v46 }
 0x181   : > { %447 = vst.msk [vmem:[%s738_s12 + $0x20] sm:$0xff] %vm317_vm0, %v439_v47 }
 0x182   : > { %v416_v49 = vpop.trf.xlu0 }
 0x183   : > { %v440_v50 = vadd.f32 %v432_v48, %v416_v49 }
 0x185   : > { %448 = vst.msk [vmem:[%s738_s12 + $0x28] sm:$0xff] %vm317_vm0, %v440_v50 }
 0x186   : > { %v417_v52 = vpop.trf.xlu0 }
 0x187   : > { %v441_v53 = vadd.f32 %v433_v51, %v417_v52 }
 0x189   : > { %449 = vst.msk [vmem:[%s738_s12 + $0x30] sm:$0xff] %vm317_vm0, %v441_v53 }
 0x18a   : > { %v418_v55 = vpop.trf.xlu0 }
 0x18b   : > { %v442_v56 = vadd.f32 %v434_v54, %v418_v55 }
 0x18d   : > { %450 = vst.msk [vmem:[%s738_s12 + $0x38] sm:$0xff] %vm317_vm0, %v442_v56 }
 0x18e PF: > { %s14_s17 = sadd.s32 1, %s660_s17   ;;  %s770_s15 = smov %s656_s16 }
 0x18f   : > { %p11_p5 = scmp.ge.s32.totalorder %s14_s17, 4   ;;  %s771_s16 = smov %s773_s18 }
 0x191   :  { %13 = sbr.rel (!%p11_p5) target bundleno = 2 (0x2), region = 69 }

// kernel: run.15
= control target key start
LH: loop header
LB: loop body
LE: loop exit
PB: predicated region body
PF: predicated region fallthrough
CT: control target
= control target key end

     0   :  { %s2533_s24 = smov 0   ;;  %s2535_s25 = smov 0   ;;  %s3156_s0 = inlined_call_operand.vmem [shape: f32[2,64,64], index: 0, kind: input, shape index: {}]   ;;  %s3157_s1 = inlined_call_operand.vmem [shape: bf16[2,8,128], index: 1, kind: input, shape index: {}]   ;;  %s3158_s2 = inlined_call_operand.vmem [shape: f32[1,64], index: 2, kind: input, shape index: {}]   ;;  %s3159_s3 = inlined_call_operand.vmem [shape: f32[1,64], index: 3, kind: input, shape index: {}]   ;;  %s3160_s4 = inlined_call_operand.vmem [shape: bf16[64,64], index: 4, kind: input, shape index: {}]   ;;  %s3161_s5 = inlined_call_operand.vmem [shape: bf16[64,64], index: 5, kind: input, shape index: {}]   ;;  %s3162_s6 = inlined_call_operand.vmem [shape: f32[1,64], index: 6, kind: input, shape index: {}]   ;;  %s3163_s7 = inlined_call_operand.vmem [shape: f32[2,64,64], index: 7, kind: output, shape index: {}]  }
   0x1   :  { %s2537_s26 = smov 0  }
   0x2 LB: > { %s29_s27 = sadd.s32 1, %s2480_s25  ;;  %p2032_p0 = scmp.ge.s32.totalorder %s2484_s26, 1  ;;  %s2484_s26 = sphi %s2537_s26, %s17_s26   ;;  %s2480_s25 = sphi %s2535_s25, %s3165_s25   ;;  %s2476_s24 = sphi %s2533_s24, %s3164_s24  }
   0x3   : > { %p31_p1 = scmp.ge.s32.totalorder %s29_s27, 2  ;;  %p267_p2 = scmp.lt.s32.totalorder %s2484_s26, 3 }
   0x5   : > { %s3167_s27 = smov (%p31_p1, %s29_s27), 0  ;;  %p268_p3 = pnand %p2032_p0, %p267_p2 }
   0x6   : > { %p312_p4 = scmp.lt.s32.totalorder (!%p268_p3), %s2476_s24, 1  ;;  %vm346_vm0 = vcmask (!%p268_p3), 523264   ;;  %v2301_v56 = vld [vmem:[%s3160_s4] sm:$0xff] (!%p268_p3)   ;;  %v2302_v57 = vld [vmem:[%s3160_s4 + $0x8] sm:$0xff] (!%p268_p3)   ;;  %v2303_v58 = vld [vmem:[%s3160_s4 + $0x10] sm:$0xff] (!%p268_p3)   ;;  %vm598_vm1 = vcmask (!%p268_p3), 130048  }
   0x7   : > { %271 = sbr.rel (%p268_p3) target bundleno = 1845 (0x735), region = 48  ;;  %2150 = vmatprep.subr.bf16.mxu0 (!%p268_p3), %v2301_v56  ;;  %v2304_v59 = vld [vmem:[%s3160_s4 + $0x18] sm:$0xff] (!%p268_p3)   ;;  %s2486_s30 = smov (!%p268_p3), 112   ;;  %vm679_vm2 = vcmask (!%p268_p3), 64512   ;;  %vm789_vm3 = vcmask (!%p268_p3), 1043456   ;;  %vm1166_vm4 = vcmask (!%p268_p3), 261248  }
   0x8   : > { %2151 = vmatpush3.bf16.msra.mxu0 (!%p268_p3), %v2301_v56  ;;  %s2487_s9 = smov (!%p268_p3), 96   ;;  %s2488_s10 = smov (!%p268_p3), 80   ;;  %vm1471_vm5 = vcmask (!%p268_p3), 392448   ;;  %vm1776_vm6 = vcmask (!%p268_p3), 523648  }
   0x9   : > { %2152 = vmatprep.subr.bf16.mxu0 (!%p268_p3), %v2302_v57  ;;  %s2489_s11 = smov (!%p268_p3), 64   ;;  %s2490_s12 = smov (!%p268_p3), 48  }
   0xa   : > { %s2491_s13 = smov (!%p268_p3), 16   ;;  %s2492_s14 = smov (!%p268_p3), 32  }
   0xc   : > { %2153 = vmatpush3.bf16.msra.mxu0 (!%p268_p3), %v2302_v57 }
   0xd   : > { %2154 = vmatprep.subr.bf16.mxu0 (!%p268_p3), %v2303_v58 }
   0xe   : > { %s3169_s24 = smov (!%p312_p4, %s2476_s24), 1 }
   0xf   : > { %s2092_s28 = sshll.u32 %s3169_s24, 6  ;;  %s2035_s17 = sshll.u32 %s3169_s24, 2 }
  0x10   : > { %s2559_s8 = scalar_lea.vmem %s3156_s0, %s2092_s28  ;;  %2155 = vmatpush3.bf16.msra.mxu0 %v2303_v58  ;;  %s324_s20 = scalar_lea.vmem %s3157_s1, %s2035_s17 }
  0x11   : > { %v336_v0 = vld [vmem:[%s2559_s8] sm:$0xff]  ;;  %v338_v1 = vld [vmem:[%s2559_s8 + $0x10] sm:$0xff]  ;;  %v337_v2 = vld [vmem:[%s2559_s8 + $0x8] sm:$0xff]  ;;  %2156 = vmatprep.subr.bf16.mxu0 %v2304_v59 }
  0x12   : > { %v347_v3 = vsel %vm346_vm0, %v336_v0, 0.0  ;;  %v353_v4 = vsel %vm346_vm0, %v338_v1, 0.0  ;;  %v339_v5 = vld [vmem:[%s2559_s8 + $0x18] sm:$0xff]  ;;  %v350_v6 = vsel %vm346_vm0, %v337_v2, 0.0  ;;  %v340_v8 = vld [vmem:[%s2559_s8 + $0x20] sm:$0xff]  ;;  %v341_v9 = vld [vmem:[%s2559_s8 + $0x28] sm:$0xff] }
  0x13   : > { %348 = vadd.xlane.f32.xlu0 %v347_v3  ;;  %354 = vadd.xlane.f32.xlu1 %v353_v4  ;;  %v356_v7 = vsel %vm346_vm0, %v339_v5, 0.0  ;;  %v359_v10 = vsel %vm346_vm0, %v340_v8, 0.0  ;;  %v362_v11 = vsel %vm346_vm0, %v341_v9, 0.0  ;;  %v342_v12 = vld [vmem:[%s2559_s8 + $0x30] sm:$0xff]  ;;  %v343_v13 = vld [vmem:[%s2559_s8 + $0x38] sm:$0xff] }
  0x14   : > { %v365_v14 = vsel %vm346_vm0, %v342_v12, 0.0  ;;  %v368_v15 = vsel %vm346_vm0, %v343_v13, 0.0  ;;  %2157 = vmatpush3.bf16.msra.mxu0 %v2304_v59  ;;  %v2633_v60 = vld [vmem:[%s324_s20] sm:$0xf] }
  0x15   : > { %2262 = vmatprep.subr.msk.bf16.mxu1 %vm598_vm1, %v2633_v60 }
  0x17   : > { %351 = vadd.xlane.f32.xlu0 %v350_v6  ;;  %357 = vadd.xlane.f32.xlu1 %v356_v7 }
  0x1b   : > { %360 = vadd.xlane.f32.xlu0 %v359_v10  ;;  %363 = vadd.xlane.f32.xlu1 %v362_v11 }
  0x1f   : > { %366 = vadd.xlane.f32.xlu0 %v365_v14  ;;  %369 = vadd.xlane.f32.xlu1 %v368_v15 }
  0xa0   : > { %v349_v16 = vpop.xlane.xlu0 %348  ;;  %v355_v17 = vpop.xlane.xlu1 %354 }
  0xa1   : > { %v372_v18 = vmul.f32 0.015625, %v349_v16  ;;  %v374_v19 = vmul.f32 0.015625, %v355_v17 }
  0xa3   : > { %v2577_v20 = vsub.f32 %v336_v0, %v372_v18  ;;  %v2579_v21 = vsub.f32 %v338_v1, %v374_v19 }
  0xa4   : > { %v352_v22 = vpop.xlane.xlu0 %351  ;;  %v358_v23 = vpop.xlane.xlu1 %357 }
  0xa5   : > { %v373_v24 = vmul.f32 0.015625, %v352_v22  ;;  %v375_v25 = vmul.f32 0.015625, %v358_v23  ;;  %v388_v26 = vmul.f32 %v2577_v20, %v2577_v20  ;;  %v390_v27 = vmul.f32 %v2579_v21, %v2579_v21 }
  0xa7   : > { %v2585_v28 = vsub.f32 %v337_v2, %v373_v24  ;;  %v2587_v29 = vsub.f32 %v339_v5, %v375_v25  ;;  %v396_v30 = vsel %vm346_vm0, %v388_v26, 0.0  ;;  %v402_v33 = vsel %vm346_vm0, %v390_v27, 0.0  ;;  %v2038_v24 = vld [vmem:[%s3158_s2] ss:$0 sm:$0xff] }
  0xa8   : > { %397 = vadd.xlane.f32.xlu0 %v396_v30  ;;  %v361_v31 = vpop.xlane.xlu0 %360  ;;  %v364_v32 = vpop.xlane.xlu1 %363 }
  0xa9   : > { %v376_v34 = vmul.f32 0.015625, %v361_v31  ;;  %v377_v35 = vmul.f32 0.015625, %v364_v32  ;;  %v389_v36 = vmul.f32 %v2585_v28, %v2585_v28  ;;  %v391_v37 = vmul.f32 %v2587_v29, %v2587_v29  ;;  %v2039_v32 = vld [vmem:[%s3159_s3] ss:$0 sm:$0xff] }
  0xab   : > { %v2595_v38 = vsub.f32 %v340_v8, %v376_v34  ;;  %v2597_v39 = vsub.f32 %v341_v9, %v377_v35  ;;  %v399_v40 = vsel %vm346_vm0, %v389_v36, 0.0  ;;  %v405_v43 = vsel %vm346_vm0, %v391_v37, 0.0 }
  0xac   : > { %403 = vadd.xlane.f32.xlu0 %v402_v33  ;;  %400 = vadd.xlane.f32.xlu1 %v399_v40  ;;  %v367_v41 = vpop.xlane.xlu0 %366  ;;  %v370_v42 = vpop.xlane.xlu1 %369 }
  0xad   : > { %v378_v44 = vmul.f32 0.015625, %v367_v41  ;;  %v379_v45 = vmul.f32 0.015625, %v370_v42  ;;  %v392_v46 = vmul.f32 %v2595_v38, %v2595_v38  ;;  %v393_v47 = vmul.f32 %v2597_v39, %v2597_v39 }
  0xaf   : > { %v2605_v48 = vsub.f32 %v342_v12, %v378_v44  ;;  %v2607_v49 = vsub.f32 %v343_v13, %v379_v45  ;;  %v408_v50 = vsel %vm346_vm0, %v392_v46, 0.0  ;;  %v411_v51 = vsel %vm346_vm0, %v393_v47, 0.0 }
  0xb0   : > { %406 = vadd.xlane.f32.xlu1 %v405_v43  ;;  %409 = vadd.xlane.f32.xlu0 %v408_v50 }
  0xb1   : > { %v394_v52 = vmul.f32 %v2605_v48, %v2605_v48  ;;  %v395_v53 = vmul.f32 %v2607_v49, %v2607_v49 }
  0xb3   : > { %v414_v54 = vsel %vm346_vm0, %v394_v52, 0.0  ;;  %v417_v55 = vsel %vm346_vm0, %v395_v53, 0.0 }
  0xb4   : > { %412 = vadd.xlane.f32.xlu1 %v411_v51  ;;  %415 = vadd.xlane.f32.xlu0 %v414_v54 }
  0xb8   : > { %418 = vadd.xlane.f32.xlu1 %v417_v55 }
 0x135   : > { %v398_v61 = vpop.xlane.xlu0 %397 }
 0x136   : > { %v420_v62 = vmul.f32 0.015625, %v398_v61 }
 0x138   : > { %v428_v63 = vadd.f32 1e-05, %v420_v62  ;;  %v612_v62 = vsel %vm598_vm1, %v2633_v60, 0 }
 0x139   : > { %v401_v0 = vpop.xlane.xlu1 %400  ;;  %v404_v1 = vpop.xlane.xlu0 %403  ;;  %2167 = vmatpush3.bf16.xpose.msra.mxu1 %v612_v62 }
 0x13a   : > { %2310 = vrsqrt.f32 %v428_v63  ;;  %v421_v2 = vmul.f32 0.015625, %v401_v0  ;;  %v422_v3 = vmul.f32 0.015625, %v404_v1 }
 0x13c   : > { %v429_v4 = vadd.f32 1e-05, %v421_v2  ;;  %v430_v5 = vadd.f32 1e-05, %v422_v3 }
 0x13d   : > { %v407_v6 = vpop.xlane.xlu1 %406  ;;  %v410_v7 = vpop.xlane.xlu0 %409 }
 0x13e   : > { %2312 = vrsqrt.f32 %v429_v4  ;;  %v423_v8 = vmul.f32 0.015625, %v407_v6  ;;  %v424_v9 = vmul.f32 0.015625, %v410_v7 }
 0x13f   : > { %2314 = vrsqrt.f32 %v430_v5 }
 0x140   : > { %v431_v10 = vadd.f32 1e-05, %v423_v8  ;;  %v432_v11 = vadd.f32 1e-05, %v424_v9 }
 0x141   : > { %v413_v12 = vpop.xlane.xlu1 %412  ;;  %v416_v13 = vpop.xlane.xlu0 %415 }
 0x142   : > { %2316 = vrsqrt.f32 %v431_v10  ;;  %v425_v14 = vmul.f32 0.015625, %v413_v12  ;;  %v426_v15 = vmul.f32 0.015625, %v416_v13 }
 0x143   : > { %2318 = vrsqrt.f32 %v432_v11 }
 0x144   : > { %v2311_v16 = vpop.eup %2310  ;;  %v433_v17 = vadd.f32 1e-05, %v425_v14  ;;  %v434_v18 = vadd.f32 1e-05, %v426_v15 }
 0x145   : > { %v419_v19 = vpop.xlane.xlu1 %418  ;;  %v444_v22 = vmul.f32 %v2311_v16, %v2577_v20 }
 0x146   : > { %2320 = vrsqrt.f32 %v433_v17  ;;  %v427_v23 = vmul.f32 0.015625, %v419_v19 }
 0x147   : > { %2322 = vrsqrt.f32 %v434_v18  ;;  %v458_v31 = vmul.f32 %v2038_v24, %v444_v22 }
 0x148   : > { %v2313_v25 = vpop.eup %2312  ;;  %v435_v26 = vadd.f32 1e-05, %v427_v23 }
 0x149   : > { %v2315_v27 = vpop.eup %2314  ;;  %v445_v30 = vmul.f32 %v2313_v25, %v2585_v28  ;;  %v472_v36 = vadd.f32 %v2039_v32, %v458_v31 }
 0x14a   : > { %2324 = vrsqrt.f32 %v435_v26  ;;  %v446_v20 = vmul.f32 %v2315_v27, %v2579_v21 }
 0x14b   : > { %v459_v33 = vmul.f32 %v2038_v24, %v445_v30 }
 0x14c   : > { %v2317_v34 = vpop.eup %2316  ;;  %v460_v41 = vmul.f32 %v2038_v24, %v446_v20 }
 0x14d   : > { %v2319_v35 = vpop.eup %2318  ;;  %v473_v37 = vadd.f32 %v2039_v32, %v459_v33  ;;  %v447_v40 = vmul.f32 %v2317_v34, %v2587_v29 }
 0x14e   : > { %v448_v42 = vmul.f32 %v2319_v35, %v2595_v38  ;;  %v474_v46 = vadd.f32 %v2039_v32, %v460_v41 }
 0x14f   : > { %v480_v43 = vpack.c.bf16 %v473_v37, %v472_v36  ;;  %v461_v28 = vmul.f32 %v2038_v24, %v447_v40 }
 0x150   : > { %v2321_v44 = vpop.eup %2320  ;;  %v462_v50 = vmul.f32 %v2038_v24, %v448_v42 }
 0x151   : > { %v2323_v45 = vpop.eup %2322  ;;  %2158 = vmatprep.mubr.msk.bf16.mxu0 %vm346_vm0, %v480_v43  ;;  %v475_v47 = vadd.f32 %v2039_v32, %v461_v28  ;;  %v449_v21 = vmul.f32 %v2321_v44, %v2597_v39 }
 0x152   : > { %v450_v51 = vmul.f32 %v2323_v45, %v2605_v48  ;;  %v476_v29 = vadd.f32 %v2039_v32, %v462_v50  ;;  %v2657_v48 = vcombine.low %v2633_v60, %v2633_v60 }
 0x153   : > { %v481_v52 = vpack.c.bf16 %v475_v47, %v474_v46  ;;  %v463_v53 = vmul.f32 %v2038_v24, %v449_v21 }
 0x154   : > { %v2325_v54 = vpop.eup %2324  ;;  %v464_v56 = vmul.f32 %v2038_v24, %v450_v51  ;;  %878 = vrot.lane.b32.xlu0 %v2657_v48, %s2486_s30 }
 0x155   : > { %2159 = vmatmul.mubr.msk.bf16.vlgmr.msra.gmra.mrb[0].mxu0 %vm346_vm0, %v481_v52  ;;  %v477_v38 = vadd.f32 %v2039_v32, %v463_v53  ;;  %v451_v55 = vmul.f32 %v2325_v54, %v2607_v49 }
 0x156   : > { %v478_v59 = vadd.f32 %v2039_v32, %v464_v56 }
 0x157   : > { %v482_v57 = vpack.c.bf16 %v477_v38, %v476_v29  ;;  %v465_v58 = vmul.f32 %v2038_v24, %v451_v55 }
 0x159   : > { %2162 = vmatprep.mubr.msk.bf16.mxu0 %vm346_vm0, %v482_v57  ;;  %v479_v61 = vadd.f32 %v2039_v32, %v465_v58 }
 0x15b   : > { %v483_v39 = vpack.c.bf16 %v479_v61, %v478_v59 }
 0x15d   : > { %2163 = vmatmul.mubr.msk.bf16.gmra.mrb[4].mxu0 %vm346_vm0, %v483_v39 }
 0x1c6   : > { %v879_v49 = vpop.permute.xlu0 %878 }
 0x1c7   : > { %2264 = vmatprep.subr.msk.bf16.mxu0 %vm598_vm1, %v879_v49  ;;  %v893_v63 = vsel %vm598_vm1, %v879_v49, 0 }
 0x1c8   : > { %2187 = vmatpush3.bf16.xpose.msra.mxu0 %v893_v63 }
 0x228   : > { %v2160_v0 = vpop.f32.mrb[0].mxu0 }
 0x229   : > { %v562_v1 = vpop.f32.mrb[1].mxu0 }
 0x22a   : > { %v2161_v2 = vpop.f32.mrb[2].mxu0 }
 0x22b   : > { %v594_v3 = vpack.c.bf16 %v2161_v2, %v2160_v0  ;;  %v565_v4 = vpop.f32.mrb[3].mxu0 }
 0x22c   : > { %v593_v5 = vpack.c.bf16 %v565_v4, %v562_v1 }
 0x22e   : > { %870 = vrot.lane.b32.xlu1 %v593_v5, %s2486_s30  ;;  %2168 = vmatprep.mubr.msk.bf16.mxu1 %vm598_vm1, %v593_v5 }
 0x22f   : > { %2169 = vmatmul.mubr.msk.bf16.vlgmr.msra.gmra.mrb[0].mxu1 %vm598_vm1, %v594_v3 }
 0x230   : > { %v2164_v60 = vpop.f32.mrb[4].mxu0 }
 0x231   : > { %v578_v6 = vpop.f32.mrb[5].mxu0 }
 0x232   : > { %872 = vrot.lane.b32.xlu1 %v594_v3, %s2486_s30  ;;  %v2165_v7 = vpop.f32.mrb[6].mxu0 }
 0x233   : > { %v596_v8 = vpack.c.bf16 %v2165_v7, %v2164_v60  ;;  %v581_v9 = vpop.f32.mrb[7].mxu0 }
 0x234   : > { %v595_v10 = vpack.c.bf16 %v581_v9, %v578_v6 }
 0x235   : > { %876 = vrot.lane.b32.xlu0 %v596_v8, %s2486_s30 }
 0x236   : > { %874 = vrot.lane.b32.xlu1 %v595_v10, %s2486_s30  ;;  %2172 = vmatprep.mubr.msk.bf16.mxu1 %vm598_vm1, %v595_v10 }
 0x237   : > { %2173 = vmatmul.mubr.msk.bf16.gmra.mrb[4].mxu1 %vm598_vm1, %v596_v8 }
 0x239   : > { %1175 = vrot.lane.b32.xlu0 %v593_v5, %s2487_s9 }
 0x23a   : > { %1183 = vrot.lane.b32.xlu1 %v2657_v48, %s2487_s9 }
 0x23d   : > { %1179 = vrot.lane.b32.xlu0 %v595_v10, %s2487_s9 }
 0x23e   : > { %1177 = vrot.lane.b32.xlu1 %v594_v3, %s2487_s9 }
 0x241   : > { %1488 = vrot.lane.b32.xlu0 %v2657_v48, %s2488_s10 }
 0x242   : > { %1181 = vrot.lane.b32.xlu1 %v596_v8, %s2487_s9 }
 0x245   : > { %1482 = vrot.lane.b32.xlu0 %v594_v3, %s2488_s10 }
 0x246   : > { %1480 = vrot.lane.b32.xlu1 %v593_v5, %s2488_s10 }
 0x249   : > { %1486 = vrot.lane.b32.xlu0 %v596_v8, %s2488_s10 }
 0x24a   : > { %1484 = vrot.lane.b32.xlu1 %v595_v10, %s2488_s10  ;;  %s3121_s10 = scalar_lea.vmem %s3163_s7, %s2092_s28 }
 0x24e   : > { %775 = vrot.lane.b32.xlu1 %v2657_v48, %s2489_s11 }
 0x2a0   : > { %v871_v11 = vpop.permute.xlu1 %870 }
 0x2a1   : > { %2188 = vmatprep.mubr.msk.bf16.mxu0 %vm598_vm1, %v871_v11 }
 0x2a4   : > { %v873_v12 = vpop.permute.xlu1 %872 }
 0x2a5   : > { %2189 = vmatmul.mubr.msk.bf16.vlgmr.msra.gmra.mrb[8].mxu0 %vm598_vm1, %v873_v12 }
 0x2a7   : > { %v877_v13 = vpop.permute.xlu0 %876 }
 0x2a8   : > { %v875_v14 = vpop.permute.xlu1 %874 }
 0x2a9   : > { %2192 = vmatprep.mubr.msk.bf16.mxu0 %vm598_vm1, %v875_v14 }
 0x2ab   : > { %v1176_v15 = vpop.permute.xlu0 %1175 }
 0x2ac   : > { %v1184_v16 = vpop.permute.xlu1 %1183 }
 0x2ad   : > { %2193 = vmatmul.mubr.msk.bf16.gmra.mrb[12].mxu0 %vm598_vm1, %v877_v13  ;;  %2266 = vmatprep.subr.msk.bf16.mxu0 %vm598_vm1, %v1184_v16  ;;  %v1198_v17 = vsel %vm598_vm1, %v1184_v16, 0 }
 0x2ae   : > { %2207 = vmatpush3.bf16.xpose.msra.mxu0 %v1198_v17  ;;  %2208 = vmatprep.mubr.msk.bf16.mxu0 %vm598_vm1, %v1176_v15 }
 0x2af   : > { %v1180_v18 = vpop.permute.xlu0 %1179 }
 0x2b0   : > { %v1178_v19 = vpop.permute.xlu1 %1177 }
 0x2b3   : > { %v1489_v22 = vpop.permute.xlu0 %1488 }
 0x2b4   : > { %v1503_v23 = vsel %vm598_vm1, %v1489_v22, 0  ;;  %2268 = vmatprep.subr.msk.bf16.mxu0 %vm598_vm1, %v1489_v22  ;;  %v1182_v24 = vpop.permute.xlu1 %1181 }
 0x2b5   : > { %2209 = vmatmul.mubr.msk.bf16.vlgmr.msra.gmra.mrb[16].mxu0 %vm598_vm1, %v1178_v19 }
 0x2b6   : > { %2212 = vmatprep.mubr.msk.bf16.mxu0 %vm598_vm1, %v1180_v18  ;;  %2227 = vmatpush3.bf16.xpose.msra.mxu0 %v1503_v23 }
 0x2b7   : > { %v1483_v26 = vpop.permute.xlu0 %1482 }
 0x2b8   : > { %v1481_v25 = vpop.permute.xlu1 %1480 }
 0x2bb   : > { %v1487_v30 = vpop.permute.xlu0 %1486 }
 0x2bc   : > { %v1485_v27 = vpop.permute.xlu1 %1484 }
 0x2bd   : > { %2213 = vmatmul.mubr.msk.bf16.gmra.mrb[20].mxu0 %vm598_vm1, %v1182_v24 }
 0x2be   : > { %2228 = vmatprep.mubr.msk.bf16.mxu0 %vm598_vm1, %v1481_v25 }
 0x2c0   : > { %v776_v28 = vpop.permute.xlu1 %775 }
 0x2c1   : > { %v791_v45 = vsel %vm789_vm3, %v776_v28, 0  ;;  %2263 = vmatprep.subr.msk.bf16.mxu1 %vm789_vm3, %v776_v28 }
 0x2c2   : > { %2177 = vmatpush3.bf16.msra.mxu1 %v791_v45 }
 0x2c5   : > { %2229 = vmatmul.mubr.msk.bf16.vlgmr.msra.gmra.mrb[24].mxu0 %vm598_vm1, %v1483_v26 }
 0x2c6   : > { %2232 = vmatprep.mubr.msk.bf16.mxu0 %vm598_vm1, %v1485_v27 }
 0x2cd   : > { %2233 = vmatmul.mubr.msk.bf16.gmra.mrb[28].mxu0 %vm598_vm1, %v1487_v30 }
 0x302   : > { %v2687_v31 = vpop.f32.mrb[0].mxu1 }
 0x303   : > { %v2689_v32 = vpop.f32.mrb[1].mxu1  ;;  %v686_v20 = vsel %vm679_vm2, %v2687_v31, -inf }
 0x304   : > { %v2693_v33 = vpop.f32.mrb[2].mxu1  ;;  %687 = vmax.xlane.f32.xlu0 %v686_v20  ;;  %v680_v34 = vsel %vm679_vm2, %v2689_v32, -inf }
 0x305   : > { %v2697_v35 = vpop.f32.mrb[3].mxu1  ;;  %681 = vmax.xlane.f32.xlu1 %v680_v34  ;;  %v689_v36 = vsel %vm679_vm2, %v2693_v33, -inf }
 0x306   : > { %v683_v41 = vsel %vm679_vm2, %v2697_v35, -inf }
 0x308   : > { %690 = vmax.xlane.f32.xlu0 %v689_v36 }
 0x30a   : > { %v2701_v37 = vpop.f32.mrb[4].mxu1 }
 0x30b   : > { %v2703_v40 = vpop.f32.mrb[5].mxu1  ;;  %v698_v42 = vsel %vm679_vm2, %v2701_v37, -inf }
 0x30c   : > { %684 = vmax.xlane.f32.xlu0 %v683_v41  ;;  %699 = vmax.xlane.f32.xlu1 %v698_v42  ;;  %v2709_v43 = vpop.f32.mrb[6].mxu1  ;;  %v692_v46 = vsel %vm679_vm2, %v2703_v40, -inf }
 0x30d   : > { %v2711_v44 = vpop.f32.mrb[7].mxu1  ;;  %v701_v47 = vsel %vm679_vm2, %v2709_v43, -inf }
 0x30e   : > { %v695_v21 = vsel %vm679_vm2, %v2711_v44, -inf }
 0x310   : > { %693 = vmax.xlane.f32.xlu1 %v692_v46  ;;  %702 = vmax.xlane.f32.xlu0 %v701_v47 }
 0x314   : > { %696 = vmax.xlane.f32.xlu0 %v695_v21 }
 0x378   : > { %v2721_v50 = vpop.f32.mrb[8].mxu0 }
 0x379   : > { %v2723_v51 = vpop.f32.mrb[9].mxu0  ;;  %v966_v52 = vsel %vm679_vm2, %v2721_v50, -inf }
 0x37a   : > { %967 = vmax.xlane.f32.xlu1 %v966_v52  ;;  %v2727_v53 = vpop.f32.mrb[10].mxu0  ;;  %v960_v38 = vsel %vm679_vm2, %v2723_v51, -inf }
 0x37b   : > { %v2729_v54 = vpop.f32.mrb[11].mxu0  ;;  %v969_v29 = vsel %vm679_vm2, %v2727_v53, -inf }
 0x37c   : > { %970 = vmax.xlane.f32.xlu0 %v969_v29  ;;  %v963_v55 = vsel %vm679_vm2, %v2729_v54, -inf }
 0x37e   : > { %961 = vmax.xlane.f32.xlu1 %v960_v38 }
 0x380   : > { %964 = vmax.xlane.f32.xlu0 %v963_v55  ;;  %v2737_v56 = vpop.f32.mrb[12].mxu0 }
 0x381   : > { %v2739_v57 = vpop.f32.mrb[13].mxu0  ;;  %v978_v58 = vsel %vm679_vm2, %v2737_v56, -inf }
 0x382   : > { %979 = vmax.xlane.f32.xlu1 %v978_v58  ;;  %v2743_v59 = vpop.f32.mrb[14].mxu0  ;;  %v972_v62 = vsel %vm679_vm2, %v2739_v57, -inf }
 0x383   : > { %v2745_v61 = vpop.f32.mrb[15].mxu0  ;;  %v981_v39 = vsel %vm679_vm2, %v2743_v59, -inf }
 0x384   : > { %982 = vmax.xlane.f32.xlu0 %v981_v39  ;;  %v975_v49 = vsel %vm679_vm2, %v2745_v61, -inf }
 0x386   : > { %973 = vmax.xlane.f32.xlu1 %v972_v62 }
 0x388   : > { %976 = vmax.xlane.f32.xlu0 %v975_v49  ;;  %v2753_v63 = vpop.f32.mrb[16].mxu0 }
 0x389   : > { %v2755_v0 = vpop.f32.mrb[17].mxu0  ;;  %v1271_v1 = vsel %vm679_vm2, %v2753_v63, -inf }
 0x38a   : > { %1272 = vmax.xlane.f32.xlu1 %v1271_v1  ;;  %v2759_v2 = vpop.f32.mrb[18].mxu0  ;;  %v1265_v5 = vsel %vm679_vm2, %v2755_v0, -inf }
 0x38b   : > { %v2761_v3 = vpop.f32.mrb[19].mxu0  ;;  %v1274_v4 = vsel %vm679_vm2, %v2759_v2, -inf }
 0x38c   : > { %1275 = vmax.xlane.f32.xlu0 %v1274_v4  ;;  %v1268_v60 = vsel %vm679_vm2, %v2761_v3, -inf }
 0x38e   : > { %1266 = vmax.xlane.f32.xlu1 %v1265_v5 }
 0x390   : > { %1269 = vmax.xlane.f32.xlu0 %v1268_v60  ;;  %v2769_v6 = vpop.f32.mrb[20].mxu0 }
 0x391   : > { %v2771_v7 = vpop.f32.mrb[21].mxu0  ;;  %v688_v8 = vpop.xlane.xlu0 %687  ;;  %v1283_v9 = vsel %vm679_vm2, %v2769_v6, -inf }
 0x392   : > { %1284 = vmax.xlane.f32.xlu1 %v1283_v9  ;;  %v2775_v10 = vpop.f32.mrb[22].mxu0  ;;  %v706_v13 = vsub.f32 %v2687_v31, %v688_v8  ;;  %v682_v14 = vpop.xlane.xlu1 %681  ;;  %v1277_v15 = vsel %vm679_vm2, %v2771_v7, -inf }
 0x393   : > { %v2777_v11 = vpop.f32.mrb[23].mxu0  ;;  %v1286_v12 = vsel %vm679_vm2, %v2775_v10, -inf  ;;  %v704_v18 = vsub.f32 %v2689_v32, %v682_v14 }
 0x394   : > { %1287 = vmax.xlane.f32.xlu0 %v1286_v12  ;;  %v1280_v16 = vsel %vm679_vm2, %v2777_v11, -inf  ;;  %v716_v17 = vmul.f32 1.442695, %v706_v13 }
 0x395   : > { %v712_v30 = vmul.f32 1.442695, %v704_v18  ;;  %v691_v4 = vpop.xlane.xlu0 %690 }
 0x396   : > { %1278 = vmax.xlane.f32.xlu1 %v1277_v15  ;;  %2326 = vpow2.f32 %v716_v17  ;;  %v707_v60 = vsub.f32 %v2693_v33, %v691_v4 }
 0x397   : > { %2328 = vpow2.f32 %v712_v30 }
 0x398   : > { %1281 = vmax.xlane.f32.xlu0 %v1280_v16  ;;  %v2787_v19 = vpop.f32.mrb[24].mxu0  ;;  %v718_v9 = vmul.f32 1.442695, %v707_v60 }
 0x399   : > { %v700_v22 = vpop.xlane.xlu1 %699  ;;  %v2789_v23 = vpop.f32.mrb[25].mxu0  ;;  %v1576_v24 = vsel %vm679_vm2, %v2787_v19, -inf }
 0x39a   : > { %1577 = vmax.xlane.f32.xlu1 %v1576_v24  ;;  %v2793_v25 = vpop.f32.mrb[26].mxu0  ;;  %v710_v31 = vsub.f32 %v2701_v37, %v700_v22  ;;  %v1570_v20 = vsel %vm679_vm2, %v2789_v23, -inf  ;;  %v685_v5 = vpop.xlane.xlu0 %684 }
 0x39b   : > { %v2795_v26 = vpop.f32.mrb[27].mxu0  ;;  %v1579_v27 = vsel %vm679_vm2, %v2793_v25, -inf  ;;  %v705_v12 = vsub.f32 %v2697_v35, %v685_v5 }
 0x39c   : > { %1580 = vmax.xlane.f32.xlu0 %v1579_v27  ;;  %v1573_v34 = vsel %vm679_vm2, %v2795_v26, -inf  ;;  %v724_v36 = vmul.f32 1.442695, %v710_v31 }
 0x39d   : > { %v694_v32 = vpop.xlane.xlu1 %693  ;;  %v714_v13 = vmul.f32 1.442695, %v705_v12 }
 0x39e   : > { %1571 = vmax.xlane.f32.xlu1 %v1570_v20  ;;  %v708_v41 = vsub.f32 %v2703_v40, %v694_v32  ;;  %2330 = vpow2.f32 %v724_v36  ;;  %v703_v8 = vpop.xlane.xlu0 %702 }
 0x39f   : > { %v711_v14 = vsub.f32 %v2709_v43, %v703_v8 }
 0x3a0   : > { %1574 = vmax.xlane.f32.xlu0 %v1573_v34  ;;  %v2805_v42 = vpop.f32.mrb[28].mxu0  ;;  %v720_v21 = vmul.f32 1.442695, %v708_v41  ;;  %v2819_v52 = vpop.eup %2326 }
 0x3a1   : > { %v2807_v28 = vpop.f32.mrb[29].mxu0  ;;  %v1588_v37 = vsel %vm679_vm2, %v2805_v42, -inf  ;;  %v734_v38 = vsel %vm679_vm2, %v2819_v52, 0.0  ;;  %v2825_v55 = vpop.eup %2328  ;;  %v726_v16 = vmul.f32 1.442695, %v711_v14 }
 0x3a2   : > { %1589 = vmax.xlane.f32.xlu1 %v1588_v37  ;;  %v2811_v45 = vpop.f32.mrb[30].mxu0  ;;  %v1582_v40 = vsel %vm679_vm2, %v2807_v28, -inf  ;;  %2332 = vpow2.f32 %v720_v21  ;;  %v728_v58 = vsel %vm679_vm2, %v2825_v55, 0.0  ;;  %v697_v15 = vpop.xlane.xlu0 %696 }
 0x3a3   : > { %v2813_v46 = vpop.f32.mrb[31].mxu0  ;;  %v1591_v47 = vsel %vm679_vm2, %v2811_v45, -inf  ;;  %2334 = vpow2.f32 %v718_v9  ;;  %v709_v17 = vsub.f32 %v2711_v44, %v697_v15 }
 0x3a4   : > { %1592 = vmax.xlane.f32.xlu0 %v1591_v47  ;;  %v1585_v29 = vsel %vm679_vm2, %v2813_v46, -inf  ;;  %2336 = vpow2.f32 %v714_v13 }
 0x3a5   : > { %2338 = vpow2.f32 %v726_v16  ;;  %v722_v18 = vmul.f32 1.442695, %v709_v17 }
 0x3a6   : > { %1583 = vmax.xlane.f32.xlu1 %v1582_v40 }
 0x3a7   : > { %2340 = vpow2.f32 %v722_v18 }
 0x3a8   : > { %1586 = vmax.xlane.f32.xlu0 %v1585_v29  ;;  %v2829_v39 = vpop.eup %2330 }
 0x3a9   : > { %v746_v62 = vsel %vm679_vm2, %v2829_v39, 0.0 }
 0x3aa   : > { %735 = vadd.xlane.f32.xlu1 %v734_v38 }
 0x3ac   : > { %v2833_v49 = vpop.eup %2332 }
 0x3ad   : > { %v740_v1 = vsel %vm679_vm2, %v2833_v49, 0.0  ;;  %v2843_v22 = vpop.eup %2334 }
 0x3ae   : > { %729 = vadd.xlane.f32.xlu1 %v728_v58  ;;  %v737_v33 = vsel %vm679_vm2, %v2843_v22, 0.0  ;;  %v2847_v24 = vpop.eup %2336 }
 0x3af   : > { %v731_v35 = vsel %vm679_vm2, %v2847_v24, 0.0  ;;  %v2851_v43 = vpop.eup %2338 }
 0x3b0   : > { %v749_v44 = vsel %vm679_vm2, %v2851_v43, 0.0 }
 0x3b1   : > { %v2855_v27 = vpop.eup %2340 }
 0x3b2   : > { %747 = vadd.xlane.f32.xlu1 %v746_v62  ;;  %v743_v30 = vsel %vm679_vm2, %v2855_v27, 0.0 }
 0x3b6   : > { %741 = vadd.xlane.f32.xlu1 %v740_v1 }
 0x3be   : > { %1052 = vrot.lane.b32.xlu0 %v2657_v48, %s2490_s12 }
 0x3dd   : > { %738 = vadd.xlane.f32.xlu0 %v737_v33 }
 0x3e1   : > { %732 = vadd.xlane.f32.xlu0 %v731_v35 }
 0x3e5   : > { %750 = vadd.xlane.f32.xlu0 %v749_v44 }
 0x3e9   : > { %744 = vadd.xlane.f32.xlu0 %v743_v30 }
 0x407   : > { %v968_v31 = vpop.xlane.xlu1 %967 }
 0x408   : > { %v986_v32 = vsub.f32 %v2721_v50, %v968_v31 }
 0x409   : > { %v971_v20 = vpop.xlane.xlu0 %970 }
 0x40a   : > { %v996_v34 = vmul.f32 1.442695, %v986_v32  ;;  %v987_v36 = vsub.f32 %v2727_v53, %v971_v20 }
 0x40b   : > { %v962_v41 = vpop.xlane.xlu1 %961 }
 0x40c   : > { %2342 = vpow2.f32 %v996_v34  ;;  %v998_v37 = vmul.f32 1.442695, %v987_v36  ;;  %v984_v47 = vsub.f32 %v2723_v51, %v962_v41 }
 0x40d   : > { %v965_v21 = vpop.xlane.xlu0 %964 }
 0x40e   : > { %2344 = vpow2.f32 %v998_v37  ;;  %v992_v40 = vmul.f32 1.442695, %v984_v47  ;;  %v985_v29 = vsub.f32 %v2729_v54, %v965_v21 }
 0x40f   : > { %v980_v38 = vpop.xlane.xlu1 %979 }
 0x410   : > { %2346 = vpow2.f32 %v992_v40  ;;  %v994_v58 = vmul.f32 1.442695, %v985_v29  ;;  %v990_v62 = vsub.f32 %v2737_v56, %v980_v38 }
 0x411   : > { %v983_v50 = vpop.xlane.xlu0 %982 }
 0x412   : > { %2348 = vpow2.f32 %v994_v58  ;;  %v1004_v1 = vmul.f32 1.442695, %v990_v62  ;;  %v991_v53 = vsub.f32 %v2743_v59, %v983_v50 }
 0x413   : > { %v974_v4 = vpop.xlane.xlu1 %973 }
 0x414   : > { %2350 = vpow2.f32 %v1004_v1  ;;  %v1006_v5 = vmul.f32 1.442695, %v991_v53  ;;  %v988_v51 = vsub.f32 %v2739_v57, %v974_v4 }
 0x415   : > { %v977_v60 = vpop.xlane.xlu0 %976 }
 0x416   : > { %v2866_v8 = vpop.eup %2342  ;;  %2352 = vpow2.f32 %v1006_v5  ;;  %v1000_v54 = vmul.f32 1.442695, %v988_v51  ;;  %v989_v9 = vsub.f32 %v2745_v61, %v977_v60 }
 0x417   : > { %v1273_v12 = vpop.xlane.xlu1 %1272  ;;  %v1014_v56 = vsel %vm679_vm2, %v2866_v8, 0.0 }
 0x418   : > { %v2871_v13 = vpop.eup %2344  ;;  %2354 = vpow2.f32 %v1000_v54  ;;  %v1002_v59 = vmul.f32 1.442695, %v989_v9  ;;  %v1291_v14 = vsub.f32 %v2753_v63, %v1273_v12  ;;  %1015 = vadd.xlane.f32.xlu1 %v1014_v56 }
 0x419   : > { %v1276_v15 = vpop.xlane.xlu0 %1275  ;;  %v1017_v57 = vsel %vm679_vm2, %v2871_v13, 0.0 }
 0x41a   : > { %v2876_v16 = vpop.eup %2346  ;;  %2356 = vpow2.f32 %v1002_v59  ;;  %v1301_v17 = vmul.f32 1.442695, %v1291_v14  ;;  %1018 = vadd.xlane.f32.xlu0 %v1017_v57  ;;  %v1292_v35 = vsub.f32 %v2759_v2, %v1276_v15 }
 0x41b   : > { %v1267_v61 = vpop.xlane.xlu1 %1266  ;;  %v1008_v18 = vsel %vm679_vm2, %v2876_v16, 0.0 }
 0x41c   : > { %v2880_v33 = vpop.eup %2348  ;;  %2358 = vpow2.f32 %v1301_v17  ;;  %v1289_v63 = vsub.f32 %v2755_v0, %v1267_v61  ;;  %1009 = vadd.xlane.f32.xlu1 %v1008_v18  ;;  %v1303_v2 = vmul.f32 1.442695, %v1292_v35 }
 0x41d   : > { %v1270_v44 = vpop.xlane.xlu0 %1269  ;;  %v1011_v30 = vsel %vm679_vm2, %v2880_v33, 0.0 }
 0x41e   : > { %v2886_v31 = vpop.eup %2350  ;;  %v1297_v32 = vmul.f32 1.442695, %v1289_v63  ;;  %1012 = vadd.xlane.f32.xlu0 %v1011_v30  ;;  %v1290_v20 = vsub.f32 %v2761_v3, %v1270_v44 }
 0x41f   : > { %v1285_v34 = vpop.xlane.xlu1 %1284  ;;  %v1026_v36 = vsel %vm679_vm2, %v2886_v31, 0.0 }
 0x420   : > { %v2891_v41 = vpop.eup %2352  ;;  %2360 = vpow2.f32 %v1297_v32  ;;  %1027 = vadd.xlane.f32.xlu1 %v1026_v36  ;;  %v1299_v21 = vmul.f32 1.442695, %v1290_v20  ;;  %v1295_v40 = vsub.f32 %v2769_v6, %v1285_v34 }
 0x421   : > { %v1288_v0 = vpop.xlane.xlu0 %1287  ;;  %v1029_v37 = vsel %vm679_vm2, %v2891_v41, 0.0  ;;  %2362 = vpow2.f32 %v1303_v2 }
 0x422   : > { %v2895_v47 = vpop.eup %2354  ;;  %1030 = vadd.xlane.f32.xlu0 %v1029_v37  ;;  %2364 = vpow2.f32 %v1299_v21  ;;  %v1309_v6 = vmul.f32 1.442695, %v1295_v40  ;;  %v1296_v4 = vsub.f32 %v2775_v10, %v1288_v0 }
 0x423   : > { %v1279_v3 = vpop.xlane.xlu1 %1278  ;;  %v1020_v29 = vsel %vm679_vm2, %v2895_v47, 0.0 }
 0x424   : > { %v2900_v38 = vpop.eup %2356  ;;  %v1293_v58 = vsub.f32 %v2771_v7, %v1279_v3  ;;  %1021 = vadd.xlane.f32.xlu1 %v1020_v29  ;;  %v1311_v56 = vmul.f32 1.442695, %v1296_v4 }
 0x425   : > { %v1282_v62 = vpop.xlane.xlu0 %1281  ;;  %v1023_v50 = vsel %vm679_vm2, %v2900_v38, 0.0 }
 0x426   : > { %v2905_v1 = vpop.eup %2358  ;;  %v1305_v53 = vmul.f32 1.442695, %v1293_v58  ;;  %1024 = vadd.xlane.f32.xlu0 %v1023_v50  ;;  %v1294_v14 = vsub.f32 %v2777_v11, %v1282_v62 }
 0x427   : > { %v1578_v5 = vpop.xlane.xlu1 %1577  ;;  %v1319_v7 = vsel %vm679_vm2, %v2905_v1, 0.0 }
 0x428   : > { %2366 = vpow2.f32 %v1305_v53  ;;  %v1596_v51 = vsub.f32 %v2787_v19, %v1578_v5  ;;  %v1307_v18 = vmul.f32 1.442695, %v1294_v14 }
 0x429   : > { %v1581_v60 = vpop.xlane.xlu0 %1580  ;;  %2368 = vpow2.f32 %v1309_v6 }
 0x42a   : > { %v2911_v54 = vpop.eup %2360  ;;  %v1606_v9 = vmul.f32 1.442695, %v1596_v51  ;;  %v1597_v12 = vsub.f32 %v2793_v25, %v1581_v60  ;;  %1320 = vadd.xlane.f32.xlu0 %v1319_v7 }
 0x42b   : > { %v1572_v59 = vpop.xlane.xlu1 %1571  ;;  %v1313_v19 = vsel %vm679_vm2, %v2911_v54, 0.0  ;;  %v2918_v57 = vpop.eup %2362 }
 0x42c   : > { %2370 = vpow2.f32 %v1606_v9  ;;  %v1594_v10 = vsub.f32 %v2789_v23, %v1572_v59  ;;  %v1608_v17 = vmul.f32 1.442695, %v1597_v12  ;;  %v2922_v63 = vpop.eup %2364  ;;  %v1322_v44 = vsel %vm679_vm2, %v2918_v57, 0.0 }
 0x42d   : > { %v1575_v15 = vpop.xlane.xlu0 %1574  ;;  %2372 = vpow2.f32 %v1311_v56  ;;  %v1316_v0 = vsel %vm679_vm2, %v2922_v63, 0.0 }
 0x42e   : > { %v1602_v61 = vmul.f32 1.442695, %v1594_v10  ;;  %1314 = vadd.xlane.f32.xlu0 %v1313_v19  ;;  %v1595_v35 = vsub.f32 %v2795_v26, %v1575_v15 }
 0x42f   : > { %v1590_v25 = vpop.xlane.xlu1 %1589 }
 0x430   : > { %2374 = vpow2.f32 %v1602_v61  ;;  %v1600_v11 = vsub.f32 %v2805_v42, %v1590_v25  ;;  %v1604_v36 = vmul.f32 1.442695, %v1595_v35 }
 0x431   : > { %v1593_v23 = vpop.xlane.xlu0 %1592  ;;  %2376 = vpow2.f32 %v1608_v17 }
 0x432   : > { %v2926_v30 = vpop.eup %2366  ;;  %v1614_v32 = vmul.f32 1.442695, %v1600_v11  ;;  %1323 = vadd.xlane.f32.xlu0 %v1322_v44  ;;  %2378 = vpow2.f32 %v1307_v18  ;;  %v1601_v21 = vsub.f32 %v2811_v45, %v1593_v23 }
 0x433   : > { %v1584_v20 = vpop.xlane.xlu1 %1583  ;;  %v1325_v34 = vsel %vm679_vm2, %v2926_v30, 0.0  ;;  %v2931_v42 = vpop.eup %2368 }
 0x434   : > { %v1598_v26 = vsub.f32 %v2807_v28, %v1584_v20  ;;  %1326 = vadd.xlane.f32.xlu1 %v1325_v34  ;;  %2380 = vpow2.f32 %v1614_v32  ;;  %v1331_v29 = vsel %vm679_vm2, %v2931_v42, 0.0  ;;  %v1616_v50 = vmul.f32 1.442695, %v1601_v21 }
 0x435   : > { %v1587_v2 = vpop.xlane.xlu0 %1586  ;;  %2382 = vpow2.f32 %v1604_v36 }
 0x436   : > { %v2935_v37 = vpop.eup %2370  ;;  %v1610_v40 = vmul.f32 1.442695, %v1598_v26  ;;  %1317 = vadd.xlane.f32.xlu0 %v1316_v0  ;;  %v1599_v45 = vsub.f32 %v2813_v46, %v1587_v2 }
 0x437   : > { %v1624_v3 = vsel %vm679_vm2, %v2935_v37, 0.0  ;;  %v2940_v28 = vpop.eup %2372  ;;  %v736_v61 = vpop.xlane.xlu1 %735 }
 0x438   : > { %1625 = vadd.xlane.f32.xlu1 %v1624_v3  ;;  %2384 = vpow2.f32 %v1610_v40  ;;  %v1334_v4 = vsel %vm679_vm2, %v2940_v28, 0.0  ;;  %v1612_v51 = vmul.f32 1.442695, %v1599_v45 }
 0x439   : > { %v2944_v58 = vpop.permute.xlu0 %1052  ;;  %2386 = vpow2.f32 %v1616_v50 }
 0x43a   : > { %v2946_v62 = vpop.eup %2374  ;;  %1332 = vadd.xlane.f32.xlu0 %v1331_v29  ;;  %2265 = vmatprep.subr.msk.bf16.mxu1 %vm789_vm3, %v2944_v58  ;;  %2388 = vpow2.f32 %v1612_v51  ;;  %v1067_v45 = vsel %vm789_vm3, %v2944_v58, 0 }
 0x43b   : > { %v1618_v53 = vsel %vm679_vm2, %v2946_v62, 0.0  ;;  %v2953_v6 = vpop.eup %2376  ;;  %v730_v25 = vpop.xlane.xlu1 %729 }
 0x43c   : > { %1619 = vadd.xlane.f32.xlu1 %v1618_v53  ;;  %v2957_v5 = vpop.eup %2378  ;;  %v1627_v46 = vsel %vm679_vm2, %v2953_v6, 0.0 }
 0x43d   : > { %v1328_v7 = vsel %vm679_vm2, %v2957_v5, 0.0 }
 0x43e   : > { %1335 = vadd.xlane.f32.xlu0 %v1334_v4  ;;  %v2961_v60 = vpop.eup %2380 }
 0x43f   : > { %v2965_v9 = vpop.eup %2382  ;;  %v1636_v12 = vsel %vm679_vm2, %v2961_v60, 0.0  ;;  %v748_v35 = vpop.xlane.xlu1 %747 }
 0x440   : > { %1628 = vadd.xlane.f32.xlu1 %v1627_v46  ;;  %v1621_v59 = vsel %vm679_vm2, %v2965_v9, 0.0 }
 0x442   : > { %1329 = vadd.xlane.f32.xlu0 %v1328_v7  ;;  %v2969_v56 = vpop.eup %2384 }
 0x443   : > { %v1630_v14 = vsel %vm679_vm2, %v2969_v56, 0.0  ;;  %v2975_v10 = vpop.eup %2386  ;;  %v742_v23 = vpop.xlane.xlu1 %741 }
 0x444   : > { %1637 = vadd.xlane.f32.xlu1 %v1636_v12  ;;  %v1639_v15 = vsel %vm679_vm2, %v2975_v10, 0.0  ;;  %v2979_v19 = vpop.eup %2388 }
 0x445   : > { %v1633_v17 = vsel %vm679_vm2, %v2979_v19, 0.0 }
 0x446   : > { %1622 = vadd.xlane.f32.xlu0 %v1621_v59 }
 0x448   : > { %1631 = vadd.xlane.f32.xlu1 %v1630_v14 }
 0x44c   : > { %1640 = vadd.xlane.f32.xlu1 %v1639_v15 }
 0x450   : > { %1634 = vadd.xlane.f32.xlu1 %v1633_v17 }
 0x45c   : > { %1662 = vrot.lane.b32.xlu0 %v2657_v48, %s2491_s13 }
 0x461   : > { %1357 = vrot.lane.b32.xlu1 %v2657_v48, %s2492_s14 }
 0x46a   : > { %v739_v18 = vpop.xlane.xlu0 %738 }
 0x46b   : > { %2390 = vrcp.f32 %v739_v18 }
 0x46c   : > { %2392 = vrcp.f32 %v730_v25 }
 0x46d   : > { %2394 = vrcp.f32 %v736_v61 }
 0x46e   : > { %v733_v11 = vpop.xlane.xlu0 %732 }
 0x46f   : > { %2396 = vrcp.f32 %v733_v11 }
 0x472   : > { %v751_v44 = vpop.xlane.xlu0 %750 }
 0x473   : > { %2398 = vrcp.f32 %v751_v44 }
 0x474   : > { %2400 = vrcp.f32 %v742_v23 }
 0x475   : > { %v2391_v32 = vpop.eup %2390  ;;  %2402 = vrcp.f32 %v748_v35 }
 0x476   : > { %v745_v20 = vpop.xlane.xlu0 %744  ;;  %v2393_v34 = vpop.eup %2392  ;;  %v763_v48 = vmul.f32 %v2391_v32, %v2843_v22 }
 0x477   : > { %2404 = vrcp.f32 %v745_v20  ;;  %v2395_v36 = vpop.eup %2394  ;;  %v760_v2 = vmul.f32 %v2393_v34, %v2825_v55 }
 0x478   : > { %v762_v21 = vmul.f32 %v2395_v36, %v2819_v52 }
 0x479   : > { %v2397_v26 = vpop.eup %2396 }
 0x47a   : > { %v761_v0 = vmul.f32 %v2397_v26, %v2847_v24  ;;  %v769_v3 = vpack.c.bf16 %v763_v48, %v762_v21 }
 0x47c   : > { %v768_v40 = vpack.c.bf16 %v761_v0, %v760_v2 }
 0x47d   : > { %v2399_v29 = vpop.eup %2398 }
 0x47e   : > { %2178 = vmatprep.mubr.msk.bf16.mxu1 %vm679_vm2, %v768_v40  ;;  %v2401_v50 = vpop.eup %2400  ;;  %v767_v55 = vmul.f32 %v2399_v29, %v2851_v43 }
 0x47f   : > { %2179 = vmatmul.mubr.msk.bf16.vlgmr.msra.gmra.mrb[8].mxu1 %vm679_vm2, %v769_v3  ;;  %v2403_v53 = vpop.eup %2402  ;;  %v764_v24 = vmul.f32 %v2401_v50, %v2833_v49 }
 0x480   : > { %2197 = vmatpush3.bf16.msra.mxu1 %v1067_v45  ;;  %v766_v4 = vmul.f32 %v2403_v53, %v2829_v39 }
 0x481   : > { %v2405_v22 = vpop.eup %2404 }
 0x482   : > { %v765_v52 = vmul.f32 %v2405_v22, %v2855_v27  ;;  %v771_v46 = vpack.c.bf16 %v767_v55, %v766_v4 }
 0x484   : > { %v770_v51 = vpack.c.bf16 %v765_v52, %v764_v24 }
 0x486   : > { %2182 = vmatprep.mubr.msk.bf16.mxu1 %vm679_vm2, %v770_v51 }
 0x487   : > { %2183 = vmatmul.mubr.msk.bf16.gmra.mrb[12].mxu1 %vm679_vm2, %v771_v46 }
 0x4a5   : > { %v1016_v58 = vpop.xlane.xlu1 %1015 }
 0x4a7   : > { %v1019_v7 = vpop.xlane.xlu0 %1018 }
 0x4a8   : > { %2406 = vrcp.f32 %v1019_v7 }
 0x4a9   : > { %v1010_v12 = vpop.xlane.xlu1 %1009 }
 0x4aa   : > { %2408 = vrcp.f32 %v1010_v12 }
 0x4ab   : > { %2410 = vrcp.f32 %v1016_v58  ;;  %v1013_v59 = vpop.xlane.xlu0 %1012 }
 0x4ac   : > { %2412 = vrcp.f32 %v1013_v59 }
 0x4ad   : > { %v1028_v43 = vpop.xlane.xlu1 %1027 }
 0x4af   : > { %v1031_v49 = vpop.xlane.xlu0 %1030 }
 0x4b0   : > { %2414 = vrcp.f32 %v1031_v49 }
 0x4b1   : > { %v1022_v27 = vpop.xlane.xlu1 %1021 }
 0x4b2   : > { %2416 = vrcp.f32 %v1022_v27  ;;  %v2407_v39 = vpop.eup %2406 }
 0x4b3   : > { %2418 = vrcp.f32 %v1028_v43  ;;  %v1025_v14 = vpop.xlane.xlu0 %1024  ;;  %v1043_v25 = vmul.f32 %v2407_v39, %v2871_v13 }
 0x4b4   : > { %v2409_v15 = vpop.eup %2408  ;;  %2420 = vrcp.f32 %v1025_v14 }
 0x4b5   : > { %v2411_v17 = vpop.eup %2410  ;;  %v1040_v35 = vmul.f32 %v2409_v15, %v2876_v16 }
 0x4b6   : > { %v2413_v61 = vpop.eup %2412  ;;  %v1042_v23 = vmul.f32 %v2411_v17, %v2866_v8 }
 0x4b7   : > { %v1321_v18 = vpop.xlane.xlu0 %1320  ;;  %v1041_v11 = vmul.f32 %v2413_v61, %v2880_v33 }
 0x4b8   : > { %v1049_v32 = vpack.c.bf16 %v1043_v25, %v1042_v23 }
 0x4b9   : > { %v1048_v44 = vpack.c.bf16 %v1041_v11, %v1040_v35 }
 0x4ba   : > { %v2415_v20 = vpop.eup %2414 }
 0x4bb   : > { %2198 = vmatprep.mubr.msk.bf16.mxu1 %vm679_vm2, %v1048_v44  ;;  %v1315_v34 = vpop.xlane.xlu0 %1314  ;;  %v1047_v13 = vmul.f32 %v2415_v20, %v2891_v41 }
 0x4bc   : > { %v2417_v36 = vpop.eup %2416  ;;  %2199 = vmatmul.mubr.msk.bf16.vlgmr.msra.gmra.mrb[16].mxu1 %vm679_vm2, %v1049_v32  ;;  %2422 = vrcp.f32 %v1315_v34 }
 0x4bd   : > { %v2419_v26 = vpop.eup %2418  ;;  %v1044_v16 = vmul.f32 %v2417_v36, %v2895_v47 }
 0x4be   : > { %v2421_v48 = vpop.eup %2420  ;;  %v1046_v8 = vmul.f32 %v2419_v26, %v2886_v31 }
 0x4bf   : > { %v1324_v2 = vpop.xlane.xlu0 %1323  ;;  %v1045_v33 = vmul.f32 %v2421_v48, %v2900_v38 }
 0x4c0   : > { %v1051_v40 = vpack.c.bf16 %v1047_v13, %v1046_v8 }
 0x4c1   : > { %v1327_v0 = vpop.xlane.xlu1 %1326  ;;  %v1050_v21 = vpack.c.bf16 %v1045_v33, %v1044_v16 }
 0x4c3   : > { %2202 = vmatprep.mubr.msk.bf16.mxu1 %vm679_vm2, %v1050_v21  ;;  %v1318_v3 = vpop.xlane.xlu0 %1317 }
 0x4c4   : > { %2424 = vrcp.f32 %v1318_v3  ;;  %2203 = vmatmul.mubr.msk.bf16.gmra.mrb[20].mxu1 %vm679_vm2, %v1051_v40 }
 0x4c5   : > { %v1626_v29 = vpop.xlane.xlu1 %1625  ;;  %2426 = vrcp.f32 %v1324_v2 }
 0x4c6   : > { %v2423_v53 = vpop.eup %2422 }
 0x4c7   : > { %v1333_v50 = vpop.xlane.xlu0 %1332  ;;  %v1345_v38 = vmul.f32 %v2423_v53, %v2911_v54 }
 0x4c9   : > { %v1620_v41 = vpop.xlane.xlu1 %1619 }
 0x4cb   : > { %v1336_v45 = vpop.xlane.xlu0 %1335 }
 0x4cd   : > { %v1629_v47 = vpop.xlane.xlu1 %1628 }
 0x4ce   : > { %v2425_v22 = vpop.eup %2424 }
 0x4cf   : > { %v1346_v31 = vmul.f32 %v2425_v22, %v2922_v63  ;;  %v1330_v55 = vpop.xlane.xlu0 %1329  ;;  %v2427_v58 = vpop.eup %2426 }
 0x4d0   : > { %2428 = vrcp.f32 %v1330_v55  ;;  %v1348_v59 = vmul.f32 %v2427_v58, %v2918_v57 }
 0x4d1   : > { %v1638_v24 = vpop.xlane.xlu1 %1637  ;;  %v1353_v52 = vpack.c.bf16 %v1346_v31, %v1345_v38  ;;  %2430 = vrcp.f32 %v1321_v18 }
 0x4d2   : > { %2432 = vrcp.f32 %v1327_v0 }
 0x4d3   : > { %2218 = vmatprep.mubr.msk.bf16.mxu1 %vm679_vm2, %v1353_v52  ;;  %v1623_v51 = vpop.xlane.xlu0 %1622  ;;  %2434 = vrcp.f32 %v1336_v45  ;;  %v2306_v52 = vld [vmem:[%s3161_s5] sm:$0xff]  }
 0x4d4   : > { %2436 = vrcp.f32 %v1623_v51  ;;  %2246 = vmatprep.subr.bf16.mxu0 %v2306_v52  ;;  %v2307_v51 = vld [vmem:[%s3161_s5 + $0x8] sm:$0xff]  }
 0x4d5   : > { %v1632_v4 = vpop.xlane.xlu1 %1631  ;;  %2438 = vrcp.f32 %v1333_v50  ;;  %2247 = vmatpush3.bf16.msra.mxu0 %v2306_v52 }
 0x4d6   : > { %2440 = vrcp.f32 %v1620_v41  ;;  %2248 = vmatprep.subr.bf16.mxu0 %v2307_v51 }
 0x4d7   : > { %v1663_v27 = vpop.permute.xlu0 %1662  ;;  %2442 = vrcp.f32 %v1629_v47 }
 0x4d8   : > { %v1677_v61 = vsel %vm789_vm3, %v1663_v27, 0 }
 0x4d9   : > { %v1641_v46 = vpop.xlane.xlu1 %1640  ;;  %2249 = vmatpush3.bf16.msra.mxu0 %v2307_v51 }
 0x4da   : > { %v2429_v54 = vpop.eup %2428 }
 0x4db   : > { %v2431_v63 = vpop.eup %2430  ;;  %v1350_v49 = vmul.f32 %v2429_v54, %v2957_v5  ;;  %v2308_v54 = vld [vmem:[%s3161_s5 + $0x10] sm:$0xff]  }
 0x4dc   : > { %v2433_v12 = vpop.eup %2432  ;;  %v1347_v39 = vmul.f32 %v2431_v63, %v2905_v1  ;;  %2250 = vmatprep.subr.bf16.mxu0 %v2308_v54 }
 0x4dd   : > { %v1635_v7 = vpop.xlane.xlu1 %1634  ;;  %v1349_v15 = vmul.f32 %v2433_v12, %v2926_v30  ;;  %v2435_v57 = vpop.eup %2434  ;;  %2251 = vmatpush3.bf16.msra.mxu0 %v2308_v54  ;;  %v2309_v12 = vld [vmem:[%s3161_s5 + $0x18] sm:$0xff]  }
 0x4de   : > { %v1354_v17 = vpack.c.bf16 %v1348_v59, %v1347_v39  ;;  %2444 = vrcp.f32 %v1635_v7  ;;  %v2437_v25 = vpop.eup %2436  ;;  %v1352_v30 = vmul.f32 %v2435_v57, %v2940_v28  ;;  %2252 = vmatprep.subr.bf16.mxu0 %v2309_v12 }
 0x4df   : > { %2446 = vrcp.f32 %v1626_v29  ;;  %v1355_v5 = vpack.c.bf16 %v1350_v49, %v1349_v15  ;;  %v2439_v1 = vpop.eup %2438  ;;  %v1651_v35 = vmul.f32 %v2437_v25, %v2965_v9 }
 0x4e0   : > { %2448 = vrcp.f32 %v1632_v4  ;;  %v2441_v18 = vpop.eup %2440  ;;  %v1351_v11 = vmul.f32 %v2439_v1, %v2931_v42 }
 0x4e1   : > { %v1358_v43 = vpop.permute.xlu1 %1357  ;;  %2450 = vrcp.f32 %v1641_v46  ;;  %v1650_v23 = vmul.f32 %v2441_v18, %v2946_v62  ;;  %v2443_v32 = vpop.eup %2442  ;;  %2253 = vmatpush3.bf16.msra.mxu0 %v2309_v12 }
 0x4e2   : > { %v1372_v14 = vsel %vm789_vm3, %v1358_v43, 0  ;;  %2267 = vmatprep.subr.msk.bf16.mxu1 %vm789_vm3, %v1358_v43  ;;  %v1356_v44 = vpack.c.bf16 %v1352_v30, %v1351_v11  ;;  %2452 = vrcp.f32 %v1638_v24  ;;  %v1653_v28 = vmul.f32 %v2443_v32, %v2953_v6 }
 0x4e3   : > { %2217 = vmatpush3.bf16.msra.mxu1 %v1372_v14  ;;  %v1658_v20 = vpack.c.bf16 %v1651_v35, %v1650_v23 }
 0x4e4   : > { %2269 = vmatprep.subr.msk.bf16.mxu1 %vm789_vm3, %v1663_v27 }
 0x4e6   : > { %2219 = vmatmul.mubr.msk.bf16.vlgmr.msra.gmra.mrb[24].mxu1 %vm679_vm2, %v1354_v17 }
 0x4e7   : > { %2222 = vmatprep.mubr.msk.bf16.mxu1 %vm679_vm2, %v1355_v5  ;;  %2237 = vmatpush3.bf16.msra.mxu1 %v1677_v61 }
 0x4e8   : > { %v2445_v34 = vpop.eup %2444 }
 0x4e9   : > { %v2447_v36 = vpop.eup %2446  ;;  %v1655_v9 = vmul.f32 %v2445_v34, %v2979_v19 }
 0x4ea   : > { %v2449_v26 = vpop.eup %2448  ;;  %v1652_v42 = vmul.f32 %v2447_v36, %v2935_v37 }
 0x4eb   : > { %v1654_v48 = vmul.f32 %v2449_v26, %v2969_v56  ;;  %v2451_v13 = vpop.eup %2450 }
 0x4ec   : > { %v1659_v62 = vpack.c.bf16 %v1653_v28, %v1652_v42  ;;  %v2453_v16 = vpop.eup %2452  ;;  %v1657_v33 = vmul.f32 %v2451_v13, %v2975_v10 }
 0x4ed   : > { %v1660_v2 = vpack.c.bf16 %v1655_v9, %v1654_v48  ;;  %v1656_v8 = vmul.f32 %v2453_v16, %v2961_v60 }
 0x4ee   : > { %2223 = vmatmul.mubr.msk.bf16.gmra.mrb[28].mxu1 %vm679_vm2, %v1356_v44 }
 0x4ef   : > { %2238 = vmatprep.mubr.msk.bf16.mxu1 %vm679_vm2, %v1658_v20  ;;  %v1661_v0 = vpack.c.bf16 %v1657_v33, %v1656_v8 }
 0x4f6   : > { %2239 = vmatmul.mubr.msk.bf16.vlgmr.msra.gmra.mrb[32].mxu1 %vm679_vm2, %v1659_v62 }
 0x4f7   : > { %2242 = vmatprep.mubr.msk.bf16.mxu1 %vm679_vm2, %v1660_v2 }
 0x4fe   : > { %2243 = vmatmul.mubr.msk.bf16.gmra.mrb[36].mxu1 %vm679_vm2, %v1661_v0 }
 0x552   : > { %v2180_v6 = vpop.f32.mrb[8].mxu1 }
 0x553   : > { %860 = vst.msk [vmem:[#allocation2 + $0x10] sm:$0xff] %vm598_vm1, %v2180_v6  ;;  %v827_v37 = vpop.f32.mrb[9].mxu1 }
 0x554   : > { %858 = vst.msk [vmem:[#allocation2] sm:$0xff] %vm598_vm1, %v827_v37  ;;  %v2181_v56 = vpop.f32.mrb[10].mxu1 }
 0x555   : > { %861 = vst.msk [vmem:[#allocation2 + $0x18] sm:$0xff] %vm598_vm1, %v2181_v56  ;;  %v830_v19 = vpop.f32.mrb[11].mxu1 }
 0x556   : > { %859 = vst.msk [vmem:[#allocation2 + $0x8] sm:$0xff] %vm598_vm1, %v830_v19 }
 0x55a   : > { %v2184_v21 = vpop.f32.mrb[12].mxu1 }
 0x55b   : > { %864 = vst.msk [vmem:[#allocation2 + $0x30] sm:$0xff] %vm598_vm1, %v2184_v21  ;;  %v843_v10 = vpop.f32.mrb[13].mxu1 }
 0x55c   : > { %862 = vst.msk [vmem:[#allocation2 + $0x20] sm:$0xff] %vm598_vm1, %v843_v10  ;;  %v2185_v60 = vpop.f32.mrb[14].mxu1 }
 0x55d   : > { %865 = vst.msk [vmem:[#allocation2 + $0x38] sm:$0xff] %vm598_vm1, %v2185_v60  ;;  %v846_v40 = vpop.f32.mrb[15].mxu1 }
 0x55e   : > { %863 = vst.msk [vmem:[#allocation2 + $0x28] sm:$0xff] %vm598_vm1, %v846_v40 }
 0x58f   : > { %v2200_v3 = vpop.f32.mrb[16].mxu1 }
 0x590   : > { %1146 = vrot.lane.b32.xlu1 %v2200_v3, %s2491_s13  ;;  %v1103_v29 = vpop.f32.mrb[17].mxu1  ;;  %v2081_v3 = vld [vmem:[%s3162_s6] ss:$0 sm:$0xff] }
 0x591   : > { %v2201_v50 = vpop.f32.mrb[18].mxu1 }
 0x592   : > { %1148 = vrot.lane.b32.xlu0 %v2201_v50, %s2491_s13  ;;  %v1106_v41 = vpop.f32.mrb[19].mxu1 }
 0x594   : > { %1142 = vrot.lane.b32.xlu1 %v1103_v29, %s2491_s13 }
 0x597   : > { %v2204_v45 = vpop.f32.mrb[20].mxu1 }
 0x598   : > { %1144 = vrot.lane.b32.xlu1 %v1106_v41, %s2491_s13  ;;  %v1119_v53 = vpop.f32.mrb[21].mxu1 }
 0x599   : > { %v2205_v47 = vpop.f32.mrb[22].mxu1 }
 0x59a   : > { %1156 = vrot.lane.b32.xlu0 %v2205_v47, %s2491_s13  ;;  %v1122_v22 = vpop.f32.mrb[23].mxu1  ;;  %v2454_v47 = vld [vmem:[%s2559_s8 + $0x10] sm:$0xff] }
 0x59c   : > { %1154 = vrot.lane.b32.xlu1 %v2204_v45, %s2491_s13 }
 0x59e   : > { %1152 = vrot.lane.b32.xlu0 %v1122_v22, %s2491_s13 }
 0x5a0   : > { %1150 = vrot.lane.b32.xlu1 %v1119_v53, %s2491_s13 }
 0x5b9   : > { %v2220_v38 = vpop.f32.mrb[24].mxu1 }
 0x5ba   : > { %1451 = vrot.lane.b32.xlu1 %v2220_v38, %s2492_s14  ;;  %v1408_v31 = vpop.f32.mrb[25].mxu1 }
 0x5bb   : > { %v2221_v55 = vpop.f32.mrb[26].mxu1 }
 0x5bc   : > { %1453 = vrot.lane.b32.xlu0 %v2221_v55, %s2492_s14  ;;  %v1411_v24 = vpop.f32.mrb[27].mxu1  ;;  %v2455_v55 = vld [vmem:[%s2559_s8] sm:$0xff] }
 0x5be   : > { %1447 = vrot.lane.b32.xlu1 %v1408_v31, %s2492_s14 }
 0x5c0   : > { %1449 = vrot.lane.b32.xlu0 %v1411_v24, %s2492_s14 }
 0x5c1   : > { %v2224_v4 = vpop.f32.mrb[28].mxu1 }
 0x5c2   : > { %v1424_v46 = vpop.f32.mrb[29].mxu1 }
 0x5c3   : > { %1455 = vrot.lane.b32.xlu1 %v1424_v46, %s2492_s14  ;;  %v2225_v58 = vpop.f32.mrb[30].mxu1  ;;  %v2457_v46 = vld [vmem:[%s2559_s8 + $0x8] sm:$0xff] }
 0x5c4   : > { %v1427_v7 = vpop.f32.mrb[31].mxu1 }
 0x5c5   : > { %1457 = vrot.lane.b32.xlu0 %v1427_v7, %s2492_s14 }
 0x5c9   : > { %v2240_v63 = vpop.f32.mrb[32].mxu1 }
 0x5ca   : > { %1756 = vrot.lane.b32.xlu1 %v2240_v63, %s2490_s12  ;;  %v1713_v59 = vpop.f32.mrb[33].mxu1 }
 0x5cb   : > { %v2241_v43 = vpop.f32.mrb[34].mxu1 }
 0x5cc   : > { %1758 = vrot.lane.b32.xlu0 %v2241_v43, %s2490_s12  ;;  %v1716_v49 = vpop.f32.mrb[35].mxu1  ;;  %v2458_v43 = vld [vmem:[%s2559_s8 + $0x30] sm:$0xff] }
 0x5ce   : > { %1752 = vrot.lane.b32.xlu1 %v1713_v59, %s2490_s12 }
 0x5d0   : > { %1754 = vrot.lane.b32.xlu0 %v1716_v49, %s2490_s12 }
 0x5d1   : > { %v2244_v27 = vpop.f32.mrb[36].mxu1 }
 0x5d2   : > { %1459 = vrot.lane.b32.xlu1 %v2224_v4, %s2492_s14  ;;  %v1729_v39 = vpop.f32.mrb[37].mxu1  ;;  %v2456_v4 = vld [vmem:[%s2559_s8 + $0x18] sm:$0xff] }
 0x5d3   : > { %v2245_v14 = vpop.f32.mrb[38].mxu1 }
 0x5d4   : > { %1461 = vrot.lane.b32.xlu0 %v2225_v58, %s2492_s14  ;;  %v1732_v15 = vpop.f32.mrb[39].mxu1 }
 0x5d6   : > { %1760 = vrot.lane.b32.xlu1 %v1729_v39, %s2490_s12 }
 0x5d8   : > { %1762 = vrot.lane.b32.xlu0 %v1732_v15, %s2490_s12 }
 0x5da   : > { %1764 = vrot.lane.b32.xlu1 %v2244_v27, %s2490_s12 }
 0x5dc   : > { %1766 = vrot.lane.b32.xlu0 %v2245_v14, %s2490_s12  ;;  %v2459_v14 = vld [vmem:[%s2559_s8 + $0x20] sm:$0xff] }
 0x602   : > { %v1147_v17 = vpop.permute.xlu1 %1146 }
 0x603   : > { %1169 = vst.msk [vmem:[#allocation2 + $0x10] sm:$0xff] %vm1166_vm4, %v1147_v17 }
 0x604   : > { %v1149_v61 = vpop.permute.xlu0 %1148 }
 0x605   : > { %1170 = vst.msk [vmem:[#allocation2 + $0x18] sm:$0xff] %vm1166_vm4, %v1149_v61  ;;  %v2460_v61 = vld [vmem:[%s2559_s8 + $0x38] sm:$0xff] }
 0x606   : > { %v1143_v57 = vpop.permute.xlu1 %1142 }
 0x607   : > { %1167 = vst.msk [vmem:[#allocation2] sm:$0xff] %vm1166_vm4, %v1143_v57 }
 0x60a   : > { %v1145_v5 = vpop.permute.xlu1 %1144 }
 0x60b   : > { %1168 = vst.msk [vmem:[#allocation2 + $0x8] sm:$0xff] %vm1166_vm4, %v1145_v5  ;;  %v2461_v5 = vld [vmem:[%s2559_s8 + $0x28] sm:$0xff] }
 0x60c   : > { %v1157_v25 = vpop.permute.xlu0 %1156 }
 0x60d   : > { %1174 = vst.msk [vmem:[#allocation2 + $0x38] sm:$0xff] %vm1166_vm4, %v1157_v25 }
 0x60e   : > { %v1155_v1 = vpop.permute.xlu1 %1154 }
 0x60f   : > { %1173 = vst.msk [vmem:[#allocation2 + $0x30] sm:$0xff] %vm1166_vm4, %v1155_v1 }
 0x610   : > { %v1153_v18 = vpop.permute.xlu0 %1152 }
 0x611   : > { %1172 = vst.msk [vmem:[#allocation2 + $0x28] sm:$0xff] %vm1166_vm4, %v1153_v18 }
 0x612   : > { %v1151_v30 = vpop.permute.xlu1 %1150 }
 0x613   : > { %1171 = vst.msk [vmem:[#allocation2 + $0x20] sm:$0xff] %vm1166_vm4, %v1151_v30 }
 0x62c   : > { %v1452_v35 = vpop.permute.xlu1 %1451 }
 0x62d   : > { %1474 = vst.msk [vmem:[#allocation2 + $0x10] sm:$0xff] %vm1471_vm5, %v1452_v35 }
 0x62e   : > { %v1454_v11 = vpop.permute.xlu0 %1453 }
 0x62f   : > { %1475 = vst.msk [vmem:[#allocation2 + $0x18] sm:$0xff] %vm1471_vm5, %v1454_v11 }
 0x630   : > { %v1448_v23 = vpop.permute.xlu1 %1447 }
 0x631   : > { %1472 = vst.msk [vmem:[#allocation2] sm:$0xff] %vm1471_vm5, %v1448_v23 }
 0x632   : > { %v1450_v44 = vpop.permute.xlu0 %1449 }
 0x633   : > { %1473 = vst.msk [vmem:[#allocation2 + $0x8] sm:$0xff] %vm1471_vm5, %v1450_v44 }
 0x635   : > { %v1456_v32 = vpop.permute.xlu1 %1455 }
 0x636   : > { %1476 = vst.msk [vmem:[#allocation2 + $0x20] sm:$0xff] %vm1471_vm5, %v1456_v32 }
 0x637   : > { %v1458_v20 = vpop.permute.xlu0 %1457 }
 0x638   : > { %1477 = vst.msk [vmem:[#allocation2 + $0x28] sm:$0xff] %vm1471_vm5, %v1458_v20 }
 0x63c   : > { %v1757_v34 = vpop.permute.xlu1 %1756 }
 0x63d   : > { %1779 = vst.msk [vmem:[#allocation2 + $0x10] sm:$0xff] %vm1776_vm6, %v1757_v34 }
 0x63e   : > { %v1759_v36 = vpop.permute.xlu0 %1758 }
 0x63f   : > { %1780 = vst.msk [vmem:[#allocation2 + $0x18] sm:$0xff] %vm1776_vm6, %v1759_v36 }
 0x640   : > { %v1753_v26 = vpop.permute.xlu1 %1752 }
 0x641   : > { %1777 = vst.msk [vmem:[#allocation2] sm:$0xff] %vm1776_vm6, %v1753_v26 }
 0x642   : > { %v1755_v28 = vpop.permute.xlu0 %1754 }
 0x643   : > { %1778 = vst.msk [vmem:[#allocation2 + $0x8] sm:$0xff] %vm1776_vm6, %v1755_v28 }
 0x644   : > { %v1460_v9 = vpop.permute.xlu1 %1459  ;;  %v1787_v8 = vld [vmem:[#allocation2 + $0x10] sm:$0xff] }
 0x645   : > { %1478 = vst.msk [vmem:[#allocation2 + $0x30] sm:$0xff] %vm1471_vm5, %v1460_v9 }
 0x646   : > { %v1462_v42 = vpop.permute.xlu0 %1461  ;;  %v1788_v62 = vld [vmem:[#allocation2 + $0x18] sm:$0xff] }
 0x647   : > { %1479 = vst.msk [vmem:[#allocation2 + $0x38] sm:$0xff] %vm1471_vm5, %v1462_v42  ;;  %v1794_v6 = vpack.c.bf16 %v1788_v62, %v1787_v8 }
 0x648   : > { %v1761_v48 = vpop.permute.xlu1 %1760  ;;  %v1785_v2 = vld [vmem:[#allocation2] sm:$0xff] }
 0x649   : > { %1781 = vst.msk [vmem:[#allocation2 + $0x20] sm:$0xff] %vm1776_vm6, %v1761_v48 }
 0x64a   : > { %v1763_v13 = vpop.permute.xlu0 %1762  ;;  %v1786_v16 = vld [vmem:[#allocation2 + $0x8] sm:$0xff] }
 0x64b   : > { %1782 = vst.msk [vmem:[#allocation2 + $0x28] sm:$0xff] %vm1776_vm6, %v1763_v13  ;;  %v1793_v33 = vpack.c.bf16 %v1786_v16, %v1785_v2 }
 0x64c   : > { %v1765_v0 = vpop.permute.xlu1 %1764 }
 0x64d   : > { %1783 = vst.msk [vmem:[#allocation2 + $0x30] sm:$0xff] %vm1776_vm6, %v1765_v0  ;;  %2254 = vmatprep.mubr.msk.bf16.mxu0 %vm346_vm0, %v1793_v33 }
 0x64e   : > { %2255 = vmatmul.mubr.msk.bf16.vlgmr.msra.gmra.mrb[32].mxu0 %vm346_vm0, %v1794_v6  ;;  %v1767_v37 = vpop.permute.xlu0 %1766 }
 0x64f   : > { %1784 = vst.msk [vmem:[#allocation2 + $0x38] sm:$0xff] %vm1776_vm6, %v1767_v37 }
 0x650   : > { %v1789_v56 = vld [vmem:[#allocation2 + $0x20] sm:$0xff] }
 0x652   : > { %v1790_v19 = vld [vmem:[#allocation2 + $0x28] sm:$0xff] }
 0x653   : > { %v1795_v21 = vpack.c.bf16 %v1790_v19, %v1789_v56 }
 0x654   : > { %v1791_v10 = vld [vmem:[#allocation2 + $0x30] sm:$0xff] }
 0x655   : > { %2258 = vmatprep.mubr.msk.bf16.mxu0 %vm346_vm0, %v1795_v21 }
 0x656   : > { %v1792_v60 = vld [vmem:[#allocation2 + $0x38] sm:$0xff] }
 0x657   : > { %v1796_v40 = vpack.c.bf16 %v1792_v60, %v1791_v10 }
 0x659   : > { %2259 = vmatmul.mubr.msk.bf16.gmra.mrb[36].mxu0 %vm346_vm0, %v1796_v40 }
 0x721   : > { %v2256_v29 = vpop.f32.mrb[32].mxu0 }
 0x722   : > { %v1891_v50 = vadd.f32 %v2256_v29, %v2081_v3  ;;  %v1882_v41 = vpop.f32.mrb[33].mxu0 }
 0x723   : > { %v1883_v45 = vadd.f32 %v2081_v3, %v1882_v41  ;;  %v2257_v53 = vpop.f32.mrb[34].mxu0 }
 0x724   : > { %v1915_v22 = vadd.f32 %v2454_v47, %v1891_v50  ;;  %v1894_v38 = vadd.f32 %v2257_v53, %v2081_v3  ;;  %v1885_v31 = vpop.f32.mrb[35].mxu0 }
 0x725   : > { %v1913_v24 = vadd.f32 %v2455_v55, %v1883_v45  ;;  %v1886_v52 = vadd.f32 %v2081_v3, %v1885_v31 }
 0x726   : > { %1923 = vst.msk [vmem:[%s3121_s10 + $0x10] sm:$0xff] %vm346_vm0, %v1915_v22  ;;  %v1916_v51 = vadd.f32 %v2456_v4, %v1894_v38 }
 0x727   : > { %1921 = vst.msk [vmem:[%s3121_s10] sm:$0xff] %vm346_vm0, %v1913_v24  ;;  %v1914_v58 = vadd.f32 %v2457_v46, %v1886_v52 }
 0x728   : > { %1924 = vst.msk [vmem:[%s3121_s10 + $0x18] sm:$0xff] %vm346_vm0, %v1916_v51 }
 0x729   : > { %1922 = vst.msk [vmem:[%s3121_s10 + $0x8] sm:$0xff] %vm346_vm0, %v1914_v58 }
 0x72c   : > { %v2260_v7 = vpop.f32.mrb[36].mxu0 }
 0x72d   : > { %v1907_v54 = vadd.f32 %v2260_v7, %v2081_v3  ;;  %v1898_v63 = vpop.f32.mrb[37].mxu0 }
 0x72e   : > { %v1899_v12 = vadd.f32 %v2081_v3, %v1898_v63  ;;  %v2261_v59 = vpop.f32.mrb[38].mxu0 }
 0x72f   : > { %v1919_v49 = vadd.f32 %v2458_v43, %v1907_v54  ;;  %v1910_v27 = vadd.f32 %v2261_v59, %v2081_v3  ;;  %v1901_v39 = vpop.f32.mrb[39].mxu0 }
 0x730   : > { %v1917_v15 = vadd.f32 %v2459_v14, %v1899_v12  ;;  %v1902_v17 = vadd.f32 %v2081_v3, %v1901_v39 }
 0x731   : > { %1927 = vst.msk [vmem:[%s3121_s10 + $0x30] sm:$0xff] %vm346_vm0, %v1919_v49  ;;  %v1920_v57 = vadd.f32 %v2460_v61, %v1910_v27 }
 0x732   : > { %1925 = vst.msk [vmem:[%s3121_s10 + $0x20] sm:$0xff] %vm346_vm0, %v1917_v15  ;;  %v1918_v25 = vadd.f32 %v2461_v5, %v1902_v17 }
 0x733   : > { %1928 = vst.msk [vmem:[%s3121_s10 + $0x38] sm:$0xff] %vm346_vm0, %v1920_v57 }
 0x734   : > { %1926 = vst.msk [vmem:[%s3121_s10 + $0x28] sm:$0xff] %vm346_vm0, %v1918_v25 }
 0x735 PF: > { %s17_s26 = sadd.s32 1, %s2484_s26   ;;  %s3164_s24 = smov %s2480_s25 }
 0x736   : > { %p14_p5 = scmp.ge.s32.totalorder %s17_s26, 4   ;;  %s3165_s25 = smov %s3167_s27 }
 0x738   :  { %16 = sbr.rel (!%p14_p5) target bundleno = 2 (0x2), region = 81 }

</bundles_post_ra>
